<compile_context>
chip_gen: v6e
topology: v6e:2x2x1
jax: 0.10.0
libtpu: 0.0.40
codegen_flags: <defaults>
</compile_context>

<pallas_src>
import functools

import jax
import jax.numpy as jnp
from jax.experimental import pallas as pl
from jax.experimental.pallas import tpu as pltpu


# ----------------------------------------------------------------------------
# Generic stride-1 "valid" conv kernel: one batch element per grid step.
# ----------------------------------------------------------------------------
@functools.lru_cache(maxsize=None)
def _conv_call(B, Hp, Wp, Cin, Cout, K, relu, dtype_str):
    Ho, Wo = Hp - K + 1, Wp - K + 1
    out_dtype = jnp.dtype(dtype_str)

    def kernel(x_ref, w_ref, b_ref, out_ref):
        # x_ref: (1, Hp, Wp, Cin) padded image, w_ref: (K, K, Cin, Cout),
        # b_ref: (1, Cout), out_ref: (1, Ho, Wo, Cout)
        x = x_ref[0].astype(jnp.float32)                       # (Hp, Wp, Cin)
        acc = jnp.zeros((Ho * Wo, Cout), jnp.float32)
        for ky in range(K):                                    # static unroll over taps
            for kx in range(K):
                patch = x[ky:ky + Ho, kx:kx + Wo, :].reshape(Ho * Wo, Cin)
                acc = acc + jnp.dot(patch,
                                    w_ref[ky, kx].astype(jnp.float32),
                                    preferred_element_type=jnp.float32)
        y = acc + b_ref[...].astype(jnp.float32)               # bias fused
        if relu:
            y = jnp.where(y > 0, y, 0.01 * y)                  # LeakyReLU(0.01) fused
        out_ref[0] = y.reshape(Ho, Wo, Cout).astype(out_ref.dtype)

    return pl.pallas_call(
        kernel,
        out_shape=jax.ShapeDtypeStruct((B, Ho, Wo, Cout), out_dtype),
        grid_spec=pltpu.PrefetchScalarGridSpec(
            num_scalar_prefetch=0,
            grid=(B,),
            in_specs=[
                pl.BlockSpec((1, Hp, Wp, Cin), lambda b: (b, 0, 0, 0)),
                pl.BlockSpec((K, K, Cin, Cout), lambda b: (0, 0, 0, 0)),
                pl.BlockSpec((1, Cout), lambda b: (0, 0)),
            ],
            out_specs=pl.BlockSpec((1, Ho, Wo, Cout), lambda b: (b, 0, 0, 0)),
        ),
        compiler_params=pltpu.CompilerParams(
            dimension_semantics=("parallel",)),
    )


def conv2d_pallas(x, w, b, *, pad=0, stride=1, relu=False):
    """PyTorch Conv2d semantics. x: (B,H,W,Cin), w: (K,K,Cin,Cout), b: (1,Cout)."""
    B, H, W, Cin = x.shape
    K = w.shape[0]
    Cout = w.shape[-1]

    # Zero-pad degenerate channel dims up to 8 (keeps MXU contraction and output
    # lanes non-degenerate; zeros contribute nothing).
    if Cin < 8:
        pc = 8 - Cin
        x = jnp.pad(x, ((0, 0), (0, 0), (0, 0), (0, pc)))
        w = jnp.pad(w, ((0, 0), (0, 0), (0, pc), (0, 0)))
        Cin = 8
    Cout_orig = Cout
    if Cout < 8:
        pc = 8 - Cout
        w = jnp.pad(w, ((0, 0), (0, 0), (0, 0), (0, pc)))
        b = jnp.pad(b, ((0, 0), (0, pc)))
        Cout = 8

    if pad:
        x = jnp.pad(x, ((0, 0), (pad, pad), (pad, pad), (0, 0)))
    Hp, Wp = H + 2 * pad, W + 2 * pad

    call = _conv_call(B, Hp, Wp, Cin, Cout, K, bool(relu), str(x.dtype))
    y = call(x, w, b)

    if stride != 1:
        y = y[:, ::stride, ::stride, :]      # stride-s conv == subsampled stride-1 conv
    if Cout_orig != Cout:
        y = y[..., :Cout_orig]
    return y


def conv_transpose2d_pallas(x, wT, b, *, stride=2, pad=1, output_padding=1):
    """PyTorch ConvTranspose2d semantics. wT: (Cin, Cout, K, K) (PyTorch layout)."""
    B, H, W, Cin = x.shape
    K = wT.shape[-1]
    lo = K - 1 - pad
    hi = K - 1 - pad + output_padding
    Hd, Wd = (H - 1) * stride + 1, (W - 1) * stride + 1
    xd = jnp.zeros((B, Hd, Wd, Cin), x.dtype).at[:, ::stride, ::stride, :].set(x)
    xd = jnp.pad(xd, ((0, 0), (lo, hi), (lo, hi), (0, 0)))
    w = jnp.transpose(wT, (2, 3, 0, 1))[::-1, ::-1]            # flipped, (K,K,Cin,Cout)
    return conv2d_pallas(xd, w, b, pad=0, stride=1, relu=False)


# ----------------------------------------------------------------------------
# Pure-JAX (lax.conv) reference path, used only for verification.
# ----------------------------------------------------------------------------
def _conv_ref(x, w, b, *, pad=0, stride=1, relu=False):
    y = jax.lax.conv_general_dilated(
        x, w, window_strides=(stride, stride),
        padding=((pad, pad), (pad, pad)),
        dimension_numbers=('NHWC', 'HWIO', 'NHWC'),
        precision=jax.lax.Precision.HIGHEST)
    y = y + b[0][None, None, None, :]
    if relu:
        y = jnp.where(y > 0, y, 0.01 * y)
    return y


def _conv_transpose_ref(x, wT, b, *, stride=2, pad=1, output_padding=1):
    K = wT.shape[-1]
    lo = K - 1 - pad
    hi = K - 1 - pad + output_padding
    w = jnp.transpose(wT, (2, 3, 0, 1))[::-1, ::-1]
    y = jax.lax.conv_general_dilated(
        x, w, window_strides=(1, 1),
        padding=((lo, hi), (lo, hi)),
        lhs_dilation=(stride, stride),
        dimension_numbers=('NHWC', 'HWIO', 'NHWC'),
        precision=jax.lax.Precision.HIGHEST)
    return y + b[0][None, None, None, :]


# ----------------------------------------------------------------------------
# backrnn sub-modules (layout: NHWC everywhere; `conv`/`convT` selects path).
# ----------------------------------------------------------------------------
def _apply_conv_x(p, x, conv, convT):
    x = conv(x, p['c0']['w'], p['c0']['b'], pad=2)                  # 5x5, 2->20
    x = conv(x, p['c1']['w'], p['c1']['b'], relu=True)              # 1x1, 20->20 + LReLU
    x = conv(x, p['c2']['w'], p['c2']['b'], pad=1, stride=2)        # 3x3/s2, 20->80
    x = conv(x, p['c3']['w'], p['c3']['b'], relu=True)              # 1x1, 80->40 + LReLU
    x = conv(x, p['c4']['w'], p['c4']['b'], pad=1, relu=True)       # 3x3, 40->40 + LReLU
    x = convT(x, p['ct']['w'], p['ct']['b'])                        # convT 40->10
    return x


def _apply_down_feature(p, x, conv):
    x = conv(x, p['c0']['w'], p['c0']['b'], pad=2)                  # 5x5, 1->20
    x = conv(x, p['c1']['w'], p['c1']['b'], relu=True)              # 1x1, 20->20 + LReLU
    x = conv(x, p['c2']['w'], p['c2']['b'], pad=1)                  # 3x3, 20->20
    x = conv(x, p['c3']['w'], p['c3']['b'], relu=True)              # 1x1, 20->40 + LReLU
    x = conv(x, p['c4']['w'], p['c4']['b'], pad=1)                  # 3x3, 40->20
    return x


def _apply_res_branch(p, x, conv):
    x = conv(x, p[0]['w'], p[0]['b'], pad=1, relu=True)             # 3x3 + LReLU
    x = conv(x, p[1]['w'], p[1]['b'], relu=True)                    # 1x1 + LReLU
    x = conv(x, p[2]['w'], p[2]['b'], pad=1)                        # 3x3
    return x


def _apply_res_part(p, x, conv):
    x = _apply_res_branch(p['b1'], x, conv) + x
    x = _apply_res_branch(p['b2'], x, conv) + x
    x = _apply_res_branch(p['b3'], x, conv) + x
    return x


def _apply_h_h(p, x, conv):
    x = conv(x, p['c0']['w'], p['c0']['b'], pad=1)                  # 3x3, 50->30
    x = conv(x, p['c1']['w'], p['c1']['b'], relu=True)              # 1x1, 30->20 + LReLU
    x = conv(x, p['c2']['w'], p['c2']['b'], pad=1)                  # 3x3, 20->20
    return x


def _apply_up_feature(p, x, conv):
    x = conv(x, p['c0']['w'], p['c0']['b'], pad=1)                  # 3x3, 50->40
    x = conv(x, p['c1']['w'], p['c1']['b'], relu=True)              # 1x1, 40->30 + LReLU
    x = conv(x, p['c2']['w'], p['c2']['b'], pad=1)                  # 3x3, 30->20
    x = conv(x, p['c3']['w'], p['c3']['b'], relu=True)              # 1x1, 20->20 + LReLU
    x = conv(x, p['c4']['w'], p['c4']['b'], pad=1)                  # 3x3, 20->20
    x = conv(x, p['c5']['w'], p['c5']['b'])                         # 1x1, 20->1
    return x


# ----------------------------------------------------------------------------
# backrnn.forward
# ----------------------------------------------------------------------------
def _backrnn_impl(params, xt8, meas, mask, h, meas_re, block_size, cs_rate,
                  conv, convT):
    B = meas.shape[0]
    # NCHW -> NHWC once at the boundary; everything stays channels-last inside.
    ht = jnp.transpose(h, (0, 2, 3, 1))                 # (B,H,W,20)
    meas_re_hw = meas_re[:, 0, :, :]                    # (B,H,W)   == torch.squeeze(meas_re)
    meas_re_nhwc = meas_re_hw[..., None]                # (B,H,W,1)
    xt = xt8[:, cs_rate - 1, :, :][..., None]           # (B,H,W,1)

    frames = [None] * cs_rate
    frames[cs_rate - 1] = xt[..., 0]

    for i in range(cs_rate - 1):
        d1 = jnp.zeros((B, block_size, block_size), meas.dtype)
        for ii in range(i + 1):
            d1 = d1 + mask[cs_rate - 1 - ii][None, :, :] * frames[cs_rate - 1 - ii]
        d2 = jnp.zeros((B, block_size, block_size), meas.dtype)
        for ii in range(i + 2, cs_rate):
            d2 = d2 + mask[cs_rate - 1 - ii][None, :, :] * meas_re_hw

        x_in = jnp.concatenate([meas_re_nhwc, (meas - d1 - d2)[..., None]], axis=-1)
        x1 = _apply_conv_x(params['conv_x'], x_in, conv, convT)          # (B,H,W,10)
        x2 = _apply_down_feature(params['extract_feature1'], xt, conv)   # (B,H,W,20)
        hcat = jnp.concatenate([ht, x1, x2], axis=-1)                    # (B,H,W,50)
        hcat = _apply_res_part(params['res_part1'], hcat, conv)
        hcat = _apply_res_part(params['res_part2'], hcat, conv)
        ht = _apply_h_h(params['h_h'], hcat, conv)                       # (B,H,W,20)
        xt = _apply_up_feature(params['up_feature1'], hcat, conv)        # (B,H,W,1)
        frames[cs_rate - 2 - i] = xt[..., 0]

    return jnp.stack(frames, axis=1)                    # (B, cs_rate, H, W)


def backrnn_pallas(params, xt8, meas, mask, h, meas_re, block_size, cs_rate):
    return _backrnn_impl(params, xt8, meas, mask, h, meas_re, block_size, cs_rate,
                         conv2d_pallas, conv_transpose2d_pallas)


def backrnn_reference(params, xt8, meas, mask, h, meas_re, block_size, cs_rate):
    return _backrnn_impl(params, xt8, meas, mask, h, meas_re, block_size, cs_rate,
                         _conv_ref, _conv_transpose_ref)


# ----------------------------------------------------------------------------
# Parameters
# ----------------------------------------------------------------------------
def make_params(key):
    keys = iter(jax.random.split(key, 48))

    def conv_p(k, cin, cout):
        kw, kb = jax.random.split(next(keys))
        std = 1.0 / float(k * k * cin) ** 0.5
        return {'w': std * jax.random.normal(kw, (k, k, cin, cout), jnp.float32),
                'b': 0.1 * jax.random.normal(kb, (1, cout), jnp.float32)}

    def convT_p(k, cin, cout):
        kw, kb = jax.random.split(next(keys))
        std = 1.0 / float(k * k * cin) ** 0.5
        return {'w': std * jax.random.normal(kw, (cin, cout, k, k), jnp.float32),
                'b': 0.1 * jax.random.normal(kb, (1, cout), jnp.float32)}

    def res_branch():
        return [conv_p(3, 50, 50), conv_p(1, 50, 50), conv_p(3, 50, 50)]

    return {
        'conv_x': {'c0': conv_p(5, 2, 20), 'c1': conv_p(1, 20, 20),
                   'c2': conv_p(3, 20, 80), 'c3': conv_p(1, 80, 40),
                   'c4': conv_p(3, 40, 40), 'ct': convT_p(3, 40, 10)},
        'extract_feature1': {'c0': conv_p(5, 1, 20), 'c1': conv_p(1, 20, 20),
                             'c2': conv_p(3, 20, 20), 'c3': conv_p(1, 20, 40),
                             'c4': conv_p(3, 40, 20)},
        'res_part1': {'b1': res_branch(), 'b2': res_branch(), 'b3': res_branch()},
        'res_part2': {'b1': res_branch(), 'b2': res_branch(), 'b3': res_branch()},
        'h_h': {'c0': conv_p(3, 50, 30), 'c1': conv_p(1, 30, 20), 'c2': conv_p(3, 20, 20)},
        'up_feature1': {'c0': conv_p(3, 50, 40), 'c1': conv_p(1, 40, 30),
                        'c2': conv_p(3, 30, 20), 'c3': conv_p(1, 20, 20),
                        'c4': conv_p(3, 20, 20), 'c5': conv_p(1, 20, 1)},
    }


if __name__ == "__main__":
    B, cs_rate, block_size = 2, 4, 16
    key = jax.random.PRNGKey(0)
    k_p, k_x, k_m, k_mask, k_h, k_mr = jax.random.split(key, 6)

    params = make_params(k_p)
    xt8 = jax.random.normal(k_x, (B, cs_rate, block_size, block_size), jnp.float32)
    meas = jax.random.normal(k_m, (B, block_size, block_size), jnp.float32)
    mask = (jax.random.uniform(k_mask, (cs_rate, block_size, block_size)) > 0.5
            ).astype(jnp.float32)
    h = jax.random.normal(k_h, (B, 20, block_size, block_size), jnp.float32)
    meas_re = jax.random.normal(k_mr, (B, 1, block_size, block_size), jnp.float32)

    out = backrnn_pallas(params, xt8, meas, mask, h, meas_re, block_size, cs_rate)
    out = jax.block_until_ready(out)
    assert out.shape == (B, cs_rate, block_size, block_size)

    ref = backrnn_reference(params, xt8, meas, mask, h, meas_re, block_size, cs_rate)
    ref = jax.block_until_ready(ref)
    max_err = float(jnp.max(jnp.abs(out - ref)))
    assert jnp.allclose(out, ref, atol=2e-2, rtol=2e-2), f"mismatch vs reference: {max_err}"

    print("KERNEL_OK")
</pallas_src>

<mosaic_0001>
module attributes {stable_mosaic.version = 11 : i64} {
  func.func @kernel(%arg0: i32, %arg1: memref<1x20x20x8xf32, #tpu.memory_space<vmem>>, %arg2: memref<5x5x8x20xf32, #tpu.memory_space<vmem>>, %arg3: memref<1x20xf32, #tpu.memory_space<vmem>>, %arg4: memref<1x16x16x20xf32, #tpu.memory_space<vmem>>) attributes {dimension_semantics = [#tpu.dimension_semantics<parallel>], iteration_bounds = array<i64: 2>, scalar_prefetch = 0 : i64, scratch_operands = 0 : i64, tpu.core_type = #tpu.core_type<tc>, window_params = [{transform_indices = @transform_0, window_bounds = array<i64: 1, 20, 20, 8>}, {pipeline_mode = #tpu.pipeline_mode<synchronous>, transform_indices = @transform_1, window_bounds = array<i64: 5, 5, 8, 20>}, {pipeline_mode = #tpu.pipeline_mode<synchronous>, transform_indices = @transform_2, window_bounds = array<i64: 1, 20>}, {transform_indices = @transform_3, window_bounds = array<i64: 1, 16, 16, 20>}]} {
    %c0 = arith.constant 0 : index
    %c0_0 = arith.constant 0 : index
    %c0_1 = arith.constant 0 : index
    %c0_2 = arith.constant 0 : index
    %0 = vector.load %arg1[%c0, %c0_0, %c0_1, %c0_2] : memref<1x20x20x8xf32, #tpu.memory_space<vmem>>, vector<1x20x20x8xf32>
    %1 = vector.shape_cast %0 : vector<1x20x20x8xf32> to vector<20x20x8xf32>
    %cst = arith.constant 0.000000e+00 : f32
    %2 = vector.broadcast %cst : f32 to vector<256x20xf32>
    %3 = vector.extract_strided_slice %1 {offsets = [0, 0, 0], sizes = [16, 16, 8], strides = [1, 1, 1]} : vector<20x20x8xf32> to vector<16x16x8xf32>
    %4 = vector.shape_cast %3 : vector<16x16x8xf32> to vector<256x8xf32>
    %c0_3 = arith.constant 0 : index
    %c0_4 = arith.constant 0 : index
    %c0_5 = arith.constant 0 : index
    %c0_6 = arith.constant 0 : index
    %5 = vector.load %arg2[%c0_3, %c0_4, %c0_5, %c0_6] : memref<5x5x8x20xf32, #tpu.memory_space<vmem>>, vector<1x1x8x20xf32>
    %6 = vector.shape_cast %5 : vector<1x1x8x20xf32> to vector<8x20xf32>
    %cst_7 = arith.constant dense<0.000000e+00> : vector<256x20xf32>
    %7 = tpu.matmul %4, %6, %cst_7 {dimension_numbers = #tpu.dot_dimension_numbers<[1], [0], [0], [1], [0, 0, 1, 1], [], []>} : vector<256x8xf32>, vector<8x20xf32>, vector<256x20xf32> -> vector<256x20xf32>
    %8 = arith.addf %2, %7 : vector<256x20xf32>
    %9 = vector.extract_strided_slice %1 {offsets = [0, 1, 0], sizes = [16, 16, 8], strides = [1, 1, 1]} : vector<20x20x8xf32> to vector<16x16x8xf32>
    %10 = vector.shape_cast %9 : vector<16x16x8xf32> to vector<256x8xf32>
    %c0_8 = arith.constant 0 : index
    %c1 = arith.constant 1 : index
    %c0_9 = arith.constant 0 : index
    %c0_10 = arith.constant 0 : index
    %11 = vector.load %arg2[%c0_8, %c1, %c0_9, %c0_10] : memref<5x5x8x20xf32, #tpu.memory_space<vmem>>, vector<1x1x8x20xf32>
    %12 = vector.shape_cast %11 : vector<1x1x8x20xf32> to vector<8x20xf32>
    %cst_11 = arith.constant dense<0.000000e+00> : vector<256x20xf32>
    %13 = tpu.matmul %10, %12, %cst_11 {dimension_numbers = #tpu.dot_dimension_numbers<[1], [0], [0], [1], [0, 0, 1, 1], [], []>} : vector<256x8xf32>, vector<8x20xf32>, vector<256x20xf32> -> vector<256x20xf32>
    %14 = arith.addf %8, %13 : vector<256x20xf32>
    %15 = vector.extract_strided_slice %1 {offsets = [0, 2, 0], sizes = [16, 16, 8], strides = [1, 1, 1]} : vector<20x20x8xf32> to vector<16x16x8xf32>
    %16 = vector.shape_cast %15 : vector<16x16x8xf32> to vector<256x8xf32>
    %c0_12 = arith.constant 0 : index
    %c2 = arith.constant 2 : index
    %c0_13 = arith.constant 0 : index
    %c0_14 = arith.constant 0 : index
    %17 = vector.load %arg2[%c0_12, %c2, %c0_13, %c0_14] : memref<5x5x8x20xf32, #tpu.memory_space<vmem>>, vector<1x1x8x20xf32>
    %18 = vector.shape_cast %17 : vector<1x1x8x20xf32> to vector<8x20xf32>
    %cst_15 = arith.constant dense<0.000000e+00> : vector<256x20xf32>
    %19 = tpu.matmul %16, %18, %cst_15 {dimension_numbers = #tpu.dot_dimension_numbers<[1], [0], [0], [1], [0, 0, 1, 1], [], []>} : vector<256x8xf32>, vector<8x20xf32>, vector<256x20xf32> -> vector<256x20xf32>
    %20 = arith.addf %14, %19 : vector<256x20xf32>
    %21 = vector.extract_strided_slice %1 {offsets = [0, 3, 0], sizes = [16, 16, 8], strides = [1, 1, 1]} : vector<20x20x8xf32> to vector<16x16x8xf32>
    %22 = vector.shape_cast %21 : vector<16x16x8xf32> to vector<256x8xf32>
    %c0_16 = arith.constant 0 : index
    %c3 = arith.constant 3 : index
    %c0_17 = arith.constant 0 : index
    %c0_18 = arith.constant 0 : index
    %23 = vector.load %arg2[%c0_16, %c3, %c0_17, %c0_18] : memref<5x5x8x20xf32, #tpu.memory_space<vmem>>, vector<1x1x8x20xf32>
    %24 = vector.shape_cast %23 : vector<1x1x8x20xf32> to vector<8x20xf32>
    %cst_19 = arith.constant dense<0.000000e+00> : vector<256x20xf32>
    %25 = tpu.matmul %22, %24, %cst_19 {dimension_numbers = #tpu.dot_dimension_numbers<[1], [0], [0], [1], [0, 0, 1, 1], [], []>} : vector<256x8xf32>, vector<8x20xf32>, vector<256x20xf32> -> vector<256x20xf32>
    %26 = arith.addf %20, %25 : vector<256x20xf32>
    %27 = vector.extract_strided_slice %1 {offsets = [0, 4, 0], sizes = [16, 16, 8], strides = [1, 1, 1]} : vector<20x20x8xf32> to vector<16x16x8xf32>
    %28 = vector.shape_cast %27 : vector<16x16x8xf32> to vector<256x8xf32>
    %c0_20 = arith.constant 0 : index
    %c4 = arith.constant 4 : index
    %c0_21 = arith.constant 0 : index
    %c0_22 = arith.constant 0 : index
    %29 = vector.load %arg2[%c0_20, %c4, %c0_21, %c0_22] : memref<5x5x8x20xf32, #tpu.memory_space<vmem>>, vector<1x1x8x20xf32>
    %30 = vector.shape_cast %29 : vector<1x1x8x20xf32> to vector<8x20xf32>
    %cst_23 = arith.constant dense<0.000000e+00> : vector<256x20xf32>
    %31 = tpu.matmul %28, %30, %cst_23 {dimension_numbers = #tpu.dot_dimension_numbers<[1], [0], [0], [1], [0, 0, 1, 1], [], []>} : vector<256x8xf32>, vector<8x20xf32>, vector<256x20xf32> -> vector<256x20xf32>
    %32 = arith.addf %26, %31 : vector<256x20xf32>
    %33 = vector.extract_strided_slice %1 {offsets = [1, 0, 0], sizes = [16, 16, 8], strides = [1, 1, 1]} : vector<20x20x8xf32> to vector<16x16x8xf32>
    %34 = vector.shape_cast %33 : vector<16x16x8xf32> to vector<256x8xf32>
    %c1_24 = arith.constant 1 : index
    %c0_25 = arith.constant 0 : index
    %c0_26 = arith.constant 0 : index
    %c0_27 = arith.constant 0 : index
    %35 = vector.load %arg2[%c1_24, %c0_25, %c0_26, %c0_27] : memref<5x5x8x20xf32, #tpu.memory_space<vmem>>, vector<1x1x8x20xf32>
    %36 = vector.shape_cast %35 : vector<1x1x8x20xf32> to vector<8x20xf32>
    %cst_28 = arith.constant dense<0.000000e+00> : vector<256x20xf32>
    %37 = tpu.matmul %34, %36, %cst_28 {dimension_numbers = #tpu.dot_dimension_numbers<[1], [0], [0], [1], [0, 0, 1, 1], [], []>} : vector<256x8xf32>, vector<8x20xf32>, vector<256x20xf32> -> vector<256x20xf32>
    %38 = arith.addf %32, %37 : vector<256x20xf32>
    %39 = vector.extract_strided_slice %1 {offsets = [1, 1, 0], sizes = [16, 16, 8], strides = [1, 1, 1]} : vector<20x20x8xf32> to vector<16x16x8xf32>
    %40 = vector.shape_cast %39 : vector<16x16x8xf32> to vector<256x8xf32>
    %c1_29 = arith.constant 1 : index
    %c1_30 = arith.constant 1 : index
    %c0_31 = arith.constant 0 : index
    %c0_32 = arith.constant 0 : index
    %41 = vector.load %arg2[%c1_29, %c1_30, %c0_31, %c0_32] : memref<5x5x8x20xf32, #tpu.memory_space<vmem>>, vector<1x1x8x20xf32>
    %42 = vector.shape_cast %41 : vector<1x1x8x20xf32> to vector<8x20xf32>
    %cst_33 = arith.constant dense<0.000000e+00> : vector<256x20xf32>
    %43 = tpu.matmul %40, %42, %cst_33 {dimension_numbers = #tpu.dot_dimension_numbers<[1], [0], [0], [1], [0, 0, 1, 1], [], []>} : vector<256x8xf32>, vector<8x20xf32>, vector<256x20xf32> -> vector<256x20xf32>
    %44 = arith.addf %38, %43 : vector<256x20xf32>
    %45 = vector.extract_strided_slice %1 {offsets = [1, 2, 0], sizes = [16, 16, 8], strides = [1, 1, 1]} : vector<20x20x8xf32> to vector<16x16x8xf32>
    %46 = vector.shape_cast %45 : vector<16x16x8xf32> to vector<256x8xf32>
    %c1_34 = arith.constant 1 : index
    %c2_35 = arith.constant 2 : index
    %c0_36 = arith.constant 0 : index
    %c0_37 = arith.constant 0 : index
    %47 = vector.load %arg2[%c1_34, %c2_35, %c0_36, %c0_37] : memref<5x5x8x20xf32, #tpu.memory_space<vmem>>, vector<1x1x8x20xf32>
    %48 = vector.shape_cast %47 : vector<1x1x8x20xf32> to vector<8x20xf32>
    %cst_38 = arith.constant dense<0.000000e+00> : vector<256x20xf32>
    %49 = tpu.matmul %46, %48, %cst_38 {dimension_numbers = #tpu.dot_dimension_numbers<[1], [0], [0], [1], [0, 0, 1, 1], [], []>} : vector<256x8xf32>, vector<8x20xf32>, vector<256x20xf32> -> vector<256x20xf32>
    %50 = arith.addf %44, %49 : vector<256x20xf32>
    %51 = vector.extract_strided_slice %1 {offsets = [1, 3, 0], sizes = [16, 16, 8], strides = [1, 1, 1]} : vector<20x20x8xf32> to vector<16x16x8xf32>
    %52 = vector.shape_cast %51 : vector<16x16x8xf32> to vector<256x8xf32>
    %c1_39 = arith.constant 1 : index
    %c3_40 = arith.constant 3 : index
    %c0_41 = arith.constant 0 : index
    %c0_42 = arith.constant 0 : index
    %53 = vector.load %arg2[%c1_39, %c3_40, %c0_41, %c0_42] : memref<5x5x8x20xf32, #tpu.memory_space<vmem>>, vector<1x1x8x20xf32>
    %54 = vector.shape_cast %53 : vector<1x1x8x20xf32> to vector<8x20xf32>
    %cst_43 = arith.constant dense<0.000000e+00> : vector<256x20xf32>
    %55 = tpu.matmul %52, %54, %cst_43 {dimension_numbers = #tpu.dot_dimension_numbers<[1], [0], [0], [1], [0, 0, 1, 1], [], []>} : vector<256x8xf32>, vector<8x20xf32>, vector<256x20xf32> -> vector<256x20xf32>
    %56 = arith.addf %50, %55 : vector<256x20xf32>
    %57 = vector.extract_strided_slice %1 {offsets = [1, 4, 0], sizes = [16, 16, 8], strides = [1, 1, 1]} : vector<20x20x8xf32> to vector<16x16x8xf32>
    %58 = vector.shape_cast %57 : vector<16x16x8xf32> to vector<256x8xf32>
    %c1_44 = arith.constant 1 : index
    %c4_45 = arith.constant 4 : index
    %c0_46 = arith.constant 0 : index
    %c0_47 = arith.constant 0 : index
    %59 = vector.load %arg2[%c1_44, %c4_45, %c0_46, %c0_47] : memref<5x5x8x20xf32, #tpu.memory_space<vmem>>, vector<1x1x8x20xf32>
    %60 = vector.shape_cast %59 : vector<1x1x8x20xf32> to vector<8x20xf32>
    %cst_48 = arith.constant dense<0.000000e+00> : vector<256x20xf32>
    %61 = tpu.matmul %58, %60, %cst_48 {dimension_numbers = #tpu.dot_dimension_numbers<[1], [0], [0], [1], [0, 0, 1, 1], [], []>} : vector<256x8xf32>, vector<8x20xf32>, vector<256x20xf32> -> vector<256x20xf32>
    %62 = arith.addf %56, %61 : vector<256x20xf32>
    %63 = vector.extract_strided_slice %1 {offsets = [2, 0, 0], sizes = [16, 16, 8], strides = [1, 1, 1]} : vector<20x20x8xf32> to vector<16x16x8xf32>
    %64 = vector.shape_cast %63 : vector<16x16x8xf32> to vector<256x8xf32>
    %c2_49 = arith.constant 2 : index
    %c0_50 = arith.constant 0 : index
    %c0_51 = arith.constant 0 : index
    %c0_52 = arith.constant 0 : index
    %65 = vector.load %arg2[%c2_49, %c0_50, %c0_51, %c0_52] : memref<5x5x8x20xf32, #tpu.memory_space<vmem>>, vector<1x1x8x20xf32>
    %66 = vector.shape_cast %65 : vector<1x1x8x20xf32> to vector<8x20xf32>
    %cst_53 = arith.constant dense<0.000000e+00> : vector<256x20xf32>
    %67 = tpu.matmul %64, %66, %cst_53 {dimension_numbers = #tpu.dot_dimension_numbers<[1], [0], [0], [1], [0, 0, 1, 1], [], []>} : vector<256x8xf32>, vector<8x20xf32>, vector<256x20xf32> -> vector<256x20xf32>
    %68 = arith.addf %62, %67 : vector<256x20xf32>
    %69 = vector.extract_strided_slice %1 {offsets = [2, 1, 0], sizes = [16, 16, 8], strides = [1, 1, 1]} : vector<20x20x8xf32> to vector<16x16x8xf32>
    %70 = vector.shape_cast %69 : vector<16x16x8xf32> to vector<256x8xf32>
    %c2_54 = arith.constant 2 : index
    %c1_55 = arith.constant 1 : index
    %c0_56 = arith.constant 0 : index
    %c0_57 = arith.constant 0 : index
    %71 = vector.load %arg2[%c2_54, %c1_55, %c0_56, %c0_57] : memref<5x5x8x20xf32, #tpu.memory_space<vmem>>, vector<1x1x8x20xf32>
    %72 = vector.shape_cast %71 : vector<1x1x8x20xf32> to vector<8x20xf32>
    %cst_58 = arith.constant dense<0.000000e+00> : vector<256x20xf32>
    %73 = tpu.matmul %70, %72, %cst_58 {dimension_numbers = #tpu.dot_dimension_numbers<[1], [0], [0], [1], [0, 0, 1, 1], [], []>} : vector<256x8xf32>, vector<8x20xf32>, vector<256x20xf32> -> vector<256x20xf32>
    %74 = arith.addf %68, %73 : vector<256x20xf32>
    %75 = vector.extract_strided_slice %1 {offsets = [2, 2, 0], sizes = [16, 16, 8], strides = [1, 1, 1]} : vector<20x20x8xf32> to vector<16x16x8xf32>
    %76 = vector.shape_cast %75 : vector<16x16x8xf32> to vector<256x8xf32>
    %c2_59 = arith.constant 2 : index
    %c2_60 = arith.constant 2 : index
    %c0_61 = arith.constant 0 : index
    %c0_62 = arith.constant 0 : index
    %77 = vector.load %arg2[%c2_59, %c2_60, %c0_61, %c0_62] : memref<5x5x8x20xf32, #tpu.memory_space<vmem>>, vector<1x1x8x20xf32>
    %78 = vector.shape_cast %77 : vector<1x1x8x20xf32> to vector<8x20xf32>
    %cst_63 = arith.constant dense<0.000000e+00> : vector<256x20xf32>
    %79 = tpu.matmul %76, %78, %cst_63 {dimension_numbers = #tpu.dot_dimension_numbers<[1], [0], [0], [1], [0, 0, 1, 1], [], []>} : vector<256x8xf32>, vector<8x20xf32>, vector<256x20xf32> -> vector<256x20xf32>
    %80 = arith.addf %74, %79 : vector<256x20xf32>
    %81 = vector.extract_strided_slice %1 {offsets = [2, 3, 0], sizes = [16, 16, 8], strides = [1, 1, 1]} : vector<20x20x8xf32> to vector<16x16x8xf32>
    %82 = vector.shape_cast %81 : vector<16x16x8xf32> to vector<256x8xf32>
    %c2_64 = arith.constant 2 : index
    %c3_65 = arith.constant 3 : index
    %c0_66 = arith.constant 0 : index
    %c0_67 = arith.constant 0 : index
    %83 = vector.load %arg2[%c2_64, %c3_65, %c0_66, %c0_67] : memref<5x5x8x20xf32, #tpu.memory_space<vmem>>, vector<1x1x8x20xf32>
    %84 = vector.shape_cast %83 : vector<1x1x8x20xf32> to vector<8x20xf32>
    %cst_68 = arith.constant dense<0.000000e+00> : vector<256x20xf32>
    %85 = tpu.matmul %82, %84, %cst_68 {dimension_numbers = #tpu.dot_dimension_numbers<[1], [0], [0], [1], [0, 0, 1, 1], [], []>} : vector<256x8xf32>, vector<8x20xf32>, vector<256x20xf32> -> vector<256x20xf32>
    %86 = arith.addf %80, %85 : vector<256x20xf32>
    %87 = vector.extract_strided_slice %1 {offsets = [2, 4, 0], sizes = [16, 16, 8], strides = [1, 1, 1]} : vector<20x20x8xf32> to vector<16x16x8xf32>
    %88 = vector.shape_cast %87 : vector<16x16x8xf32> to vector<256x8xf32>
    %c2_69 = arith.constant 2 : index
    %c4_70 = arith.constant 4 : index
    %c0_71 = arith.constant 0 : index
    %c0_72 = arith.constant 0 : index
    %89 = vector.load %arg2[%c2_69, %c4_70, %c0_71, %c0_72] : memref<5x5x8x20xf32, #tpu.memory_space<vmem>>, vector<1x1x8x20xf32>
    %90 = vector.shape_cast %89 : vector<1x1x8x20xf32> to vector<8x20xf32>
    %cst_73 = arith.constant dense<0.000000e+00> : vector<256x20xf32>
    %91 = tpu.matmul %88, %90, %cst_73 {dimension_numbers = #tpu.dot_dimension_numbers<[1], [0], [0], [1], [0, 0, 1, 1], [], []>} : vector<256x8xf32>, vector<8x20xf32>, vector<256x20xf32> -> vector<256x20xf32>
    %92 = arith.addf %86, %91 : vector<256x20xf32>
    %93 = vector.extract_strided_slice %1 {offsets = [3, 0, 0], sizes = [16, 16, 8], strides = [1, 1, 1]} : vector<20x20x8xf32> to vector<16x16x8xf32>
    %94 = vector.shape_cast %93 : vector<16x16x8xf32> to vector<256x8xf32>
    %c3_74 = arith.constant 3 : index
    %c0_75 = arith.constant 0 : index
    %c0_76 = arith.constant 0 : index
    %c0_77 = arith.constant 0 : index
    %95 = vector.load %arg2[%c3_74, %c0_75, %c0_76, %c0_77] : memref<5x5x8x20xf32, #tpu.memory_space<vmem>>, vector<1x1x8x20xf32>
    %96 = vector.shape_cast %95 : vector<1x1x8x20xf32> to vector<8x20xf32>
    %cst_78 = arith.constant dense<0.000000e+00> : vector<256x20xf32>
    %97 = tpu.matmul %94, %96, %cst_78 {dimension_numbers = #tpu.dot_dimension_numbers<[1], [0], [0], [1], [0, 0, 1, 1], [], []>} : vector<256x8xf32>, vector<8x20xf32>, vector<256x20xf32> -> vector<256x20xf32>
    %98 = arith.addf %92, %97 : vector<256x20xf32>
    %99 = vector.extract_strided_slice %1 {offsets = [3, 1, 0], sizes = [16, 16, 8], strides = [1, 1, 1]} : vector<20x20x8xf32> to vector<16x16x8xf32>
    %100 = vector.shape_cast %99 : vector<16x16x8xf32> to vector<256x8xf32>
    %c3_79 = arith.constant 3 : index
    %c1_80 = arith.constant 1 : index
    %c0_81 = arith.constant 0 : index
    %c0_82 = arith.constant 0 : index
    %101 = vector.load %arg2[%c3_79, %c1_80, %c0_81, %c0_82] : memref<5x5x8x20xf32, #tpu.memory_space<vmem>>, vector<1x1x8x20xf32>
    %102 = vector.shape_cast %101 : vector<1x1x8x20xf32> to vector<8x20xf32>
    %cst_83 = arith.constant dense<0.000000e+00> : vector<256x20xf32>
    %103 = tpu.matmul %100, %102, %cst_83 {dimension_numbers = #tpu.dot_dimension_numbers<[1], [0], [0], [1], [0, 0, 1, 1], [], []>} : vector<256x8xf32>, vector<8x20xf32>, vector<256x20xf32> -> vector<256x20xf32>
    %104 = arith.addf %98, %103 : vector<256x20xf32>
    %105 = vector.extract_strided_slice %1 {offsets = [3, 2, 0], sizes = [16, 16, 8], strides = [1, 1, 1]} : vector<20x20x8xf32> to vector<16x16x8xf32>
    %106 = vector.shape_cast %105 : vector<16x16x8xf32> to vector<256x8xf32>
    %c3_84 = arith.constant 3 : index
    %c2_85 = arith.constant 2 : index
    %c0_86 = arith.constant 0 : index
    %c0_87 = arith.constant 0 : index
    %107 = vector.load %arg2[%c3_84, %c2_85, %c0_86, %c0_87] : memref<5x5x8x20xf32, #tpu.memory_space<vmem>>, vector<1x1x8x20xf32>
    %108 = vector.shape_cast %107 : vector<1x1x8x20xf32> to vector<8x20xf32>
    %cst_88 = arith.constant dense<0.000000e+00> : vector<256x20xf32>
    %109 = tpu.matmul %106, %108, %cst_88 {dimension_numbers = #tpu.dot_dimension_numbers<[1], [0], [0], [1], [0, 0, 1, 1], [], []>} : vector<256x8xf32>, vector<8x20xf32>, vector<256x20xf32> -> vector<256x20xf32>
    %110 = arith.addf %104, %109 : vector<256x20xf32>
    %111 = vector.extract_strided_slice %1 {offsets = [3, 3, 0], sizes = [16, 16, 8], strides = [1, 1, 1]} : vector<20x20x8xf32> to vector<16x16x8xf32>
    %112 = vector.shape_cast %111 : vector<16x16x8xf32> to vector<256x8xf32>
    %c3_89 = arith.constant 3 : index
    %c3_90 = arith.constant 3 : index
    %c0_91 = arith.constant 0 : index
    %c0_92 = arith.constant 0 : index
    %113 = vector.load %arg2[%c3_89, %c3_90, %c0_91, %c0_92] : memref<5x5x8x20xf32, #tpu.memory_space<vmem>>, vector<1x1x8x20xf32>
    %114 = vector.shape_cast %113 : vector<1x1x8x20xf32> to vector<8x20xf32>
    %cst_93 = arith.constant dense<0.000000e+00> : vector<256x20xf32>
    %115 = tpu.matmul %112, %114, %cst_93 {dimension_numbers = #tpu.dot_dimension_numbers<[1], [0], [0], [1], [0, 0, 1, 1], [], []>} : vector<256x8xf32>, vector<8x20xf32>, vector<256x20xf32> -> vector<256x20xf32>
    %116 = arith.addf %110, %115 : vector<256x20xf32>
    %117 = vector.extract_strided_slice %1 {offsets = [3, 4, 0], sizes = [16, 16, 8], strides = [1, 1, 1]} : vector<20x20x8xf32> to vector<16x16x8xf32>
    %118 = vector.shape_cast %117 : vector<16x16x8xf32> to vector<256x8xf32>
    %c3_94 = arith.constant 3 : index
    %c4_95 = arith.constant 4 : index
    %c0_96 = arith.constant 0 : index
    %c0_97 = arith.constant 0 : index
    %119 = vector.load %arg2[%c3_94, %c4_95, %c0_96, %c0_97] : memref<5x5x8x20xf32, #tpu.memory_space<vmem>>, vector<1x1x8x20xf32>
    %120 = vector.shape_cast %119 : vector<1x1x8x20xf32> to vector<8x20xf32>
    %cst_98 = arith.constant dense<0.000000e+00> : vector<256x20xf32>
    %121 = tpu.matmul %118, %120, %cst_98 {dimension_numbers = #tpu.dot_dimension_numbers<[1], [0], [0], [1], [0, 0, 1, 1], [], []>} : vector<256x8xf32>, vector<8x20xf32>, vector<256x20xf32> -> vector<256x20xf32>
    %122 = arith.addf %116, %121 : vector<256x20xf32>
    %123 = vector.extract_strided_slice %1 {offsets = [4, 0, 0], sizes = [16, 16, 8], strides = [1, 1, 1]} : vector<20x20x8xf32> to vector<16x16x8xf32>
    %124 = vector.shape_cast %123 : vector<16x16x8xf32> to vector<256x8xf32>
    %c4_99 = arith.constant 4 : index
    %c0_100 = arith.constant 0 : index
    %c0_101 = arith.constant 0 : index
    %c0_102 = arith.constant 0 : index
    %125 = vector.load %arg2[%c4_99, %c0_100, %c0_101, %c0_102] : memref<5x5x8x20xf32, #tpu.memory_space<vmem>>, vector<1x1x8x20xf32>
    %126 = vector.shape_cast %125 : vector<1x1x8x20xf32> to vector<8x20xf32>
    %cst_103 = arith.constant dense<0.000000e+00> : vector<256x20xf32>
    %127 = tpu.matmul %124, %126, %cst_103 {dimension_numbers = #tpu.dot_dimension_numbers<[1], [0], [0], [1], [0, 0, 1, 1], [], []>} : vector<256x8xf32>, vector<8x20xf32>, vector<256x20xf32> -> vector<256x20xf32>
    %128 = arith.addf %122, %127 : vector<256x20xf32>
    %129 = vector.extract_strided_slice %1 {offsets = [4, 1, 0], sizes = [16, 16, 8], strides = [1, 1, 1]} : vector<20x20x8xf32> to vector<16x16x8xf32>
    %130 = vector.shape_cast %129 : vector<16x16x8xf32> to vector<256x8xf32>
    %c4_104 = arith.constant 4 : index
    %c1_105 = arith.constant 1 : index
    %c0_106 = arith.constant 0 : index
    %c0_107 = arith.constant 0 : index
    %131 = vector.load %arg2[%c4_104, %c1_105, %c0_106, %c0_107] : memref<5x5x8x20xf32, #tpu.memory_space<vmem>>, vector<1x1x8x20xf32>
    %132 = vector.shape_cast %131 : vector<1x1x8x20xf32> to vector<8x20xf32>
    %cst_108 = arith.constant dense<0.000000e+00> : vector<256x20xf32>
    %133 = tpu.matmul %130, %132, %cst_108 {dimension_numbers = #tpu.dot_dimension_numbers<[1], [0], [0], [1], [0, 0, 1, 1], [], []>} : vector<256x8xf32>, vector<8x20xf32>, vector<256x20xf32> -> vector<256x20xf32>
    %134 = arith.addf %128, %133 : vector<256x20xf32>
    %135 = vector.extract_strided_slice %1 {offsets = [4, 2, 0], sizes = [16, 16, 8], strides = [1, 1, 1]} : vector<20x20x8xf32> to vector<16x16x8xf32>
    %136 = vector.shape_cast %135 : vector<16x16x8xf32> to vector<256x8xf32>
    %c4_109 = arith.constant 4 : index
    %c2_110 = arith.constant 2 : index
    %c0_111 = arith.constant 0 : index
    %c0_112 = arith.constant 0 : index
    %137 = vector.load %arg2[%c4_109, %c2_110, %c0_111, %c0_112] : memref<5x5x8x20xf32, #tpu.memory_space<vmem>>, vector<1x1x8x20xf32>
    %138 = vector.shape_cast %137 : vector<1x1x8x20xf32> to vector<8x20xf32>
    %cst_113 = arith.constant dense<0.000000e+00> : vector<256x20xf32>
    %139 = tpu.matmul %136, %138, %cst_113 {dimension_numbers = #tpu.dot_dimension_numbers<[1], [0], [0], [1], [0, 0, 1, 1], [], []>} : vector<256x8xf32>, vector<8x20xf32>, vector<256x20xf32> -> vector<256x20xf32>
    %140 = arith.addf %134, %139 : vector<256x20xf32>
    %141 = vector.extract_strided_slice %1 {offsets = [4, 3, 0], sizes = [16, 16, 8], strides = [1, 1, 1]} : vector<20x20x8xf32> to vector<16x16x8xf32>
    %142 = vector.shape_cast %141 : vector<16x16x8xf32> to vector<256x8xf32>
    %c4_114 = arith.constant 4 : index
    %c3_115 = arith.constant 3 : index
    %c0_116 = arith.constant 0 : index
    %c0_117 = arith.constant 0 : index
    %143 = vector.load %arg2[%c4_114, %c3_115, %c0_116, %c0_117] : memref<5x5x8x20xf32, #tpu.memory_space<vmem>>, vector<1x1x8x20xf32>
    %144 = vector.shape_cast %143 : vector<1x1x8x20xf32> to vector<8x20xf32>
    %cst_118 = arith.constant dense<0.000000e+00> : vector<256x20xf32>
    %145 = tpu.matmul %142, %144, %cst_118 {dimension_numbers = #tpu.dot_dimension_numbers<[1], [0], [0], [1], [0, 0, 1, 1], [], []>} : vector<256x8xf32>, vector<8x20xf32>, vector<256x20xf32> -> vector<256x20xf32>
    %146 = arith.addf %140, %145 : vector<256x20xf32>
    %147 = vector.extract_strided_slice %1 {offsets = [4, 4, 0], sizes = [16, 16, 8], strides = [1, 1, 1]} : vector<20x20x8xf32> to vector<16x16x8xf32>
    %148 = vector.shape_cast %147 : vector<16x16x8xf32> to vector<256x8xf32>
    %c4_119 = arith.constant 4 : index
    %c4_120 = arith.constant 4 : index
    %c0_121 = arith.constant 0 : index
    %c0_122 = arith.constant 0 : index
    %149 = vector.load %arg2[%c4_119, %c4_120, %c0_121, %c0_122] : memref<5x5x8x20xf32, #tpu.memory_space<vmem>>, vector<1x1x8x20xf32>
    %150 = vector.shape_cast %149 : vector<1x1x8x20xf32> to vector<8x20xf32>
    %cst_123 = arith.constant dense<0.000000e+00> : vector<256x20xf32>
    %151 = tpu.matmul %148, %150, %cst_123 {dimension_numbers = #tpu.dot_dimension_numbers<[1], [0], [0], [1], [0, 0, 1, 1], [], []>} : vector<256x8xf32>, vector<8x20xf32>, vector<256x20xf32> -> vector<256x20xf32>
    %152 = arith.addf %146, %151 : vector<256x20xf32>
    %c0_124 = arith.constant 0 : index
    %c0_125 = arith.constant 0 : index
    %153 = vector.load %arg3[%c0_124, %c0_125] : memref<1x20xf32, #tpu.memory_space<vmem>>, vector<1x20xf32>
    %154 = vector.broadcast %153 : vector<1x20xf32> to vector<256x20xf32>
    %155 = arith.addf %152, %154 : vector<256x20xf32>
    %156 = vector.shape_cast %155 : vector<256x20xf32> to vector<16x16x20xf32>
    %c0_126 = arith.constant 0 : index
    %c0_127 = arith.constant 0 : index
    %c0_128 = arith.constant 0 : index
    %c0_129 = arith.constant 0 : index
    %157 = vector.load %arg4[%c0_126, %c0_127, %c0_128, %c0_129] : memref<1x16x16x20xf32, #tpu.memory_space<vmem>>, vector<1x16x16x20xf32>
    %158 = vector.shape_cast %157 : vector<1x16x16x20xf32> to vector<16x16x20xf32>
    %159 = vector.shape_cast %156 : vector<16x16x20xf32> to vector<1x16x16x20xf32>
    tpu.vector_store %arg4[%c0_126, %c0_127, %c0_128, %c0_129], %159 {strides = array<i32>} : memref<1x16x16x20xf32, #tpu.memory_space<vmem>>, vector<1x16x16x20xf32>,
    return
  }
  func.func @transform_0(%arg0: i32) -> (i32, i32, i32, i32) {
    %c0_i32 = arith.constant 0 : i32
    %c0_i32_0 = arith.constant 0 : i32
    %c0_i32_1 = arith.constant 0 : i32
    %c0_i32_2 = arith.constant 0 : i32
    return %arg0, %c0_i32, %c0_i32_0, %c0_i32_1 : i32, i32, i32, i32
  }
  func.func @transform_1(%arg0: i32) -> (i32, i32, i32, i32) {
    %c0_i32 = arith.constant 0 : i32
    %c0_i32_0 = arith.constant 0 : i32
    %c0_i32_1 = arith.constant 0 : i32
    %c0_i32_2 = arith.constant 0 : i32
    %c0_i32_3 = arith.constant 0 : i32
    return %c0_i32, %c0_i32_0, %c0_i32_1, %c0_i32_2 : i32, i32, i32, i32
  }
  func.func @transform_2(%arg0: i32) -> (i32, i32) {
    %c0_i32 = arith.constant 0 : i32
    %c0_i32_0 = arith.constant 0 : i32
    %c0_i32_1 = arith.constant 0 : i32
    return %c0_i32, %c0_i32_0 : i32, i32
  }
  func.func @transform_3(%arg0: i32) -> (i32, i32, i32, i32) {
    %c0_i32 = arith.constant 0 : i32
    %c0_i32_0 = arith.constant 0 : i32
    %c0_i32_1 = arith.constant 0 : i32
    %c0_i32_2 = arith.constant 0 : i32
    return %arg0, %c0_i32, %c0_i32_0, %c0_i32_1 : i32, i32, i32, i32
  }
}

</mosaic_0001>

<bundles_post_ra>
// kernel: tpu_custom_call.1
= control target key start
LH: loop header
LB: loop body
LE: loop exit
PB: predicated region body
PF: predicated region fallthrough
CT: control target
= control target key end

     0   :  { %8 = vsyncpa [#allocation3], 0  ;;  %s14975_s0 = inlined_call_operand.vmem [shape: f32[2,20,20,8], index: 0, kind: input, shape index: {}]   ;;  %s14976_s1 = inlined_call_operand.vmem [shape: f32[5,5,8,20], index: 1, kind: input, shape index: {}]   ;;  %s14977_s2 = inlined_call_operand.vmem [shape: f32[1,20], index: 2, kind: input, shape index: {}]   ;;  %s14978_s3 = inlined_call_operand.hbm [shape: f32[2,16,16,20], index: 3, kind: output, shape index: {}]  }
   0x1   :  { %10 = vsyncpa [#allocation3 + $0x1], 0  ;;  %s10753_s12 = smov 0   ;;  %s10755_s13 = smov 0  }
   0x2   :  { %s10757_s14 = smov 0   ;;  %s10759_s15 = smov 0  }
   0x3 LB: > { %s10774_s16 = sadd.s32 4294967295, %s10728_s15   ;;  %s7652_s17 = sadd.s32 4294967294, %s10728_s15   ;;  %s10728_s15 = sphi %s10759_s15, %s16053_s15   ;;  %s10724_s14 = sphi %s10757_s14, %s16052_s14   ;;  %s10720_s13 = sphi %s10755_s13, %s16051_s13   ;;  %s10716_s12 = sphi %s10753_s12, %s16050_s12  }
   0x4   : > { %s10778_s18 = sadd.s32 1, %s10728_s15   ;;  %s91_s19 = sadd.s32 1, %s10724_s14 }
   0x5   : > { %s88_s20 = ssub.s32 %s10728_s15, %s10778_s18  ;;  %p101_p0 = scmp.ne.s32.totalorder %s10724_s14, %s10720_s13 }
   0x6   : > { %p89_p1 = scmp.eq.s32.totalorder %s88_s20, 0  ;;  %p102_p2 = scmp.eq.s32.totalorder %s10774_s16, 1 }
   0x7   : > { %p107_p3 = scmp.ne.s32.totalorder %s10720_s13, %s10716_s12  ;;  %p108_p4 = scmp.eq.s32.totalorder %s7652_s17, 1 }
   0x8   : > { %s10789_s21 = scalar_select %p89_p1, %s10724_s14, %s91_s19  }
   0x9   : > { %p10791_p5 = por %p102_p2, %p101_p0  ;;  %p10795_p6 = por %p108_p4, %p107_p3 }
   0xa   : > { %p7655_p7 = scmp.ge.s32.totalorder %s10728_s15, 1  ;;  %p140_p8 = scmp.lt.s32.totalorder %s10728_s15, 3 }
   0xc   : > { %p141_p9 = pnand %p7655_p7, %p140_p8 }
   0xe   : > { %144 = sbr.rel (%p141_p9) target bundleno = 1043 (0x413), region = 32 }
  0x13   : > { %v7658_v0 = vld [vmem:[%s14976_s1 + $0x8] sm:$0xff]  ;;  %p164_p10 = scmp.lt.s32.totalorder %s10774_s16, 1  ;;  %v229_v1 = vld [vmem:[%s14976_s1] sm:$0xff]  ;;  %v7723_v2 = vld [vmem:[%s14976_s1 + $0x10] sm:$0xff]  ;;  %vm278_vm0 = vcmask 1046528   ;;  %vm361_vm1 = vcmask 64512  }
  0x14   : > { %10564 = vmatprep.subr.mxu1 %v7658_v0  ;;  %9314 = vmatprep.subr.mxu0 %v7658_v0  ;;  %v10862_v23 = vld [vmem:[%s14976_s1 + $0x18] sm:$0xff]  ;;  %v10880_v30 = vld [vmem:[%s14976_s1 + $0x20] sm:$0xff]  ;;  %vm940_vm2 = vcmask 1045504   ;;  %vm1344_vm3 = vcmask 1044480   ;;  %vm1748_vm4 = vcmask 1043456   ;;  %vm7543_vm5 = vcmask 162816  }
  0x15   : > { %10565 = vmatpush3.msra.mxu1 %v7658_v0  ;;  %9315 = vmatpush3.msra.mxu0 %v7658_v0  ;;  %s165_s30 = scalar_select %p164_p10, %s10774_s16, 1 }
  0x16   : > { %9364 = vmatprep.subr.mxu1 %v229_v1  ;;  %9414 = vmatprep.subr.mxu0 %v7723_v2  ;;  %s10730_s11 = smov [#allocation2]  }
  0x17   : > { %s10566_s4 = smul.u32 480, %s165_s30  ;;  %s10672_s17 = sshll.u32 %s10730_s11, 4  ;;  %s10673_s17 = int_to_ptr.vmem [resolvable:$false] %s10672_s17 }
  0x18   : > { %s10674_s19 = scalar_lea.vmem %s10673_s17, 8192 }
  0x19   : > { %s10815_s7 = scalar_lea.vmem %s14975_s0, %s10566_s4  ;;  %s8488_s4 = sshll.u32 %s10774_s16, 12 }
  0x1a   : > { %v10818_v3 = vld [vmem:[%s10815_s7] sm:$0xff]  ;;  %v10821_v4 = vld [vmem:[%s10815_s7 + $0x8] sm:$0xff]  ;;  %v10833_v10 = vld [vmem:[%s10815_s7 + $0x10] sm:$0xf]  ;;  %s14924_s9 = scalar_lea.hbm %s14978_s3, %s8488_s4 }
  0x1b   : > { %v10824_v5 = vld [vmem:[%s10815_s7 + $0xc0] sm:$0xff]  ;;  %v279_v6 = vrot.slane %v10818_v3, 1  ;;  %v280_v7 = vrot.slane %v10821_v4, 1  ;;  %v10829_v8 = vld [vmem:[%s10815_s7 + $0xc8] sm:$0xff]  ;;  %v282_v12 = vrot.slane %v10833_v10, 1  ;;  %v10841_v14 = vld [vmem:[%s10815_s7 + $0x18] sm:$0xff] }
  0x1c   : > { %v319_v9 = vrot.slane %v10824_v5, 1  ;;  %v320_v11 = vrot.slane %v10829_v8, 1  ;;  %v10838_v13 = vld [vmem:[%s10815_s7 + $0xd0] sm:$0xf]  ;;  %v10844_v15 = vld [vmem:[%s10815_s7 + $0x20] sm:$0xff]  ;;  %v284_v18 = vrot.slane %v10841_v14, 1 }
  0x1d   : > { %v281_v16 = vsel %vm278_vm0, %v279_v6, %v280_v7  ;;  %v322_v17 = vrot.slane %v10838_v13, 1  ;;  %v285_v19 = vrot.slane %v10844_v15, 1  ;;  %v10851_v20 = vld [vmem:[%s10815_s7 + $0xd8] sm:$0xff]  ;;  %v10854_v21 = vld [vmem:[%s10815_s7 + $0xe0] sm:$0xff]  ;;  %v10857_v22 = vld [vmem:[%s10815_s7 + $0x30] sm:$0xff]  ;;  %v283_v25 = vsel %vm278_vm0, %v280_v7, %v282_v12 }
  0x1e   : > { %9316 = vmatprep.mubr.msk.f32.mxu0 %vm361_vm1, %v281_v16  ;;  %v10866_v24 = vsel %vm278_vm0, %v319_v9, %v320_v11  ;;  %v324_v26 = vrot.slane %v10851_v20, 1  ;;  %v325_v27 = vrot.slane %v10854_v21, 1  ;;  %v10872_v28 = vld [vmem:[%s10815_s7 + $0x28] sm:$0xf]  ;;  %v10894_v35 = vld [vmem:[%s10815_s7 + $0x38] sm:$0xff]  ;;  %v10897_v36 = vld [vmem:[%s10815_s7 + $0xf0] sm:$0xff] }
  0x1f   : > { %15312 = vst [vmem:[#allocation5_spill] sm:$0xff] %v10866_v24  ;;  %v10875_v29 = vld [vmem:[%s10815_s7 + $0xe8] sm:$0xf]  ;;  %9340 = vmatprep.mubr.msk.f32.mxu1 %vm361_vm1, %v10866_v24  ;;  %9317 = vmatmul.mubr.msk.f32.vlgmr.msra.gmra.mxu0 %vm361_vm1, %v283_v25  ;;  %v10886_v31 = vsel %vm278_vm0, %v320_v11, %v322_v17  ;;  %v10889_v32 = vsel %vm278_vm0, %v284_v18, %v285_v19  ;;  %v287_v33 = vrot.slane %v10872_v28, 1  ;;  %v10900_v37 = vld [vmem:[%s10815_s7 + $0xf8] sm:$0xff]  ;;  %v289_v39 = vrot.slane %v10857_v22, 1 }
  0x20   : > { %15313 = vst [vmem:[#allocation6_spill] sm:$0xff] %v10886_v31  ;;  %15314 = vst [vmem:[#allocation7_spill] sm:$0xff] %v10889_v32  ;;  %v327_v34 = vrot.slane %v10875_v29, 1  ;;  %9341 = vmatmul.mubr.msk.f32.vlgmr.msra.gmra.mxu1 %vm361_vm1, %v10886_v31  ;;  %9415 = vmatpush3.msra.mxu0 %v7723_v2  ;;  %v10905_v38 = vsel %vm278_vm0, %v324_v26, %v325_v27  ;;  %v290_v40 = vrot.slane %v10894_v35, 1  ;;  %v329_v41 = vrot.slane %v10897_v36, 1  ;;  %v10914_v43 = vld [vmem:[%s10815_s7 + $0x48] sm:$0xff] }
  0x21   : > { %15315 = vst [vmem:[#allocation8_spill] sm:$0xff] %v10905_v38  ;;  %v10911_v42 = vld [vmem:[%s10815_s7 + $0x40] sm:$0xf]  ;;  %9365 = vmatpush3.msra.mxu1 %v229_v1  ;;  %9319 = vmatprep.mubr.msk.f32.mxu0 %vm361_vm1, %v10889_v32  ;;  %v10919_v44 = vsel %vm278_vm0, %v285_v19, %v287_v33  ;;  %v330_v46 = vrot.slane %v10900_v37, 1  ;;  %v10930_v49 = vld [vmem:[%s10815_s7 + $0x50] sm:$0xff]  ;;  %v10933_v50 = vld [vmem:[%s10815_s7 + $0x108] sm:$0xff] }
  0x22   : > { %15316 = vst [vmem:[#allocation9_spill] sm:$0xff] %v10919_v44  ;;  %v10922_v45 = vsel %vm278_vm0, %v325_v27, %v327_v34  ;;  %v292_v47 = vrot.slane %v10911_v42, 1  ;;  %v10927_v48 = vld [vmem:[%s10815_s7 + $0x100] sm:$0xf]  ;;  %9343 = vmatprep.mubr.msk.f32.mxu1 %vm361_vm1, %v10905_v38  ;;  %v10938_v51 = vsel %vm278_vm0, %v289_v39, %v290_v40  ;;  %v294_v53 = vrot.slane %v10914_v43, 1  ;;  %v10944_v55 = vld [vmem:[%s10815_s7 + $0x110] sm:$0xff]  ;;  %9464 = vmatprep.subr.mxu1 %v10862_v23 }
  0x23   : > { %15317 = vst [vmem:[#allocation10_spill] sm:$0xff] %v10922_v45  ;;  %15318 = vst [vmem:[#allocation11_spill] sm:$0xff] %v10938_v51  ;;  %v332_v52 = vrot.slane %v10927_v48, 1  ;;  %v295_v54 = vrot.slane %v10930_v49, 1  ;;  %v10947_v56 = vld [vmem:[%s10815_s7 + $0x58] sm:$0xf]  ;;  %9320 = vmatmul.mubr.msk.f32.gmra.mxu0 %vm361_vm1, %v10919_v44  ;;  %v10953_v57 = vsel %vm278_vm0, %v329_v41, %v330_v46  ;;  %9514 = vmatprep.subr.mxu0 %v10880_v30 }
  0x24   : > { %15319 = vst [vmem:[#allocation12_spill] sm:$0xff] %v10953_v57  ;;  %v334_v58 = vrot.slane %v10933_v50, 1  ;;  %v335_v59 = vrot.slane %v10944_v55, 1  ;;  %v10958_v60 = vld [vmem:[%s10815_s7 + $0x118] sm:$0xf]  ;;  %v10961_v61 = vld [vmem:[%s10815_s7 + $0x60] sm:$0xff]  ;;  %9344 = vmatmul.mubr.msk.f32.gmra.mxu1 %vm361_vm1, %v10922_v45  ;;  %9322 = vmatprep.mubr.msk.f32.mxu0 %vm361_vm1, %v10938_v51  ;;  %v10972_v63 = vsel %vm278_vm0, %v290_v40, %v292_v47 }
  0x25   : > { %v10964_v62 = vld [vmem:[%s10815_s7 + $0x68] sm:$0xff]  ;;  %15320 = vst [vmem:[#allocation13_spill] sm:$0xff] %v10972_v63  ;;  %v297_v0 = vrot.slane %v10947_v56, 1  ;;  %v337_v1 = vrot.slane %v10958_v60, 1  ;;  %v10977_v2 = vld [vmem:[%s10815_s7 + $0x120] sm:$0xff]  ;;  %9346 = vmatprep.mubr.msk.f32.mxu1 %vm361_vm1, %v10953_v57  ;;  %v10985_v7 = vsel %vm278_vm0, %v330_v46, %v332_v52  ;;  %v10988_v9 = vsel %vm278_vm0, %v294_v53, %v295_v54  ;;  %v11004_v26 = vld [vmem:[%s10815_s7 + $0x78] sm:$0xff] }
  0x26   : > { %v10980_v6 = vld [vmem:[%s10815_s7 + $0x128] sm:$0xff]  ;;  %15321 = vst [vmem:[#allocation14_spill] sm:$0xff] %v10985_v7  ;;  %15322 = vst [vmem:[#allocation15_spill] sm:$0xff] %v10988_v9  ;;  %v299_v11 = vrot.slane %v10961_v61, 1  ;;  %v300_v12 = vrot.slane %v10964_v62, 1  ;;  %v10999_v18 = vsel %vm278_vm0, %v334_v58, %v335_v59  ;;  %v339_v19 = vrot.slane %v10977_v2, 1 }
  0x27   : > { %v10993_v16 = vld [vmem:[%s10815_s7 + $0x70] sm:$0xf]  ;;  %15323 = vst [vmem:[#allocation16_spill] sm:$0xff] %v10999_v18  ;;  %v340_v25 = vrot.slane %v10980_v6, 1  ;;  %v11007_v27 = vld [vmem:[%s10815_s7 + $0x80] sm:$0xff]  ;;  %9323 = vmatmul.mubr.msk.f32.gmra.mxu0 %vm361_vm1, %v10972_v63  ;;  %v11012_v33 = vld [vmem:[%s10815_s7 + $0x138] sm:$0xff]  ;;  %v11022_v39 = vsel %vm278_vm0, %v295_v54, %v297_v0  ;;  %v11029_v46 = vsel %vm278_vm0, %v335_v59, %v337_v1 }
  0x28   : > { %v10996_v17 = vld [vmem:[%s10815_s7 + $0x130] sm:$0xf]  ;;  %v11015_v34 = vld [vmem:[%s10815_s7 + $0x140] sm:$0xff]  ;;  %9347 = vmatmul.mubr.msk.f32.gmra.mxu1 %vm361_vm1, %v10985_v7  ;;  %9325 = vmatprep.mubr.msk.f32.mxu0 %vm361_vm1, %v10988_v9  ;;  %15324 = vst [vmem:[#allocation17_spill] sm:$0xff] %v11022_v39  ;;  %v302_v40 = vrot.slane %v10993_v16, 1  ;;  %15325 = vst [vmem:[#allocation18_spill] sm:$0xff] %v11029_v46  ;;  %v11032_v47 = vsel %vm278_vm0, %v299_v11, %v300_v12 }
  0x29   : > { %v342_v41 = vrot.slane %v10996_v17, 1  ;;  %9349 = vmatprep.mubr.msk.f32.mxu1 %vm361_vm1, %v10999_v18  ;;  %15326 = vst [vmem:[#allocation19_spill] sm:$0xff] %v11032_v47  ;;  %v304_v52 = vrot.slane %v11004_v26, 1  ;;  %v305_v53 = vrot.slane %v11007_v27, 1  ;;  %v11037_v54 = vld [vmem:[%s10815_s7 + $0x88] sm:$0xf]  ;;  %v11043_v0 = vsel %vm278_vm0, %v339_v19, %v340_v25 }
  0x2a   : > { %v11040_v58 = vld [vmem:[%s10815_s7 + $0x148] sm:$0xf]  ;;  %15327 = vst [vmem:[#allocation20_spill] sm:$0xff] %v11043_v0  ;;  %v344_v7 = vrot.slane %v11012_v33, 1  ;;  %v345_v18 = vrot.slane %v11015_v34, 1  ;;  %v11048_v59 = vld [vmem:[%s10815_s7 + $0x90] sm:$0xff]  ;;  %v11066_v19 = vsel %vm278_vm0, %v300_v12, %v302_v40 }
  0x2b   : > { %v11051_v1 = vld [vmem:[%s10815_s7 + $0x98] sm:$0xff]  ;;  %9326 = vmatmul.mubr.msk.f32.gmra.mxu0 %vm361_vm1, %v11022_v39  ;;  %v11056_v11 = vld [vmem:[%s10815_s7 + $0x150] sm:$0xff]  ;;  %15329 = vst [vmem:[#allocation22_spill] sm:$0xff] %v11066_v19  ;;  %v307_v45 = vrot.slane %v11037_v54, 1  ;;  %v347_v38 = vrot.slane %v11040_v58, 1  ;;  %v11073_v31 = vsel %vm278_vm0, %v340_v25, %v342_v41  ;;  %v309_v24 = vrot.slane %v11048_v59, 1 }
  0x2c   : > { %v11059_v57 = vld [vmem:[%s10815_s7 + $0x158] sm:$0xff]  ;;  %9350 = vmatmul.mubr.msk.f32.gmra.mxu1 %vm361_vm1, %v11029_v46  ;;  %9328 = vmatprep.mubr.msk.f32.mxu0 %vm361_vm1, %v11032_v47  ;;  %15330 = vst [vmem:[#allocation23_spill] sm:$0xff] %v11073_v31  ;;  %v11076_v46 = vsel %vm278_vm0, %v304_v52, %v305_v53  ;;  %v310_v12 = vrot.slane %v11051_v1, 1  ;;  %v11081_v40 = vld [vmem:[%s10815_s7 + $0xa0] sm:$0xf]  ;;  %v11087_v39 = vsel %vm278_vm0, %v344_v7, %v345_v18  ;;  %v349_v9 = vrot.slane %v11056_v11, 1 }
  0x2d   : > { %15328 = vst [vmem:[#allocation21_spill] sm:$0xff] %v11059_v57  ;;  %9352 = vmatprep.mubr.msk.f32.mxu1 %vm361_vm1, %v11043_v0  ;;  %15331 = vst [vmem:[#allocation24_spill] sm:$0xff] %v11076_v46  ;;  %v11084_v47 = vld [vmem:[%s10815_s7 + $0x160] sm:$0xf]  ;;  %v350_v0 = vrot.slane %v11059_v57, 1  ;;  %v11092_v25 = vld [vmem:[%s10815_s7 + $0xa8] sm:$0xff]  ;;  %v11110_v7 = vsel %vm278_vm0, %v305_v53, %v307_v45 }
  0x2e   : > { %15332 = vst [vmem:[#allocation25_spill] sm:$0xff] %v11084_v47  ;;  %15333 = vst [vmem:[#allocation26_spill] sm:$0xff] %v11087_v39  ;;  %v11095_v41 = vld [vmem:[%s10815_s7 + $0xb0] sm:$0xff]  ;;  %v11100_v52 = vld [vmem:[%s10815_s7 + $0x168] sm:$0xff]  ;;  %v312_v51 = vrot.slane %v11081_v40, 1  ;;  %v352_v44 = vrot.slane %v11084_v47, 1  ;;  %v11120_v32 = vsel %vm278_vm0, %v309_v24, %v310_v12 }
  0x2f   : > { %9329 = vmatmul.mubr.msk.f32.gmra.mxu0 %vm361_vm1, %v11066_v19  ;;  %v11103_v63 = vld [vmem:[%s10815_s7 + $0x170] sm:$0xff]  ;;  %15334 = vst [vmem:[#allocation27_spill] sm:$0xff] %v11110_v7  ;;  %v11117_v19 = vsel %vm278_vm0, %v345_v18, %v347_v38  ;;  %15336 = vst [vmem:[#allocation29_spill] sm:$0xff] %v11120_v32  ;;  %v11125_v57 = vld [vmem:[%s10815_s7 + $0xb8] sm:$0xf]  ;;  %v11128_v45 = vsel %vm278_vm0, %v349_v9, %v350_v0  ;;  %v354_v53 = vrot.slane %v11100_v52, 1 }
  0x30   : > { %9353 = vmatmul.mubr.msk.f32.gmra.mxu1 %vm361_vm1, %v11073_v31  ;;  %9331 = vmatprep.mubr.msk.f32.mxu0 %vm361_vm1, %v11076_v46  ;;  %15335 = vst [vmem:[#allocation28_spill] sm:$0xff] %v11117_v19  ;;  %v314_v31 = vrot.slane %v11092_v25, 1  ;;  %v315_v46 = vrot.slane %v11095_v41, 1  ;;  %15337 = vst [vmem:[#allocation30_spill] sm:$0xff] %v11128_v45  ;;  %v355_v47 = vrot.slane %v11103_v63, 1  ;;  %v11142_v24 = vsel %vm278_vm0, %v310_v12, %v312_v51 }
  0x31   : > { %9355 = vmatprep.mubr.msk.f32.mxu1 %vm361_vm1, %v11087_v39  ;;  %v11133_v39 = vld [vmem:[%s10815_s7 + $0x178] sm:$0xf]  ;;  %15338 = vst [vmem:[#allocation31_spill] sm:$0xff] %v11142_v24  ;;  %v11145_v38 = vsel %vm278_vm0, %v350_v0, %v352_v44  ;;  %v317_v9 = vrot.slane %v11125_v57, 1  ;;  %v944_v44 = vrot.slane %v10833_v10, 2 }
  0x32   : > { %15339 = vst [vmem:[#allocation32_spill] sm:$0xff] %v11145_v38  ;;  %v11151_v18 = vsel %vm278_vm0, %v314_v31, %v315_v46  ;;  %v11157_v51 = vsel %vm278_vm0, %v354_v53, %v355_v47  ;;  %v946_v53 = vrot.slane %v10841_v14, 2 }
  0x33   : > { %9332 = vmatmul.mubr.msk.f32.gmra.mxu0 %vm361_vm1, %v11110_v7  ;;  %15340 = vst [vmem:[#allocation33_spill] sm:$0xff] %v11151_v18  ;;  %v357_v7 = vrot.slane %v11133_v39, 1  ;;  %15341 = vst [vmem:[#allocation34_spill] sm:$0xff] %v11157_v51  ;;  %v11166_v31 = vsel %vm278_vm0, %v315_v46, %v317_v9  ;;  %v949_v9 = vrot.slane %v10872_v28, 2 }
  0x34   : > { %9356 = vmatmul.mubr.msk.f32.gmra.mxu1 %vm361_vm1, %v11117_v19  ;;  %9334 = vmatprep.mubr.msk.f32.mxu0 %vm361_vm1, %v11120_v32  ;;  %v941_v19 = vrot.slane %v10818_v3, 2  ;;  %v942_v32 = vrot.slane %v10821_v4, 2  ;;  %15342 = vst [vmem:[#allocation35_spill] sm:$0xff] %v11166_v31 }
  0x35   : > { %9358 = vmatprep.mubr.msk.f32.mxu1 %vm361_vm1, %v11128_v45  ;;  %v11172_v0 = vsel %vm278_vm0, %v355_v47, %v357_v7  ;;  %v951_v47 = vrot.slane %v10857_v22, 2  ;;  %v1348_v45 = vrot.slane %v10833_v10, 3 }
  0x36   : > { %15343 = vst [vmem:[#allocation36_spill] sm:$0xff] %v11172_v0  ;;  %v943_v12 = vsel %vm940_vm2, %v941_v19, %v942_v32  ;;  %v945_v46 = vsel %vm940_vm2, %v942_v32, %v944_v44  ;;  %v952_v19 = vrot.slane %v10894_v35, 2  ;;  %v954_v44 = vrot.slane %v10911_v42, 2 }
  0x37   : > { %9335 = vmatmul.mubr.msk.f32.gmra.mxu0 %vm361_vm1, %v11142_v24 }
  0x38   : > { %9359 = vmatmul.mubr.msk.f32.gmra.mxu1 %vm361_vm1, %v11145_v38  ;;  %9337 = vmatprep.mubr.msk.f32.mxu0 %vm361_vm1, %v11151_v18  ;;  %v947_v38 = vrot.slane %v10844_v15, 2 }
  0x39   : > { %9361 = vmatprep.mubr.msk.f32.mxu1 %vm361_vm1, %v11157_v51  ;;  %v1750_v51 = vrot.slane %v10821_v4, 4 }
  0x3a   : > { %v11190_v7 = vsel %vm940_vm2, %v946_v53, %v947_v38  ;;  %v11201_v32 = vsel %vm940_vm2, %v947_v38, %v949_v9  ;;  %v11207_v53 = vld [vmem:[%s14976_s1 + $0x30] sm:$0xff]  ;;  %v957_v38 = vrot.slane %v10930_v49, 2  ;;  %v1345_v9 = vrot.slane %v10818_v3, 3 }
  0x3b   : > { %9338 = vmatmul.mubr.msk.f32.gmra.mxu0 %vm361_vm1, %v11166_v31  ;;  %15344 = vst [vmem:[#allocation37_spill] sm:$0xff] %v11190_v7  ;;  %15345 = vst [vmem:[#allocation38_spill] sm:$0xff] %v11201_v32  ;;  %v962_v31 = vrot.slane %v10964_v62, 2 }
  0x3c   : > { %9362 = vmatmul.mubr.msk.f32.gmra.mxu1 %vm361_vm1, %v11172_v0  ;;  %9416 = vmatprep.mubr.msk.f32.mxu0 %vm361_vm1, %v943_v12  ;;  %v11195_v12 = vld [vmem:[%s14976_s1 + $0x28] sm:$0xff]  ;;  %v1749_v0 = vrot.slane %v10818_v3, 4 }
  0x3d   : > { %9366 = vmatprep.mubr.msk.f32.mxu1 %vm361_vm1, %v10818_v3 }
  0x3f   : > { %9417 = vmatmul.mubr.msk.f32.vlgmr.msra.gmra.mxu0 %vm361_vm1, %v945_v46  ;;  %v11213_v46 = vsel %vm940_vm2, %v951_v47, %v952_v19  ;;  %v1346_v47 = vrot.slane %v10821_v4, 3 }
  0x40   : > { %9367 = vmatmul.mubr.msk.f32.vlgmr.msra.gmra.mxu1 %vm361_vm1, %v10821_v4  ;;  %9515 = vmatpush3.msra.mxu0 %v10880_v30  ;;  %15346 = vst [vmem:[#allocation39_spill] sm:$0xff] %v11213_v46  ;;  %v956_v30 = vrot.slane %v10914_v43, 2 }
  0x41   : > { %9465 = vmatpush3.msra.mxu1 %v10862_v23  ;;  %9369 = vmatprep.mubr.msk.f32.mxu1 %vm361_vm1, %v10841_v14  ;;  %v959_v23 = vrot.slane %v10947_v56, 2  ;;  %v11244_v18 = vsel %vm1344_vm3, %v1345_v9, %v1346_v47  ;;  %v11251_v4 = vsel %vm1344_vm3, %v1346_v47, %v1348_v45  ;;  %v969_v9 = vrot.slane %v11037_v54, 2 }
  0x42   : > { %9419 = vmatprep.mubr.msk.f32.mxu0 %vm361_vm1, %v11190_v7  ;;  %9564 = vmatprep.subr.mxu1 %v11195_v12  ;;  %v11232_v7 = vsel %vm940_vm2, %v952_v19, %v954_v44  ;;  %v11240_v3 = vsel %vm940_vm2, %v956_v30, %v957_v38  ;;  %v1752_v19 = vrot.slane %v10833_v10, 4  ;;  %v11248_v44 = vsel %vm1748_vm4, %v1749_v0, %v1750_v51 }
  0x43   : > { %9420 = vmatmul.mubr.msk.f32.gmra.mxu0 %vm361_vm1, %v11201_v32  ;;  %9614 = vmatprep.subr.mxu0 %v11207_v53  ;;  %15347 = vst [vmem:[#allocation40_spill] sm:$0xff] %v11232_v7  ;;  %v961_v32 = vrot.slane %v10961_v61, 2  ;;  %15348 = vst [vmem:[#allocation41_spill] sm:$0xff] %v11240_v3  ;;  %v11263_v10 = vsel %vm940_vm2, %v957_v38, %v959_v23  ;;  %v964_v0 = vrot.slane %v10993_v16, 2  ;;  %v967_v30 = vrot.slane %v11007_v27, 2 }
  0x44   : > { %9370 = vmatmul.mubr.msk.f32.gmra.mxu1 %vm361_vm1, %v10844_v15  ;;  %9422 = vmatprep.mubr.msk.f32.mxu0 %vm361_vm1, %v11213_v46  ;;  %v11256_v46 = vsel %vm1748_vm4, %v1750_v51, %v1752_v19  ;;  %15349 = vst [vmem:[#allocation42_spill] sm:$0xff] %v11263_v10  ;;  %v966_v51 = vrot.slane %v11004_v26, 2  ;;  %v971_v23 = vrot.slane %v11048_v59, 2  ;;  %v972_v47 = vrot.slane %v11051_v1, 2 }
  0x45   : > { %9372 = vmatprep.mubr.msk.f32.mxu1 %vm361_vm1, %v10857_v22  ;;  %v11269_v45 = vsel %vm940_vm2, %v961_v32, %v962_v31  ;;  %v11280_v38 = vsel %vm940_vm2, %v962_v31, %v964_v0  ;;  %v11297_v31 = vsel %vm940_vm2, %v967_v30, %v969_v9  ;;  %v974_v19 = vrot.slane %v11081_v40, 2 }
  0x46   : > { %15350 = vst [vmem:[#allocation43_spill] sm:$0xff] %v11269_v45  ;;  %15351 = vst [vmem:[#allocation44_spill] sm:$0xff] %v11280_v38  ;;  %v11286_v32 = vsel %vm940_vm2, %v966_v51, %v967_v30  ;;  %v11303_v0 = vsel %vm940_vm2, %v971_v23, %v972_v47  ;;  %v976_v51 = vrot.slane %v11092_v25, 2  ;;  %v979_v9 = vrot.slane %v11125_v57, 2 }
  0x47   : > { %9423 = vmatmul.mubr.msk.f32.gmra.mxu0 %vm361_vm1, %v11232_v7  ;;  %15352 = vst [vmem:[#allocation45_spill] sm:$0xff] %v11286_v32  ;;  %15353 = vst [vmem:[#allocation46_spill] sm:$0xff] %v11297_v31  ;;  %v11314_v30 = vsel %vm940_vm2, %v972_v47, %v974_v19  ;;  %v984_v19 = vrot.slane %v10838_v13, 2 }
  0x48   : > { %9373 = vmatmul.mubr.msk.f32.gmra.mxu1 %vm361_vm1, %v10894_v35  ;;  %9425 = vmatprep.mubr.msk.f32.mxu0 %vm361_vm1, %v11240_v3  ;;  %15354 = vst [vmem:[#allocation47_spill] sm:$0xff] %v11303_v0  ;;  %15355 = vst [vmem:[#allocation48_spill] sm:$0xff] %v11314_v30 }
  0x49   : > { %9375 = vmatprep.mubr.msk.f32.mxu1 %vm361_vm1, %v10914_v43 }
  0x4b   : > { %9426 = vmatmul.mubr.msk.f32.gmra.mxu0 %vm361_vm1, %v11263_v10  ;;  %v1016_v10 = vrot.slane %v11100_v52, 2 }
  0x4c   : > { %9376 = vmatmul.mubr.msk.f32.gmra.mxu1 %vm361_vm1, %v10930_v49  ;;  %9428 = vmatprep.mubr.msk.f32.mxu0 %vm361_vm1, %v11269_v45 }
  0x4d   : > { %9378 = vmatprep.mubr.msk.f32.mxu1 %vm361_vm1, %v10961_v61 }
  0x4f   : > { %9429 = vmatmul.mubr.msk.f32.gmra.mxu0 %vm361_vm1, %v11280_v38  ;;  %v977_v38 = vrot.slane %v11095_v41, 2 }
  0x50   : > { %9379 = vmatmul.mubr.msk.f32.gmra.mxu1 %vm361_vm1, %v10964_v62  ;;  %9431 = vmatprep.mubr.msk.f32.mxu0 %vm361_vm1, %v11286_v32  ;;  %v981_v32 = vrot.slane %v10824_v5, 2 }
  0x51   : > { %9381 = vmatprep.mubr.msk.f32.mxu1 %vm361_vm1, %v11004_v26  ;;  %v11320_v23 = vsel %vm940_vm2, %v976_v51, %v977_v38  ;;  %v11331_v47 = vsel %vm940_vm2, %v977_v38, %v979_v9  ;;  %v989_v9 = vrot.slane %v10875_v29, 2 }
  0x52   : > { %15356 = vst [vmem:[#allocation49_spill] sm:$0xff] %v11320_v23  ;;  %15357 = vst [vmem:[#allocation50_spill] sm:$0xff] %v11331_v47 }
  0x53   : > { %9432 = vmatmul.mubr.msk.f32.gmra.mxu0 %vm361_vm1, %v11297_v31  ;;  %v982_v31 = vrot.slane %v10829_v8, 2 }
  0x54   : > { %9382 = vmatmul.mubr.msk.f32.gmra.mxu1 %vm361_vm1, %v11007_v27  ;;  %9434 = vmatprep.mubr.msk.f32.mxu0 %vm361_vm1, %v11303_v0  ;;  %v986_v0 = vrot.slane %v10851_v20, 2 }
  0x55   : > { %9384 = vmatprep.mubr.msk.f32.mxu1 %vm361_vm1, %v11048_v59  ;;  %v11337_v51 = vsel %vm940_vm2, %v981_v32, %v982_v31  ;;  %v11348_v38 = vsel %vm940_vm2, %v982_v31, %v984_v19  ;;  %v994_v19 = vrot.slane %v10927_v48, 2 }
  0x56   : > { %15358 = vst [vmem:[#allocation51_spill] sm:$0xff] %v11337_v51  ;;  %15359 = vst [vmem:[#allocation52_spill] sm:$0xff] %v11348_v38 }
  0x57   : > { %9435 = vmatmul.mubr.msk.f32.gmra.mxu0 %vm361_vm1, %v11314_v30  ;;  %v987_v30 = vrot.slane %v10854_v21, 2 }
  0x58   : > { %9385 = vmatmul.mubr.msk.f32.gmra.mxu1 %vm361_vm1, %v11051_v1  ;;  %9437 = vmatprep.mubr.msk.f32.mxu0 %vm361_vm1, %v11320_v23  ;;  %v991_v23 = vrot.slane %v10897_v36, 2 }
  0x59   : > { %9387 = vmatprep.mubr.msk.f32.mxu1 %vm361_vm1, %v11092_v25  ;;  %v11354_v32 = vsel %vm940_vm2, %v986_v0, %v987_v30  ;;  %v11365_v31 = vsel %vm940_vm2, %v987_v30, %v989_v9  ;;  %v999_v9 = vrot.slane %v10958_v60, 2 }
  0x5a   : > { %15360 = vst [vmem:[#allocation53_spill] sm:$0xff] %v11354_v32  ;;  %15361 = vst [vmem:[#allocation54_spill] sm:$0xff] %v11365_v31 }
  0x5b   : > { %9438 = vmatmul.mubr.msk.f32.gmra.mxu0 %vm361_vm1, %v11331_v47  ;;  %v992_v47 = vrot.slane %v10900_v37, 2 }
  0x5c   : > { %9388 = vmatmul.mubr.msk.f32.gmra.mxu1 %vm361_vm1, %v11095_v41  ;;  %9440 = vmatprep.mubr.msk.f32.mxu0 %vm361_vm1, %v11337_v51  ;;  %v996_v51 = vrot.slane %v10933_v50, 2 }
  0x5d   : > { %9390 = vmatprep.mubr.msk.f32.mxu1 %vm361_vm1, %v10824_v5  ;;  %v11371_v0 = vsel %vm940_vm2, %v991_v23, %v992_v47  ;;  %v11382_v30 = vsel %vm940_vm2, %v992_v47, %v994_v19  ;;  %v1004_v19 = vrot.slane %v10996_v17, 2 }
  0x5e   : > { %15362 = vst [vmem:[#allocation55_spill] sm:$0xff] %v11371_v0  ;;  %15363 = vst [vmem:[#allocation56_spill] sm:$0xff] %v11382_v30 }
  0x5f   : > { %9441 = vmatmul.mubr.msk.f32.gmra.mxu0 %vm361_vm1, %v11348_v38  ;;  %v997_v38 = vrot.slane %v10944_v55, 2 }
  0x60   : > { %9391 = vmatmul.mubr.msk.f32.gmra.mxu1 %vm361_vm1, %v10829_v8  ;;  %9443 = vmatprep.mubr.msk.f32.mxu0 %vm361_vm1, %v11354_v32  ;;  %v1001_v32 = vrot.slane %v10977_v2, 2 }
  0x61   : > { %9393 = vmatprep.mubr.msk.f32.mxu1 %vm361_vm1, %v10851_v20  ;;  %v11388_v23 = vsel %vm940_vm2, %v996_v51, %v997_v38  ;;  %v11399_v47 = vsel %vm940_vm2, %v997_v38, %v999_v9  ;;  %v1009_v9 = vrot.slane %v11040_v58, 2 }
  0x62   : > { %15364 = vst [vmem:[#allocation57_spill] sm:$0xff] %v11388_v23  ;;  %15365 = vst [vmem:[#allocation58_spill] sm:$0xff] %v11399_v47 }
  0x63   : > { %9444 = vmatmul.mubr.msk.f32.gmra.mxu0 %vm361_vm1, %v11365_v31  ;;  %v1002_v31 = vrot.slane %v10980_v6, 2 }
  0x64   : > { %9394 = vmatmul.mubr.msk.f32.gmra.mxu1 %vm361_vm1, %v10854_v21  ;;  %9446 = vmatprep.mubr.msk.f32.mxu0 %vm361_vm1, %v11371_v0  ;;  %v1006_v0 = vrot.slane %v11012_v33, 2 }
  0x65   : > { %9396 = vmatprep.mubr.msk.f32.mxu1 %vm361_vm1, %v10897_v36  ;;  %v11405_v51 = vsel %vm940_vm2, %v1001_v32, %v1002_v31  ;;  %v11416_v38 = vsel %vm940_vm2, %v1002_v31, %v1004_v19  ;;  %v15371_v19 = vld [vmem:[#allocation25_spill] sm:$0xff] }
  0x66   : > { %15366 = vst [vmem:[#allocation59_spill] sm:$0xff] %v11405_v51  ;;  %15367 = vst [vmem:[#allocation60_spill] sm:$0xff] %v11416_v38 }
  0x67   : > { %9447 = vmatmul.mubr.msk.f32.gmra.mxu0 %vm361_vm1, %v11382_v30  ;;  %v1007_v30 = vrot.slane %v11015_v34, 2 }
  0x68   : > { %9397 = vmatmul.mubr.msk.f32.gmra.mxu1 %vm361_vm1, %v10900_v37  ;;  %9449 = vmatprep.mubr.msk.f32.mxu0 %vm361_vm1, %v11388_v23  ;;  %v1011_v23 = vrot.slane %v11056_v11, 2 }
  0x69   : > { %9399 = vmatprep.mubr.msk.f32.mxu1 %vm361_vm1, %v10933_v50  ;;  %v11422_v32 = vsel %vm940_vm2, %v1006_v0, %v1007_v30  ;;  %v11433_v31 = vsel %vm940_vm2, %v1007_v30, %v1009_v9  ;;  %v1019_v9 = vrot.slane %v11133_v39, 2 }
  0x6a   : > { %15368 = vst [vmem:[#allocation61_spill] sm:$0xff] %v11422_v32 }
  0x6b   : > { %9450 = vmatmul.mubr.msk.f32.gmra.mxu0 %vm361_vm1, %v11399_v47  ;;  %v15369_v47 = vld [vmem:[#allocation21_spill] sm:$0xff] }
  0x6c   : > { %9400 = vmatmul.mubr.msk.f32.gmra.mxu1 %vm361_vm1, %v10944_v55  ;;  %9452 = vmatprep.mubr.msk.f32.mxu0 %vm361_vm1, %v11405_v51  ;;  %v1012_v45 = vrot.slane %v15369_v47, 2  ;;  %15370 = vst [vmem:[#allocation21_spill] sm:$0xff] %v11433_v31  ;;  %v1014_v51 = vrot.slane %v15371_v19, 2 }
  0x6d   : > { %9402 = vmatprep.mubr.msk.f32.mxu1 %vm361_vm1, %v10977_v2 }
  0x6e   : > { %v11439_v0 = vsel %vm940_vm2, %v1011_v23, %v1012_v45  ;;  %v11450_v30 = vsel %vm940_vm2, %v1012_v45, %v1014_v51  ;;  %v1350_v51 = vrot.slane %v10841_v14, 3 }
  0x6f   : > { %9453 = vmatmul.mubr.msk.f32.gmra.mxu0 %vm361_vm1, %v11416_v38  ;;  %15372 = vst [vmem:[#allocation25_spill] sm:$0xff] %v11439_v0  ;;  %v1017_v38 = vrot.slane %v11103_v63, 2  ;;  %15373 = vst [vmem:[#allocation62_spill] sm:$0xff] %v11450_v30 }
  0x70   : > { %9403 = vmatmul.mubr.msk.f32.gmra.mxu1 %vm361_vm1, %v10980_v6  ;;  %9455 = vmatprep.mubr.msk.f32.mxu0 %vm361_vm1, %v11422_v32  ;;  %v1789_v32 = vrot.slane %v10824_v5, 4 }
  0x71   : > { %9405 = vmatprep.mubr.msk.f32.mxu1 %vm361_vm1, %v11012_v33  ;;  %v11456_v23 = vsel %vm940_vm2, %v1016_v10, %v1017_v38  ;;  %v11465_v45 = vsel %vm940_vm2, %v1017_v38, %v1019_v9  ;;  %v1351_v10 = vrot.slane %v10844_v15, 3  ;;  %v1353_v38 = vrot.slane %v10872_v28, 3 }
  0x72   : > { %15374 = vst [vmem:[#allocation63_spill] sm:$0xff] %v11456_v23  ;;  %15375 = vst [vmem:[#allocation64_spill] sm:$0xff] %v11465_v45  ;;  %v1757_v9 = vrot.slane %v10872_v28, 4  ;;  %v11498_v28 = vld [vmem:[%s14976_s1 + $0x38] sm:$0xff] }
  0x73   : > { %9456 = vmatmul.mubr.msk.f32.gmra.mxu0 %vm361_vm1, %v11433_v31  ;;  %v1356_v31 = vrot.slane %v10894_v35, 3 }
  0x74   : > { %9406 = vmatmul.mubr.msk.f32.gmra.mxu1 %vm361_vm1, %v11015_v34  ;;  %9458 = vmatprep.mubr.msk.f32.mxu0 %vm361_vm1, %v11439_v0  ;;  %v1755_v0 = vrot.slane %v10844_v15, 4  ;;  %v1355_v15 = vrot.slane %v10857_v22, 3 }
  0x75   : > { %9408 = vmatprep.mubr.msk.f32.mxu1 %vm361_vm1, %v11056_v11 }
  0x77   : > { %9459 = vmatmul.mubr.msk.f32.gmra.mxu0 %vm361_vm1, %v11450_v30  ;;  %v1754_v30 = vrot.slane %v10841_v14, 4  ;;  %v11486_v14 = vsel %vm1344_vm3, %v1350_v51, %v1351_v10  ;;  %v11527_v51 = vsel %vm1344_vm3, %v1355_v15, %v1356_v31  ;;  %v1770_v15 = vrot.slane %v10964_v62, 4 }
  0x78   : > { %9409 = vmatmul.mubr.msk.f32.gmra.mxu1 %vm361_vm1, %v15369_v47  ;;  %9461 = vmatprep.mubr.msk.f32.mxu0 %vm361_vm1, %v11456_v23  ;;  %v1759_v23 = vrot.slane %v10857_v22, 4  ;;  %v11504_v22 = vsel %vm1344_vm3, %v1351_v10, %v1353_v38  ;;  %15379 = vst [vmem:[#allocation68_spill] sm:$0xff] %v11527_v51  ;;  %v1361_v10 = vrot.slane %v10930_v49, 3 }
  0x79   : > { %9411 = vmatprep.mubr.msk.f32.mxu1 %vm361_vm1, %v11100_v52 }
  0x7b   : > { %9462 = vmatmul.mubr.msk.f32.gmra.mxu0 %vm361_vm1, %v11465_v45  ;;  %v1760_v45 = vrot.slane %v10894_v35, 4  ;;  %v11507_v35 = vsel %vm1748_vm4, %v1755_v0, %v1757_v9  ;;  %v1769_v9 = vrot.slane %v10961_v61, 4 }
  0x7c   : > { %9412 = vmatmul.mubr.msk.f32.gmra.mxu1 %vm361_vm1, %v11103_v63  ;;  %9516 = vmatprep.mubr.msk.f32.mxu0 %vm361_vm1, %v11248_v44  ;;  %v11493_v44 = vsel %vm1748_vm4, %v1754_v30, %v1755_v0  ;;  %15377 = vst [vmem:[#allocation66_spill] sm:$0xff] %v11507_v35  ;;  %v1764_v0 = vrot.slane %v10914_v43, 4  ;;  %v1765_v30 = vrot.slane %v10930_v49, 4  ;;  %v1767_v49 = vrot.slane %v10947_v56, 4 }
  0x7d   : > { %9466 = vmatprep.mubr.msk.f32.mxu1 %vm361_vm1, %v11244_v18  ;;  %15376 = vst [vmem:[#allocation65_spill] sm:$0xff] %v11493_v44  ;;  %v1762_v18 = vrot.slane %v10911_v42, 4 }
  0x7e   : > { %v11550_v38 = vsel %vm1748_vm4, %v1764_v0, %v1765_v30  ;;  %v1772_v0 = vrot.slane %v10993_v16, 4 }
  0x7f   : > { %9517 = vmatmul.mubr.msk.f32.vlgmr.msra.gmra.mxu0 %vm361_vm1, %v11256_v46  ;;  %v11513_v46 = vld [vmem:[%s14976_s1 + $0x40] sm:$0xff]  ;;  %15382 = vst [vmem:[#allocation71_spill] sm:$0xff] %v11550_v38 }
  0x80   : > { %9467 = vmatmul.mubr.msk.f32.vlgmr.msra.gmra.mxu1 %vm361_vm1, %v11251_v4  ;;  %9615 = vmatpush3.msra.mxu0 %v11207_v53  ;;  %v11519_v53 = vsel %vm1748_vm4, %v1759_v23, %v1760_v45  ;;  %v1358_v4 = vrot.slane %v10911_v42, 3  ;;  %v11540_v42 = vsel %vm1748_vm4, %v1760_v45, %v1762_v18  ;;  %v1365_v18 = vrot.slane %v10961_v61, 3 }
  0x81   : > { %9565 = vmatpush3.msra.mxu1 %v11195_v12  ;;  %9469 = vmatprep.mubr.msk.f32.mxu1 %vm361_vm1, %v11486_v14  ;;  %15378 = vst [vmem:[#allocation67_spill] sm:$0xff] %v11519_v53  ;;  %v1360_v12 = vrot.slane %v10914_v43, 3  ;;  %15380 = vst [vmem:[#allocation69_spill] sm:$0xff] %v11540_v42  ;;  %v1363_v43 = vrot.slane %v10947_v56, 3  ;;  %v1366_v56 = vrot.slane %v10964_v62, 3 }
  0x82   : > { %9519 = vmatprep.mubr.msk.f32.mxu0 %vm361_vm1, %v11493_v44  ;;  %9664 = vmatprep.subr.mxu1 %v11498_v28  ;;  %v11547_v23 = vsel %vm1344_vm3, %v1356_v31, %v1358_v4  ;;  %v11569_v4 = vsel %vm1748_vm4, %v1765_v30, %v1767_v49  ;;  %v1370_v30 = vrot.slane %v11004_v26, 3  ;;  %v1373_v49 = vrot.slane %v11037_v54, 3 }
  0x83   : > { %9520 = vmatmul.mubr.msk.f32.gmra.mxu0 %vm361_vm1, %v11507_v35  ;;  %9714 = vmatprep.subr.mxu0 %v11513_v46  ;;  %15381 = vst [vmem:[#allocation70_spill] sm:$0xff] %v11547_v23  ;;  %v11555_v45 = vsel %vm1344_vm3, %v1360_v12, %v1361_v10  ;;  %v11566_v31 = vsel %vm1344_vm3, %v1361_v10, %v1363_v43  ;;  %15385 = vst [vmem:[#allocation74_spill] sm:$0xff] %v11569_v4  ;;  %v1371_v43 = vrot.slane %v11007_v27, 3 }
  0x84   : > { %9470 = vmatmul.mubr.msk.f32.gmra.mxu1 %vm361_vm1, %v11504_v22  ;;  %9522 = vmatprep.mubr.msk.f32.mxu0 %vm361_vm1, %v11519_v53  ;;  %15383 = vst [vmem:[#allocation72_spill] sm:$0xff] %v11555_v45  ;;  %15384 = vst [vmem:[#allocation73_spill] sm:$0xff] %v11566_v31  ;;  %v11575_v12 = vsel %vm1748_vm4, %v1769_v9, %v1770_v15  ;;  %v1774_v53 = vrot.slane %v11004_v26, 4  ;;  %v11581_v10 = vsel %vm1344_vm3, %v1365_v18, %v1366_v56 }
  0x85   : > { %9472 = vmatprep.mubr.msk.f32.mxu1 %vm361_vm1, %v11527_v51  ;;  %15386 = vst [vmem:[#allocation75_spill] sm:$0xff] %v11575_v12  ;;  %15387 = vst [vmem:[#allocation76_spill] sm:$0xff] %v11581_v10  ;;  %v1777_v9 = vrot.slane %v11037_v54, 4  ;;  %v1779_v35 = vrot.slane %v11048_v59, 4  ;;  %v1376_v54 = vrot.slane %v11051_v1, 3  ;;  %v1784_v44 = vrot.slane %v11092_v25, 4 }
  0x87   : > { %9523 = vmatmul.mubr.msk.f32.gmra.mxu0 %vm361_vm1, %v11540_v42  ;;  %v1368_v42 = vrot.slane %v10993_v16, 3  ;;  %v11592_v16 = vsel %vm1748_vm4, %v1770_v15, %v1772_v0  ;;  %v11607_v15 = vsel %vm1344_vm3, %v1370_v30, %v1371_v43  ;;  %v1375_v0 = vrot.slane %v11048_v59, 3 }
  0x88   : > { %9473 = vmatmul.mubr.msk.f32.gmra.mxu1 %vm361_vm1, %v11547_v23  ;;  %9525 = vmatprep.mubr.msk.f32.mxu0 %vm361_vm1, %v11550_v38  ;;  %v1775_v38 = vrot.slane %v11007_v27, 4  ;;  %15388 = vst [vmem:[#allocation77_spill] sm:$0xff] %v11592_v16  ;;  %15391 = vst [vmem:[#allocation80_spill] sm:$0xff] %v11607_v15 }
  0x89   : > { %9475 = vmatprep.mubr.msk.f32.mxu1 %vm361_vm1, %v11555_v45  ;;  %v11599_v18 = vsel %vm1344_vm3, %v1366_v56, %v1368_v42  ;;  %v1782_v56 = vrot.slane %v11081_v40, 4 }
  0x8a   : > { %15389 = vst [vmem:[#allocation78_spill] sm:$0xff] %v11599_v18  ;;  %v11621_v42 = vsel %vm1748_vm4, %v1775_v38, %v1777_v9  ;;  %v1787_v9 = vrot.slane %v11125_v57, 4 }
  0x8b   : > { %9526 = vmatmul.mubr.msk.f32.gmra.mxu0 %vm361_vm1, %v11569_v4  ;;  %v11602_v4 = vsel %vm1748_vm4, %v1774_v53, %v1775_v38  ;;  %v11618_v53 = vsel %vm1344_vm3, %v1371_v43, %v1373_v49  ;;  %15393 = vst [vmem:[#allocation82_spill] sm:$0xff] %v11621_v42  ;;  %v11633_v43 = vsel %vm1344_vm3, %v1375_v0, %v1376_v54  ;;  %v1380_v38 = vrot.slane %v11092_v25, 3 }
  0x8c   : > { %9476 = vmatmul.mubr.msk.f32.gmra.mxu1 %vm361_vm1, %v11566_v31  ;;  %9528 = vmatprep.mubr.msk.f32.mxu0 %vm361_vm1, %v11575_v12  ;;  %15390 = vst [vmem:[#allocation79_spill] sm:$0xff] %v11602_v4  ;;  %v1780_v12 = vrot.slane %v11051_v1, 4  ;;  %15392 = vst [vmem:[#allocation81_spill] sm:$0xff] %v11618_v53  ;;  %v1381_v49 = vrot.slane %v11095_v41, 3 }
  0x8d   : > { %9478 = vmatprep.mubr.msk.f32.mxu1 %vm361_vm1, %v11581_v10  ;;  %15395 = vst [vmem:[#allocation84_spill] sm:$0xff] %v11633_v43 }
  0x8e   : > { %v11627_v30 = vsel %vm1748_vm4, %v1779_v35, %v1780_v12  ;;  %v1383_v35 = vrot.slane %v11125_v57, 3  ;;  %v1386_v57 = vrot.slane %v10829_v8, 3 }
  0x8f   : > { %9529 = vmatmul.mubr.msk.f32.gmra.mxu0 %vm361_vm1, %v11592_v16  ;;  %15394 = vst [vmem:[#allocation83_spill] sm:$0xff] %v11627_v30  ;;  %v1378_v16 = vrot.slane %v11081_v40, 3  ;;  %v11644_v40 = vsel %vm1748_vm4, %v1780_v12, %v1782_v56  ;;  %v11659_v12 = vsel %vm1344_vm3, %v1380_v38, %v1381_v49  ;;  %v1385_v56 = vrot.slane %v10824_v5, 3 }
  0x90   : > { %9479 = vmatmul.mubr.msk.f32.gmra.mxu1 %vm361_vm1, %v11599_v18  ;;  %9531 = vmatprep.mubr.msk.f32.mxu0 %vm361_vm1, %v11602_v4  ;;  %v1785_v4 = vrot.slane %v11095_v41, 4  ;;  %15396 = vst [vmem:[#allocation85_spill] sm:$0xff] %v11644_v40  ;;  %15399 = vst [vmem:[#allocation88_spill] sm:$0xff] %v11659_v12  ;;  %v1794_v38 = vrot.slane %v10851_v20, 4 }
  0x91   : > { %9481 = vmatprep.mubr.msk.f32.mxu1 %vm361_vm1, %v11607_v15  ;;  %v11651_v0 = vsel %vm1344_vm3, %v1376_v54, %v1378_v16  ;;  %v1792_v54 = vrot.slane %v10838_v13, 4 }
  0x92   : > { %15397 = vst [vmem:[#allocation86_spill] sm:$0xff] %v11651_v0  ;;  %v11673_v16 = vsel %vm1748_vm4, %v1785_v4, %v1787_v9  ;;  %v1797_v9 = vrot.slane %v10875_v29, 4 }
  0x93   : > { %9532 = vmatmul.mubr.msk.f32.gmra.mxu0 %vm361_vm1, %v11621_v42  ;;  %v11654_v42 = vsel %vm1748_vm4, %v1784_v44, %v1785_v4  ;;  %v11670_v44 = vsel %vm1344_vm3, %v1381_v49, %v1383_v35  ;;  %15401 = vst [vmem:[#allocation90_spill] sm:$0xff] %v11673_v16  ;;  %v11685_v49 = vsel %vm1344_vm3, %v1385_v56, %v1386_v57  ;;  %v1390_v4 = vrot.slane %v10851_v20, 3 }
  0x94   : > { %9482 = vmatmul.mubr.msk.f32.gmra.mxu1 %vm361_vm1, %v11618_v53  ;;  %9534 = vmatprep.mubr.msk.f32.mxu0 %vm361_vm1, %v11627_v30  ;;  %15398 = vst [vmem:[#allocation87_spill] sm:$0xff] %v11654_v42  ;;  %v1790_v30 = vrot.slane %v10829_v8, 4  ;;  %15400 = vst [vmem:[#allocation89_spill] sm:$0xff] %v11670_v44  ;;  %v1388_v8 = vrot.slane %v10838_v13, 3  ;;  %v1391_v35 = vrot.slane %v10854_v21, 3  ;;  %v1799_v56 = vrot.slane %v10897_v36, 4 }
  0x95   : > { %9484 = vmatprep.mubr.msk.f32.mxu1 %vm361_vm1, %v11633_v43  ;;  %15403 = vst [vmem:[#allocation92_spill] sm:$0xff] %v11685_v49 }
  0x96   : > { %v11679_v5 = vsel %vm1748_vm4, %v1789_v32, %v1790_v30  ;;  %v11696_v13 = vsel %vm1748_vm4, %v1790_v30, %v1792_v54  ;;  %v1393_v32 = vrot.slane %v10875_v29, 3  ;;  %v11703_v20 = vsel %vm1344_vm3, %v1386_v57, %v1388_v8 }
  0x97   : > { %9535 = vmatmul.mubr.msk.f32.gmra.mxu0 %vm361_vm1, %v11644_v40  ;;  %15402 = vst [vmem:[#allocation91_spill] sm:$0xff] %v11679_v5  ;;  %15404 = vst [vmem:[#allocation93_spill] sm:$0xff] %v11696_v13  ;;  %v11711_v30 = vsel %vm1344_vm3, %v1390_v4, %v1391_v35  ;;  %v1395_v54 = vrot.slane %v10897_v36, 3  ;;  %v1396_v29 = vrot.slane %v10900_v37, 3  ;;  %v1804_v4 = vrot.slane %v10933_v50, 4  ;;  %v12098_v40 = vld [vmem:[%s10815_s7 + $0x150] sm:$0xff] }
  0x98   : > { %9485 = vmatmul.mubr.msk.f32.gmra.mxu1 %vm361_vm1, %v11651_v0  ;;  %9537 = vmatprep.mubr.msk.f32.mxu0 %vm361_vm1, %v11654_v42  ;;  %v1795_v42 = vrot.slane %v10854_v21, 4  ;;  %15405 = vst [vmem:[#allocation94_spill] sm:$0xff] %v11703_v20  ;;  %15407 = vst [vmem:[#allocation96_spill] sm:$0xff] %v11711_v30  ;;  %v11722_v57 = vsel %vm1344_vm3, %v1391_v35, %v1393_v32  ;;  %v1401_v32 = vrot.slane %v10944_v55, 3 }
  0x99   : > { %9487 = vmatprep.mubr.msk.f32.mxu1 %vm361_vm1, %v11659_v12  ;;  %15408 = vst [vmem:[#allocation97_spill] sm:$0xff] %v11722_v57  ;;  %v11737_v35 = vsel %vm1344_vm3, %v1395_v54, %v1396_v29  ;;  %v1809_v54 = vrot.slane %v10977_v2, 4  ;;  %15478 = vst [vmem:[#allocation139_spill] sm:$0xff] %v12098_v40 }
  0x9a   : > { %v11706_v21 = vsel %vm1748_vm4, %v1794_v38, %v1795_v42  ;;  %v11725_v8 = vsel %vm1748_vm4, %v1795_v42, %v1797_v9  ;;  %v1802_v38 = vrot.slane %v10927_v48, 4  ;;  %15411 = vst [vmem:[#allocation100_spill] sm:$0xff] %v11737_v35  ;;  %v1400_v42 = vrot.slane %v10933_v50, 3 }
  0x9b   : > { %9538 = vmatmul.mubr.msk.f32.gmra.mxu0 %vm361_vm1, %v11673_v16  ;;  %15406 = vst [vmem:[#allocation95_spill] sm:$0xff] %v11706_v21  ;;  %15409 = vst [vmem:[#allocation98_spill] sm:$0xff] %v11725_v8  ;;  %v1403_v9 = vrot.slane %v10958_v60, 3 }
  0x9c   : > { %9488 = vmatmul.mubr.msk.f32.gmra.mxu1 %vm361_vm1, %v11670_v44  ;;  %9540 = vmatprep.mubr.msk.f32.mxu0 %vm361_vm1, %v11679_v5  ;;  %v1800_v5 = vrot.slane %v10900_v37, 4  ;;  %v1398_v37 = vrot.slane %v10927_v48, 3 }
  0x9d   : > { %9490 = vmatprep.mubr.msk.f32.mxu1 %vm361_vm1, %v11685_v49 }
  0x9e   : > { %v11731_v36 = vsel %vm1748_vm4, %v1799_v56, %v1800_v5  ;;  %v11748_v48 = vsel %vm1748_vm4, %v1800_v5, %v1802_v38  ;;  %v1807_v56 = vrot.slane %v10958_v60, 4  ;;  %v11755_v50 = vsel %vm1344_vm3, %v1396_v29, %v1398_v37 }
  0x9f   : > { %9541 = vmatmul.mubr.msk.f32.gmra.mxu0 %vm361_vm1, %v11696_v13  ;;  %15410 = vst [vmem:[#allocation99_spill] sm:$0xff] %v11731_v36  ;;  %15412 = vst [vmem:[#allocation101_spill] sm:$0xff] %v11748_v48  ;;  %v11763_v5 = vsel %vm1344_vm3, %v1400_v42, %v1401_v32  ;;  %v1405_v38 = vrot.slane %v10977_v2, 3  ;;  %v1406_v60 = vrot.slane %v10980_v6, 3  ;;  %v11774_v29 = vsel %vm1344_vm3, %v1401_v32, %v1403_v9  ;;  %v12070_v13 = vld [vmem:[%s10815_s7 + $0x138] sm:$0xff] }
  0xa0   : > { %9491 = vmatmul.mubr.msk.f32.gmra.mxu1 %vm361_vm1, %v11703_v20  ;;  %9543 = vmatprep.mubr.msk.f32.mxu0 %vm361_vm1, %v11706_v21  ;;  %v1805_v21 = vrot.slane %v10944_v55, 4  ;;  %15413 = vst [vmem:[#allocation102_spill] sm:$0xff] %v11755_v50  ;;  %15415 = vst [vmem:[#allocation104_spill] sm:$0xff] %v11763_v5  ;;  %v1814_v42 = vrot.slane %v11012_v33, 4  ;;  %v1411_v9 = vrot.slane %v11015_v34, 3 }
  0xa1   : > { %9493 = vmatprep.mubr.msk.f32.mxu1 %vm361_vm1, %v11711_v30  ;;  %15416 = vst [vmem:[#allocation105_spill] sm:$0xff] %v11774_v29  ;;  %v11789_v32 = vsel %vm1344_vm3, %v1405_v38, %v1406_v60  ;;  %v1819_v38 = vrot.slane %v11056_v11, 4  ;;  %15472 = vst [vmem:[#allocation135_spill] sm:$0xff] %v12070_v13 }
  0xa2   : > { %v11758_v55 = vsel %vm1748_vm4, %v1804_v4, %v1805_v21  ;;  %v11777_v37 = vsel %vm1748_vm4, %v1805_v21, %v1807_v56  ;;  %v1812_v4 = vrot.slane %v10996_v17, 4  ;;  %15419 = vst [vmem:[#allocation108_spill] sm:$0xff] %v11789_v32  ;;  %v1410_v21 = vrot.slane %v11012_v33, 3 }
  0xa3   : > { %9544 = vmatmul.mubr.msk.f32.gmra.mxu0 %vm361_vm1, %v11725_v8  ;;  %15414 = vst [vmem:[#allocation103_spill] sm:$0xff] %v11758_v55  ;;  %15417 = vst [vmem:[#allocation106_spill] sm:$0xff] %v11777_v37  ;;  %v1413_v56 = vrot.slane %v11040_v58, 3 }
  0xa4   : > { %9494 = vmatmul.mubr.msk.f32.gmra.mxu1 %vm361_vm1, %v11722_v57  ;;  %9546 = vmatprep.mubr.msk.f32.mxu0 %vm361_vm1, %v11731_v36  ;;  %v1810_v36 = vrot.slane %v10980_v6, 4  ;;  %v1408_v6 = vrot.slane %v10996_v17, 3 }
  0xa5   : > { %9496 = vmatprep.mubr.msk.f32.mxu1 %vm361_vm1, %v11737_v35 }
  0xa6   : > { %v11783_v2 = vsel %vm1748_vm4, %v1809_v54, %v1810_v36  ;;  %v11800_v17 = vsel %vm1748_vm4, %v1810_v36, %v1812_v4  ;;  %v1817_v54 = vrot.slane %v11040_v58, 4  ;;  %v11807_v33 = vsel %vm1344_vm3, %v1406_v60, %v1408_v6 }
  0xa7   : > { %9547 = vmatmul.mubr.msk.f32.gmra.mxu0 %vm361_vm1, %v11748_v48  ;;  %15418 = vst [vmem:[#allocation107_spill] sm:$0xff] %v11783_v2  ;;  %15420 = vst [vmem:[#allocation109_spill] sm:$0xff] %v11800_v17  ;;  %v11815_v36 = vsel %vm1344_vm3, %v1410_v21, %v1411_v9  ;;  %v1415_v4 = vrot.slane %v11056_v11, 3  ;;  %v1416_v58 = vrot.slane %v15369_v47, 3  ;;  %v11826_v60 = vsel %vm1344_vm3, %v1411_v9, %v1413_v56 }
  0xa8   : > { %9497 = vmatmul.mubr.msk.f32.gmra.mxu1 %vm361_vm1, %v11755_v50  ;;  %9549 = vmatprep.mubr.msk.f32.mxu0 %vm361_vm1, %v11758_v55  ;;  %v1815_v55 = vrot.slane %v11015_v34, 4  ;;  %15421 = vst [vmem:[#allocation110_spill] sm:$0xff] %v11807_v33  ;;  %15423 = vst [vmem:[#allocation112_spill] sm:$0xff] %v11815_v36  ;;  %v1824_v21 = vrot.slane %v11100_v52, 4  ;;  %v1421_v56 = vrot.slane %v11103_v63, 3 }
  0xa9   : > { %9499 = vmatprep.mubr.msk.f32.mxu1 %vm361_vm1, %v11763_v5  ;;  %15424 = vst [vmem:[#allocation113_spill] sm:$0xff] %v11826_v60  ;;  %v11841_v9 = vsel %vm1344_vm3, %v1415_v4, %v1416_v58  ;;  %v1423_v4 = vrot.slane %v11133_v39, 3 }
  0xaa   : > { %v11810_v34 = vsel %vm1748_vm4, %v1814_v42, %v1815_v55  ;;  %v11829_v6 = vsel %vm1748_vm4, %v1815_v55, %v1817_v54  ;;  %v1822_v42 = vrot.slane %v15371_v19, 4  ;;  %15427 = vst [vmem:[#allocation116_spill] sm:$0xff] %v11841_v9  ;;  %v1420_v55 = vrot.slane %v11100_v52, 3 }
  0xab   : > { %9550 = vmatmul.mubr.msk.f32.gmra.mxu0 %vm361_vm1, %v11777_v37  ;;  %15422 = vst [vmem:[#allocation111_spill] sm:$0xff] %v11810_v34  ;;  %15425 = vst [vmem:[#allocation114_spill] sm:$0xff] %v11829_v6  ;;  %v1827_v54 = vrot.slane %v11133_v39, 4  ;;  %v11879_v39 = vsel %vm1344_vm3, %v1421_v56, %v1423_v4  ;;  %v15438_v4 = vld [vmem:[#allocation13_spill] sm:$0xff]  ;;  %v12039_v37 = vld [vmem:[%s10815_s7 + $0x110] sm:$0xff] }
  0xac   : > { %9500 = vmatmul.mubr.msk.f32.gmra.mxu1 %vm361_vm1, %v11774_v29  ;;  %9552 = vmatprep.mubr.msk.f32.mxu0 %vm361_vm1, %v11783_v2  ;;  %v1820_v2 = vrot.slane %v15369_v47, 4  ;;  %v1418_v47 = vrot.slane %v15371_v19, 3  ;;  %15433 = vst [vmem:[#allocation122_spill] sm:$0xff] %v11879_v39  ;;  %15466 = vst [vmem:[#allocation132_spill] sm:$0xff] %v12039_v37 }
  0xad   : > { %9502 = vmatprep.mubr.msk.f32.mxu1 %vm361_vm1, %v11789_v32 }
  0xae   : > { %v11835_v11 = vsel %vm1748_vm4, %v1819_v38, %v1820_v2  ;;  %v11852_v19 = vsel %vm1748_vm4, %v1820_v2, %v1822_v42  ;;  %v10608_v42 = vld [vmem:[%s10815_s7 + $0x18] sm:$0xff] }
  0xaf   : > { %9553 = vmatmul.mubr.msk.f32.gmra.mxu0 %vm361_vm1, %v11800_v17  ;;  %15426 = vst [vmem:[#allocation115_spill] sm:$0xff] %v11835_v11  ;;  %15428 = vst [vmem:[#allocation117_spill] sm:$0xff] %v11852_v19 }
  0xb0   : > { %9503 = vmatmul.mubr.msk.f32.gmra.mxu1 %vm361_vm1, %v11807_v33  ;;  %9555 = vmatprep.mubr.msk.f32.mxu0 %vm361_vm1, %v11810_v34  ;;  %v1825_v34 = vrot.slane %v11103_v63, 4  ;;  %v11858_v63 = vsel %vm1344_vm3, %v1416_v58, %v1418_v47  ;;  %v15434_v58 = vld [vmem:[#allocation7_spill] sm:$0xff]  ;;  %v11894_v47 = vld [vmem:[%s14976_s1 + $0x48] sm:$0xff] }
  0xb1   : > { %9505 = vmatprep.mubr.msk.f32.mxu1 %vm361_vm1, %v11815_v36  ;;  %15429 = vst [vmem:[#allocation118_spill] sm:$0xff] %v11858_v63 }
  0xb2   : > { %v11861_v38 = vsel %vm1748_vm4, %v1824_v21, %v1825_v34  ;;  %v11874_v2 = vsel %vm1748_vm4, %v1825_v34, %v1827_v54  ;;  %v15435_v34 = vld [vmem:[#allocation9_spill] sm:$0xff]  ;;  %v15437_v54 = vld [vmem:[#allocation11_spill] sm:$0xff] }
  0xb3   : > { %9556 = vmatmul.mubr.msk.f32.gmra.mxu0 %vm361_vm1, %v11829_v6  ;;  %15430 = vst [vmem:[#allocation119_spill] sm:$0xff] %v11861_v38  ;;  %15432 = vst [vmem:[#allocation121_spill] sm:$0xff] %v11874_v2  ;;  %v10609_v21 = vld [vmem:[%s10815_s7 + $0x20] sm:$0xff]  ;;  %v15465_v6 = vld [vmem:[#allocation18_spill] sm:$0xff] }
  0xb4   : > { %9506 = vmatmul.mubr.msk.f32.gmra.mxu1 %vm361_vm1, %v11826_v60  ;;  %9558 = vmatprep.mubr.msk.f32.mxu0 %vm361_vm1, %v11835_v11  ;;  %v11865_v11 = vsel %vm1344_vm3, %v1420_v55, %v1421_v56  ;;  %v11902_v55 = vld [vmem:[%s14976_s1 + $0x50] sm:$0xff] }
  0xb5   : > { %9508 = vmatprep.mubr.msk.f32.mxu1 %vm361_vm1, %v11841_v9  ;;  %15431 = vst [vmem:[#allocation120_spill] sm:$0xff] %v11865_v11  ;;  %v11906_v56 = vld [vmem:[%s10815_s7 + $0x30] sm:$0xff] }
  0xb6   : > { %15436 = vst [vmem:[#allocation7_spill] sm:$0xff] %v11906_v56 }
  0xb7   : > { %9559 = vmatmul.mubr.msk.f32.gmra.mxu0 %vm361_vm1, %v11852_v19 }
  0xb8   : > { %9509 = vmatmul.mubr.msk.f32.gmra.mxu1 %vm361_vm1, %v11858_v63  ;;  %9561 = vmatprep.mubr.msk.f32.mxu0 %vm361_vm1, %v11861_v38  ;;  %v12026_v38 = vld [vmem:[%s10815_s7 + $0x108] sm:$0xff] }
  0xb9   : > { %9511 = vmatprep.mubr.msk.f32.mxu1 %vm361_vm1, %v11865_v11  ;;  %15464 = vst [vmem:[#allocation131_spill] sm:$0xff] %v12026_v38 }
  0xbb   : > { %9562 = vmatmul.mubr.msk.f32.gmra.mxu0 %vm361_vm1, %v11874_v2 }
  0xbc   : > { %9512 = vmatmul.mubr.msk.f32.gmra.mxu1 %vm361_vm1, %v11879_v39  ;;  %9616 = vmatprep.mubr.msk.f32.mxu0 %vm361_vm1, %v15434_v58  ;;  %v11924_v58 = vld [vmem:[%s10815_s7 + $0x48] sm:$0xff]  ;;  %v12116_v39 = vld [vmem:[%s10815_s7 + $0x158] sm:$0xff] }
  0xbd   : > { %9566 = vmatprep.mubr.msk.f32.mxu1 %vm361_vm1, %v10608_v42  ;;  %15441 = vst [vmem:[#allocation123_spill] sm:$0xff] %v11924_v58  ;;  %v15442_v42 = vld [vmem:[#allocation17_spill] sm:$0xff]  ;;  %15483 = vst [vmem:[#allocation143_spill] sm:$0xff] %v12116_v39 }
  0xbf   : > { %9617 = vmatmul.mubr.msk.f32.vlgmr.msra.gmra.mxu0 %vm361_vm1, %v15435_v34  ;;  %v11931_v34 = vld [vmem:[%s10815_s7 + $0x50] sm:$0xff] }
  0xc0   : > { %9567 = vmatmul.mubr.msk.f32.vlgmr.msra.gmra.mxu1 %vm361_vm1, %v10609_v21  ;;  %9715 = vmatpush3.msra.mxu0 %v11513_v46  ;;  %v11917_v46 = vld [vmem:[%s10815_s7 + $0x38] sm:$0xff]  ;;  %15443 = vst [vmem:[#allocation124_spill] sm:$0xff] %v11931_v34  ;;  %v15444_v21 = vld [vmem:[#allocation19_spill] sm:$0xff] }
  0xc1   : > { %9665 = vmatpush3.msra.mxu1 %v11498_v28  ;;  %9569 = vmatprep.mubr.msk.f32.mxu1 %vm361_vm1, %v11906_v56  ;;  %15439 = vst [vmem:[#allocation9_spill] sm:$0xff] %v11917_v46  ;;  %v15440_v28 = vld [vmem:[#allocation15_spill] sm:$0xff]  ;;  %v15481_v56 = vld [vmem:[#allocation32_spill] sm:$0xff] }
  0xc2   : > { %9619 = vmatprep.mubr.msk.f32.mxu0 %vm361_vm1, %v15437_v54  ;;  %9764 = vmatprep.subr.mxu1 %v11894_v47  ;;  %v12017_v54 = vld [vmem:[%s10815_s7 + $0xf8] sm:$0xff] }
  0xc3   : > { %9620 = vmatmul.mubr.msk.f32.gmra.mxu0 %vm361_vm1, %v15438_v4  ;;  %9814 = vmatprep.subr.mxu0 %v11902_v55  ;;  %v15446_v4 = vld [vmem:[#allocation24_spill] sm:$0xff]  ;;  %15462 = vst [vmem:[#allocation130_spill] sm:$0xff] %v12017_v54 }
  0xc4   : > { %9570 = vmatmul.mubr.msk.f32.gmra.mxu1 %vm361_vm1, %v11917_v46  ;;  %9622 = vmatprep.mubr.msk.f32.mxu0 %vm361_vm1, %v15440_v28  ;;  %v15445_v28 = vld [vmem:[#allocation22_spill] sm:$0xff] }
  0xc5   : > { %9572 = vmatprep.mubr.msk.f32.mxu1 %vm361_vm1, %v11924_v58  ;;  %v12105_v58 = vld [vmem:[%s10815_s7 + $0x190] sm:$0xf] }
  0xc6   : > { %15479 = vst [vmem:[#allocation140_spill] sm:$0xff] %v12105_v58  ;;  %v2421_v11 = vrot.slane %v12105_v58, 1 }
  0xc7   : > { %9623 = vmatmul.mubr.msk.f32.gmra.mxu0 %vm361_vm1, %v15442_v42  ;;  %v15447_v42 = vld [vmem:[#allocation27_spill] sm:$0xff] }
  0xc8   : > { %9573 = vmatmul.mubr.msk.f32.gmra.mxu1 %vm361_vm1, %v11931_v34  ;;  %9625 = vmatprep.mubr.msk.f32.mxu0 %vm361_vm1, %v15444_v21 }
  0xc9   : > { %9575 = vmatprep.mubr.msk.f32.mxu1 %vm361_vm1, %v10961_v61  ;;  %v15448_v61 = vld [vmem:[#allocation29_spill] sm:$0xff] }
  0xcb   : > { %9626 = vmatmul.mubr.msk.f32.gmra.mxu0 %vm361_vm1, %v15445_v28  ;;  %v15461_v28 = vld [vmem:[#allocation14_spill] sm:$0xff] }
  0xcc   : > { %9576 = vmatmul.mubr.msk.f32.gmra.mxu1 %vm361_vm1, %v10964_v62  ;;  %9628 = vmatprep.mubr.msk.f32.mxu0 %vm361_vm1, %v15446_v4  ;;  %v15449_v62 = vld [vmem:[#allocation33_spill] sm:$0xff] }
  0xcd   : > { %9578 = vmatprep.mubr.msk.f32.mxu1 %vm361_vm1, %v11004_v26  ;;  %v15450_v26 = vld [vmem:[#allocation35_spill] sm:$0xff] }
  0xcf   : > { %9629 = vmatmul.mubr.msk.f32.gmra.mxu0 %vm361_vm1, %v15447_v42  ;;  %v12004_v42 = vld [vmem:[%s10815_s7 + $0xf0] sm:$0xff] }
  0xd0   : > { %9579 = vmatmul.mubr.msk.f32.gmra.mxu1 %vm361_vm1, %v11007_v27  ;;  %9631 = vmatprep.mubr.msk.f32.mxu0 %vm361_vm1, %v15448_v61  ;;  %v15451_v27 = vld [vmem:[#allocation5_spill] sm:$0xff]  ;;  %15460 = vst [vmem:[#allocation129_spill] sm:$0xff] %v12004_v42 }
  0xd1   : > { %9581 = vmatprep.mubr.msk.f32.mxu1 %vm361_vm1, %v11048_v59  ;;  %v11970_v59 = vld [vmem:[%s10815_s7 + $0xc0] sm:$0xff] }
  0xd2   : > { %15452 = vst [vmem:[#allocation125_spill] sm:$0xff] %v11970_v59 }
  0xd3   : > { %9632 = vmatmul.mubr.msk.f32.gmra.mxu0 %vm361_vm1, %v11142_v24  ;;  %v11995_v24 = vld [vmem:[%s10815_s7 + $0xe0] sm:$0xff] }
  0xd4   : > { %9582 = vmatmul.mubr.msk.f32.gmra.mxu1 %vm361_vm1, %v11051_v1  ;;  %9634 = vmatprep.mubr.msk.f32.mxu0 %vm361_vm1, %v15449_v62  ;;  %v15453_v1 = vld [vmem:[#allocation6_spill] sm:$0xff]  ;;  %15458 = vst [vmem:[#allocation128_spill] sm:$0xff] %v11995_v24 }
  0xd5   : > { %9584 = vmatprep.mubr.msk.f32.mxu1 %vm361_vm1, %v11092_v25  ;;  %v11977_v62 = vld [vmem:[%s10815_s7 + $0xc8] sm:$0xff]  ;;  %v15455_v25 = vld [vmem:[#allocation8_spill] sm:$0xff] }
  0xd6   : > { %15454 = vst [vmem:[#allocation126_spill] sm:$0xff] %v11977_v62 }
  0xd7   : > { %9635 = vmatmul.mubr.msk.f32.gmra.mxu0 %vm361_vm1, %v15450_v26  ;;  %v15457_v26 = vld [vmem:[#allocation10_spill] sm:$0xff] }
  0xd8   : > { %9585 = vmatmul.mubr.msk.f32.gmra.mxu1 %vm361_vm1, %v11095_v41  ;;  %9637 = vmatprep.mubr.msk.f32.mxu0 %vm361_vm1, %v15451_v27  ;;  %v11984_v41 = vld [vmem:[%s10815_s7 + $0xd8] sm:$0xff] }
  0xd9   : > { %9587 = vmatprep.mubr.msk.f32.mxu1 %vm361_vm1, %v11970_v59  ;;  %15456 = vst [vmem:[#allocation127_spill] sm:$0xff] %v11984_v41 }
  0xdb   : > { %9638 = vmatmul.mubr.msk.f32.gmra.mxu0 %vm361_vm1, %v15453_v1 }
  0xdc   : > { %9588 = vmatmul.mubr.msk.f32.gmra.mxu1 %vm361_vm1, %v11977_v62  ;;  %9640 = vmatprep.mubr.msk.f32.mxu0 %vm361_vm1, %v15455_v25  ;;  %v15459_v25 = vld [vmem:[#allocation12_spill] sm:$0xff]  ;;  %v12089_v62 = vld [vmem:[%s10815_s7 + $0x140] sm:$0xff] }
  0xdd   : > { %9590 = vmatprep.mubr.msk.f32.mxu1 %vm361_vm1, %v11984_v41  ;;  %v12080_v41 = vld [vmem:[%s10815_s7 + $0x188] sm:$0xff]  ;;  %15476 = vst [vmem:[#allocation138_spill] sm:$0xff] %v12089_v62 }
  0xde   : > { %15473 = vst [vmem:[#allocation136_spill] sm:$0xff] %v12080_v41 }
  0xdf   : > { %v11988_v27 = vpop.f32.mrf.mxu0  ;;  %9641 = vmatmul.mubr.msk.f32.gmra.mxu0 %vm361_vm1, %v15457_v26 }
  0xe0   : > { %v11992_v1 = vpop.f32.mrf.mxu1  ;;  %9591 = vmatmul.mubr.msk.f32.gmra.mxu1 %vm361_vm1, %v11995_v24  ;;  %9643 = vmatprep.mubr.msk.f32.mxu0 %vm361_vm1, %v15459_v25  ;;  %v15463_v25 = vld [vmem:[#allocation16_spill] sm:$0xff]  ;;  %v12077_v24 = vld [vmem:[%s10815_s7 + $0x180] sm:$0xff] }
  0xe1   : > { %v12001_v61 = vpop.f32.mrf.mxu0  ;;  %9593 = vmatprep.mubr.msk.f32.mxu1 %vm361_vm1, %v12004_v42  ;;  %v12061_v42 = vld [vmem:[%s10815_s7 + $0x128] sm:$0xff]  ;;  %v2418_v34 = vrot.slane %v12077_v24, 1 }
  0xe2   : > { %v12008_v26 = vpop.f32.mrf.mxu1  ;;  %15470 = vst [vmem:[#allocation134_spill] sm:$0xff] %v12061_v42 }
  0xe3   : > { %v12010_v4 = vpop.f32.mrf.mxu0  ;;  %9644 = vmatmul.mubr.msk.f32.gmra.mxu0 %vm361_vm1, %v15461_v28 }
  0xe4   : > { %v12014_v21 = vpop.f32.mrf.mxu1  ;;  %9594 = vmatmul.mubr.msk.f32.gmra.mxu1 %vm361_vm1, %v12017_v54  ;;  %9646 = vmatprep.mubr.msk.f32.mxu0 %vm361_vm1, %v15463_v25  ;;  %v15467_v25 = vld [vmem:[#allocation20_spill] sm:$0xff]  ;;  %v15469_v54 = vld [vmem:[#allocation23_spill] sm:$0xff] }
  0xe5   : > { %v12023_v2 = vpop.f32.mrf.mxu0  ;;  %9596 = vmatprep.mubr.msk.f32.mxu1 %vm361_vm1, %v12026_v38  ;;  %v12048_v38 = vld [vmem:[%s10815_s7 + $0x120] sm:$0xff] }
  0xe6   : > { %v12030_v28 = vpop.f32.mrf.mxu1  ;;  %15468 = vst [vmem:[#allocation133_spill] sm:$0xff] %v12048_v38 }
  0xe7   : > { %v12032_v19 = vpop.f32.mrf.mxu0  ;;  %9647 = vmatmul.mubr.msk.f32.gmra.mxu0 %vm361_vm1, %v15465_v6 }
  0xe8   : > { %v12036_v17 = vpop.f32.mrf.mxu1  ;;  %9597 = vmatmul.mubr.msk.f32.gmra.mxu1 %vm361_vm1, %v12039_v37  ;;  %9649 = vmatprep.mubr.msk.f32.mxu0 %vm361_vm1, %v15467_v25  ;;  %v15471_v25 = vld [vmem:[#allocation26_spill] sm:$0xff] }
  0xe9   : > { %v12045_v48 = vpop.f32.mrf.mxu0  ;;  %9599 = vmatprep.mubr.msk.f32.mxu1 %vm361_vm1, %v12048_v38 }
  0xea   : > { %v12052_v6 = vpop.f32.mrf.mxu1 }
  0xeb   : > { %v12054_v8 = vpop.f32.mrf.mxu0  ;;  %9650 = vmatmul.mubr.msk.f32.gmra.mxu0 %vm361_vm1, %v15469_v54 }
  0xec   : > { %v12058_v37 = vpop.f32.mrf.mxu1  ;;  %9600 = vmatmul.mubr.msk.f32.gmra.mxu1 %vm361_vm1, %v12061_v42  ;;  %9652 = vmatprep.mubr.msk.f32.mxu0 %vm361_vm1, %v15471_v25  ;;  %v15474_v42 = vld [vmem:[#allocation28_spill] sm:$0xff] }
  0xed   : > { %v12067_v38 = vpop.f32.mrf.mxu0  ;;  %9602 = vmatprep.mubr.msk.f32.mxu1 %vm361_vm1, %v12070_v13  ;;  %v15477_v13 = vld [vmem:[#allocation30_spill] sm:$0xff] }
  0xee   : > { %v12074_v54 = vpop.f32.mrf.mxu1 }
  0xef   : > { %v12082_v16 = vpop.f32.mrf.mxu0  ;;  %9653 = vmatmul.mubr.msk.f32.gmra.mxu0 %vm361_vm1, %v15474_v42  ;;  %v2419_v42 = vrot.slane %v12080_v41, 1 }
  0xf0   : > { %v12086_v25 = vpop.f32.mrf.mxu1  ;;  %9603 = vmatmul.mubr.msk.f32.gmra.mxu1 %vm361_vm1, %v12089_v62  ;;  %9655 = vmatprep.mubr.msk.f32.mxu0 %vm361_vm1, %v15477_v13 }
  0xf1   : > { %15475 = vst [vmem:[#allocation137_spill] sm:$0xff] %v12086_v25  ;;  %v12095_v59 = vpop.f32.mrf.mxu0  ;;  %9605 = vmatprep.mubr.msk.f32.mxu1 %vm361_vm1, %v12098_v40  ;;  %v15484_v40 = vld [vmem:[#allocation34_spill] sm:$0xff]  ;;  %v15487_v25 = vld [vmem:[#allocation36_spill] sm:$0xff] }
  0xf2   : > { %v12107_v46 = vpop.f32.mrf.mxu1 }
  0xf3   : > { %15480 = vst [vmem:[#allocation141_spill] sm:$0xff] %v12107_v46  ;;  %v12109_v62 = vpop.f32.mrf.mxu0  ;;  %9656 = vmatmul.mubr.msk.f32.gmra.mxu0 %vm361_vm1, %v15481_v56  ;;  %v12128_v46 = vsel %vm278_vm0, %v2418_v34, %v2419_v42 }
  0xf4   : > { %v12113_v13 = vpop.f32.mrf.mxu1  ;;  %9606 = vmatmul.mubr.msk.f32.gmra.mxu1 %vm361_vm1, %v12116_v39  ;;  %9658 = vmatprep.mubr.msk.f32.mxu0 %vm361_vm1, %v15484_v40  ;;  %15485 = vst [vmem:[#allocation144_spill] sm:$0xff] %v12128_v46  ;;  %v12139_v40 = vld [vmem:[%s10815_s7 + $0x170] sm:$0xff] }
  0xf5   : > { %15482 = vst [vmem:[#allocation142_spill] sm:$0xff] %v12113_v13  ;;  %v12123_v63 = vpop.f32.mrf.mxu0  ;;  %9608 = vmatprep.mubr.msk.f32.mxu1 %vm361_vm1, %v11100_v52  ;;  %15489 = vst [vmem:[#allocation147_spill] sm:$0xff] %v12139_v40  ;;  %v12146_v52 = vsel %vm278_vm0, %v2419_v42, %v2421_v11  ;;  %v15493_v42 = vld [vmem:[#allocation37_spill] sm:$0xff] }
  0xf6   : > { %v12130_v56 = vpop.f32.mrf.mxu1  ;;  %15490 = vst [vmem:[#allocation148_spill] sm:$0xff] %v12146_v52 }
  0xf7   : > { %15486 = vst [vmem:[#allocation145_spill] sm:$0xff] %v12130_v56  ;;  %v12132_v13 = vpop.f32.mrf.mxu0  ;;  %9659 = vmatmul.mubr.msk.f32.gmra.mxu0 %vm361_vm1, %v15487_v25 }
  0xf8   : > { %v12136_v39 = vpop.f32.mrf.mxu1  ;;  %9609 = vmatmul.mubr.msk.f32.gmra.mxu1 %vm361_vm1, %v12139_v40  ;;  %9661 = vmatprep.mubr.msk.f32.mxu0 %vm361_vm1, %v12128_v46 }
  0xf9   : > { %15488 = vst [vmem:[#allocation146_spill] sm:$0xff] %v12136_v39  ;;  %v12148_v34 = vpop.f32.mrf.mxu0  ;;  %9611 = vmatprep.mubr.msk.f32.mxu1 %vm361_vm1, %v12077_v24 }
  0xfa   : > { %v12152_v56 = vpop.f32.mrf.mxu1 }
  0xfb   : > { %15491 = vst [vmem:[#allocation149_spill] sm:$0xff] %v12152_v56  ;;  %v12154_v25 = vpop.f32.mrf.mxu0  ;;  %9662 = vmatmul.mubr.msk.f32.gmra.mxu0 %vm361_vm1, %v12146_v52  ;;  %v12175_v52 = vld [vmem:[%s14976_s1 + $0x58] sm:$0xff]  ;;  %v15495_v56 = vld [vmem:[#allocation38_spill] sm:$0xff] }
  0xfc   : > { %v12158_v39 = vpop.f32.mrf.mxu1  ;;  %9612 = vmatmul.mubr.msk.f32.gmra.mxu1 %vm361_vm1, %v12080_v41  ;;  %9716 = vmatprep.mubr.msk.f32.mxu0 %vm361_vm1, %v11486_v14  ;;  %v12183_v14 = vld [vmem:[%s14976_s1 + $0x60] sm:$0xff] }
  0xfd   : > { %15492 = vst [vmem:[#allocation150_spill] sm:$0xff] %v12158_v39  ;;  %v12164_v11 = vpop.f32.mrf.mxu0  ;;  %9666 = vmatprep.mubr.msk.f32.mxu1 %vm361_vm1, %v15493_v42 }
  0xfe   : > { %v12168_v46 = vpop.f32.mrf.mxu1 }
  0xff   : > { %15494 = vst [vmem:[#allocation37_spill] sm:$0xff] %v12168_v46  ;;  %v9418_v40 = vpop.f32.mrf.mxu0  ;;  %9717 = vmatmul.mubr.msk.f32.vlgmr.msra.gmra.mxu0 %vm361_vm1, %v11504_v22  ;;  %v15496_v46 = vld [vmem:[#allocation39_spill] sm:$0xff] }
 0x100   : > { %v9368_v39 = vpop.f32.mrf.mxu1  ;;  %9667 = vmatmul.mubr.msk.f32.vlgmr.msra.gmra.mxu1 %vm361_vm1, %v15495_v56  ;;  %9815 = vmatpush3.msra.mxu0 %v11902_v55 }
 0x101   : > { %v787_v42 = vadd.f32 %v9368_v39, %v11988_v27  ;;  %9765 = vmatpush3.msra.mxu1 %v11894_v47  ;;  %v1153_v22 = vpop.f32.mrf.mxu0  ;;  %9669 = vmatprep.mubr.msk.f32.mxu1 %vm361_vm1, %v15496_v46 }
 0x102   : > { %v781_v58 = vpop.f32.mrf.mxu1  ;;  %9719 = vmatprep.mubr.msk.f32.mxu0 %vm361_vm1, %v11527_v51  ;;  %9864 = vmatprep.subr.mxu1 %v12175_v52 }
 0x103   : > { %v12192_v55 = vadd.f32 %v9418_v40, %v787_v42  ;;  %v782_v56 = vadd.f32 %v781_v58, %v12001_v61  ;;  %v9421_v41 = vpop.f32.mrf.mxu0  ;;  %9720 = vmatmul.mubr.msk.f32.gmra.mxu0 %vm361_vm1, %v11547_v23  ;;  %9914 = vmatprep.subr.mxu0 %v12183_v14 }
 0x104   : > { %v9371_v39 = vpop.f32.mrf.mxu1  ;;  %9670 = vmatmul.mubr.msk.f32.gmra.mxu1 %vm361_vm1, %v11232_v7  ;;  %9722 = vmatprep.mubr.msk.f32.mxu0 %vm361_vm1, %v11555_v45  ;;  %v15497_v7 = vld [vmem:[#allocation42_spill] sm:$0xff]  ;;  %v15499_v45 = vld [vmem:[#allocation44_spill] sm:$0xff] }
 0x105   : > { %v12202_v47 = vadd.f32 %v1153_v22, %v782_v56  ;;  %v797_v40 = vadd.f32 %v9371_v39, %v12010_v4  ;;  %v1163_v27 = vpop.f32.mrf.mxu0  ;;  %9672 = vmatprep.mubr.msk.f32.mxu1 %vm361_vm1, %v11240_v3 }
 0x106   : > { %v791_v58 = vpop.f32.mrf.mxu1 }
 0x107   : > { %v12207_v61 = vadd.f32 %v9421_v41, %v797_v40  ;;  %v792_v42 = vadd.f32 %v791_v58, %v12023_v2  ;;  %v9424_v23 = vpop.f32.mrf.mxu0  ;;  %9723 = vmatmul.mubr.msk.f32.gmra.mxu0 %vm361_vm1, %v11566_v31  ;;  %v15498_v41 = vld [vmem:[#allocation43_spill] sm:$0xff] }
 0x108   : > { %v9374_v51 = vpop.f32.mrf.mxu1  ;;  %9673 = vmatmul.mubr.msk.f32.gmra.mxu1 %vm361_vm1, %v15497_v7  ;;  %9725 = vmatprep.mubr.msk.f32.mxu0 %vm361_vm1, %v11581_v10  ;;  %v15501_v10 = vld [vmem:[#allocation46_spill] sm:$0xff] }
 0x109   : > { %v12216_v4 = vadd.f32 %v1163_v27, %v792_v42  ;;  %v807_v22 = vadd.f32 %v9374_v51, %v12032_v19  ;;  %v1173_v56 = vpop.f32.mrf.mxu0  ;;  %9675 = vmatprep.mubr.msk.f32.mxu1 %vm361_vm1, %v15498_v41 }
 0x10a   : > { %v801_v2 = vpop.f32.mrf.mxu1 }
 0x10b   : > { %v12221_v39 = vadd.f32 %v9424_v23, %v807_v22  ;;  %v802_v40 = vadd.f32 %v801_v2, %v12045_v48  ;;  %v9427_v58 = vpop.f32.mrf.mxu0  ;;  %9726 = vmatmul.mubr.msk.f32.gmra.mxu0 %vm361_vm1, %v11599_v18  ;;  %v15500_v23 = vld [vmem:[#allocation45_spill] sm:$0xff] }
 0x10c   : > { %v9377_v31 = vpop.f32.mrf.mxu1  ;;  %9676 = vmatmul.mubr.msk.f32.gmra.mxu1 %vm361_vm1, %v15499_v45  ;;  %9728 = vmatprep.mubr.msk.f32.mxu0 %vm361_vm1, %v11607_v15  ;;  %v15503_v15 = vld [vmem:[#allocation48_spill] sm:$0xff] }
 0x10d   : > { %v12230_v51 = vadd.f32 %v1173_v56, %v802_v40  ;;  %v817_v19 = vadd.f32 %v9377_v31, %v12054_v8  ;;  %v1183_v27 = vpop.f32.mrf.mxu0  ;;  %9678 = vmatprep.mubr.msk.f32.mxu1 %vm361_vm1, %v15500_v23  ;;  %v15502_v40 = vld [vmem:[#allocation47_spill] sm:$0xff] }
 0x10e   : > { %v811_v48 = vpop.f32.mrf.mxu1 }
 0x10f   : > { %v12235_v42 = vadd.f32 %v9427_v58, %v817_v19  ;;  %v812_v22 = vadd.f32 %v811_v48, %v12067_v38  ;;  %v9430_v2 = vpop.f32.mrf.mxu0  ;;  %9729 = vmatmul.mubr.msk.f32.gmra.mxu0 %vm361_vm1, %v11618_v53 }
 0x110   : > { %v9380_v18 = vpop.f32.mrf.mxu1  ;;  %9679 = vmatmul.mubr.msk.f32.gmra.mxu1 %vm361_vm1, %v15501_v10  ;;  %9731 = vmatprep.mubr.msk.f32.mxu0 %vm361_vm1, %v11633_v43  ;;  %v15505_v43 = vld [vmem:[#allocation50_spill] sm:$0xff] }
 0x111   : > { %v12244_v31 = vadd.f32 %v1183_v27, %v812_v22  ;;  %v827_v8 = vadd.f32 %v9380_v18, %v12082_v16  ;;  %v1193_v56 = vpop.f32.mrf.mxu0  ;;  %9681 = vmatprep.mubr.msk.f32.mxu1 %vm361_vm1, %v15502_v40  ;;  %v15504_v22 = vld [vmem:[#allocation49_spill] sm:$0xff] }
 0x112   : > { %v821_v38 = vpop.f32.mrf.mxu1 }
 0x113   : > { %v12249_v58 = vadd.f32 %v9430_v2, %v827_v8  ;;  %v822_v19 = vadd.f32 %v821_v38, %v12095_v59  ;;  %v9433_v48 = vpop.f32.mrf.mxu0  ;;  %9732 = vmatmul.mubr.msk.f32.gmra.mxu0 %vm361_vm1, %v11651_v0 }
 0x114   : > { %v9383_v53 = vpop.f32.mrf.mxu1  ;;  %9682 = vmatmul.mubr.msk.f32.gmra.mxu1 %vm361_vm1, %v15503_v15  ;;  %9734 = vmatprep.mubr.msk.f32.mxu0 %vm361_vm1, %v11659_v12  ;;  %v15507_v12 = vld [vmem:[#allocation52_spill] sm:$0xff] }
 0x115   : > { %v12258_v18 = vadd.f32 %v1193_v56, %v822_v19  ;;  %v837_v16 = vadd.f32 %v9383_v53, %v12109_v62  ;;  %v1203_v27 = vpop.f32.mrf.mxu0  ;;  %9684 = vmatprep.mubr.msk.f32.mxu1 %vm361_vm1, %v15504_v22  ;;  %v15506_v19 = vld [vmem:[#allocation51_spill] sm:$0xff] }
 0x116   : > { %v831_v59 = vpop.f32.mrf.mxu1 }
 0x117   : > { %v12263_v2 = vadd.f32 %v9433_v48, %v837_v16  ;;  %v832_v8 = vadd.f32 %v831_v59, %v12123_v63  ;;  %v9436_v38 = vpop.f32.mrf.mxu0  ;;  %9735 = vmatmul.mubr.msk.f32.gmra.mxu0 %vm361_vm1, %v11670_v44 }
 0x118   : > { %v9386_v0 = vpop.f32.mrf.mxu1  ;;  %9685 = vmatmul.mubr.msk.f32.gmra.mxu1 %vm361_vm1, %v15505_v43  ;;  %9737 = vmatprep.mubr.msk.f32.mxu0 %vm361_vm1, %v11685_v49  ;;  %v15509_v49 = vld [vmem:[#allocation54_spill] sm:$0xff] }
 0x119   : > { %v12272_v53 = vadd.f32 %v1203_v27, %v832_v8  ;;  %v847_v62 = vadd.f32 %v9386_v0, %v12132_v13  ;;  %v1213_v56 = vpop.f32.mrf.mxu0  ;;  %9687 = vmatprep.mubr.msk.f32.mxu1 %vm361_vm1, %v15506_v19  ;;  %v15508_v8 = vld [vmem:[#allocation53_spill] sm:$0xff] }
 0x11a   : > { %v841_v63 = vpop.f32.mrf.mxu1 }
 0x11b   : > { %v12277_v48 = vadd.f32 %v9436_v38, %v847_v62  ;;  %v842_v16 = vadd.f32 %v841_v63, %v12148_v34  ;;  %v9439_v59 = vpop.f32.mrf.mxu0  ;;  %9738 = vmatmul.mubr.msk.f32.gmra.mxu0 %vm361_vm1, %v11703_v20 }
 0x11c   : > { %v9389_v44 = vpop.f32.mrf.mxu1  ;;  %9688 = vmatmul.mubr.msk.f32.gmra.mxu1 %vm361_vm1, %v15507_v12  ;;  %9740 = vmatprep.mubr.msk.f32.mxu0 %vm361_vm1, %v11711_v30  ;;  %v15511_v30 = vld [vmem:[#allocation56_spill] sm:$0xff] }
 0x11d   : > { %v12286_v0 = vadd.f32 %v1213_v56, %v842_v16  ;;  %v857_v13 = vadd.f32 %v9389_v44, %v12154_v25  ;;  %v1223_v27 = vpop.f32.mrf.mxu0  ;;  %9690 = vmatprep.mubr.msk.f32.mxu1 %vm361_vm1, %v15508_v8  ;;  %v15510_v16 = vld [vmem:[#allocation55_spill] sm:$0xff]  ;;  %v15531_v8 = vld [vmem:[#allocation122_spill] sm:$0xff] }
 0x11e   : > { %v851_v34 = vpop.f32.mrf.mxu1 }
 0x11f   : > { %v12291_v38 = vadd.f32 %v9439_v59, %v857_v13  ;;  %v852_v62 = vadd.f32 %v851_v34, %v12164_v11  ;;  %v9442_v63 = vpop.f32.mrf.mxu0  ;;  %9741 = vmatmul.mubr.msk.f32.gmra.mxu0 %vm361_vm1, %v11722_v57 }
 0x120   : > { %v9392_v20 = vpop.f32.mrf.mxu1  ;;  %9691 = vmatmul.mubr.msk.f32.gmra.mxu1 %vm361_vm1, %v15509_v49  ;;  %9743 = vmatprep.mubr.msk.f32.mxu0 %vm361_vm1, %v11737_v35  ;;  %v15513_v35 = vld [vmem:[#allocation58_spill] sm:$0xff]  ;;  %v15530_v49 = vld [vmem:[#allocation145_spill] sm:$0xff] }
 0x121   : > { %v12300_v44 = vadd.f32 %v1223_v27, %v852_v62  ;;  %v867_v25 = vadd.f32 %v9392_v20, %v11992_v1  ;;  %v1233_v56 = vpop.f32.mrf.mxu0  ;;  %9693 = vmatprep.mubr.msk.f32.mxu1 %vm361_vm1, %v15510_v16  ;;  %v15512_v62 = vld [vmem:[#allocation57_spill] sm:$0xff]  ;;  %v15527_v16 = vld [vmem:[#allocation63_spill] sm:$0xff] }
 0x122   : > { %v861_v11 = vpop.f32.mrf.mxu1 }
 0x123   : > { %v12305_v59 = vadd.f32 %v9442_v63, %v867_v25  ;;  %v862_v13 = vadd.f32 %v861_v11, %v12008_v26  ;;  %v9445_v34 = vpop.f32.mrf.mxu0  ;;  %9744 = vmatmul.mubr.msk.f32.gmra.mxu0 %vm361_vm1, %v11755_v50 }
 0x124   : > { %v9395_v57 = vpop.f32.mrf.mxu1  ;;  %9694 = vmatmul.mubr.msk.f32.gmra.mxu1 %vm361_vm1, %v15511_v30  ;;  %9746 = vmatprep.mubr.msk.f32.mxu0 %vm361_vm1, %v11763_v5  ;;  %v15515_v5 = vld [vmem:[#allocation60_spill] sm:$0xff]  ;;  %v15526_v30 = vld [vmem:[#allocation142_spill] sm:$0xff] }
 0x125   : > { %v12314_v20 = vadd.f32 %v1233_v56, %v862_v13  ;;  %v877_v1 = vadd.f32 %v9395_v57, %v12014_v21  ;;  %v1243_v27 = vpop.f32.mrf.mxu0  ;;  %9696 = vmatprep.mubr.msk.f32.mxu1 %vm361_vm1, %v15512_v62  ;;  %v15514_v13 = vld [vmem:[#allocation59_spill] sm:$0xff] }
 0x126   : > { %v871_v26 = vpop.f32.mrf.mxu1 }
 0x127   : > { %v12319_v63 = vadd.f32 %v9445_v34, %v877_v1  ;;  %v872_v25 = vadd.f32 %v871_v26, %v12030_v28  ;;  %v9448_v11 = vpop.f32.mrf.mxu0  ;;  %9747 = vmatmul.mubr.msk.f32.gmra.mxu0 %vm361_vm1, %v11774_v29 }
 0x128   : > { %v9398_v50 = vpop.f32.mrf.mxu1  ;;  %9697 = vmatmul.mubr.msk.f32.gmra.mxu1 %vm361_vm1, %v15513_v35  ;;  %9749 = vmatprep.mubr.msk.f32.mxu0 %vm361_vm1, %v11789_v32  ;;  %v15517_v32 = vld [vmem:[#allocation21_spill] sm:$0xff] }
 0x129   : > { %v12328_v57 = vadd.f32 %v1243_v27, %v872_v25  ;;  %v887_v21 = vadd.f32 %v9398_v50, %v12036_v17  ;;  %v1253_v56 = vpop.f32.mrf.mxu0  ;;  %9699 = vmatprep.mubr.msk.f32.mxu1 %vm361_vm1, %v15514_v13  ;;  %v15516_v25 = vld [vmem:[#allocation61_spill] sm:$0xff]  ;;  %v15525_v13 = vld [vmem:[#allocation140_spill] sm:$0xff] }
 0x12a   : > { %v881_v28 = vpop.f32.mrf.mxu1  ;;  %v2957_v35 = vrot.slane %v15525_v13, 3 }
 0x12b   : > { %v12333_v34 = vadd.f32 %v9448_v11, %v887_v21  ;;  %v882_v1 = vadd.f32 %v881_v28, %v12052_v6  ;;  %v9451_v26 = vpop.f32.mrf.mxu0  ;;  %9750 = vmatmul.mubr.msk.f32.gmra.mxu0 %vm361_vm1, %v11807_v33 }
 0x12c   : > { %v9401_v29 = vpop.f32.mrf.mxu1  ;;  %9700 = vmatmul.mubr.msk.f32.gmra.mxu1 %vm361_vm1, %v15515_v5  ;;  %9752 = vmatprep.mubr.msk.f32.mxu0 %vm361_vm1, %v11815_v36  ;;  %v2686_v36 = vrot.slane %v12077_v24, 2  ;;  %v15522_v5 = vld [vmem:[#allocation118_spill] sm:$0xff] }
 0x12d   : > { %v12342_v50 = vadd.f32 %v1253_v56, %v882_v1  ;;  %v897_v17 = vadd.f32 %v9401_v29, %v12058_v37  ;;  %v1263_v27 = vpop.f32.mrf.mxu0  ;;  %9702 = vmatprep.mubr.msk.f32.mxu1 %vm361_vm1, %v15516_v25  ;;  %v15518_v37 = vld [vmem:[#allocation137_spill] sm:$0xff] }
 0x12e   : > { %v891_v6 = vpop.f32.mrf.mxu1 }
 0x12f   : > { %v12347_v11 = vadd.f32 %v9451_v26, %v897_v17  ;;  %v892_v21 = vadd.f32 %v891_v6, %v12074_v54  ;;  %v9454_v28 = vpop.f32.mrf.mxu0  ;;  %9753 = vmatmul.mubr.msk.f32.gmra.mxu0 %vm361_vm1, %v11826_v60  ;;  %v15519_v26 = vld [vmem:[#allocation25_spill] sm:$0xff]  ;;  %v2954_v54 = vrot.slane %v12077_v24, 3  ;;  %v15520_v17 = vld [vmem:[#allocation136_spill] sm:$0xff] }
 0x130   : > { %v9404_v33 = vpop.f32.mrf.mxu1  ;;  %9703 = vmatmul.mubr.msk.f32.gmra.mxu1 %vm361_vm1, %v15517_v32  ;;  %9755 = vmatprep.mubr.msk.f32.mxu0 %vm361_vm1, %v11841_v9  ;;  %v2955_v6 = vrot.slane %v15520_v17, 3  ;;  %v2687_v32 = vrot.slane %v15520_v17, 2  ;;  %v15521_v9 = vld [vmem:[#allocation141_spill] sm:$0xff] }
 0x131   : > { %v12356_v29 = vadd.f32 %v1263_v27, %v892_v21  ;;  %v907_v56 = vadd.f32 %v9404_v33, %v15518_v37  ;;  %v1273_v1 = vpop.f32.mrf.mxu0  ;;  %9705 = vmatprep.mubr.msk.f32.mxu1 %vm361_vm1, %v15519_v26  ;;  %v15523_v37 = vld [vmem:[#allocation62_spill] sm:$0xff]  ;;  %v15524_v26 = vld [vmem:[#allocation120_spill] sm:$0xff] }
 0x132   : > { %v901_v60 = vpop.f32.mrf.mxu1 }
 0x133   : > { %v12365_v25 = vadd.f32 %v9454_v28, %v907_v56  ;;  %v902_v27 = vadd.f32 %v901_v60, %v15521_v9  ;;  %v9457_v21 = vpop.f32.mrf.mxu0  ;;  %9756 = vmatmul.mubr.msk.f32.gmra.mxu0 %vm361_vm1, %v15522_v5  ;;  %v12381_v60 = vsel %vm1344_vm3, %v2954_v54, %v2955_v6  ;;  %v2689_v9 = vrot.slane %v15525_v13, 2 }
 0x134   : > { %v9407_v33 = vpop.f32.mrf.mxu1  ;;  %9706 = vmatmul.mubr.msk.f32.gmra.mxu1 %vm361_vm1, %v15523_v37  ;;  %9758 = vmatprep.mubr.msk.f32.mxu0 %vm361_vm1, %v15524_v26  ;;  %15528 = vst [vmem:[#allocation38_spill] sm:$0xff] %v12381_v60  ;;  %v12385_v37 = vsel %vm940_vm2, %v2686_v36, %v2687_v32  ;;  %v12397_v54 = vsel %vm1344_vm3, %v2955_v6, %v2957_v35  ;;  %v15537_v6 = vld [vmem:[#allocation7_spill] sm:$0xff] }
 0x135   : > { %v12375_v62 = vadd.f32 %v1273_v1, %v902_v27  ;;  %v917_v28 = vadd.f32 %v9407_v33, %v15526_v30  ;;  %v1283_v56 = vpop.f32.mrf.mxu0  ;;  %9708 = vmatprep.mubr.msk.f32.mxu1 %vm361_vm1, %v15527_v16  ;;  %15529 = vst [vmem:[#allocation39_spill] sm:$0xff] %v12385_v37  ;;  %v15532_v33 = vld [vmem:[#allocation64_spill] sm:$0xff]  ;;  %15533 = vst [vmem:[#allocation137_spill] sm:$0xff] %v12397_v54 }
 0x136   : > { %v911_v5 = vpop.f32.mrf.mxu1 }
 0x137   : > { %v12387_v26 = vadd.f32 %v9457_v21, %v917_v28  ;;  %v912_v1 = vadd.f32 %v911_v5, %v15530_v49  ;;  %v9460_v27 = vpop.f32.mrf.mxu0  ;;  %9759 = vmatmul.mubr.msk.f32.gmra.mxu0 %vm361_vm1, %v15531_v8  ;;  %v15534_v21 = vld [vmem:[#allocation146_spill] sm:$0xff]  ;;  %v12405_v49 = vsel %vm940_vm2, %v2687_v32, %v2689_v9 }
 0x138   : > { %v9410_v30 = vpop.f32.mrf.mxu1  ;;  %9709 = vmatmul.mubr.msk.f32.gmra.mxu1 %vm361_vm1, %v15532_v33  ;;  %9761 = vmatprep.mubr.msk.f32.mxu0 %vm361_vm1, %v12381_v60  ;;  %15535 = vst [vmem:[#allocation136_spill] sm:$0xff] %v12405_v49  ;;  %v15536_v33 = vld [vmem:[#allocation149_spill] sm:$0xff]  ;;  %v15538_v32 = vld [vmem:[#allocation150_spill] sm:$0xff] }
 0x139   : > { %v12399_v36 = vadd.f32 %v1283_v56, %v912_v1  ;;  %v927_v28 = vadd.f32 %v9410_v30, %v15534_v21  ;;  %v1293_v16 = vpop.f32.mrf.mxu0  ;;  %9711 = vmatprep.mubr.msk.f32.mxu1 %vm361_vm1, %v12385_v37  ;;  %v15540_v21 = vld [vmem:[#allocation37_spill] sm:$0xff] }
 0x13a   : > { %v921_v5 = vpop.f32.mrf.mxu1  ;;  %v15554_v37 = vld [vmem:[#allocation85_spill] sm:$0xff] }
 0x13b   : > { %v12407_v8 = vadd.f32 %v9460_v27, %v927_v28  ;;  %v922_v12 = vadd.f32 %v921_v5, %v15536_v33  ;;  %v9463_v60 = vpop.f32.mrf.mxu0  ;;  %9762 = vmatmul.mubr.msk.f32.gmra.mxu0 %vm361_vm1, %v12397_v54  ;;  %v15539_v27 = vld [vmem:[#allocation65_spill] sm:$0xff] }
 0x13c   : > { %v9413_v35 = vpop.f32.mrf.mxu1  ;;  %9712 = vmatmul.mubr.msk.f32.gmra.mxu1 %vm361_vm1, %v12405_v49  ;;  %9816 = vmatprep.mubr.msk.f32.mxu0 %vm361_vm1, %v15537_v6  ;;  %v15541_v54 = vld [vmem:[#allocation9_spill] sm:$0xff]  ;;  %v10630_v49 = vld [vmem:[%s10815_s7 + $0x68] sm:$0xff] }
 0x13d   : > { %v12416_v56 = vadd.f32 %v1293_v16, %v922_v12  ;;  %v937_v9 = vadd.f32 %v9413_v35, %v15538_v32  ;;  %v1303_v1 = vpop.f32.mrf.mxu0  ;;  %9766 = vmatprep.mubr.msk.f32.mxu1 %vm361_vm1, %v15539_v27  ;;  %v12429_v12 = vld [vmem:[%s14976_s1 + $0x68] sm:$0xff] }
 0x13e   : > { %v931_v30 = vpop.f32.mrf.mxu1  ;;  %v15542_v35 = vld [vmem:[#allocation66_spill] sm:$0xff] }
 0x13f   : > { %v12421_v33 = vadd.f32 %v9463_v60, %v937_v9  ;;  %v932_v28 = vadd.f32 %v931_v30, %v15540_v21  ;;  %v9518_v5 = vpop.f32.mrf.mxu0  ;;  %9817 = vmatmul.mubr.msk.f32.vlgmr.msra.gmra.mxu0 %vm361_vm1, %v15541_v54  ;;  %v12437_v60 = vld [vmem:[%s14976_s1 + $0x70] sm:$0xff] }
 0x140   : > { %v9468_v16 = vpop.f32.mrf.mxu1  ;;  %9767 = vmatmul.mubr.msk.f32.vlgmr.msra.gmra.mxu1 %vm361_vm1, %v15542_v35  ;;  %9915 = vmatpush3.msra.mxu0 %v12183_v14  ;;  %v15543_v9 = vld [vmem:[#allocation67_spill] sm:$0xff] }
 0x141   : > { %v12439_v6 = vadd.f32 %v1303_v1, %v932_v28  ;;  %v1717_v54 = vadd.f32 %v9468_v16, %v12192_v55  ;;  %9865 = vmatpush3.msra.mxu1 %v12175_v52  ;;  %v1961_v32 = vpop.f32.mrf.mxu0  ;;  %9769 = vmatprep.mubr.msk.f32.mxu1 %vm361_vm1, %v15543_v9  ;;  %v15544_v30 = vld [vmem:[#allocation123_spill] sm:$0xff]  ;;  %v15545_v28 = vld [vmem:[#allocation124_spill] sm:$0xff]  ;;  %v15546_v55 = vld [vmem:[#allocation69_spill] sm:$0xff] }
 0x142   : > { %v1557_v27 = vpop.f32.mrf.mxu1  ;;  %9819 = vmatprep.mubr.msk.f32.mxu0 %vm361_vm1, %v15544_v30  ;;  %9964 = vmatprep.subr.mxu1 %v12429_v12  ;;  %v10629_v16 = vld [vmem:[%s10815_s7 + $0x60] sm:$0xff] }
 0x143   : > { %v12448_v14 = vadd.f32 %v9518_v5, %v1717_v54  ;;  %v1716_v21 = vadd.f32 %v1557_v27, %v12202_v47  ;;  %v9521_v1 = vpop.f32.mrf.mxu0  ;;  %9820 = vmatmul.mubr.msk.f32.gmra.mxu0 %vm361_vm1, %v15545_v28  ;;  %10014 = vmatprep.subr.mxu0 %v12437_v60  ;;  %v15547_v54 = vld [vmem:[#allocation71_spill] sm:$0xff] }
 0x144   : > { %v9471_v52 = vpop.f32.mrf.mxu1  ;;  %9770 = vmatmul.mubr.msk.f32.gmra.mxu1 %vm361_vm1, %v15546_v55  ;;  %9822 = vmatprep.mubr.msk.f32.mxu0 %vm361_vm1, %v10629_v16  ;;  %v15548_v16 = vld [vmem:[#allocation74_spill] sm:$0xff] }
 0x145   : > { %v12458_v35 = vadd.f32 %v1961_v32, %v1716_v21  ;;  %v1719_v5 = vadd.f32 %v9471_v52, %v12207_v61  ;;  %v1971_v47 = vpop.f32.mrf.mxu0  ;;  %9772 = vmatprep.mubr.msk.f32.mxu1 %vm361_vm1, %v15547_v54  ;;  %v10631_v61 = vld [vmem:[%s10815_s7 + $0x78] sm:$0xff]  ;;  %v15549_v52 = vld [vmem:[#allocation75_spill] sm:$0xff]  ;;  %v10632_v54 = vld [vmem:[%s10815_s7 + $0x80] sm:$0xff] }
 0x146   : > { %v1567_v27 = vpop.f32.mrf.mxu1 }
 0x147   : > { %v12463_v30 = vadd.f32 %v9521_v1, %v1719_v5  ;;  %v1718_v28 = vadd.f32 %v1567_v27, %v12216_v4  ;;  %v9524_v9 = vpop.f32.mrf.mxu0  ;;  %9823 = vmatmul.mubr.msk.f32.gmra.mxu0 %vm361_vm1, %v10630_v49 }
 0x148   : > { %v9474_v55 = vpop.f32.mrf.mxu1  ;;  %9773 = vmatmul.mubr.msk.f32.gmra.mxu1 %vm361_vm1, %v15548_v16  ;;  %9825 = vmatprep.mubr.msk.f32.mxu0 %vm361_vm1, %v10631_v61  ;;  %v15550_v61 = vld [vmem:[#allocation77_spill] sm:$0xff] }
 0x149   : > { %v12472_v32 = vadd.f32 %v1971_v47, %v1718_v28  ;;  %v1721_v21 = vadd.f32 %v9474_v55, %v12221_v39  ;;  %v1981_v1 = vpop.f32.mrf.mxu0  ;;  %9775 = vmatprep.mubr.msk.f32.mxu1 %vm361_vm1, %v15549_v52  ;;  %v10633_v39 = vld [vmem:[%s10815_s7 + $0x90] sm:$0xff]  ;;  %v10634_v52 = vld [vmem:[%s10815_s7 + $0x98] sm:$0xff] }
 0x14a   : > { %v1577_v4 = vpop.f32.mrf.mxu1  ;;  %v15551_v28 = vld [vmem:[#allocation79_spill] sm:$0xff] }
 0x14b   : > { %v12477_v5 = vadd.f32 %v9524_v9, %v1721_v21  ;;  %v1720_v49 = vadd.f32 %v1577_v4, %v12230_v51  ;;  %v9527_v27 = vpop.f32.mrf.mxu0  ;;  %9826 = vmatmul.mubr.msk.f32.gmra.mxu0 %vm361_vm1, %v10632_v54 }
 0x14c   : > { %v9477_v16 = vpop.f32.mrf.mxu1  ;;  %9776 = vmatmul.mubr.msk.f32.gmra.mxu1 %vm361_vm1, %v15550_v61  ;;  %9828 = vmatprep.mubr.msk.f32.mxu0 %vm361_vm1, %v10633_v39  ;;  %v15552_v39 = vld [vmem:[#allocation82_spill] sm:$0xff] }
 0x14d   : > { %v12486_v55 = vadd.f32 %v1981_v1, %v1720_v49  ;;  %v1723_v9 = vadd.f32 %v9477_v16, %v12235_v42  ;;  %v1991_v47 = vpop.f32.mrf.mxu0  ;;  %9778 = vmatprep.mubr.msk.f32.mxu1 %vm361_vm1, %v15551_v28  ;;  %v10635_v1 = vld [vmem:[%s10815_s7 + $0xa8] sm:$0xff]  ;;  %v10636_v28 = vld [vmem:[%s10815_s7 + $0xb0] sm:$0xff] }
 0x14e   : > { %v1587_v51 = vpop.f32.mrf.mxu1 }
 0x14f   : > { %v12491_v21 = vadd.f32 %v9527_v27, %v1723_v9  ;;  %v1722_v54 = vadd.f32 %v1587_v51, %v12244_v31  ;;  %v9530_v4 = vpop.f32.mrf.mxu0  ;;  %9829 = vmatmul.mubr.msk.f32.gmra.mxu0 %vm361_vm1, %v10634_v52  ;;  %v15553_v27 = vld [vmem:[#allocation83_spill] sm:$0xff] }
 0x150   : > { %v9480_v61 = vpop.f32.mrf.mxu1  ;;  %9779 = vmatmul.mubr.msk.f32.gmra.mxu1 %vm361_vm1, %v15552_v39  ;;  %9831 = vmatprep.mubr.msk.f32.mxu0 %vm361_vm1, %v10635_v1 }
 0x151   : > { %v12500_v42 = vadd.f32 %v1991_v47, %v1722_v54  ;;  %v1725_v16 = vadd.f32 %v9480_v61, %v12249_v58  ;;  %v2001_v49 = vpop.f32.mrf.mxu0  ;;  %9781 = vmatprep.mubr.msk.f32.mxu1 %vm361_vm1, %v15553_v27  ;;  %v15555_v47 = vld [vmem:[#allocation125_spill] sm:$0xff]  ;;  %v15558_v27 = vld [vmem:[#allocation90_spill] sm:$0xff] }
 0x152   : > { %v1597_v31 = vpop.f32.mrf.mxu1 }
 0x153   : > { %v12505_v9 = vadd.f32 %v9530_v4, %v1725_v16  ;;  %v1724_v52 = vadd.f32 %v1597_v31, %v12258_v18  ;;  %v9533_v51 = vpop.f32.mrf.mxu0  ;;  %9832 = vmatmul.mubr.msk.f32.gmra.mxu0 %vm361_vm1, %v10636_v28  ;;  %v15556_v4 = vld [vmem:[#allocation87_spill] sm:$0xff]  ;;  %v15557_v31 = vld [vmem:[#allocation126_spill] sm:$0xff] }
 0x154   : > { %v9483_v39 = vpop.f32.mrf.mxu1  ;;  %9782 = vmatmul.mubr.msk.f32.gmra.mxu1 %vm361_vm1, %v15554_v37  ;;  %9834 = vmatprep.mubr.msk.f32.mxu0 %vm361_vm1, %v15555_v47 }
 0x155   : > { %v12514_v58 = vadd.f32 %v2001_v49, %v1724_v52  ;;  %v1727_v61 = vadd.f32 %v9483_v39, %v12263_v2  ;;  %v2011_v54 = vpop.f32.mrf.mxu0  ;;  %9784 = vmatprep.mubr.msk.f32.mxu1 %vm361_vm1, %v15556_v4  ;;  %v15559_v49 = vld [vmem:[#allocation127_spill] sm:$0xff]  ;;  %v15562_v4 = vld [vmem:[#allocation93_spill] sm:$0xff] }
 0x156   : > { %v1607_v18 = vpop.f32.mrf.mxu1 }
 0x157   : > { %v12519_v1 = vadd.f32 %v9533_v51, %v1727_v61  ;;  %v1726_v28 = vadd.f32 %v1607_v18, %v12272_v53  ;;  %v9536_v16 = vpop.f32.mrf.mxu0  ;;  %9835 = vmatmul.mubr.msk.f32.gmra.mxu0 %vm361_vm1, %v15557_v31  ;;  %v15560_v51 = vld [vmem:[#allocation91_spill] sm:$0xff]  ;;  %v15561_v31 = vld [vmem:[#allocation128_spill] sm:$0xff] }
 0x158   : > { %v9486_v37 = vpop.f32.mrf.mxu1  ;;  %9785 = vmatmul.mubr.msk.f32.gmra.mxu1 %vm361_vm1, %v15558_v27  ;;  %9837 = vmatprep.mubr.msk.f32.mxu0 %vm361_vm1, %v15559_v49 }
 0x159   : > { %v12528_v2 = vadd.f32 %v2011_v54, %v1726_v28  ;;  %v1729_v39 = vadd.f32 %v9486_v37, %v12277_v48  ;;  %v2021_v52 = vpop.f32.mrf.mxu0  ;;  %9787 = vmatprep.mubr.msk.f32.mxu1 %vm361_vm1, %v15560_v51  ;;  %v15563_v54 = vld [vmem:[#allocation129_spill] sm:$0xff]  ;;  %v15566_v51 = vld [vmem:[#allocation98_spill] sm:$0xff] }
 0x15a   : > { %v1617_v53 = vpop.f32.mrf.mxu1 }
 0x15b   : > { %v12533_v47 = vadd.f32 %v9536_v16, %v1729_v39  ;;  %v1728_v61 = vadd.f32 %v1617_v53, %v12286_v0  ;;  %v9539_v18 = vpop.f32.mrf.mxu0  ;;  %9838 = vmatmul.mubr.msk.f32.gmra.mxu0 %vm361_vm1, %v15561_v31  ;;  %v15564_v16 = vld [vmem:[#allocation95_spill] sm:$0xff]  ;;  %v15565_v31 = vld [vmem:[#allocation130_spill] sm:$0xff] }
 0x15c   : > { %v9489_v27 = vpop.f32.mrf.mxu1  ;;  %9788 = vmatmul.mubr.msk.f32.gmra.mxu1 %vm361_vm1, %v15562_v4  ;;  %9840 = vmatprep.mubr.msk.f32.mxu0 %vm361_vm1, %v15563_v54 }
 0x15d   : > { %v12542_v48 = vadd.f32 %v2021_v52, %v1728_v61  ;;  %v1731_v37 = vadd.f32 %v9489_v27, %v12291_v38  ;;  %v2031_v28 = vpop.f32.mrf.mxu0  ;;  %9790 = vmatprep.mubr.msk.f32.mxu1 %vm361_vm1, %v15564_v16  ;;  %v15567_v52 = vld [vmem:[#allocation131_spill] sm:$0xff]  ;;  %v15570_v16 = vld [vmem:[#allocation101_spill] sm:$0xff] }
 0x15e   : > { %v1627_v0 = vpop.f32.mrf.mxu1 }
 0x15f   : > { %v12547_v49 = vadd.f32 %v9539_v18, %v1731_v37  ;;  %v1730_v39 = vadd.f32 %v1627_v0, %v12300_v44  ;;  %v9542_v53 = vpop.f32.mrf.mxu0  ;;  %9841 = vmatmul.mubr.msk.f32.gmra.mxu0 %vm361_vm1, %v15565_v31  ;;  %v15568_v18 = vld [vmem:[#allocation99_spill] sm:$0xff]  ;;  %v15569_v31 = vld [vmem:[#allocation132_spill] sm:$0xff] }
 0x160   : > { %v9492_v4 = vpop.f32.mrf.mxu1  ;;  %9791 = vmatmul.mubr.msk.f32.gmra.mxu1 %vm361_vm1, %v15566_v51  ;;  %9843 = vmatprep.mubr.msk.f32.mxu0 %vm361_vm1, %v15567_v52 }
 0x161   : > { %v12556_v38 = vadd.f32 %v2031_v28, %v1730_v39  ;;  %v1733_v27 = vadd.f32 %v9492_v4, %v12305_v59  ;;  %v2041_v61 = vpop.f32.mrf.mxu0  ;;  %9793 = vmatprep.mubr.msk.f32.mxu1 %vm361_vm1, %v15568_v18  ;;  %v15571_v28 = vld [vmem:[#allocation133_spill] sm:$0xff]  ;;  %v15574_v18 = vld [vmem:[#allocation106_spill] sm:$0xff] }
 0x162   : > { %v1637_v44 = vpop.f32.mrf.mxu1 }
 0x163   : > { %v12561_v54 = vadd.f32 %v9542_v53, %v1733_v27  ;;  %v1732_v37 = vadd.f32 %v1637_v44, %v12314_v20  ;;  %v9545_v0 = vpop.f32.mrf.mxu0  ;;  %9844 = vmatmul.mubr.msk.f32.gmra.mxu0 %vm361_vm1, %v15569_v31  ;;  %v15572_v53 = vld [vmem:[#allocation103_spill] sm:$0xff]  ;;  %v15573_v31 = vld [vmem:[#allocation134_spill] sm:$0xff] }
 0x164   : > { %v9495_v51 = vpop.f32.mrf.mxu1  ;;  %9794 = vmatmul.mubr.msk.f32.gmra.mxu1 %vm361_vm1, %v15570_v16  ;;  %9846 = vmatprep.mubr.msk.f32.mxu0 %vm361_vm1, %v15571_v28 }
 0x165   : > { %v12570_v59 = vadd.f32 %v2041_v61, %v1732_v37  ;;  %v1735_v4 = vadd.f32 %v9495_v51, %v12319_v63  ;;  %v2051_v39 = vpop.f32.mrf.mxu0  ;;  %9796 = vmatprep.mubr.msk.f32.mxu1 %vm361_vm1, %v15572_v53  ;;  %v15575_v61 = vld [vmem:[#allocation135_spill] sm:$0xff]  ;;  %v15582_v53 = vld [vmem:[#allocation114_spill] sm:$0xff] }
 0x166   : > { %v1647_v20 = vpop.f32.mrf.mxu1 }
 0x167   : > { %v12575_v52 = vadd.f32 %v9545_v0, %v1735_v4  ;;  %v1734_v27 = vadd.f32 %v1647_v20, %v12328_v57  ;;  %v9548_v44 = vpop.f32.mrf.mxu0  ;;  %9847 = vmatmul.mubr.msk.f32.gmra.mxu0 %vm361_vm1, %v15573_v31  ;;  %v15576_v0 = vld [vmem:[#allocation107_spill] sm:$0xff]  ;;  %v15577_v31 = vld [vmem:[#allocation138_spill] sm:$0xff] }
 0x168   : > { %v9498_v16 = vpop.f32.mrf.mxu1  ;;  %9797 = vmatmul.mubr.msk.f32.gmra.mxu1 %vm361_vm1, %v15574_v18  ;;  %9849 = vmatprep.mubr.msk.f32.mxu0 %vm361_vm1, %v15575_v61  ;;  %v15578_v61 = vld [vmem:[#allocation109_spill] sm:$0xff] }
 0x169   : > { %v12584_v63 = vadd.f32 %v2051_v39, %v1734_v27  ;;  %v1737_v51 = vadd.f32 %v9498_v16, %v12333_v34  ;;  %v2061_v37 = vpop.f32.mrf.mxu0  ;;  %9799 = vmatprep.mubr.msk.f32.mxu1 %vm361_vm1, %v15576_v0  ;;  %v15579_v39 = vld [vmem:[#allocation139_spill] sm:$0xff] }
 0x16a   : > { %v1657_v57 = vpop.f32.mrf.mxu1  ;;  %v15581_v0 = vld [vmem:[#allocation143_spill] sm:$0xff] }
 0x16b   : > { %v12589_v28 = vadd.f32 %v9548_v44, %v1737_v51  ;;  %v1736_v4 = vadd.f32 %v1657_v57, %v12342_v50  ;;  %v9551_v20 = vpop.f32.mrf.mxu0  ;;  %9850 = vmatmul.mubr.msk.f32.gmra.mxu0 %vm361_vm1, %v15577_v31  ;;  %v15580_v44 = vld [vmem:[#allocation111_spill] sm:$0xff] }
 0x16c   : > { %v9501_v18 = vpop.f32.mrf.mxu1  ;;  %9800 = vmatmul.mubr.msk.f32.gmra.mxu1 %vm361_vm1, %v15578_v61  ;;  %9852 = vmatprep.mubr.msk.f32.mxu0 %vm361_vm1, %v15579_v39  ;;  %v3222_v39 = vrot.slane %v12077_v24, 4 }
 0x16d   : > { %v12598_v34 = vadd.f32 %v2061_v37, %v1736_v4  ;;  %v1739_v16 = vadd.f32 %v9501_v18, %v12347_v11  ;;  %v2071_v27 = vpop.f32.mrf.mxu0  ;;  %9802 = vmatprep.mubr.msk.f32.mxu1 %vm361_vm1, %v15580_v44  ;;  %v10637_v37 = vld [vmem:[%s10815_s7 + $0x168] sm:$0xff] }
 0x16e   : > { %v1667_v50 = vpop.f32.mrf.mxu1 }
 0x16f   : > { %v12603_v51 = vadd.f32 %v9551_v20, %v1739_v16  ;;  %v1738_v57 = vadd.f32 %v1667_v50, %v12356_v29  ;;  %v9554_v31 = vpop.f32.mrf.mxu0  ;;  %9853 = vmatmul.mubr.msk.f32.gmra.mxu0 %vm361_vm1, %v15581_v0  ;;  %v15583_v20 = vld [vmem:[#allocation115_spill] sm:$0xff]  ;;  %v3223_v0 = vrot.slane %v15520_v17, 4 }
 0x170   : > { %v9504_v61 = vpop.f32.mrf.mxu1  ;;  %9803 = vmatmul.mubr.msk.f32.gmra.mxu1 %vm361_vm1, %v15582_v53  ;;  %9855 = vmatprep.mubr.msk.f32.mxu0 %vm361_vm1, %v10637_v37  ;;  %v15584_v37 = vld [vmem:[#allocation147_spill] sm:$0xff] }
 0x171   : > { %v12612_v11 = vadd.f32 %v2071_v27, %v1738_v57  ;;  %v1741_v18 = vadd.f32 %v9504_v61, %v12365_v25  ;;  %v2081_v4 = vpop.f32.mrf.mxu0  ;;  %9805 = vmatprep.mubr.msk.f32.mxu1 %vm361_vm1, %v15583_v20  ;;  %v15585_v25 = vld [vmem:[#allocation117_spill] sm:$0xff]  ;;  %v12638_v20 = vsel %vm1748_vm4, %v3222_v39, %v3223_v0 }
 0x172   : > { %v1677_v29 = vpop.f32.mrf.mxu1  ;;  %15587 = vst [vmem:[#allocation141_spill] sm:$0xff] %v12638_v20 }
 0x173   : > { %v12619_v16 = vadd.f32 %v9554_v31, %v1741_v18  ;;  %v1740_v50 = vadd.f32 %v1677_v29, %v12375_v62  ;;  %v9557_v53 = vpop.f32.mrf.mxu0  ;;  %9856 = vmatmul.mubr.msk.f32.gmra.mxu0 %vm361_vm1, %v15584_v37  ;;  %v15586_v18 = vld [vmem:[#allocation119_spill] sm:$0xff]  ;;  %v12634_v62 = vld [vmem:[%s10815_s7 + $0x198] sm:$0xff]  ;;  %v3225_v29 = vrot.slane %v15525_v13, 4  ;;  %v12650_v13 = vld [vmem:[%s10815_s7 + $0x1a0] sm:$0xff] }
 0x174   : > { %v9507_v27 = vpop.f32.mrf.mxu1  ;;  %9806 = vmatmul.mubr.msk.f32.gmra.mxu1 %vm361_vm1, %v15585_v25  ;;  %9858 = vmatprep.mubr.msk.f32.mxu0 %vm361_vm1, %v12077_v24 }
 0x175   : > { %v12628_v61 = vadd.f32 %v2081_v4, %v1740_v50  ;;  %v1743_v57 = vadd.f32 %v9507_v27, %v12387_v26  ;;  %v2091_v31 = vpop.f32.mrf.mxu0  ;;  %9808 = vmatprep.mubr.msk.f32.mxu1 %vm361_vm1, %v15586_v18  ;;  %v15588_v50 = vld [vmem:[#allocation121_spill] sm:$0xff] }
 0x176   : > { %v1687_v37 = vpop.f32.mrf.mxu1 }
 0x177   : > { %v12640_v25 = vadd.f32 %v9557_v53, %v1743_v57  ;;  %v1742_v24 = vadd.f32 %v1687_v37, %v12399_v36  ;;  %v9560_v4 = vpop.f32.mrf.mxu0  ;;  %9859 = vmatmul.mubr.msk.f32.gmra.mxu0 %vm361_vm1, %v15520_v17  ;;  %v12658_v36 = vsel %vm1748_vm4, %v3223_v0, %v3225_v29 }
 0x178   : > { %v9510_v26 = vpop.f32.mrf.mxu1  ;;  %9809 = vmatmul.mubr.msk.f32.gmra.mxu1 %vm361_vm1, %v15588_v50  ;;  %9861 = vmatprep.mubr.msk.f32.mxu0 %vm361_vm1, %v12634_v62  ;;  %15589 = vst [vmem:[#allocation140_spill] sm:$0xff] %v12658_v36 }
 0x179   : > { %v12652_v27 = vadd.f32 %v2091_v31, %v1742_v24  ;;  %v1745_v53 = vadd.f32 %v9510_v26, %v12407_v8  ;;  %v2101_v39 = vpop.f32.mrf.mxu0  ;;  %9811 = vmatprep.mubr.msk.f32.mxu1 %vm361_vm1, %v12638_v20  ;;  %v15590_v24 = vld [vmem:[#allocation11_spill] sm:$0xff] }
 0x17a   : > { %v1697_v17 = vpop.f32.mrf.mxu1 }
 0x17b   : > { %v12660_v57 = vadd.f32 %v9560_v4, %v1745_v53  ;;  %v1744_v37 = vadd.f32 %v1697_v17, %v12416_v56  ;;  %v9563_v50 = vpop.f32.mrf.mxu0  ;;  %9862 = vmatmul.mubr.msk.f32.gmra.mxu0 %vm361_vm1, %v12650_v13  ;;  %v15591_v17 = vld [vmem:[#allocation40_spill] sm:$0xff] }
 0x17c   : > { %v9513_v31 = vpop.f32.mrf.mxu1  ;;  %9812 = vmatmul.mubr.msk.f32.gmra.mxu1 %vm361_vm1, %v12658_v36  ;;  %9916 = vmatprep.mubr.msk.f32.mxu0 %vm361_vm1, %v15496_v46  ;;  %v12682_v46 = vld [vmem:[%s14976_s1 + $0x78] sm:$0xff] }
 0x17d   : > { %v12669_v8 = vadd.f32 %v2101_v39, %v1744_v37  ;;  %v1747_v0 = vadd.f32 %v9513_v31, %v12421_v33  ;;  %v2111_v29 = vpop.f32.mrf.mxu0  ;;  %9866 = vmatprep.mubr.msk.f32.mxu1 %vm361_vm1, %v15590_v24  ;;  %v15592_v33 = vld [vmem:[#allocation13_spill] sm:$0xff] }
 0x17e   : > { %v1707_v56 = vpop.f32.mrf.mxu1 }
 0x17f   : > { %v12674_v4 = vadd.f32 %v9563_v50, %v1747_v0  ;;  %v1746_v26 = vadd.f32 %v1707_v56, %v12439_v6  ;;  %v9618_v53 = vpop.f32.mrf.mxu0  ;;  %9917 = vmatmul.mubr.msk.f32.vlgmr.msra.gmra.mxu0 %vm361_vm1, %v15591_v17  ;;  %v12690_v50 = vld [vmem:[%s14976_s1 + $0x80] sm:$0xff]  ;;  %v15593_v0 = vld [vmem:[#allocation15_spill] sm:$0xff] }
 0x180   : > { %v9568_v39 = vpop.f32.mrf.mxu1  ;;  %9867 = vmatmul.mubr.msk.f32.vlgmr.msra.gmra.mxu1 %vm361_vm1, %v15592_v33  ;;  %10015 = vmatpush3.msra.mxu0 %v12437_v60 }
 0x181   : > { %v12692_v6 = vadd.f32 %v2111_v29, %v1746_v26  ;;  %v2386_v37 = vadd.f32 %v9568_v39, %v12448_v14  ;;  %9965 = vmatpush3.msra.mxu1 %v12429_v12  ;;  %v2495_v31 = vpop.f32.mrf.mxu0  ;;  %9869 = vmatprep.mubr.msk.f32.mxu1 %vm361_vm1, %v15593_v0  ;;  %v15594_v14 = vld [vmem:[#allocation17_spill] sm:$0xff]  ;;  %v15595_v39 = vld [vmem:[#allocation19_spill] sm:$0xff] }
 0x182   : > { %v2226_v24 = vpop.f32.mrf.mxu1  ;;  %9919 = vmatprep.mubr.msk.f32.mxu0 %vm361_vm1, %v11240_v3  ;;  %10064 = vmatprep.subr.mxu1 %v12682_v46  ;;  %v15596_v3 = vld [vmem:[#allocation22_spill] sm:$0xff] }
 0x183   : > { %v12701_v60 = vadd.f32 %v9618_v53, %v2386_v37  ;;  %v2385_v56 = vadd.f32 %v2226_v24, %v12458_v35  ;;  %v9621_v29 = vpop.f32.mrf.mxu0  ;;  %9920 = vmatmul.mubr.msk.f32.gmra.mxu0 %vm361_vm1, %v15497_v7  ;;  %10114 = vmatprep.subr.mxu0 %v12690_v50 }
 0x184   : > { %v9571_v12 = vpop.f32.mrf.mxu1  ;;  %9870 = vmatmul.mubr.msk.f32.gmra.mxu1 %vm361_vm1, %v15594_v14  ;;  %9922 = vmatprep.mubr.msk.f32.mxu0 %vm361_vm1, %v15498_v41  ;;  %v15598_v41 = vld [vmem:[#allocation27_spill] sm:$0xff] }
 0x185   : > { %v12711_v26 = vadd.f32 %v2495_v31, %v2385_v56  ;;  %v2388_v53 = vadd.f32 %v9571_v12, %v12463_v30  ;;  %v2505_v17 = vpop.f32.mrf.mxu0  ;;  %9872 = vmatprep.mubr.msk.f32.mxu1 %vm361_vm1, %v15595_v39 }
 0x186   : > { %v2236_v35 = vpop.f32.mrf.mxu1 }
 0x187   : > { %v12716_v33 = vadd.f32 %v9621_v29, %v2388_v53  ;;  %v2387_v37 = vadd.f32 %v2236_v35, %v12472_v32  ;;  %v9624_v24 = vpop.f32.mrf.mxu0  ;;  %9923 = vmatmul.mubr.msk.f32.gmra.mxu0 %vm361_vm1, %v15499_v45  ;;  %v15597_v29 = vld [vmem:[#allocation24_spill] sm:$0xff] }
 0x188   : > { %v9574_v7 = vpop.f32.mrf.mxu1  ;;  %9873 = vmatmul.mubr.msk.f32.gmra.mxu1 %vm361_vm1, %v15596_v3  ;;  %9925 = vmatprep.mubr.msk.f32.mxu0 %vm361_vm1, %v15500_v23  ;;  %v15600_v23 = vld [vmem:[#allocation31_spill] sm:$0xff] }
 0x189   : > { %v12725_v30 = vadd.f32 %v2505_v17, %v2387_v37  ;;  %v2390_v31 = vadd.f32 %v9574_v7, %v12477_v5  ;;  %v2515_v56 = vpop.f32.mrf.mxu0  ;;  %9875 = vmatprep.mubr.msk.f32.mxu1 %vm361_vm1, %v15597_v29  ;;  %v15599_v37 = vld [vmem:[#allocation29_spill] sm:$0xff] }
 0x18a   : > { %v2246_v32 = vpop.f32.mrf.mxu1 }
 0x18b   : > { %v12730_v12 = vadd.f32 %v9624_v24, %v2390_v31  ;;  %v2389_v53 = vadd.f32 %v2246_v32, %v12486_v55  ;;  %v9627_v35 = vpop.f32.mrf.mxu0  ;;  %9926 = vmatmul.mubr.msk.f32.gmra.mxu0 %vm361_vm1, %v15501_v10 }
 0x18c   : > { %v9577_v45 = vpop.f32.mrf.mxu1  ;;  %9876 = vmatmul.mubr.msk.f32.gmra.mxu1 %vm361_vm1, %v15598_v41  ;;  %9928 = vmatprep.mubr.msk.f32.mxu0 %vm361_vm1, %v15502_v40  ;;  %v15602_v40 = vld [vmem:[#allocation35_spill] sm:$0xff]  ;;  %v15638_v41 = vld [vmem:[#allocation136_spill] sm:$0xff] }
 0x18d   : > { %v12739_v7 = vadd.f32 %v2515_v56, %v2389_v53  ;;  %v2392_v5 = vadd.f32 %v9577_v45, %v12491_v21  ;;  %v2525_v17 = vpop.f32.mrf.mxu0  ;;  %9878 = vmatprep.mubr.msk.f32.mxu1 %vm361_vm1, %v15599_v37  ;;  %v15601_v53 = vld [vmem:[#allocation33_spill] sm:$0xff]  ;;  %v15635_v37 = vld [vmem:[#allocation144_spill] sm:$0xff] }
 0x18e   : > { %v2256_v55 = vpop.f32.mrf.mxu1 }
 0x18f   : > { %v12744_v24 = vadd.f32 %v9627_v35, %v2392_v5  ;;  %v2391_v31 = vadd.f32 %v2256_v55, %v12500_v42  ;;  %v9630_v32 = vpop.f32.mrf.mxu0  ;;  %9929 = vmatmul.mubr.msk.f32.gmra.mxu0 %vm361_vm1, %v15503_v15 }
 0x190   : > { %v9580_v10 = vpop.f32.mrf.mxu1  ;;  %9879 = vmatmul.mubr.msk.f32.gmra.mxu1 %vm361_vm1, %v15600_v23  ;;  %9931 = vmatprep.mubr.msk.f32.mxu0 %vm361_vm1, %v15504_v22 }
 0x191   : > { %v12753_v45 = vadd.f32 %v2525_v17, %v2391_v31  ;;  %v2394_v21 = vadd.f32 %v9580_v10, %v12505_v9  ;;  %v2535_v56 = vpop.f32.mrf.mxu0  ;;  %9881 = vmatprep.mubr.msk.f32.mxu1 %vm361_vm1, %v15601_v53  ;;  %v15603_v31 = vld [vmem:[#allocation5_spill] sm:$0xff] }
 0x192   : > { %v2266_v42 = vpop.f32.mrf.mxu1 }
 0x193   : > { %v12758_v35 = vadd.f32 %v9630_v32, %v2394_v21  ;;  %v2393_v5 = vadd.f32 %v2266_v42, %v12514_v58  ;;  %v9633_v55 = vpop.f32.mrf.mxu0  ;;  %9932 = vmatmul.mubr.msk.f32.gmra.mxu0 %vm361_vm1, %v15505_v43  ;;  %v15604_v43 = vld [vmem:[#allocation52_spill] sm:$0xff] }
 0x194   : > { %v9583_v15 = vpop.f32.mrf.mxu1  ;;  %9882 = vmatmul.mubr.msk.f32.gmra.mxu1 %vm361_vm1, %v15602_v40  ;;  %9934 = vmatprep.mubr.msk.f32.mxu0 %vm361_vm1, %v15506_v19  ;;  %v15605_v40 = vld [vmem:[#allocation6_spill] sm:$0xff] }
 0x195   : > { %v12767_v10 = vadd.f32 %v2535_v56, %v2393_v5  ;;  %v2396_v9 = vadd.f32 %v9583_v15, %v12519_v1  ;;  %v2545_v17 = vpop.f32.mrf.mxu0  ;;  %9884 = vmatprep.mubr.msk.f32.mxu1 %vm361_vm1, %v15603_v31  ;;  %v15606_v56 = vld [vmem:[#allocation53_spill] sm:$0xff]  ;;  %v15608_v19 = vld [vmem:[#allocation54_spill] sm:$0xff] }
 0x196   : > { %v2276_v58 = vpop.f32.mrf.mxu1  ;;  %v15609_v31 = vld [vmem:[#allocation10_spill] sm:$0xff] }
 0x197   : > { %v12772_v32 = vadd.f32 %v9633_v55, %v2396_v9  ;;  %v2395_v21 = vadd.f32 %v2276_v58, %v12528_v2  ;;  %v9636_v42 = vpop.f32.mrf.mxu0  ;;  %9935 = vmatmul.mubr.msk.f32.gmra.mxu0 %vm361_vm1, %v15604_v43  ;;  %v15607_v55 = vld [vmem:[#allocation8_spill] sm:$0xff] }
 0x198   : > { %v9586_v22 = vpop.f32.mrf.mxu1  ;;  %9885 = vmatmul.mubr.msk.f32.gmra.mxu1 %vm361_vm1, %v15605_v40  ;;  %9937 = vmatprep.mubr.msk.f32.mxu0 %vm361_vm1, %v15606_v56  ;;  %v15612_v56 = vld [vmem:[#allocation56_spill] sm:$0xff] }
 0x199   : > { %v12781_v15 = vadd.f32 %v2545_v17, %v2395_v21  ;;  %v2398_v1 = vadd.f32 %v9586_v22, %v12533_v47  ;;  %v2555_v5 = vpop.f32.mrf.mxu0  ;;  %9887 = vmatprep.mubr.msk.f32.mxu1 %vm361_vm1, %v15607_v55  ;;  %v15610_v17 = vld [vmem:[#allocation55_spill] sm:$0xff]  ;;  %v15613_v55 = vld [vmem:[#allocation14_spill] sm:$0xff] }
 0x19a   : > { %v2286_v2 = vpop.f32.mrf.mxu1 }
 0x19b   : > { %v12786_v9 = vadd.f32 %v9636_v42, %v2398_v1  ;;  %v2397_v58 = vadd.f32 %v2286_v2, %v12542_v48  ;;  %v9639_v43 = vpop.f32.mrf.mxu0  ;;  %9938 = vmatmul.mubr.msk.f32.gmra.mxu0 %vm361_vm1, %v15608_v19  ;;  %v15611_v42 = vld [vmem:[#allocation12_spill] sm:$0xff] }
 0x19c   : > { %v9589_v40 = vpop.f32.mrf.mxu1  ;;  %9888 = vmatmul.mubr.msk.f32.gmra.mxu1 %vm361_vm1, %v15609_v31  ;;  %9940 = vmatprep.mubr.msk.f32.mxu0 %vm361_vm1, %v15610_v17  ;;  %v15616_v17 = vld [vmem:[#allocation58_spill] sm:$0xff] }
 0x19d   : > { %v12795_v22 = vadd.f32 %v2555_v5, %v2397_v58  ;;  %v2400_v47 = vadd.f32 %v9589_v40, %v12547_v49  ;;  %v2565_v21 = vpop.f32.mrf.mxu0  ;;  %9890 = vmatprep.mubr.msk.f32.mxu1 %vm361_vm1, %v15611_v42  ;;  %v15614_v5 = vld [vmem:[#allocation57_spill] sm:$0xff]  ;;  %v15617_v42 = vld [vmem:[#allocation18_spill] sm:$0xff] }
 0x19e   : > { %v2296_v48 = vpop.f32.mrf.mxu1 }
 0x19f   : > { %v12800_v1 = vadd.f32 %v9639_v43, %v2400_v47  ;;  %v2399_v2 = vadd.f32 %v2296_v48, %v12556_v38  ;;  %v9642_v19 = vpop.f32.mrf.mxu0  ;;  %9941 = vmatmul.mubr.msk.f32.gmra.mxu0 %vm361_vm1, %v15612_v56  ;;  %v15615_v43 = vld [vmem:[#allocation16_spill] sm:$0xff] }
 0x1a0   : > { %v9592_v31 = vpop.f32.mrf.mxu1  ;;  %9891 = vmatmul.mubr.msk.f32.gmra.mxu1 %vm361_vm1, %v15613_v55  ;;  %9943 = vmatprep.mubr.msk.f32.mxu0 %vm361_vm1, %v15614_v5  ;;  %v15620_v5 = vld [vmem:[#allocation60_spill] sm:$0xff] }
 0x1a1   : > { %v12809_v40 = vadd.f32 %v2565_v21, %v2399_v2  ;;  %v2402_v49 = vadd.f32 %v9592_v31, %v12561_v54  ;;  %v2575_v58 = vpop.f32.mrf.mxu0  ;;  %9893 = vmatprep.mubr.msk.f32.mxu1 %vm361_vm1, %v15615_v43  ;;  %v15618_v21 = vld [vmem:[#allocation59_spill] sm:$0xff] }
 0x1a2   : > { %v2306_v38 = vpop.f32.mrf.mxu1  ;;  %v15621_v43 = vld [vmem:[#allocation23_spill] sm:$0xff] }
 0x1a3   : > { %v12814_v47 = vadd.f32 %v9642_v19, %v2402_v49  ;;  %v2401_v48 = vadd.f32 %v2306_v38, %v12570_v59  ;;  %v9645_v56 = vpop.f32.mrf.mxu0  ;;  %9944 = vmatmul.mubr.msk.f32.gmra.mxu0 %vm361_vm1, %v15616_v17  ;;  %v15619_v19 = vld [vmem:[#allocation20_spill] sm:$0xff] }
 0x1a4   : > { %v9595_v55 = vpop.f32.mrf.mxu1  ;;  %9894 = vmatmul.mubr.msk.f32.gmra.mxu1 %vm361_vm1, %v15617_v42  ;;  %9946 = vmatprep.mubr.msk.f32.mxu0 %vm361_vm1, %v15618_v21  ;;  %v15624_v21 = vld [vmem:[#allocation21_spill] sm:$0xff] }
 0x1a5   : > { %v12823_v54 = vadd.f32 %v2575_v58, %v2401_v48  ;;  %v2404_v31 = vadd.f32 %v9595_v55, %v12575_v52  ;;  %v2585_v2 = vpop.f32.mrf.mxu0  ;;  %9896 = vmatprep.mubr.msk.f32.mxu1 %vm361_vm1, %v15619_v19  ;;  %v15622_v58 = vld [vmem:[#allocation61_spill] sm:$0xff]  ;;  %v15625_v19 = vld [vmem:[#allocation28_spill] sm:$0xff] }
 0x1a6   : > { %v2316_v59 = vpop.f32.mrf.mxu1 }
 0x1a7   : > { %v12828_v49 = vadd.f32 %v9645_v56, %v2404_v31  ;;  %v2403_v38 = vadd.f32 %v2316_v59, %v12584_v63  ;;  %v9648_v17 = vpop.f32.mrf.mxu0  ;;  %9947 = vmatmul.mubr.msk.f32.gmra.mxu0 %vm361_vm1, %v15620_v5  ;;  %v15623_v56 = vld [vmem:[#allocation26_spill] sm:$0xff] }
 0x1a8   : > { %v9598_v42 = vpop.f32.mrf.mxu1  ;;  %9897 = vmatmul.mubr.msk.f32.gmra.mxu1 %vm361_vm1, %v15621_v43  ;;  %9949 = vmatprep.mubr.msk.f32.mxu0 %vm361_vm1, %v15622_v58  ;;  %v15628_v58 = vld [vmem:[#allocation62_spill] sm:$0xff] }
 0x1a9   : > { %v12837_v52 = vadd.f32 %v2585_v2, %v2403_v38  ;;  %v2406_v55 = vadd.f32 %v9598_v42, %v12589_v28  ;;  %v2595_v48 = vpop.f32.mrf.mxu0  ;;  %9899 = vmatprep.mubr.msk.f32.mxu1 %vm361_vm1, %v15623_v56  ;;  %v15626_v2 = vld [vmem:[#allocation25_spill] sm:$0xff]  ;;  %v15634_v56 = vld [vmem:[#allocation39_spill] sm:$0xff] }
 0x1aa   : > { %v2326_v63 = vpop.f32.mrf.mxu1 }
 0x1ab   : > { %v12842_v31 = vadd.f32 %v9648_v17, %v2406_v55  ;;  %v2405_v59 = vadd.f32 %v2326_v63, %v12598_v34  ;;  %v9651_v5 = vpop.f32.mrf.mxu0  ;;  %9950 = vmatmul.mubr.msk.f32.gmra.mxu0 %vm361_vm1, %v15624_v21  ;;  %v15627_v17 = vld [vmem:[#allocation30_spill] sm:$0xff] }
 0x1ac   : > { %v9601_v43 = vpop.f32.mrf.mxu1  ;;  %9900 = vmatmul.mubr.msk.f32.gmra.mxu1 %vm361_vm1, %v15625_v19  ;;  %9952 = vmatprep.mubr.msk.f32.mxu0 %vm361_vm1, %v15626_v2  ;;  %v15629_v2 = vld [vmem:[#allocation32_spill] sm:$0xff] }
 0x1ad   : > { %v12851_v28 = vadd.f32 %v2595_v48, %v2405_v59  ;;  %v2408_v42 = vadd.f32 %v9601_v43, %v12603_v51  ;;  %v2605_v38 = vpop.f32.mrf.mxu0  ;;  %9902 = vmatprep.mubr.msk.f32.mxu1 %vm361_vm1, %v15627_v17  ;;  %v15630_v48 = vld [vmem:[#allocation63_spill] sm:$0xff]  ;;  %v3757_v17 = vrot.slane %v12650_v13, 1 }
 0x1ae   : > { %v2336_v34 = vpop.f32.mrf.mxu1 }
 0x1af   : > { %v12856_v55 = vadd.f32 %v9651_v5, %v2408_v42  ;;  %v2407_v63 = vadd.f32 %v2336_v34, %v12612_v11  ;;  %v9654_v21 = vpop.f32.mrf.mxu0  ;;  %9953 = vmatmul.mubr.msk.f32.gmra.mxu0 %vm361_vm1, %v15628_v58  ;;  %v15631_v5 = vld [vmem:[#allocation34_spill] sm:$0xff]  ;;  %v4024_v11 = vrot.slane %v12634_v62, 2  ;;  %v4025_v42 = vrot.slane %v12650_v13, 2 }
 0x1b0   : > { %v9604_v19 = vpop.f32.mrf.mxu1  ;;  %9903 = vmatmul.mubr.msk.f32.gmra.mxu1 %vm361_vm1, %v15629_v2  ;;  %9955 = vmatprep.mubr.msk.f32.mxu0 %vm361_vm1, %v15630_v48  ;;  %v12873_v34 = vld [vmem:[%s10815_s7 + $0x1a8] sm:$0xf]  ;;  %v3756_v2 = vrot.slane %v12634_v62, 1 }
 0x1b1   : > { %v12865_v51 = vadd.f32 %v2605_v38, %v2407_v63  ;;  %v2410_v43 = vadd.f32 %v9604_v19, %v12619_v16  ;;  %v2615_v59 = vpop.f32.mrf.mxu0  ;;  %9905 = vmatprep.mubr.msk.f32.mxu1 %vm361_vm1, %v15631_v5  ;;  %v15632_v19 = vld [vmem:[#allocation64_spill] sm:$0xff]  ;;  %v4027_v53 = vrot.slane %v12873_v34, 2 }
 0x1b2   : > { %v2346_v58 = vpop.f32.mrf.mxu1  ;;  %v15633_v5 = vld [vmem:[#allocation36_spill] sm:$0xff] }
 0x1b3   : > { %v12877_v48 = vadd.f32 %v9654_v21, %v2410_v43  ;;  %v2409_v38 = vadd.f32 %v2346_v58, %v12628_v61  ;;  %v9657_v16 = vpop.f32.mrf.mxu0  ;;  %9956 = vmatmul.mubr.msk.f32.gmra.mxu0 %vm361_vm1, %v15632_v19  ;;  %v12893_v61 = vsel %vm940_vm2, %v4024_v11, %v4025_v42  ;;  %v3759_v58 = vrot.slane %v12873_v34, 1 }
 0x1b4   : > { %v9607_v63 = vpop.f32.mrf.mxu1  ;;  %9906 = vmatmul.mubr.msk.f32.gmra.mxu1 %vm361_vm1, %v15633_v5  ;;  %9958 = vmatprep.mubr.msk.f32.mxu0 %vm361_vm1, %v15634_v56  ;;  %15636 = vst [vmem:[#allocation142_spill] sm:$0xff] %v12893_v61  ;;  %v12897_v5 = vsel %vm278_vm0, %v3756_v2, %v3757_v17  ;;  %v12909_v11 = vsel %vm940_vm2, %v4025_v42, %v4027_v53 }
 0x1b5   : > { %v12887_v23 = vadd.f32 %v2615_v59, %v2409_v38  ;;  %v2412_v21 = vadd.f32 %v9607_v63, %v12640_v25  ;;  %v2625_v43 = vpop.f32.mrf.mxu0  ;;  %9908 = vmatprep.mubr.msk.f32.mxu1 %vm361_vm1, %v15635_v37  ;;  %15637 = vst [vmem:[#allocation145_spill] sm:$0xff] %v12897_v5  ;;  %v15639_v63 = vld [vmem:[#allocation148_spill] sm:$0xff]  ;;  %15640 = vst [vmem:[#allocation146_spill] sm:$0xff] %v12909_v11 }
 0x1b6   : > { %v2356_v19 = vpop.f32.mrf.mxu1 }
 0x1b7   : > { %v12899_v56 = vadd.f32 %v9657_v16, %v2412_v21  ;;  %v2411_v59 = vadd.f32 %v2356_v19, %v12652_v27  ;;  %v9660_v38 = vpop.f32.mrf.mxu0  ;;  %9959 = vmatmul.mubr.msk.f32.gmra.mxu0 %vm361_vm1, %v15638_v41  ;;  %v12917_v27 = vsel %vm278_vm0, %v3757_v17, %v3759_v58  ;;  %v15643_v58 = vld [vmem:[#allocation68_spill] sm:$0xff] }
 0x1b8   : > { %v9610_v25 = vpop.f32.mrf.mxu1  ;;  %9909 = vmatmul.mubr.msk.f32.gmra.mxu1 %vm361_vm1, %v15639_v63  ;;  %9961 = vmatprep.mubr.msk.f32.mxu0 %vm361_vm1, %v12893_v61  ;;  %15641 = vst [vmem:[#allocation149_spill] sm:$0xff] %v12917_v27 }
 0x1b9   : > { %v12911_v2 = vadd.f32 %v2625_v43, %v2411_v59  ;;  %v2414_v16 = vadd.f32 %v9610_v25, %v12660_v57  ;;  %v2635_v21 = vpop.f32.mrf.mxu0  ;;  %9911 = vmatprep.mubr.msk.f32.mxu1 %vm361_vm1, %v12897_v5  ;;  %v15642_v57 = vld [vmem:[#allocation67_spill] sm:$0xff] }
 0x1ba   : > { %v2366_v19 = vpop.f32.mrf.mxu1 }
 0x1bb   : > { %v12919_v41 = vadd.f32 %v9660_v38, %v2414_v16  ;;  %v2413_v63 = vadd.f32 %v2366_v19, %v12669_v8  ;;  %v9663_v61 = vpop.f32.mrf.mxu0  ;;  %9962 = vmatmul.mubr.msk.f32.gmra.mxu0 %vm361_vm1, %v12909_v11  ;;  %v15644_v16 = vld [vmem:[#allocation69_spill] sm:$0xff] }
 0x1bc   : > { %v9613_v53 = vpop.f32.mrf.mxu1  ;;  %9912 = vmatmul.mubr.msk.f32.gmra.mxu1 %vm361_vm1, %v12917_v27  ;;  %10016 = vmatprep.mubr.msk.f32.mxu0 %vm361_vm1, %v15642_v57  ;;  %v15646_v57 = vld [vmem:[#allocation72_spill] sm:$0xff]  ;;  %v15652_v11 = vld [vmem:[#allocation77_spill] sm:$0xff] }
 0x1bd   : > { %v12928_v42 = vadd.f32 %v2635_v21, %v2413_v63  ;;  %v2416_v17 = vadd.f32 %v9613_v53, %v12674_v4  ;;  %v2645_v43 = vpop.f32.mrf.mxu0  ;;  %9966 = vmatprep.mubr.msk.f32.mxu1 %vm361_vm1, %v15643_v58  ;;  %v12941_v63 = vld [vmem:[%s14976_s1 + $0x88] sm:$0xff]  ;;  %v15647_v58 = vld [vmem:[#allocation71_spill] sm:$0xff] }
 0x1be   : > { %v2376_v8 = vpop.f32.mrf.mxu1  ;;  %v15645_v4 = vld [vmem:[#allocation70_spill] sm:$0xff] }
 0x1bf   : > { %v12933_v59 = vadd.f32 %v9663_v61, %v2416_v17  ;;  %v2415_v38 = vadd.f32 %v2376_v8, %v12692_v6  ;;  %v9718_v25 = vpop.f32.mrf.mxu0  ;;  %10017 = vmatmul.mubr.msk.f32.vlgmr.msra.gmra.mxu0 %vm361_vm1, %v15644_v16  ;;  %v12949_v61 = vld [vmem:[%s14976_s1 + $0x90] sm:$0xff] }
 0x1c0   : > { %v9668_v21 = vpop.f32.mrf.mxu1  ;;  %9967 = vmatmul.mubr.msk.f32.vlgmr.msra.gmra.mxu1 %vm361_vm1, %v15645_v4  ;;  %10115 = vmatpush3.msra.mxu0 %v12690_v50  ;;  %v15650_v16 = vld [vmem:[#allocation75_spill] sm:$0xff] }
 0x1c1   : > { %v12951_v6 = vadd.f32 %v2645_v43, %v2415_v38  ;;  %v2923_v19 = vadd.f32 %v9668_v21, %v12701_v60  ;;  %10065 = vmatpush3.msra.mxu1 %v12682_v46  ;;  %v3031_v53 = vpop.f32.mrf.mxu0  ;;  %9969 = vmatprep.mubr.msk.f32.mxu1 %vm361_vm1, %v15646_v57  ;;  %v15648_v38 = vld [vmem:[#allocation74_spill] sm:$0xff]  ;;  %v15649_v60 = vld [vmem:[#allocation73_spill] sm:$0xff] }
 0x1c2   : > { %v2763_v17 = vpop.f32.mrf.mxu1  ;;  %10019 = vmatprep.mubr.msk.f32.mxu0 %vm361_vm1, %v15647_v58  ;;  %10164 = vmatprep.subr.mxu1 %v12941_v63  ;;  %v15653_v57 = vld [vmem:[#allocation78_spill] sm:$0xff] }
 0x1c3   : > { %v12960_v50 = vadd.f32 %v9718_v25, %v2923_v19  ;;  %v2922_v8 = vadd.f32 %v2763_v17, %v12711_v26  ;;  %v9721_v43 = vpop.f32.mrf.mxu0  ;;  %10020 = vmatmul.mubr.msk.f32.gmra.mxu0 %vm361_vm1, %v15648_v38  ;;  %10214 = vmatprep.subr.mxu0 %v12949_v61  ;;  %v15651_v19 = vld [vmem:[#allocation76_spill] sm:$0xff] }
 0x1c4   : > { %v9671_v46 = vpop.f32.mrf.mxu1  ;;  %9970 = vmatmul.mubr.msk.f32.gmra.mxu1 %vm361_vm1, %v15649_v60  ;;  %10022 = vmatprep.mubr.msk.f32.mxu0 %vm361_vm1, %v15650_v16  ;;  %v15656_v16 = vld [vmem:[#allocation82_spill] sm:$0xff] }
 0x1c5   : > { %v12970_v21 = vadd.f32 %v3031_v53, %v2922_v8  ;;  %v2925_v25 = vadd.f32 %v9671_v46, %v12716_v33  ;;  %v3041_v4 = vpop.f32.mrf.mxu0  ;;  %9972 = vmatprep.mubr.msk.f32.mxu1 %vm361_vm1, %v15651_v19  ;;  %v15654_v53 = vld [vmem:[#allocation79_spill] sm:$0xff]  ;;  %v15657_v19 = vld [vmem:[#allocation81_spill] sm:$0xff] }
 0x1c6   : > { %v2773_v26 = vpop.f32.mrf.mxu1 }
 0x1c7   : > { %v12975_v17 = vadd.f32 %v9721_v43, %v2925_v25  ;;  %v2924_v38 = vadd.f32 %v2773_v26, %v12725_v30  ;;  %v9724_v58 = vpop.f32.mrf.mxu0  ;;  %10023 = vmatmul.mubr.msk.f32.gmra.mxu0 %vm361_vm1, %v15652_v11  ;;  %v15655_v43 = vld [vmem:[#allocation80_spill] sm:$0xff] }
 0x1c8   : > { %v9674_v60 = vpop.f32.mrf.mxu1  ;;  %9973 = vmatmul.mubr.msk.f32.gmra.mxu1 %vm361_vm1, %v15653_v57  ;;  %10025 = vmatprep.mubr.msk.f32.mxu0 %vm361_vm1, %v15654_v53  ;;  %v15660_v53 = vld [vmem:[#allocation85_spill] sm:$0xff] }
 0x1c9   : > { %v12984_v33 = vadd.f32 %v3041_v4, %v2924_v38  ;;  %v2927_v8 = vadd.f32 %v9674_v60, %v12730_v12  ;;  %v3051_v46 = vpop.f32.mrf.mxu0  ;;  %9975 = vmatprep.mubr.msk.f32.mxu1 %vm361_vm1, %v15655_v43  ;;  %v15658_v38 = vld [vmem:[#allocation83_spill] sm:$0xff]  ;;  %v15661_v43 = vld [vmem:[#allocation86_spill] sm:$0xff] }
 0x1ca   : > { %v2783_v30 = vpop.f32.mrf.mxu1 }
 0x1cb   : > { %v12989_v25 = vadd.f32 %v9724_v58, %v2927_v8  ;;  %v2926_v26 = vadd.f32 %v2783_v30, %v12739_v7  ;;  %v9727_v11 = vpop.f32.mrf.mxu0  ;;  %10026 = vmatmul.mubr.msk.f32.gmra.mxu0 %vm361_vm1, %v15656_v16  ;;  %v15659_v58 = vld [vmem:[#allocation84_spill] sm:$0xff] }
 0x1cc   : > { %v9677_v57 = vpop.f32.mrf.mxu1  ;;  %9976 = vmatmul.mubr.msk.f32.gmra.mxu1 %vm361_vm1, %v15657_v19  ;;  %10028 = vmatprep.mubr.msk.f32.mxu0 %vm361_vm1, %v15658_v38  ;;  %v15664_v38 = vld [vmem:[#allocation90_spill] sm:$0xff] }
 0x1cd   : > { %v12998_v12 = vadd.f32 %v3051_v46, %v2926_v26  ;;  %v2929_v60 = vadd.f32 %v9677_v57, %v12744_v24  ;;  %v3061_v4 = vpop.f32.mrf.mxu0  ;;  %9978 = vmatprep.mubr.msk.f32.mxu1 %vm361_vm1, %v15659_v58  ;;  %v15662_v46 = vld [vmem:[#allocation87_spill] sm:$0xff]  ;;  %v15665_v58 = vld [vmem:[#allocation89_spill] sm:$0xff] }
 0x1ce   : > { %v2793_v7 = vpop.f32.mrf.mxu1 }
 0x1cf   : > { %v13003_v8 = vadd.f32 %v9727_v11, %v2929_v60  ;;  %v2928_v30 = vadd.f32 %v2793_v7, %v12753_v45  ;;  %v9730_v16 = vpop.f32.mrf.mxu0  ;;  %10029 = vmatmul.mubr.msk.f32.gmra.mxu0 %vm361_vm1, %v15660_v53  ;;  %v15663_v11 = vld [vmem:[#allocation88_spill] sm:$0xff] }
 0x1d0   : > { %v9680_v19 = vpop.f32.mrf.mxu1  ;;  %9979 = vmatmul.mubr.msk.f32.gmra.mxu1 %vm361_vm1, %v15661_v43  ;;  %10031 = vmatprep.mubr.msk.f32.mxu0 %vm361_vm1, %v15662_v46  ;;  %v15668_v46 = vld [vmem:[#allocation93_spill] sm:$0xff] }
 0x1d1   : > { %v13012_v24 = vadd.f32 %v3061_v4, %v2928_v30  ;;  %v2931_v57 = vadd.f32 %v9680_v19, %v12758_v35  ;;  %v3071_v26 = vpop.f32.mrf.mxu0  ;;  %9981 = vmatprep.mubr.msk.f32.mxu1 %vm361_vm1, %v15663_v11  ;;  %v15666_v4 = vld [vmem:[#allocation91_spill] sm:$0xff]  ;;  %v15669_v11 = vld [vmem:[#allocation94_spill] sm:$0xff] }
 0x1d2   : > { %v2803_v45 = vpop.f32.mrf.mxu1 }
 0x1d3   : > { %v13017_v60 = vadd.f32 %v9730_v16, %v2931_v57  ;;  %v2930_v7 = vadd.f32 %v2803_v45, %v12767_v10  ;;  %v9733_v53 = vpop.f32.mrf.mxu0  ;;  %10032 = vmatmul.mubr.msk.f32.gmra.mxu0 %vm361_vm1, %v15664_v38  ;;  %v15667_v16 = vld [vmem:[#allocation92_spill] sm:$0xff] }
 0x1d4   : > { %v9683_v43 = vpop.f32.mrf.mxu1  ;;  %9982 = vmatmul.mubr.msk.f32.gmra.mxu1 %vm361_vm1, %v15665_v58  ;;  %10034 = vmatprep.mubr.msk.f32.mxu0 %vm361_vm1, %v15666_v4  ;;  %v15672_v4 = vld [vmem:[#allocation98_spill] sm:$0xff] }
 0x1d5   : > { %v13026_v35 = vadd.f32 %v3071_v26, %v2930_v7  ;;  %v2933_v19 = vadd.f32 %v9683_v43, %v12772_v32  ;;  %v3081_v30 = vpop.f32.mrf.mxu0  ;;  %9984 = vmatprep.mubr.msk.f32.mxu1 %vm361_vm1, %v15667_v16  ;;  %v15670_v26 = vld [vmem:[#allocation95_spill] sm:$0xff]  ;;  %v15673_v16 = vld [vmem:[#allocation97_spill] sm:$0xff] }
 0x1d6   : > { %v2813_v10 = vpop.f32.mrf.mxu1 }
 0x1d7   : > { %v13031_v57 = vadd.f32 %v9733_v53, %v2933_v19  ;;  %v2932_v45 = vadd.f32 %v2813_v10, %v12781_v15  ;;  %v9736_v38 = vpop.f32.mrf.mxu0  ;;  %10035 = vmatmul.mubr.msk.f32.gmra.mxu0 %vm361_vm1, %v15668_v46  ;;  %v15671_v53 = vld [vmem:[#allocation96_spill] sm:$0xff] }
 0x1d8   : > { %v9686_v58 = vpop.f32.mrf.mxu1  ;;  %9985 = vmatmul.mubr.msk.f32.gmra.mxu1 %vm361_vm1, %v15669_v11  ;;  %10037 = vmatprep.mubr.msk.f32.mxu0 %vm361_vm1, %v15670_v26  ;;  %v15676_v26 = vld [vmem:[#allocation101_spill] sm:$0xff] }
 0x1d9   : > { %v13040_v32 = vadd.f32 %v3081_v30, %v2932_v45  ;;  %v2935_v43 = vadd.f32 %v9686_v58, %v12786_v9  ;;  %v3091_v7 = vpop.f32.mrf.mxu0  ;;  %9987 = vmatprep.mubr.msk.f32.mxu1 %vm361_vm1, %v15671_v53  ;;  %v15674_v30 = vld [vmem:[#allocation99_spill] sm:$0xff]  ;;  %v15677_v53 = vld [vmem:[#allocation102_spill] sm:$0xff] }
 0x1da   : > { %v2823_v15 = vpop.f32.mrf.mxu1 }
 0x1db   : > { %v13045_v19 = vadd.f32 %v9736_v38, %v2935_v43  ;;  %v2934_v10 = vadd.f32 %v2823_v15, %v12795_v22  ;;  %v9739_v46 = vpop.f32.mrf.mxu0  ;;  %10038 = vmatmul.mubr.msk.f32.gmra.mxu0 %vm361_vm1, %v15672_v4  ;;  %v15675_v38 = vld [vmem:[#allocation100_spill] sm:$0xff] }
 0x1dc   : > { %v9689_v11 = vpop.f32.mrf.mxu1  ;;  %9988 = vmatmul.mubr.msk.f32.gmra.mxu1 %vm361_vm1, %v15673_v16  ;;  %10040 = vmatprep.mubr.msk.f32.mxu0 %vm361_vm1, %v15674_v30  ;;  %v15680_v30 = vld [vmem:[#allocation106_spill] sm:$0xff] }
 0x1dd   : > { %v13054_v9 = vadd.f32 %v3091_v7, %v2934_v10  ;;  %v2937_v58 = vadd.f32 %v9689_v11, %v12800_v1  ;;  %v3101_v45 = vpop.f32.mrf.mxu0  ;;  %9990 = vmatprep.mubr.msk.f32.mxu1 %vm361_vm1, %v15675_v38  ;;  %v15678_v7 = vld [vmem:[#allocation103_spill] sm:$0xff]  ;;  %v15681_v38 = vld [vmem:[#allocation105_spill] sm:$0xff] }
 0x1de   : > { %v2833_v22 = vpop.f32.mrf.mxu1 }
 0x1df   : > { %v13059_v43 = vadd.f32 %v9739_v46, %v2937_v58  ;;  %v2936_v15 = vadd.f32 %v2833_v22, %v12809_v40  ;;  %v9742_v4 = vpop.f32.mrf.mxu0  ;;  %10041 = vmatmul.mubr.msk.f32.gmra.mxu0 %vm361_vm1, %v15676_v26  ;;  %v15679_v46 = vld [vmem:[#allocation104_spill] sm:$0xff] }
 0x1e0   : > { %v9692_v16 = vpop.f32.mrf.mxu1  ;;  %9991 = vmatmul.mubr.msk.f32.gmra.mxu1 %vm361_vm1, %v15677_v53  ;;  %10043 = vmatprep.mubr.msk.f32.mxu0 %vm361_vm1, %v15678_v7  ;;  %v15684_v7 = vld [vmem:[#allocation109_spill] sm:$0xff] }
 0x1e1   : > { %v13068_v1 = vadd.f32 %v3101_v45, %v2936_v15  ;;  %v2939_v11 = vadd.f32 %v9692_v16, %v12814_v47  ;;  %v3111_v10 = vpop.f32.mrf.mxu0  ;;  %9993 = vmatprep.mubr.msk.f32.mxu1 %vm361_vm1, %v15679_v46  ;;  %v15682_v45 = vld [vmem:[#allocation107_spill] sm:$0xff]  ;;  %v15685_v46 = vld [vmem:[#allocation110_spill] sm:$0xff] }
 0x1e2   : > { %v2843_v40 = vpop.f32.mrf.mxu1 }
 0x1e3   : > { %v13073_v58 = vadd.f32 %v9742_v4, %v2939_v11  ;;  %v2938_v22 = vadd.f32 %v2843_v40, %v12823_v54  ;;  %v9745_v26 = vpop.f32.mrf.mxu0  ;;  %10044 = vmatmul.mubr.msk.f32.gmra.mxu0 %vm361_vm1, %v15680_v30  ;;  %v15683_v4 = vld [vmem:[#allocation108_spill] sm:$0xff] }
 0x1e4   : > { %v9695_v53 = vpop.f32.mrf.mxu1  ;;  %9994 = vmatmul.mubr.msk.f32.gmra.mxu1 %vm361_vm1, %v15681_v38  ;;  %10046 = vmatprep.mubr.msk.f32.mxu0 %vm361_vm1, %v15682_v45 }
 0x1e5   : > { %v13082_v47 = vadd.f32 %v3111_v10, %v2938_v22  ;;  %v2941_v16 = vadd.f32 %v9695_v53, %v12828_v49  ;;  %v3121_v15 = vpop.f32.mrf.mxu0  ;;  %9996 = vmatprep.mubr.msk.f32.mxu1 %vm361_vm1, %v15683_v4 }
 0x1e6   : > { %v2853_v54 = vpop.f32.mrf.mxu1 }
 0x1e7   : > { %v13087_v11 = vadd.f32 %v9745_v26, %v2941_v16  ;;  %v2940_v40 = vadd.f32 %v2853_v54, %v12837_v52  ;;  %v9748_v30 = vpop.f32.mrf.mxu0  ;;  %10047 = vmatmul.mubr.msk.f32.gmra.mxu0 %vm361_vm1, %v15684_v7  ;;  %v15686_v26 = vld [vmem:[#allocation112_spill] sm:$0xff]  ;;  %v15687_v7 = vld [vmem:[#allocation114_spill] sm:$0xff] }
 0x1e8   : > { %v9698_v38 = vpop.f32.mrf.mxu1  ;;  %9997 = vmatmul.mubr.msk.f32.gmra.mxu1 %vm361_vm1, %v15685_v46  ;;  %10049 = vmatprep.mubr.msk.f32.mxu0 %vm361_vm1, %v15580_v44  ;;  %v15688_v46 = vld [vmem:[#allocation113_spill] sm:$0xff] }
 0x1e9   : > { %v13096_v49 = vadd.f32 %v3121_v15, %v2940_v40  ;;  %v2943_v53 = vadd.f32 %v9698_v38, %v12842_v31  ;;  %v3131_v10 = vpop.f32.mrf.mxu0  ;;  %9999 = vmatprep.mubr.msk.f32.mxu1 %vm361_vm1, %v15686_v26  ;;  %v15689_v15 = vld [vmem:[#allocation115_spill] sm:$0xff]  ;;  %v15691_v44 = vld [vmem:[#allocation117_spill] sm:$0xff]  ;;  %v15692_v26 = vld [vmem:[#allocation118_spill] sm:$0xff] }
 0x1ea   : > { %v2863_v52 = vpop.f32.mrf.mxu1 }
 0x1eb   : > { %v13101_v22 = vadd.f32 %v9748_v30, %v2943_v53  ;;  %v2942_v16 = vadd.f32 %v2863_v52, %v12851_v28  ;;  %v9751_v54 = vpop.f32.mrf.mxu0  ;;  %10050 = vmatmul.mubr.msk.f32.gmra.mxu0 %vm361_vm1, %v15687_v7  ;;  %v15690_v30 = vld [vmem:[#allocation116_spill] sm:$0xff] }
 0x1ec   : > { %v9701_v45 = vpop.f32.mrf.mxu1  ;;  %10000 = vmatmul.mubr.msk.f32.gmra.mxu1 %vm361_vm1, %v15688_v46  ;;  %10052 = vmatprep.mubr.msk.f32.mxu0 %vm361_vm1, %v15689_v15 }
 0x1ed   : > { %v13110_v31 = vadd.f32 %v3131_v10, %v2942_v16  ;;  %v2945_v38 = vadd.f32 %v9701_v45, %v12856_v55  ;;  %v3141_v40 = vpop.f32.mrf.mxu0  ;;  %10002 = vmatprep.mubr.msk.f32.mxu1 %vm361_vm1, %v15690_v30  ;;  %v15693_v16 = vld [vmem:[#allocation120_spill] sm:$0xff] }
 0x1ee   : > { %v2873_v28 = vpop.f32.mrf.mxu1 }
 0x1ef   : > { %v13115_v53 = vadd.f32 %v9751_v54, %v2945_v38  ;;  %v2944_v52 = vadd.f32 %v2873_v28, %v12865_v51  ;;  %v9754_v7 = vpop.f32.mrf.mxu0  ;;  %10053 = vmatmul.mubr.msk.f32.gmra.mxu0 %vm361_vm1, %v15691_v44  ;;  %v4560_v51 = vrot.slane %v12634_v62, 4  ;;  %v4561_v54 = vrot.slane %v12650_v13, 4 }
 0x1f0   : > { %v9704_v46 = vpop.f32.mrf.mxu1  ;;  %10003 = vmatmul.mubr.msk.f32.gmra.mxu1 %vm361_vm1, %v15692_v26  ;;  %10055 = vmatprep.mubr.msk.f32.mxu0 %vm361_vm1, %v15586_v18  ;;  %v4292_v28 = vrot.slane %v12634_v62, 3  ;;  %v4293_v44 = vrot.slane %v12650_v13, 3  ;;  %v15694_v18 = vld [vmem:[#allocation121_spill] sm:$0xff] }
 0x1f1   : > { %v13124_v55 = vadd.f32 %v3141_v40, %v2944_v52  ;;  %v2947_v45 = vadd.f32 %v9704_v46, %v12877_v48  ;;  %v3151_v10 = vpop.f32.mrf.mxu0  ;;  %10005 = vmatprep.mubr.msk.f32.mxu1 %vm361_vm1, %v15693_v16  ;;  %v15695_v46 = vld [vmem:[#allocation122_spill] sm:$0xff]  ;;  %v4563_v16 = vrot.slane %v12873_v34, 4 }
 0x1f2   : > { %v2883_v38 = vpop.f32.mrf.mxu1 }
 0x1f3   : > { %v13133_v15 = vadd.f32 %v9754_v7, %v2947_v45  ;;  %v2946_v40 = vadd.f32 %v2883_v38, %v12887_v23  ;;  %v9757_v52 = vpop.f32.mrf.mxu0  ;;  %10056 = vmatmul.mubr.msk.f32.gmra.mxu0 %vm361_vm1, %v15694_v18  ;;  %v15696_v45 = vld [vmem:[#allocation38_spill] sm:$0xff]  ;;  %v13149_v23 = vsel %vm1748_vm4, %v4560_v51, %v4561_v54  ;;  %v4295_v38 = vrot.slane %v12873_v34, 3 }
 0x1f4   : > { %v9707_v48 = vpop.f32.mrf.mxu1  ;;  %10006 = vmatmul.mubr.msk.f32.gmra.mxu1 %vm361_vm1, %v15695_v46  ;;  %10058 = vmatprep.mubr.msk.f32.mxu0 %vm361_vm1, %v12638_v20  ;;  %15697 = vst [vmem:[#allocation7_spill] sm:$0xff] %v13149_v23  ;;  %v13153_v46 = vsel %vm1344_vm3, %v4292_v28, %v4293_v44  ;;  %v13165_v34 = vsel %vm1748_vm4, %v4561_v54, %v4563_v16 }
 0x1f5   : > { %v13143_v62 = vadd.f32 %v3151_v10, %v2946_v40  ;;  %v2949_v13 = vadd.f32 %v9707_v48, %v12899_v56  ;;  %v3161_v7 = vpop.f32.mrf.mxu0  ;;  %10008 = vmatprep.mubr.msk.f32.mxu1 %vm361_vm1, %v15696_v45  ;;  %15698 = vst [vmem:[#allocation150_spill] sm:$0xff] %v13153_v46  ;;  %v15699_v48 = vld [vmem:[#allocation137_spill] sm:$0xff]  ;;  %15700 = vst [vmem:[#allocation65_spill] sm:$0xff] %v13165_v34 }
 0x1f6   : > { %v2893_v18 = vpop.f32.mrf.mxu1 }
 0x1f7   : > { %v13155_v20 = vadd.f32 %v9757_v52, %v2949_v13  ;;  %v2948_v10 = vadd.f32 %v2893_v18, %v12911_v2  ;;  %v9760_v40 = vpop.f32.mrf.mxu0  ;;  %10059 = vmatmul.mubr.msk.f32.gmra.mxu0 %vm361_vm1, %v12658_v36  ;;  %v13173_v2 = vsel %vm1344_vm3, %v4293_v44, %v4295_v38 }
 0x1f8   : > { %v9710_v56 = vpop.f32.mrf.mxu1  ;;  %10009 = vmatmul.mubr.msk.f32.gmra.mxu1 %vm361_vm1, %v15699_v48  ;;  %10061 = vmatprep.mubr.msk.f32.mxu0 %vm361_vm1, %v13149_v23  ;;  %15701 = vst [vmem:[#allocation37_spill] sm:$0xff] %v13173_v2 }
 0x1f9   : > { %v13167_v51 = vadd.f32 %v3161_v7, %v2948_v10  ;;  %v2951_v28 = vadd.f32 %v9710_v56, %v12919_v41  ;;  %v3171_v18 = vpop.f32.mrf.mxu0  ;;  %10011 = vmatprep.mubr.msk.f32.mxu1 %vm361_vm1, %v13153_v46  ;;  %v10638_v7 = vld [vmem:[%s10815_s7 + $0x48] sm:$0xff] }
 0x1fa   : > { %v2903_v52 = vpop.f32.mrf.mxu1 }
 0x1fb   : > { %v13175_v13 = vadd.f32 %v9760_v40, %v2951_v28  ;;  %v2950_v23 = vadd.f32 %v2903_v52, %v12928_v42  ;;  %v9763_v36 = vpop.f32.mrf.mxu0  ;;  %10062 = vmatmul.mubr.msk.f32.gmra.mxu0 %vm361_vm1, %v13165_v34  ;;  %v13212_v28 = vld [vmem:[%s10815_s7 + $0x60] sm:$0xff] }
 0x1fc   : > { %v9713_v16 = vpop.f32.mrf.mxu1  ;;  %10012 = vmatmul.mubr.msk.f32.gmra.mxu1 %vm361_vm1, %v13173_v2  ;;  %10116 = vmatprep.mubr.msk.f32.mxu0 %vm361_vm1, %v15593_v0  ;;  %v13197_v0 = vld [vmem:[%s14976_s1 + $0x98] sm:$0xff] }
 0x1fd   : > { %v13184_v41 = vadd.f32 %v3171_v18, %v2950_v23  ;;  %v2953_v44 = vadd.f32 %v9713_v16, %v12933_v59  ;;  %v3181_v54 = vpop.f32.mrf.mxu0  ;;  %10066 = vmatprep.mubr.msk.f32.mxu1 %vm361_vm1, %v10638_v7  ;;  %v10639_v23 = vld [vmem:[%s10815_s7 + $0x50] sm:$0xff]  ;;  %v13226_v16 = vld [vmem:[%s10815_s7 + $0x68] sm:$0xff]  ;;  %v13236_v7 = vld [vmem:[%s10815_s7 + $0x78] sm:$0xff] }
 0x1fe   : > { %v2913_v42 = vpop.f32.mrf.mxu1 }
 0x1ff   : > { %v13189_v38 = vadd.f32 %v9763_v36, %v2953_v44  ;;  %v2952_v10 = vadd.f32 %v2913_v42, %v12951_v6  ;;  %v9818_v40 = vpop.f32.mrf.mxu0  ;;  %10117 = vmatmul.mubr.msk.f32.vlgmr.msra.gmra.mxu0 %vm361_vm1, %v15594_v14  ;;  %v13205_v36 = vld [vmem:[%s14976_s1 + $0xa0] sm:$0xff] }
 0x200   : > { %v9768_v59 = vpop.f32.mrf.mxu1  ;;  %10067 = vmatmul.mubr.msk.f32.vlgmr.msra.gmra.mxu1 %vm361_vm1, %v10639_v23  ;;  %10215 = vmatpush3.msra.mxu0 %v12949_v61  ;;  %v15702_v23 = vld [vmem:[#allocation27_spill] sm:$0xff] }
 0x201   : > { %v13207_v6 = vadd.f32 %v3181_v54, %v2952_v10  ;;  %v3459_v14 = vadd.f32 %v9768_v59, %v12960_v50  ;;  %10165 = vmatpush3.msra.mxu1 %v12941_v63  ;;  %v3564_v56 = vpop.f32.mrf.mxu0  ;;  %10069 = vmatprep.mubr.msk.f32.mxu1 %vm361_vm1, %v13212_v28 }
 0x202   : > { %v3299_v61 = vpop.f32.mrf.mxu1  ;;  %10119 = vmatprep.mubr.msk.f32.mxu0 %vm361_vm1, %v15595_v39  ;;  %10264 = vmatprep.subr.mxu1 %v13197_v0  ;;  %v15709_v39 = vld [vmem:[#allocation35_spill] sm:$0xff] }
 0x203   : > { %v13219_v18 = vadd.f32 %v9818_v40, %v3459_v14  ;;  %v3458_v52 = vadd.f32 %v3299_v61, %v12970_v21  ;;  %v9821_v50 = vpop.f32.mrf.mxu0  ;;  %10120 = vmatmul.mubr.msk.f32.gmra.mxu0 %vm361_vm1, %v15596_v3  ;;  %10314 = vmatprep.subr.mxu0 %v13205_v36 }
 0x204   : > { %v9771_v63 = vpop.f32.mrf.mxu1  ;;  %10070 = vmatmul.mubr.msk.f32.gmra.mxu1 %vm361_vm1, %v13226_v16  ;;  %10122 = vmatprep.mubr.msk.f32.mxu0 %vm361_vm1, %v15597_v29  ;;  %v15705_v29 = vld [vmem:[#allocation31_spill] sm:$0xff] }
 0x205   : > { %v13232_v44 = vadd.f32 %v3564_v56, %v3458_v52  ;;  %v3461_v21 = vadd.f32 %v9771_v63, %v12975_v17  ;;  %v3574_v54 = vpop.f32.mrf.mxu0  ;;  %10072 = vmatprep.mubr.msk.f32.mxu1 %vm361_vm1, %v13236_v7  ;;  %v13246_v56 = vld [vmem:[%s10815_s7 + $0x80] sm:$0xff] }
 0x206   : > { %v3309_v42 = vpop.f32.mrf.mxu1  ;;  %v15703_v17 = vld [vmem:[#allocation29_spill] sm:$0xff] }
 0x207   : > { %v13240_v10 = vadd.f32 %v9821_v50, %v3461_v21  ;;  %v3460_v40 = vadd.f32 %v3309_v42, %v12984_v33  ;;  %v9824_v59 = vpop.f32.mrf.mxu0  ;;  %10123 = vmatmul.mubr.msk.f32.gmra.mxu0 %vm361_vm1, %v15702_v23  ;;  %v13256_v50 = vld [vmem:[%s10815_s7 + $0x90] sm:$0xff] }
 0x208   : > { %v9774_v14 = vpop.f32.mrf.mxu1  ;;  %10073 = vmatmul.mubr.msk.f32.gmra.mxu1 %vm361_vm1, %v13246_v56  ;;  %10125 = vmatprep.mubr.msk.f32.mxu0 %vm361_vm1, %v15703_v17  ;;  %15704 = vst [vmem:[#allocation9_spill] sm:$0xff] %v13256_v50 }
 0x209   : > { %v13252_v61 = vadd.f32 %v3574_v54, %v3460_v40  ;;  %v3463_v52 = vadd.f32 %v9774_v14, %v12989_v25  ;;  %v3584_v33 = vpop.f32.mrf.mxu0  ;;  %10075 = vmatprep.mubr.msk.f32.mxu1 %vm361_vm1, %v13256_v50  ;;  %v13266_v40 = vld [vmem:[%s10815_s7 + $0x98] sm:$0xff]  ;;  %v15707_v25 = vld [vmem:[#allocation33_spill] sm:$0xff] }
 0x20a   : > { %v3319_v63 = vpop.f32.mrf.mxu1  ;;  %15706 = vst [vmem:[#allocation66_spill] sm:$0xff] %v13266_v40 }
 0x20b   : > { %v13260_v21 = vadd.f32 %v9824_v59, %v3463_v52  ;;  %v3462_v42 = vadd.f32 %v3319_v63, %v12998_v12  ;;  %v9827_v23 = vpop.f32.mrf.mxu0  ;;  %10126 = vmatmul.mubr.msk.f32.gmra.mxu0 %vm361_vm1, %v15705_v29  ;;  %v13276_v52 = vld [vmem:[%s10815_s7 + $0xa8] sm:$0xff] }
 0x20c   : > { %v9777_v54 = vpop.f32.mrf.mxu1  ;;  %10076 = vmatmul.mubr.msk.f32.gmra.mxu1 %vm361_vm1, %v13266_v40  ;;  %10128 = vmatprep.mubr.msk.f32.mxu0 %vm361_vm1, %v15707_v25  ;;  %15708 = vst [vmem:[#allocation123_spill] sm:$0xff] %v13276_v52 }
 0x20d   : > { %v13272_v14 = vadd.f32 %v3584_v33, %v3462_v42  ;;  %v3465_v59 = vadd.f32 %v9777_v54, %v13003_v8  ;;  %v3594_v12 = vpop.f32.mrf.mxu0  ;;  %10078 = vmatprep.mubr.msk.f32.mxu1 %vm361_vm1, %v13276_v52  ;;  %v13286_v42 = vld [vmem:[%s10815_s7 + $0xb0] sm:$0xff]  ;;  %v15711_v8 = vld [vmem:[#allocation5_spill] sm:$0xff] }
 0x20e   : > { %v3329_v63 = vpop.f32.mrf.mxu1  ;;  %15710 = vst [vmem:[#allocation124_spill] sm:$0xff] %v13286_v42 }
 0x20f   : > { %v13280_v29 = vadd.f32 %v9827_v23, %v3465_v59  ;;  %v3464_v17 = vadd.f32 %v3329_v63, %v13012_v24  ;;  %v9830_v3 = vpop.f32.mrf.mxu0  ;;  %10129 = vmatmul.mubr.msk.f32.gmra.mxu0 %vm361_vm1, %v15709_v39  ;;  %v13296_v59 = vld [vmem:[%s10815_s7 + $0xc0] sm:$0xff] }
 0x210   : > { %v9780_v33 = vpop.f32.mrf.mxu1  ;;  %10079 = vmatmul.mubr.msk.f32.gmra.mxu1 %vm361_vm1, %v13286_v42  ;;  %10131 = vmatprep.mubr.msk.f32.mxu0 %vm361_vm1, %v15711_v8  ;;  %15712 = vst [vmem:[#allocation125_spill] sm:$0xff] %v13296_v59  ;;  %v15713_v42 = vld [vmem:[#allocation6_spill] sm:$0xff] }
 0x211   : > { %v13292_v54 = vadd.f32 %v3594_v12, %v3464_v17  ;;  %v3467_v23 = vadd.f32 %v9780_v33, %v13017_v60  ;;  %v3604_v24 = vpop.f32.mrf.mxu0  ;;  %10081 = vmatprep.mubr.msk.f32.mxu1 %vm361_vm1, %v13296_v59  ;;  %v13306_v12 = vld [vmem:[%s10815_s7 + $0xc8] sm:$0xff]  ;;  %v15715_v60 = vld [vmem:[#allocation8_spill] sm:$0xff] }
 0x212   : > { %v3339_v63 = vpop.f32.mrf.mxu1  ;;  %15714 = vst [vmem:[#allocation126_spill] sm:$0xff] %v13306_v12  ;;  %v15717_v59 = vld [vmem:[#allocation10_spill] sm:$0xff] }
 0x213   : > { %v13300_v39 = vadd.f32 %v9830_v3, %v3467_v23  ;;  %v3466_v25 = vadd.f32 %v3339_v63, %v13026_v35  ;;  %v9833_v34 = vpop.f32.mrf.mxu0  ;;  %10132 = vmatmul.mubr.msk.f32.gmra.mxu0 %vm361_vm1, %v15713_v42  ;;  %v13316_v23 = vld [vmem:[%s10815_s7 + $0xd8] sm:$0xff] }
 0x214   : > { %v9783_v17 = vpop.f32.mrf.mxu1  ;;  %10082 = vmatmul.mubr.msk.f32.gmra.mxu1 %vm361_vm1, %v13306_v12  ;;  %10134 = vmatprep.mubr.msk.f32.mxu0 %vm361_vm1, %v15715_v60  ;;  %15716 = vst [vmem:[#allocation127_spill] sm:$0xff] %v13316_v23 }
 0x215   : > { %v13312_v33 = vadd.f32 %v3604_v24, %v3466_v25  ;;  %v3469_v3 = vadd.f32 %v9783_v17, %v13031_v57  ;;  %v3614_v35 = vpop.f32.mrf.mxu0  ;;  %10084 = vmatprep.mubr.msk.f32.mxu1 %vm361_vm1, %v13316_v23  ;;  %v13326_v24 = vld [vmem:[%s10815_s7 + $0xe0] sm:$0xff]  ;;  %v15719_v57 = vld [vmem:[#allocation12_spill] sm:$0xff]  ;;  %v15721_v23 = vld [vmem:[#allocation14_spill] sm:$0xff] }
 0x216   : > { %v3349_v63 = vpop.f32.mrf.mxu1  ;;  %15718 = vst [vmem:[#allocation128_spill] sm:$0xff] %v13326_v24 }
 0x217   : > { %v13320_v42 = vadd.f32 %v9833_v34, %v3469_v3  ;;  %v3468_v8 = vadd.f32 %v3349_v63, %v13040_v32  ;;  %v9836_v12 = vpop.f32.mrf.mxu0  ;;  %10135 = vmatmul.mubr.msk.f32.gmra.mxu0 %vm361_vm1, %v15717_v59  ;;  %v13336_v3 = vld [vmem:[%s10815_s7 + $0xf0] sm:$0xff] }
 0x218   : > { %v9786_v25 = vpop.f32.mrf.mxu1  ;;  %10085 = vmatmul.mubr.msk.f32.gmra.mxu1 %vm361_vm1, %v13326_v24  ;;  %10137 = vmatprep.mubr.msk.f32.mxu0 %vm361_vm1, %v15719_v57  ;;  %15720 = vst [vmem:[#allocation129_spill] sm:$0xff] %v13336_v3 }
 0x219   : > { %v13332_v17 = vadd.f32 %v3614_v35, %v3468_v8  ;;  %v3471_v34 = vadd.f32 %v9786_v25, %v13045_v19  ;;  %v3624_v32 = vpop.f32.mrf.mxu0  ;;  %10087 = vmatprep.mubr.msk.f32.mxu1 %vm361_vm1, %v13336_v3  ;;  %v13346_v35 = vld [vmem:[%s10815_s7 + $0xf8] sm:$0xff]  ;;  %v15725_v3 = vld [vmem:[#allocation18_spill] sm:$0xff] }
 0x21a   : > { %v3359_v63 = vpop.f32.mrf.mxu1  ;;  %15722 = vst [vmem:[#allocation130_spill] sm:$0xff] %v13346_v35  ;;  %v15723_v19 = vld [vmem:[#allocation16_spill] sm:$0xff] }
 0x21b   : > { %v13340_v59 = vadd.f32 %v9836_v12, %v3471_v34  ;;  %v3470_v60 = vadd.f32 %v3359_v63, %v13054_v9  ;;  %v9839_v24 = vpop.f32.mrf.mxu0  ;;  %10138 = vmatmul.mubr.msk.f32.gmra.mxu0 %vm361_vm1, %v15721_v23  ;;  %v13356_v34 = vld [vmem:[%s10815_s7 + $0x108] sm:$0xff] }
 0x21c   : > { %v9789_v8 = vpop.f32.mrf.mxu1  ;;  %10088 = vmatmul.mubr.msk.f32.gmra.mxu1 %vm361_vm1, %v13346_v35  ;;  %10140 = vmatprep.mubr.msk.f32.mxu0 %vm361_vm1, %v15723_v19  ;;  %15724 = vst [vmem:[#allocation131_spill] sm:$0xff] %v13356_v34 }
 0x21d   : > { %v13352_v25 = vadd.f32 %v3624_v32, %v3470_v60  ;;  %v3473_v12 = vadd.f32 %v9789_v8, %v13059_v43  ;;  %v3634_v9 = vpop.f32.mrf.mxu0  ;;  %10090 = vmatprep.mubr.msk.f32.mxu1 %vm361_vm1, %v13356_v34  ;;  %v13366_v32 = vld [vmem:[%s10815_s7 + $0x110] sm:$0xff]  ;;  %v15727_v43 = vld [vmem:[#allocation20_spill] sm:$0xff] }
 0x21e   : > { %v3369_v63 = vpop.f32.mrf.mxu1  ;;  %15726 = vst [vmem:[#allocation132_spill] sm:$0xff] %v13366_v32  ;;  %v15729_v34 = vld [vmem:[#allocation23_spill] sm:$0xff] }
 0x21f   : > { %v13360_v23 = vadd.f32 %v9839_v24, %v3473_v12  ;;  %v3472_v57 = vadd.f32 %v3369_v63, %v13068_v1  ;;  %v9842_v35 = vpop.f32.mrf.mxu0  ;;  %10141 = vmatmul.mubr.msk.f32.gmra.mxu0 %vm361_vm1, %v15725_v3  ;;  %v13376_v12 = vld [vmem:[%s10815_s7 + $0x120] sm:$0xff] }
 0x220   : > { %v9792_v60 = vpop.f32.mrf.mxu1  ;;  %10091 = vmatmul.mubr.msk.f32.gmra.mxu1 %vm361_vm1, %v13366_v32  ;;  %10143 = vmatprep.mubr.msk.f32.mxu0 %vm361_vm1, %v15727_v43  ;;  %15728 = vst [vmem:[#allocation133_spill] sm:$0xff] %v13376_v12 }
 0x221   : > { %v13372_v8 = vadd.f32 %v3634_v9, %v3472_v57  ;;  %v3475_v24 = vadd.f32 %v9792_v60, %v13073_v58  ;;  %v3644_v1 = vpop.f32.mrf.mxu0  ;;  %10093 = vmatprep.mubr.msk.f32.mxu1 %vm361_vm1, %v13376_v12  ;;  %v13386_v9 = vld [vmem:[%s10815_s7 + $0x128] sm:$0xff]  ;;  %v15733_v12 = vld [vmem:[#allocation28_spill] sm:$0xff] }
 0x222   : > { %v3379_v63 = vpop.f32.mrf.mxu1  ;;  %15730 = vst [vmem:[#allocation134_spill] sm:$0xff] %v13386_v9  ;;  %v15731_v58 = vld [vmem:[#allocation26_spill] sm:$0xff] }
 0x223   : > { %v13380_v3 = vadd.f32 %v9842_v35, %v3475_v24  ;;  %v3474_v19 = vadd.f32 %v3379_v63, %v13082_v47  ;;  %v9845_v32 = vpop.f32.mrf.mxu0  ;;  %10144 = vmatmul.mubr.msk.f32.gmra.mxu0 %vm361_vm1, %v15729_v34  ;;  %v13396_v24 = vld [vmem:[%s10815_s7 + $0x138] sm:$0xff] }
 0x224   : > { %v9795_v57 = vpop.f32.mrf.mxu1  ;;  %10094 = vmatmul.mubr.msk.f32.gmra.mxu1 %vm361_vm1, %v13386_v9  ;;  %10146 = vmatprep.mubr.msk.f32.mxu0 %vm361_vm1, %v15731_v58  ;;  %15732 = vst [vmem:[#allocation135_spill] sm:$0xff] %v13396_v24 }
 0x225   : > { %v13392_v60 = vadd.f32 %v3644_v1, %v3474_v19  ;;  %v3477_v35 = vadd.f32 %v9795_v57, %v13087_v11  ;;  %v3654_v47 = vpop.f32.mrf.mxu0  ;;  %10096 = vmatprep.mubr.msk.f32.mxu1 %vm361_vm1, %v13396_v24  ;;  %v13406_v1 = vld [vmem:[%s10815_s7 + $0x140] sm:$0xff]  ;;  %v15735_v11 = vld [vmem:[#allocation30_spill] sm:$0xff] }
 0x226   : > { %v3389_v63 = vpop.f32.mrf.mxu1  ;;  %15734 = vst [vmem:[#allocation138_spill] sm:$0xff] %v13406_v1 }
 0x227   : > { %v13400_v34 = vadd.f32 %v9845_v32, %v3477_v35  ;;  %v3476_v43 = vadd.f32 %v3389_v63, %v13096_v49  ;;  %v9848_v9 = vpop.f32.mrf.mxu0  ;;  %10147 = vmatmul.mubr.msk.f32.gmra.mxu0 %vm361_vm1, %v15733_v12  ;;  %v13416_v35 = vld [vmem:[%s10815_s7 + $0x150] sm:$0xff] }
 0x228   : > { %v9798_v19 = vpop.f32.mrf.mxu1  ;;  %10097 = vmatmul.mubr.msk.f32.gmra.mxu1 %vm361_vm1, %v13406_v1  ;;  %10149 = vmatprep.mubr.msk.f32.mxu0 %vm361_vm1, %v15735_v11  ;;  %15736 = vst [vmem:[#allocation139_spill] sm:$0xff] %v13416_v35  ;;  %v15737_v11 = vld [vmem:[#allocation32_spill] sm:$0xff] }
 0x229   : > { %v13412_v57 = vadd.f32 %v3654_v47, %v3476_v43  ;;  %v3479_v32 = vadd.f32 %v9798_v19, %v13101_v22  ;;  %v3664_v49 = vpop.f32.mrf.mxu0  ;;  %10099 = vmatprep.mubr.msk.f32.mxu1 %vm361_vm1, %v13416_v35  ;;  %v13426_v22 = vld [vmem:[%s10815_s7 + $0x158] sm:$0xff]  ;;  %v15739_v47 = vld [vmem:[#allocation34_spill] sm:$0xff] }
 0x22a   : > { %v3399_v63 = vpop.f32.mrf.mxu1  ;;  %15738 = vst [vmem:[#allocation143_spill] sm:$0xff] %v13426_v22  ;;  %v13444_v35 = vld [vmem:[%s10815_s7 + $0x1b8] sm:$0xff] }
 0x22b   : > { %v13420_v12 = vadd.f32 %v9848_v9, %v3479_v32  ;;  %v3478_v58 = vadd.f32 %v3399_v63, %v13110_v31  ;;  %v9851_v1 = vpop.f32.mrf.mxu0  ;;  %10150 = vmatmul.mubr.msk.f32.gmra.mxu0 %vm361_vm1, %v15737_v11  ;;  %v13436_v31 = vld [vmem:[%s10815_s7 + $0x168] sm:$0xff]  ;;  %v13441_v11 = vld [vmem:[%s10815_s7 + $0x1b0] sm:$0xff] }
 0x22c   : > { %v9801_v43 = vpop.f32.mrf.mxu1  ;;  %10100 = vmatmul.mubr.msk.f32.gmra.mxu1 %vm361_vm1, %v13426_v22  ;;  %10152 = vmatprep.mubr.msk.f32.mxu0 %vm361_vm1, %v15739_v47  ;;  %15740 = vst [vmem:[#allocation147_spill] sm:$0xff] %v13436_v31  ;;  %v15741_v47 = vld [vmem:[#allocation36_spill] sm:$0xff] }
 0x22d   : > { %v13432_v19 = vadd.f32 %v3664_v49, %v3478_v58  ;;  %v3481_v9 = vadd.f32 %v9801_v43, %v13115_v53  ;;  %v3674_v32 = vpop.f32.mrf.mxu0  ;;  %10102 = vmatprep.mubr.msk.f32.mxu1 %vm361_vm1, %v13436_v31  ;;  %v13452_v43 = vld [vmem:[%s10815_s7 + $0x170] sm:$0xff] }
 0x22e   : > { %v3409_v63 = vpop.f32.mrf.mxu1  ;;  %15742 = vst [vmem:[#allocation11_spill] sm:$0xff] %v13452_v43 }
 0x22f   : > { %v13446_v22 = vadd.f32 %v9851_v1, %v3481_v9  ;;  %v3480_v58 = vadd.f32 %v3409_v63, %v13124_v55  ;;  %v9854_v49 = vpop.f32.mrf.mxu0  ;;  %10153 = vmatmul.mubr.msk.f32.gmra.mxu0 %vm361_vm1, %v15741_v47  ;;  %v13462_v55 = vld [vmem:[%s10815_s7 + $0x180] sm:$0xff]  ;;  %v5094_v63 = vrot.slane %v13441_v11, 1  ;;  %v5095_v47 = vrot.slane %v13444_v35, 1 }
 0x230   : > { %v9804_v53 = vpop.f32.mrf.mxu1  ;;  %10103 = vmatmul.mubr.msk.f32.gmra.mxu1 %vm361_vm1, %v13452_v43  ;;  %10155 = vmatprep.mubr.msk.f32.mxu0 %vm361_vm1, %v15635_v37  ;;  %15743 = vst [vmem:[#allocation40_spill] sm:$0xff] %v13462_v55  ;;  %v13469_v43 = vld [vmem:[%s10815_s7 + $0x1c0] sm:$0xf]  ;;  %v13477_v37 = vld [vmem:[%s10815_s7 + $0x188] sm:$0xff] }
 0x231   : > { %v13458_v31 = vadd.f32 %v3674_v32, %v3480_v58  ;;  %v3483_v1 = vadd.f32 %v9804_v53, %v13133_v15  ;;  %v3684_v9 = vpop.f32.mrf.mxu0  ;;  %10105 = vmatprep.mubr.msk.f32.mxu1 %vm361_vm1, %v13462_v55  ;;  %v15744_v15 = vld [vmem:[#allocation148_spill] sm:$0xff]  ;;  %15745 = vst [vmem:[#allocation13_spill] sm:$0xff] %v13477_v37  ;;  %v5097_v55 = vrot.slane %v13469_v43, 1 }
 0x232   : > { %v3419_v24 = vpop.f32.mrf.mxu1 }
 0x233   : > { %v13471_v52 = vadd.f32 %v9854_v49, %v3483_v1  ;;  %v3482_v32 = vadd.f32 %v3419_v24, %v13143_v62  ;;  %v9857_v58 = vpop.f32.mrf.mxu0  ;;  %10156 = vmatmul.mubr.msk.f32.gmra.mxu0 %vm361_vm1, %v15744_v15  ;;  %v13488_v1 = vld [vmem:[%s10815_s7 + $0x198] sm:$0xff]  ;;  %v13493_v15 = vsel %vm278_vm0, %v5094_v63, %v5095_v47  ;;  %v13508_v63 = vsel %vm278_vm0, %v5095_v47, %v5097_v55 }
 0x234   : > { %v9807_v53 = vpop.f32.mrf.mxu1  ;;  %10106 = vmatmul.mubr.msk.f32.gmra.mxu1 %vm361_vm1, %v13477_v37  ;;  %10158 = vmatprep.mubr.msk.f32.mxu0 %vm361_vm1, %v12897_v5  ;;  %15746 = vst [vmem:[#allocation15_spill] sm:$0xff] %v13493_v15  ;;  %15748 = vst [vmem:[#allocation67_spill] sm:$0xff] %v13508_v63 }
 0x235   : > { %v13484_v49 = vadd.f32 %v3684_v9, %v3482_v32  ;;  %v3485_v62 = vadd.f32 %v9807_v53, %v13155_v20  ;;  %v3694_v24 = vpop.f32.mrf.mxu0  ;;  %10108 = vmatprep.mubr.msk.f32.mxu1 %vm361_vm1, %v13488_v1  ;;  %v13501_v20 = vld [vmem:[%s10815_s7 + $0x1a0] sm:$0xff] }
 0x236   : > { %v3429_v40 = vpop.f32.mrf.mxu1  ;;  %15747 = vst [vmem:[#allocation17_spill] sm:$0xff] %v13501_v20 }
 0x237   : > { %v13495_v37 = vadd.f32 %v9857_v58, %v3485_v62  ;;  %v3484_v5 = vadd.f32 %v3429_v40, %v13167_v51  ;;  %v9860_v50 = vpop.f32.mrf.mxu0  ;;  %10159 = vmatmul.mubr.msk.f32.gmra.mxu0 %vm361_vm1, %v12917_v27 }
 0x238   : > { %v9810_v9 = vpop.f32.mrf.mxu1  ;;  %10109 = vmatmul.mubr.msk.f32.gmra.mxu1 %vm361_vm1, %v13501_v20  ;;  %10161 = vmatprep.mubr.msk.f32.mxu0 %vm361_vm1, %v13493_v15  ;;  %v15760_v20 = vld [vmem:[#allocation46_spill] sm:$0xff] }
 0x239   : > { %v13510_v32 = vadd.f32 %v3694_v24, %v3484_v5  ;;  %v3487_v51 = vadd.f32 %v9810_v9, %v13175_v13  ;;  %v3704_v40 = vpop.f32.mrf.mxu0  ;;  %10111 = vmatprep.mubr.msk.f32.mxu1 %vm361_vm1, %v13441_v11  ;;  %v15749_v5 = vld [vmem:[#allocation72_spill] sm:$0xff] }
 0x23a   : > { %v3439_v58 = vpop.f32.mrf.mxu1 }
 0x23b   : > { %v13515_v53 = vadd.f32 %v9860_v50, %v3487_v51  ;;  %v3486_v62 = vadd.f32 %v3439_v58, %v13184_v41  ;;  %v9863_v27 = vpop.f32.mrf.mxu0  ;;  %10162 = vmatmul.mubr.msk.f32.gmra.mxu0 %vm361_vm1, %v13508_v63  ;;  %v15750_v50 = vld [vmem:[#allocation41_spill] sm:$0xff] }
 0x23c   : > { %v9813_v15 = vpop.f32.mrf.mxu1  ;;  %10112 = vmatmul.mubr.msk.f32.gmra.mxu1 %vm361_vm1, %v13444_v35  ;;  %10216 = vmatprep.mubr.msk.f32.mxu0 %vm361_vm1, %v15749_v5  ;;  %v15751_v58 = vld [vmem:[#allocation73_spill] sm:$0xff] }
 0x23d   : > { %v13524_v13 = vadd.f32 %v3704_v40, %v3486_v62  ;;  %v3489_v47 = vadd.f32 %v9813_v15, %v13189_v38  ;;  %v3714_v55 = vpop.f32.mrf.mxu0  ;;  %10166 = vmatprep.mubr.msk.f32.mxu1 %vm361_vm1, %v15750_v50  ;;  %v13537_v40 = vld [vmem:[%s14976_s1 + $0xa8] sm:$0xff] }
 0x23e   : > { %v3449_v41 = vpop.f32.mrf.mxu1  ;;  %v15752_v38 = vld [vmem:[#allocation42_spill] sm:$0xff] }
 0x23f   : > { %v13529_v24 = vadd.f32 %v9863_v27, %v3489_v47  ;;  %v3488_v9 = vadd.f32 %v3449_v41, %v13207_v6  ;;  %v9918_v51 = vpop.f32.mrf.mxu0  ;;  %10217 = vmatmul.mubr.msk.f32.vlgmr.msra.gmra.mxu0 %vm361_vm1, %v15751_v58  ;;  %v13545_v27 = vld [vmem:[%s14976_s1 + $0xb0] sm:$0xff]  ;;  %v15754_v41 = vld [vmem:[#allocation76_spill] sm:$0xff] }
 0x240   : > { %v9868_v62 = vpop.f32.mrf.mxu1  ;;  %10167 = vmatmul.mubr.msk.f32.vlgmr.msra.gmra.mxu1 %vm361_vm1, %v15752_v38  ;;  %10315 = vmatpush3.msra.mxu0 %v13205_v36  ;;  %v15753_v47 = vld [vmem:[#allocation43_spill] sm:$0xff] }
 0x241   : > { %v13547_v6 = vadd.f32 %v3714_v55, %v3488_v9  ;;  %v3993_v15 = vadd.f32 %v9868_v62, %v13219_v18  ;;  %10265 = vmatpush3.msra.mxu1 %v13197_v0  ;;  %v4101_v5 = vpop.f32.mrf.mxu0  ;;  %10169 = vmatprep.mubr.msk.f32.mxu1 %vm361_vm1, %v15753_v47  ;;  %v15755_v9 = vld [vmem:[#allocation78_spill] sm:$0xff]  ;;  %v15756_v18 = vld [vmem:[#allocation44_spill] sm:$0xff]  ;;  %v15759_v47 = vld [vmem:[#allocation81_spill] sm:$0xff] }
 0x242   : > { %v3833_v50 = vpop.f32.mrf.mxu1  ;;  %10219 = vmatprep.mubr.msk.f32.mxu0 %vm361_vm1, %v15754_v41  ;;  %10364 = vmatprep.subr.mxu1 %v13537_v40  ;;  %v15757_v62 = vld [vmem:[#allocation80_spill] sm:$0xff]  ;;  %v15758_v41 = vld [vmem:[#allocation45_spill] sm:$0xff] }
 0x243   : > { %v13556_v36 = vadd.f32 %v9918_v51, %v3993_v15  ;;  %v3992_v58 = vadd.f32 %v3833_v50, %v13232_v44  ;;  %v9921_v55 = vpop.f32.mrf.mxu0  ;;  %10220 = vmatmul.mubr.msk.f32.gmra.mxu0 %vm361_vm1, %v15755_v9  ;;  %10414 = vmatprep.subr.mxu0 %v13545_v27 }
 0x244   : > { %v9871_v0 = vpop.f32.mrf.mxu1  ;;  %10170 = vmatmul.mubr.msk.f32.gmra.mxu1 %vm361_vm1, %v15756_v18  ;;  %10222 = vmatprep.mubr.msk.f32.mxu0 %vm361_vm1, %v15757_v62  ;;  %v15763_v62 = vld [vmem:[#allocation86_spill] sm:$0xff] }
 0x245   : > { %v13566_v38 = vadd.f32 %v4101_v5, %v3992_v58  ;;  %v3995_v51 = vadd.f32 %v9871_v0, %v13240_v10  ;;  %v4111_v15 = vpop.f32.mrf.mxu0  ;;  %10172 = vmatprep.mubr.msk.f32.mxu1 %vm361_vm1, %v15758_v41  ;;  %v15761_v5 = vld [vmem:[#allocation84_spill] sm:$0xff] }
 0x246   : > { %v3843_v44 = vpop.f32.mrf.mxu1  ;;  %v15764_v41 = vld [vmem:[#allocation48_spill] sm:$0xff] }
 0x247   : > { %v13571_v50 = vadd.f32 %v9921_v55, %v3995_v51  ;;  %v3994_v9 = vadd.f32 %v3843_v44, %v13252_v61  ;;  %v9924_v63 = vpop.f32.mrf.mxu0  ;;  %10223 = vmatmul.mubr.msk.f32.gmra.mxu0 %vm361_vm1, %v15759_v47  ;;  %v15762_v55 = vld [vmem:[#allocation47_spill] sm:$0xff] }
 0x248   : > { %v9874_v18 = vpop.f32.mrf.mxu1  ;;  %10173 = vmatmul.mubr.msk.f32.gmra.mxu1 %vm361_vm1, %v15760_v20  ;;  %10225 = vmatprep.mubr.msk.f32.mxu0 %vm361_vm1, %v15761_v5  ;;  %v15767_v5 = vld [vmem:[#allocation89_spill] sm:$0xff] }
 0x249   : > { %v13580_v10 = vadd.f32 %v4111_v15, %v3994_v9  ;;  %v3997_v58 = vadd.f32 %v9874_v18, %v13260_v21  ;;  %v4121_v0 = vpop.f32.mrf.mxu0  ;;  %10175 = vmatprep.mubr.msk.f32.mxu1 %vm361_vm1, %v15762_v55  ;;  %v15765_v9 = vld [vmem:[#allocation88_spill] sm:$0xff]  ;;  %v15768_v55 = vld [vmem:[#allocation50_spill] sm:$0xff] }
 0x24a   : > { %v3853_v61 = vpop.f32.mrf.mxu1 }
 0x24b   : > { %v13585_v51 = vadd.f32 %v9924_v63, %v3997_v58  ;;  %v3996_v44 = vadd.f32 %v3853_v61, %v13272_v14  ;;  %v9927_v47 = vpop.f32.mrf.mxu0  ;;  %10226 = vmatmul.mubr.msk.f32.gmra.mxu0 %vm361_vm1, %v15763_v62  ;;  %v15766_v63 = vld [vmem:[#allocation49_spill] sm:$0xff] }
 0x24c   : > { %v9877_v20 = vpop.f32.mrf.mxu1  ;;  %10176 = vmatmul.mubr.msk.f32.gmra.mxu1 %vm361_vm1, %v15764_v41  ;;  %10228 = vmatprep.mubr.msk.f32.mxu0 %vm361_vm1, %v15765_v9  ;;  %v15771_v9 = vld [vmem:[#allocation94_spill] sm:$0xff] }
 0x24d   : > { %v13594_v21 = vadd.f32 %v4121_v0, %v3996_v44  ;;  %v3999_v18 = vadd.f32 %v9877_v20, %v13280_v29  ;;  %v4131_v15 = vpop.f32.mrf.mxu0  ;;  %10178 = vmatprep.mubr.msk.f32.mxu1 %vm361_vm1, %v15766_v63  ;;  %v15769_v0 = vld [vmem:[#allocation92_spill] sm:$0xff] }
 0x24e   : > { %v3863_v14 = vpop.f32.mrf.mxu1  ;;  %v15772_v63 = vld [vmem:[#allocation52_spill] sm:$0xff] }
 0x24f   : > { %v13599_v58 = vadd.f32 %v9927_v47, %v3999_v18  ;;  %v3998_v61 = vadd.f32 %v3863_v14, %v13292_v54  ;;  %v9930_v62 = vpop.f32.mrf.mxu0  ;;  %10229 = vmatmul.mubr.msk.f32.gmra.mxu0 %vm361_vm1, %v15767_v5  ;;  %v15770_v47 = vld [vmem:[#allocation51_spill] sm:$0xff] }
 0x250   : > { %v9880_v41 = vpop.f32.mrf.mxu1  ;;  %10179 = vmatmul.mubr.msk.f32.gmra.mxu1 %vm361_vm1, %v15768_v55  ;;  %10231 = vmatprep.mubr.msk.f32.mxu0 %vm361_vm1, %v15769_v0  ;;  %v15775_v0 = vld [vmem:[#allocation97_spill] sm:$0xff] }
 0x251   : > { %v13608_v29 = vadd.f32 %v4131_v15, %v3998_v61  ;;  %v4001_v20 = vadd.f32 %v9880_v41, %v13300_v39  ;;  %v4141_v44 = vpop.f32.mrf.mxu0  ;;  %10181 = vmatprep.mubr.msk.f32.mxu1 %vm361_vm1, %v15770_v47  ;;  %v15773_v15 = vld [vmem:[#allocation96_spill] sm:$0xff]  ;;  %v15776_v47 = vld [vmem:[#allocation54_spill] sm:$0xff] }
 0x252   : > { %v3873_v54 = vpop.f32.mrf.mxu1 }
 0x253   : > { %v13613_v18 = vadd.f32 %v9930_v62, %v4001_v20  ;;  %v4000_v14 = vadd.f32 %v3873_v54, %v13312_v33  ;;  %v9933_v5 = vpop.f32.mrf.mxu0  ;;  %10232 = vmatmul.mubr.msk.f32.gmra.mxu0 %vm361_vm1, %v15771_v9  ;;  %v15774_v62 = vld [vmem:[#allocation53_spill] sm:$0xff] }
 0x254   : > { %v9883_v55 = vpop.f32.mrf.mxu1  ;;  %10182 = vmatmul.mubr.msk.f32.gmra.mxu1 %vm361_vm1, %v15772_v63  ;;  %10234 = vmatprep.mubr.msk.f32.mxu0 %vm361_vm1, %v15773_v15  ;;  %v15779_v15 = vld [vmem:[#allocation102_spill] sm:$0xff] }
 0x255   : > { %v13622_v39 = vadd.f32 %v4141_v44, %v4000_v14  ;;  %v4003_v41 = vadd.f32 %v9883_v55, %v13320_v42  ;;  %v4151_v61 = vpop.f32.mrf.mxu0  ;;  %10184 = vmatprep.mubr.msk.f32.mxu1 %vm361_vm1, %v15774_v62  ;;  %v15777_v44 = vld [vmem:[#allocation100_spill] sm:$0xff] }
 0x256   : > { %v3883_v33 = vpop.f32.mrf.mxu1  ;;  %v15780_v62 = vld [vmem:[#allocation56_spill] sm:$0xff] }
 0x257   : > { %v13627_v20 = vadd.f32 %v9933_v5, %v4003_v41  ;;  %v4002_v54 = vadd.f32 %v3883_v33, %v13332_v17  ;;  %v9936_v9 = vpop.f32.mrf.mxu0  ;;  %10235 = vmatmul.mubr.msk.f32.gmra.mxu0 %vm361_vm1, %v15775_v0  ;;  %v15778_v5 = vld [vmem:[#allocation55_spill] sm:$0xff] }
 0x258   : > { %v9886_v63 = vpop.f32.mrf.mxu1  ;;  %10185 = vmatmul.mubr.msk.f32.gmra.mxu1 %vm361_vm1, %v15776_v47  ;;  %10237 = vmatprep.mubr.msk.f32.mxu0 %vm361_vm1, %v15777_v44  ;;  %v15783_v44 = vld [vmem:[#allocation105_spill] sm:$0xff] }
 0x259   : > { %v13636_v42 = vadd.f32 %v4151_v61, %v4002_v54  ;;  %v4005_v55 = vadd.f32 %v9886_v63, %v13340_v59  ;;  %v4161_v14 = vpop.f32.mrf.mxu0  ;;  %10187 = vmatprep.mubr.msk.f32.mxu1 %vm361_vm1, %v15778_v5  ;;  %v15781_v61 = vld [vmem:[#allocation104_spill] sm:$0xff]  ;;  %v15784_v5 = vld [vmem:[#allocation58_spill] sm:$0xff] }
 0x25a   : > { %v3893_v17 = vpop.f32.mrf.mxu1 }
 0x25b   : > { %v13641_v41 = vadd.f32 %v9936_v9, %v4005_v55  ;;  %v4004_v33 = vadd.f32 %v3893_v17, %v13352_v25  ;;  %v9939_v0 = vpop.f32.mrf.mxu0  ;;  %10238 = vmatmul.mubr.msk.f32.gmra.mxu0 %vm361_vm1, %v15779_v15  ;;  %v15782_v9 = vld [vmem:[#allocation57_spill] sm:$0xff] }
 0x25c   : > { %v9889_v47 = vpop.f32.mrf.mxu1  ;;  %10188 = vmatmul.mubr.msk.f32.gmra.mxu1 %vm361_vm1, %v15780_v62  ;;  %10240 = vmatprep.mubr.msk.f32.mxu0 %vm361_vm1, %v15781_v61 }
 0x25d   : > { %v13650_v59 = vadd.f32 %v4161_v14, %v4004_v33  ;;  %v4007_v63 = vadd.f32 %v9889_v47, %v13360_v23  ;;  %v4171_v54 = vpop.f32.mrf.mxu0  ;;  %10190 = vmatprep.mubr.msk.f32.mxu1 %vm361_vm1, %v15782_v9 }
 0x25e   : > { %v3903_v25 = vpop.f32.mrf.mxu1 }
 0x25f   : > { %v13655_v55 = vadd.f32 %v9939_v0, %v4007_v63  ;;  %v4006_v17 = vadd.f32 %v3903_v25, %v13372_v8  ;;  %v9942_v15 = vpop.f32.mrf.mxu0  ;;  %10241 = vmatmul.mubr.msk.f32.gmra.mxu0 %vm361_vm1, %v15783_v44  ;;  %v15785_v0 = vld [vmem:[#allocation59_spill] sm:$0xff]  ;;  %v15786_v44 = vld [vmem:[#allocation110_spill] sm:$0xff] }
 0x260   : > { %v9892_v62 = vpop.f32.mrf.mxu1  ;;  %10191 = vmatmul.mubr.msk.f32.gmra.mxu1 %vm361_vm1, %v15784_v5  ;;  %10243 = vmatprep.mubr.msk.f32.mxu0 %vm361_vm1, %v15683_v4  ;;  %v15787_v5 = vld [vmem:[#allocation60_spill] sm:$0xff]  ;;  %v15790_v4 = vld [vmem:[#allocation113_spill] sm:$0xff] }
 0x261   : > { %v13664_v23 = vadd.f32 %v4171_v54, %v4006_v17  ;;  %v4009_v47 = vadd.f32 %v9892_v62, %v13380_v3  ;;  %v4181_v14 = vpop.f32.mrf.mxu0  ;;  %10193 = vmatprep.mubr.msk.f32.mxu1 %vm361_vm1, %v15785_v0  ;;  %v15788_v54 = vld [vmem:[#allocation112_spill] sm:$0xff]  ;;  %v15791_v0 = vld [vmem:[#allocation21_spill] sm:$0xff] }
 0x262   : > { %v3913_v8 = vpop.f32.mrf.mxu1 }
 0x263   : > { %v13669_v33 = vadd.f32 %v9942_v15, %v4009_v47  ;;  %v4008_v63 = vadd.f32 %v3913_v8, %v13392_v60  ;;  %v9945_v25 = vpop.f32.mrf.mxu0  ;;  %10244 = vmatmul.mubr.msk.f32.gmra.mxu0 %vm361_vm1, %v15786_v44  ;;  %v15789_v15 = vld [vmem:[#allocation61_spill] sm:$0xff] }
 0x264   : > { %v9895_v61 = vpop.f32.mrf.mxu1  ;;  %10194 = vmatmul.mubr.msk.f32.gmra.mxu1 %vm361_vm1, %v15787_v5  ;;  %10246 = vmatprep.mubr.msk.f32.mxu0 %vm361_vm1, %v15788_v54  ;;  %v15793_v54 = vld [vmem:[#allocation62_spill] sm:$0xff] }
 0x265   : > { %v13678_v3 = vadd.f32 %v4181_v14, %v4008_v63  ;;  %v4011_v62 = vadd.f32 %v9895_v61, %v13400_v34  ;;  %v4191_v17 = vpop.f32.mrf.mxu0  ;;  %10196 = vmatprep.mubr.msk.f32.mxu1 %vm361_vm1, %v15789_v15  ;;  %v15792_v63 = vld [vmem:[#allocation25_spill] sm:$0xff] }
 0x266   : > { %v3923_v60 = vpop.f32.mrf.mxu1 }
 0x267   : > { %v13683_v47 = vadd.f32 %v9945_v25, %v4011_v62  ;;  %v4010_v8 = vadd.f32 %v3923_v60, %v13412_v57  ;;  %v9948_v44 = vpop.f32.mrf.mxu0  ;;  %10247 = vmatmul.mubr.msk.f32.gmra.mxu0 %vm361_vm1, %v15790_v4 }
 0x268   : > { %v9898_v5 = vpop.f32.mrf.mxu1  ;;  %10197 = vmatmul.mubr.msk.f32.gmra.mxu1 %vm361_vm1, %v15791_v0  ;;  %10249 = vmatprep.mubr.msk.f32.mxu0 %vm361_vm1, %v15690_v30  ;;  %v15796_v30 = vld [vmem:[#allocation122_spill] sm:$0xff] }
 0x269   : > { %v13692_v34 = vadd.f32 %v4191_v17, %v4010_v8  ;;  %v4013_v61 = vadd.f32 %v9898_v5, %v13420_v12  ;;  %v4201_v14 = vpop.f32.mrf.mxu0  ;;  %10199 = vmatprep.mubr.msk.f32.mxu1 %vm361_vm1, %v15792_v63  ;;  %v15794_v17 = vld [vmem:[#allocation120_spill] sm:$0xff] }
 0x26a   : > { %v3933_v57 = vpop.f32.mrf.mxu1  ;;  %v15797_v63 = vld [vmem:[#allocation64_spill] sm:$0xff] }
 0x26b   : > { %v13697_v25 = vadd.f32 %v9948_v44, %v4013_v61  ;;  %v4012_v62 = vadd.f32 %v3933_v57, %v13432_v19  ;;  %v9951_v60 = vpop.f32.mrf.mxu0  ;;  %10250 = vmatmul.mubr.msk.f32.gmra.mxu0 %vm361_vm1, %v15692_v26  ;;  %v15795_v44 = vld [vmem:[#allocation63_spill] sm:$0xff] }
 0x26c   : > { %v9901_v4 = vpop.f32.mrf.mxu1  ;;  %10200 = vmatmul.mubr.msk.f32.gmra.mxu1 %vm361_vm1, %v15793_v54  ;;  %10252 = vmatprep.mubr.msk.f32.mxu0 %vm361_vm1, %v15794_v17 }
 0x26d   : > { %v13706_v12 = vadd.f32 %v4201_v14, %v4012_v62  ;;  %v4015_v5 = vadd.f32 %v9901_v4, %v13446_v22  ;;  %v4211_v8 = vpop.f32.mrf.mxu0  ;;  %10202 = vmatprep.mubr.msk.f32.mxu1 %vm361_vm1, %v15795_v44  ;;  %v15798_v62 = vld [vmem:[#allocation39_spill] sm:$0xff] }
 0x26e   : > { %v3943_v19 = vpop.f32.mrf.mxu1 }
 0x26f   : > { %v13711_v61 = vadd.f32 %v9951_v60, %v4015_v5  ;;  %v4014_v57 = vadd.f32 %v3943_v19, %v13458_v31  ;;  %v9954_v26 = vpop.f32.mrf.mxu0  ;;  %10253 = vmatmul.mubr.msk.f32.gmra.mxu0 %vm361_vm1, %v15796_v30  ;;  %v5630_v31 = vrot.slane %v13441_v11, 3  ;;  %v5631_v60 = vrot.slane %v13444_v35, 3 }
 0x270   : > { %v9904_v54 = vpop.f32.mrf.mxu1  ;;  %10203 = vmatmul.mubr.msk.f32.gmra.mxu1 %vm361_vm1, %v15797_v63  ;;  %10255 = vmatprep.mubr.msk.f32.mxu0 %vm361_vm1, %v15696_v45  ;;  %v5362_v19 = vrot.slane %v13441_v11, 2  ;;  %v5363_v30 = vrot.slane %v13444_v35, 2  ;;  %v5633_v45 = vrot.slane %v13469_v43, 3  ;;  %v15800_v63 = vld [vmem:[#allocation142_spill] sm:$0xff] }
 0x271   : > { %v13720_v4 = vadd.f32 %v4211_v8, %v4014_v57  ;;  %v4017_v22 = vadd.f32 %v9904_v54, %v13471_v52  ;;  %v4221_v14 = vpop.f32.mrf.mxu0  ;;  %10205 = vmatprep.mubr.msk.f32.mxu1 %vm361_vm1, %v15798_v62  ;;  %v15799_v54 = vld [vmem:[#allocation136_spill] sm:$0xff] }
 0x272   : > { %v3953_v5 = vpop.f32.mrf.mxu1 }
 0x273   : > { %v13729_v17 = vadd.f32 %v9954_v26, %v4017_v22  ;;  %v4016_v8 = vadd.f32 %v3953_v5, %v13484_v49  ;;  %v9957_v57 = vpop.f32.mrf.mxu0  ;;  %10256 = vmatmul.mubr.msk.f32.gmra.mxu0 %vm361_vm1, %v15699_v48  ;;  %v13745_v49 = vsel %vm1344_vm3, %v5630_v31, %v5631_v60  ;;  %v5365_v5 = vrot.slane %v13469_v43, 2 }
 0x274   : > { %v9907_v52 = vpop.f32.mrf.mxu1  ;;  %10206 = vmatmul.mubr.msk.f32.gmra.mxu1 %vm361_vm1, %v15799_v54  ;;  %10258 = vmatprep.mubr.msk.f32.mxu0 %vm361_vm1, %v13153_v46  ;;  %15801 = vst [vmem:[#allocation68_spill] sm:$0xff] %v13745_v49  ;;  %v13749_v54 = vsel %vm940_vm2, %v5362_v19, %v5363_v30  ;;  %v13761_v31 = vsel %vm1344_vm3, %v5631_v60, %v5633_v45 }
 0x275   : > { %v13739_v62 = vadd.f32 %v4221_v14, %v4016_v8  ;;  %v4019_v26 = vadd.f32 %v9907_v52, %v13495_v37  ;;  %v4231_v22 = vpop.f32.mrf.mxu0  ;;  %10208 = vmatprep.mubr.msk.f32.mxu1 %vm361_vm1, %v15800_v63  ;;  %v15802_v52 = vld [vmem:[#allocation146_spill] sm:$0xff]  ;;  %15803 = vst [vmem:[#allocation69_spill] sm:$0xff] %v13761_v31 }
 0x276   : > { %v3963_v48 = vpop.f32.mrf.mxu1 }
 0x277   : > { %v13751_v46 = vadd.f32 %v9957_v57, %v4019_v26  ;;  %v4018_v14 = vadd.f32 %v3963_v48, %v13510_v32  ;;  %v9960_v8 = vpop.f32.mrf.mxu0  ;;  %10259 = vmatmul.mubr.msk.f32.gmra.mxu0 %vm361_vm1, %v13173_v2  ;;  %v13769_v48 = vsel %vm940_vm2, %v5363_v30, %v5365_v5 }
 0x278   : > { %v9910_v37 = vpop.f32.mrf.mxu1  ;;  %10209 = vmatmul.mubr.msk.f32.gmra.mxu1 %vm361_vm1, %v15802_v52  ;;  %10261 = vmatprep.mubr.msk.f32.mxu0 %vm361_vm1, %v13745_v49 }
 0x279   : > { %v13763_v19 = vadd.f32 %v4231_v22, %v4018_v14  ;;  %v4021_v57 = vadd.f32 %v9910_v37, %v13515_v53  ;;  %v4241_v26 = vpop.f32.mrf.mxu0  ;;  %10211 = vmatprep.mubr.msk.f32.mxu1 %vm361_vm1, %v13749_v54  ;;  %v15804_v22 = vld [vmem:[#allocation71_spill] sm:$0xff] }
 0x27a   : > { %v3973_v32 = vpop.f32.mrf.mxu1 }
 0x27b   : > { %v13771_v2 = vadd.f32 %v9960_v8, %v4021_v57  ;;  %v4020_v52 = vadd.f32 %v3973_v32, %v13524_v13  ;;  %v9963_v49 = vpop.f32.mrf.mxu0  ;;  %10262 = vmatmul.mubr.msk.f32.gmra.mxu0 %vm361_vm1, %v13761_v31  ;;  %v15806_v57 = vld [vmem:[#allocation75_spill] sm:$0xff]  ;;  %v15815_v31 = vld [vmem:[#allocation85_spill] sm:$0xff] }
 0x27c   : > { %v9913_v45 = vpop.f32.mrf.mxu1  ;;  %10212 = vmatmul.mubr.msk.f32.gmra.mxu1 %vm361_vm1, %v13769_v48  ;;  %10316 = vmatprep.mubr.msk.f32.mxu0 %vm361_vm1, %v13212_v28  ;;  %v13793_v28 = vld [vmem:[%s14976_s1 + $0xb8] sm:$0xff] }
 0x27d   : > { %v13780_v53 = vadd.f32 %v4241_v26, %v4020_v52  ;;  %v4023_v30 = vadd.f32 %v9913_v45, %v13529_v24  ;;  %v4251_v60 = vpop.f32.mrf.mxu0  ;;  %10266 = vmatprep.mubr.msk.f32.mxu1 %vm361_vm1, %v15804_v22  ;;  %v15805_v24 = vld [vmem:[#allocation74_spill] sm:$0xff] }
 0x27e   : > { %v3983_v13 = vpop.f32.mrf.mxu1 }
 0x27f   : > { %v13785_v5 = vadd.f32 %v9963_v49, %v4023_v30  ;;  %v4022_v14 = vadd.f32 %v3983_v13, %v13547_v6  ;;  %v10018_v8 = vpop.f32.mrf.mxu0  ;;  %10317 = vmatmul.mubr.msk.f32.vlgmr.msra.gmra.mxu0 %vm361_vm1, %v13226_v16  ;;  %v13801_v49 = vld [vmem:[%s14976_s1 + $0xc0] sm:$0xff]  ;;  %v15809_v13 = vld [vmem:[#allocation79_spill] sm:$0xff] }
 0x280   : > { %v9968_v37 = vpop.f32.mrf.mxu1  ;;  %10267 = vmatmul.mubr.msk.f32.vlgmr.msra.gmra.mxu1 %vm361_vm1, %v15805_v24  ;;  %10415 = vmatpush3.msra.mxu0 %v13545_v27  ;;  %v15808_v30 = vld [vmem:[#allocation9_spill] sm:$0xff] }
 0x281   : > { %v13803_v6 = vadd.f32 %v4251_v60, %v4022_v14  ;;  %v4529_v16 = vadd.f32 %v9968_v37, %v13556_v36  ;;  %10365 = vmatpush3.msra.mxu1 %v13537_v40  ;;  %v4637_v52 = vpop.f32.mrf.mxu0  ;;  %10269 = vmatprep.mubr.msk.f32.mxu1 %vm361_vm1, %v15806_v57  ;;  %v15807_v36 = vld [vmem:[#allocation77_spill] sm:$0xff]  ;;  %v15810_v37 = vld [vmem:[#allocation66_spill] sm:$0xff] }
 0x282   : > { %v4369_v26 = vpop.f32.mrf.mxu1  ;;  %10319 = vmatprep.mubr.msk.f32.mxu0 %vm361_vm1, %v13236_v7  ;;  %10464 = vmatprep.subr.mxu1 %v13793_v28 }
 0x283   : > { %v13812_v27 = vadd.f32 %v10018_v8, %v4529_v16  ;;  %v4528_v32 = vadd.f32 %v4369_v26, %v13566_v38  ;;  %v10021_v45 = vpop.f32.mrf.mxu0  ;;  %10320 = vmatmul.mubr.msk.f32.gmra.mxu0 %vm361_vm1, %v13246_v56  ;;  %10514 = vmatprep.subr.mxu0 %v13801_v49  ;;  %v15811_v16 = vld [vmem:[#allocation82_spill] sm:$0xff] }
 0x284   : > { %v9971_v40 = vpop.f32.mrf.mxu1  ;;  %10270 = vmatmul.mubr.msk.f32.gmra.mxu1 %vm361_vm1, %v15807_v36  ;;  %10322 = vmatprep.mubr.msk.f32.mxu0 %vm361_vm1, %v15808_v30 }
 0x285   : > { %v13822_v7 = vadd.f32 %v4637_v52, %v4528_v32  ;;  %v4531_v60 = vadd.f32 %v9971_v40, %v13571_v50  ;;  %v4647_v22 = vpop.f32.mrf.mxu0  ;;  %10272 = vmatprep.mubr.msk.f32.mxu1 %vm361_vm1, %v15809_v13  ;;  %v15812_v52 = vld [vmem:[#allocation123_spill] sm:$0xff] }
 0x286   : > { %v4379_v38 = vpop.f32.mrf.mxu1 }
 0x287   : > { %v13827_v14 = vadd.f32 %v10021_v45, %v4531_v60  ;;  %v4530_v56 = vadd.f32 %v4379_v38, %v13580_v10  ;;  %v10024_v8 = vpop.f32.mrf.mxu0  ;;  %10323 = vmatmul.mubr.msk.f32.gmra.mxu0 %vm361_vm1, %v15810_v37  ;;  %v15813_v45 = vld [vmem:[#allocation83_spill] sm:$0xff]  ;;  %v15814_v38 = vld [vmem:[#allocation124_spill] sm:$0xff] }
 0x288   : > { %v9974_v24 = vpop.f32.mrf.mxu1  ;;  %10273 = vmatmul.mubr.msk.f32.gmra.mxu1 %vm361_vm1, %v15811_v16  ;;  %10325 = vmatprep.mubr.msk.f32.mxu0 %vm361_vm1, %v15812_v52 }
 0x289   : > { %v13836_v50 = vadd.f32 %v4647_v22, %v4530_v56  ;;  %v4533_v26 = vadd.f32 %v9974_v24, %v13585_v51  ;;  %v4657_v32 = vpop.f32.mrf.mxu0  ;;  %10275 = vmatprep.mubr.msk.f32.mxu1 %vm361_vm1, %v15813_v45  ;;  %v15816_v22 = vld [vmem:[#allocation125_spill] sm:$0xff]  ;;  %v15819_v45 = vld [vmem:[#allocation90_spill] sm:$0xff] }
 0x28a   : > { %v4389_v10 = vpop.f32.mrf.mxu1 }
 0x28b   : > { %v13841_v40 = vadd.f32 %v10024_v8, %v4533_v26  ;;  %v4532_v30 = vadd.f32 %v4389_v10, %v13594_v21  ;;  %v10027_v60 = vpop.f32.mrf.mxu0  ;;  %10326 = vmatmul.mubr.msk.f32.gmra.mxu0 %vm361_vm1, %v15814_v38  ;;  %v15817_v8 = vld [vmem:[#allocation87_spill] sm:$0xff]  ;;  %v15818_v38 = vld [vmem:[#allocation126_spill] sm:$0xff] }
 0x28c   : > { %v9977_v37 = vpop.f32.mrf.mxu1  ;;  %10276 = vmatmul.mubr.msk.f32.gmra.mxu1 %vm361_vm1, %v15815_v31  ;;  %10328 = vmatprep.mubr.msk.f32.mxu0 %vm361_vm1, %v15816_v22 }
 0x28d   : > { %v13850_v51 = vadd.f32 %v4657_v32, %v4532_v30  ;;  %v4535_v56 = vadd.f32 %v9977_v37, %v13599_v58  ;;  %v4667_v24 = vpop.f32.mrf.mxu0  ;;  %10278 = vmatprep.mubr.msk.f32.mxu1 %vm361_vm1, %v15817_v8  ;;  %v15820_v32 = vld [vmem:[#allocation127_spill] sm:$0xff]  ;;  %v15823_v8 = vld [vmem:[#allocation93_spill] sm:$0xff] }
 0x28e   : > { %v4399_v21 = vpop.f32.mrf.mxu1 }
 0x28f   : > { %v13855_v52 = vadd.f32 %v10027_v60, %v4535_v56  ;;  %v4534_v26 = vadd.f32 %v4399_v21, %v13608_v29  ;;  %v10030_v10 = vpop.f32.mrf.mxu0  ;;  %10329 = vmatmul.mubr.msk.f32.gmra.mxu0 %vm361_vm1, %v15818_v38  ;;  %v15821_v60 = vld [vmem:[#allocation91_spill] sm:$0xff]  ;;  %v15822_v38 = vld [vmem:[#allocation128_spill] sm:$0xff] }
 0x290   : > { %v9980_v31 = vpop.f32.mrf.mxu1  ;;  %10279 = vmatmul.mubr.msk.f32.gmra.mxu1 %vm361_vm1, %v15819_v45  ;;  %10331 = vmatprep.mubr.msk.f32.mxu0 %vm361_vm1, %v15820_v32 }
 0x291   : > { %v13864_v58 = vadd.f32 %v4667_v24, %v4534_v26  ;;  %v4537_v30 = vadd.f32 %v9980_v31, %v13613_v18  ;;  %v4677_v37 = vpop.f32.mrf.mxu0  ;;  %10281 = vmatprep.mubr.msk.f32.mxu1 %vm361_vm1, %v15821_v60  ;;  %v15824_v24 = vld [vmem:[#allocation129_spill] sm:$0xff]  ;;  %v15827_v60 = vld [vmem:[#allocation98_spill] sm:$0xff] }
 0x292   : > { %v4409_v29 = vpop.f32.mrf.mxu1 }
 0x293   : > { %v13869_v22 = vadd.f32 %v10030_v10, %v4537_v30  ;;  %v4536_v56 = vadd.f32 %v4409_v29, %v13622_v39  ;;  %v10033_v21 = vpop.f32.mrf.mxu0  ;;  %10332 = vmatmul.mubr.msk.f32.gmra.mxu0 %vm361_vm1, %v15822_v38  ;;  %v15825_v10 = vld [vmem:[#allocation95_spill] sm:$0xff]  ;;  %v15826_v38 = vld [vmem:[#allocation130_spill] sm:$0xff] }
 0x294   : > { %v9983_v45 = vpop.f32.mrf.mxu1  ;;  %10282 = vmatmul.mubr.msk.f32.gmra.mxu1 %vm361_vm1, %v15823_v8  ;;  %10334 = vmatprep.mubr.msk.f32.mxu0 %vm361_vm1, %v15824_v24 }
 0x295   : > { %v13878_v18 = vadd.f32 %v4677_v37, %v4536_v56  ;;  %v4539_v31 = vadd.f32 %v9983_v45, %v13627_v20  ;;  %v4687_v26 = vpop.f32.mrf.mxu0  ;;  %10284 = vmatprep.mubr.msk.f32.mxu1 %vm361_vm1, %v15825_v10  ;;  %v15828_v37 = vld [vmem:[#allocation131_spill] sm:$0xff]  ;;  %v15831_v10 = vld [vmem:[#allocation101_spill] sm:$0xff] }
 0x296   : > { %v4419_v39 = vpop.f32.mrf.mxu1 }
 0x297   : > { %v13883_v32 = vadd.f32 %v10033_v21, %v4539_v31  ;;  %v4538_v30 = vadd.f32 %v4419_v39, %v13636_v42  ;;  %v10036_v29 = vpop.f32.mrf.mxu0  ;;  %10335 = vmatmul.mubr.msk.f32.gmra.mxu0 %vm361_vm1, %v15826_v38  ;;  %v15829_v21 = vld [vmem:[#allocation99_spill] sm:$0xff]  ;;  %v15830_v38 = vld [vmem:[#allocation132_spill] sm:$0xff] }
 0x298   : > { %v9986_v8 = vpop.f32.mrf.mxu1  ;;  %10285 = vmatmul.mubr.msk.f32.gmra.mxu1 %vm361_vm1, %v15827_v60  ;;  %10337 = vmatprep.mubr.msk.f32.mxu0 %vm361_vm1, %v15828_v37 }
 0x299   : > { %v13892_v20 = vadd.f32 %v4687_v26, %v4538_v30  ;;  %v4541_v45 = vadd.f32 %v9986_v8, %v13641_v41  ;;  %v4697_v56 = vpop.f32.mrf.mxu0  ;;  %10287 = vmatprep.mubr.msk.f32.mxu1 %vm361_vm1, %v15829_v21  ;;  %v15832_v26 = vld [vmem:[#allocation133_spill] sm:$0xff]  ;;  %v15835_v21 = vld [vmem:[#allocation106_spill] sm:$0xff] }
 0x29a   : > { %v4429_v42 = vpop.f32.mrf.mxu1 }
 0x29b   : > { %v13897_v24 = vadd.f32 %v10036_v29, %v4541_v45  ;;  %v4540_v31 = vadd.f32 %v4429_v42, %v13650_v59  ;;  %v10039_v39 = vpop.f32.mrf.mxu0  ;;  %10338 = vmatmul.mubr.msk.f32.gmra.mxu0 %vm361_vm1, %v15830_v38  ;;  %v15833_v29 = vld [vmem:[#allocation103_spill] sm:$0xff]  ;;  %v15834_v38 = vld [vmem:[#allocation134_spill] sm:$0xff] }
 0x29c   : > { %v9989_v60 = vpop.f32.mrf.mxu1  ;;  %10288 = vmatmul.mubr.msk.f32.gmra.mxu1 %vm361_vm1, %v15831_v10  ;;  %10340 = vmatprep.mubr.msk.f32.mxu0 %vm361_vm1, %v15832_v26 }
 0x29d   : > { %v13906_v41 = vadd.f32 %v4697_v56, %v4540_v31  ;;  %v4543_v8 = vadd.f32 %v9989_v60, %v13655_v55  ;;  %v4707_v30 = vpop.f32.mrf.mxu0  ;;  %10290 = vmatprep.mubr.msk.f32.mxu1 %vm361_vm1, %v15833_v29  ;;  %v15836_v56 = vld [vmem:[#allocation135_spill] sm:$0xff]  ;;  %v15839_v29 = vld [vmem:[#allocation109_spill] sm:$0xff] }
 0x29e   : > { %v4439_v59 = vpop.f32.mrf.mxu1 }
 0x29f   : > { %v13911_v37 = vadd.f32 %v10039_v39, %v4543_v8  ;;  %v4542_v45 = vadd.f32 %v4439_v59, %v13664_v23  ;;  %v10042_v42 = vpop.f32.mrf.mxu0  ;;  %10341 = vmatmul.mubr.msk.f32.gmra.mxu0 %vm361_vm1, %v15834_v38  ;;  %v15837_v39 = vld [vmem:[#allocation107_spill] sm:$0xff]  ;;  %v15838_v38 = vld [vmem:[#allocation138_spill] sm:$0xff] }
 0x2a0   : > { %v9992_v10 = vpop.f32.mrf.mxu1  ;;  %10291 = vmatmul.mubr.msk.f32.gmra.mxu1 %vm361_vm1, %v15835_v21  ;;  %10343 = vmatprep.mubr.msk.f32.mxu0 %vm361_vm1, %v15836_v56 }
 0x2a1   : > { %v13920_v55 = vadd.f32 %v4707_v30, %v4542_v45  ;;  %v4545_v60 = vadd.f32 %v9992_v10, %v13669_v33  ;;  %v4717_v31 = vpop.f32.mrf.mxu0  ;;  %10293 = vmatprep.mubr.msk.f32.mxu1 %vm361_vm1, %v15837_v39  ;;  %v15840_v30 = vld [vmem:[#allocation139_spill] sm:$0xff]  ;;  %v15843_v39 = vld [vmem:[#allocation114_spill] sm:$0xff] }
 0x2a2   : > { %v4449_v23 = vpop.f32.mrf.mxu1 }
 0x2a3   : > { %v13925_v26 = vadd.f32 %v10042_v42, %v4545_v60  ;;  %v4544_v8 = vadd.f32 %v4449_v23, %v13678_v3  ;;  %v10045_v59 = vpop.f32.mrf.mxu0  ;;  %10344 = vmatmul.mubr.msk.f32.gmra.mxu0 %vm361_vm1, %v15838_v38  ;;  %v15841_v42 = vld [vmem:[#allocation111_spill] sm:$0xff] }
 0x2a4   : > { %v9995_v21 = vpop.f32.mrf.mxu1  ;;  %10294 = vmatmul.mubr.msk.f32.gmra.mxu1 %vm361_vm1, %v15839_v29  ;;  %10346 = vmatprep.mubr.msk.f32.mxu0 %vm361_vm1, %v15840_v30  ;;  %v15842_v38 = vld [vmem:[#allocation143_spill] sm:$0xff] }
 0x2a5   : > { %v13934_v33 = vadd.f32 %v4717_v31, %v4544_v8  ;;  %v4547_v10 = vadd.f32 %v9995_v21, %v13683_v47  ;;  %v4727_v45 = vpop.f32.mrf.mxu0  ;;  %10296 = vmatprep.mubr.msk.f32.mxu1 %vm361_vm1, %v15841_v42  ;;  %v15844_v31 = vld [vmem:[#allocation147_spill] sm:$0xff]  ;;  %v15847_v42 = vld [vmem:[#allocation117_spill] sm:$0xff] }
 0x2a6   : > { %v4459_v3 = vpop.f32.mrf.mxu1 }
 0x2a7   : > { %v13939_v56 = vadd.f32 %v10045_v59, %v4547_v10  ;;  %v4546_v60 = vadd.f32 %v4459_v3, %v13692_v34  ;;  %v10048_v23 = vpop.f32.mrf.mxu0  ;;  %10347 = vmatmul.mubr.msk.f32.gmra.mxu0 %vm361_vm1, %v15842_v38  ;;  %v15845_v59 = vld [vmem:[#allocation115_spill] sm:$0xff] }
 0x2a8   : > { %v9998_v29 = vpop.f32.mrf.mxu1  ;;  %10297 = vmatmul.mubr.msk.f32.gmra.mxu1 %vm361_vm1, %v15843_v39  ;;  %10349 = vmatprep.mubr.msk.f32.mxu0 %vm361_vm1, %v15844_v31  ;;  %v15846_v38 = vld [vmem:[#allocation11_spill] sm:$0xff] }
 0x2a9   : > { %v13948_v47 = vadd.f32 %v4727_v45, %v4546_v60  ;;  %v4549_v21 = vadd.f32 %v9998_v29, %v13697_v25  ;;  %v4737_v8 = vpop.f32.mrf.mxu0  ;;  %10299 = vmatprep.mubr.msk.f32.mxu1 %vm361_vm1, %v15845_v59  ;;  %v15848_v45 = vld [vmem:[#allocation40_spill] sm:$0xff]  ;;  %v15851_v59 = vld [vmem:[#allocation121_spill] sm:$0xff] }
 0x2aa   : > { %v4469_v34 = vpop.f32.mrf.mxu1 }
 0x2ab   : > { %v13953_v30 = vadd.f32 %v10048_v23, %v4549_v21  ;;  %v4548_v10 = vadd.f32 %v4469_v34, %v13706_v12  ;;  %v10051_v3 = vpop.f32.mrf.mxu0  ;;  %10350 = vmatmul.mubr.msk.f32.gmra.mxu0 %vm361_vm1, %v15846_v38  ;;  %v15849_v23 = vld [vmem:[#allocation119_spill] sm:$0xff]  ;;  %v15850_v38 = vld [vmem:[#allocation13_spill] sm:$0xff] }
 0x2ac   : > { %v10001_v39 = vpop.f32.mrf.mxu1  ;;  %10300 = vmatmul.mubr.msk.f32.gmra.mxu1 %vm361_vm1, %v15847_v42  ;;  %10352 = vmatprep.mubr.msk.f32.mxu0 %vm361_vm1, %v15848_v45  ;;  %v5899_v45 = vrot.slane %v13444_v35, 4 }
 0x2ad   : > { %v13962_v25 = vadd.f32 %v4737_v8, %v4548_v10  ;;  %v4551_v29 = vadd.f32 %v10001_v39, %v13711_v61  ;;  %v4747_v60 = vpop.f32.mrf.mxu0  ;;  %10302 = vmatprep.mubr.msk.f32.mxu1 %vm361_vm1, %v15849_v23  ;;  %v15852_v10 = vld [vmem:[#allocation141_spill] sm:$0xff] }
 0x2ae   : > { %v4479_v12 = vpop.f32.mrf.mxu1 }
 0x2af   : > { %v13967_v31 = vadd.f32 %v10051_v3, %v4551_v29  ;;  %v4550_v21 = vadd.f32 %v4479_v12, %v13720_v4  ;;  %v10054_v34 = vpop.f32.mrf.mxu0  ;;  %10353 = vmatmul.mubr.msk.f32.gmra.mxu0 %vm361_vm1, %v15850_v38  ;;  %v5898_v3 = vrot.slane %v13441_v11, 4 }
 0x2b0   : > { %v10004_v42 = vpop.f32.mrf.mxu1  ;;  %10303 = vmatmul.mubr.msk.f32.gmra.mxu1 %vm361_vm1, %v15851_v59  ;;  %10355 = vmatprep.mubr.msk.f32.mxu0 %vm361_vm1, %v13488_v1  ;;  %v15853_v1 = vld [vmem:[#allocation17_spill] sm:$0xff] }
 0x2b1   : > { %v13976_v61 = vadd.f32 %v4747_v60, %v4550_v21  ;;  %v4553_v39 = vadd.f32 %v10004_v42, %v13729_v17  ;;  %v4757_v8 = vpop.f32.mrf.mxu0  ;;  %10305 = vmatprep.mubr.msk.f32.mxu1 %vm361_vm1, %v15852_v10  ;;  %v15854_v17 = vld [vmem:[#allocation140_spill] sm:$0xff]  ;;  %v14002_v10 = vsel %vm1748_vm4, %v5898_v3, %v5899_v45 }
 0x2b2   : > { %v4489_v4 = vpop.f32.mrf.mxu1  ;;  %15856 = vst [vmem:[#allocation70_spill] sm:$0xff] %v14002_v10 }
 0x2b3   : > { %v13983_v29 = vadd.f32 %v10054_v34, %v4553_v39  ;;  %v4552_v12 = vadd.f32 %v4489_v4, %v13739_v62  ;;  %v10057_v38 = vpop.f32.mrf.mxu0  ;;  %10356 = vmatmul.mubr.msk.f32.gmra.mxu0 %vm361_vm1, %v15853_v1  ;;  %v15855_v39 = vld [vmem:[#allocation7_spill] sm:$0xff]  ;;  %v13998_v62 = vld [vmem:[%s10815_s7 + $0x1c8] sm:$0xff]  ;;  %v5901_v4 = vrot.slane %v13469_v43, 4 }
 0x2b4   : > { %v10007_v60 = vpop.f32.mrf.mxu1  ;;  %10306 = vmatmul.mubr.msk.f32.gmra.mxu1 %vm361_vm1, %v15854_v17  ;;  %10358 = vmatprep.mubr.msk.f32.mxu0 %vm361_vm1, %v13441_v11  ;;  %v14014_v43 = vld [vmem:[%s10815_s7 + $0x1d0] sm:$0xff] }
 0x2b5   : > { %v13992_v42 = vadd.f32 %v4757_v8, %v4552_v12  ;;  %v4555_v21 = vadd.f32 %v10007_v60, %v13751_v46  ;;  %v4767_v34 = vpop.f32.mrf.mxu0  ;;  %10308 = vmatprep.mubr.msk.f32.mxu1 %vm361_vm1, %v15855_v39  ;;  %v15857_v12 = vld [vmem:[#allocation65_spill] sm:$0xff]  ;;  %v15862_v39 = vld [vmem:[#allocation22_spill] sm:$0xff] }
 0x2b6   : > { %v4499_v1 = vpop.f32.mrf.mxu1 }
 0x2b7   : > { %v14004_v17 = vadd.f32 %v10057_v38, %v4555_v21  ;;  %v4554_v11 = vadd.f32 %v4499_v1, %v13763_v19  ;;  %v10060_v8 = vpop.f32.mrf.mxu0  ;;  %10359 = vmatmul.mubr.msk.f32.gmra.mxu0 %vm361_vm1, %v13444_v35  ;;  %v14022_v19 = vsel %vm1748_vm4, %v5899_v45, %v5901_v4 }
 0x2b8   : > { %v10010_v46 = vpop.f32.mrf.mxu1  ;;  %10309 = vmatmul.mubr.msk.f32.gmra.mxu1 %vm361_vm1, %v15857_v12  ;;  %10361 = vmatprep.mubr.msk.f32.mxu0 %vm361_vm1, %v13998_v62  ;;  %15858 = vst [vmem:[#allocation72_spill] sm:$0xff] %v14022_v19 }
 0x2b9   : > { %v14016_v60 = vadd.f32 %v4767_v34, %v4554_v11  ;;  %v4557_v3 = vadd.f32 %v10010_v46, %v13771_v2  ;;  %v4777_v38 = vpop.f32.mrf.mxu0  ;;  %10311 = vmatprep.mubr.msk.f32.mxu1 %vm361_vm1, %v14002_v10  ;;  %v15859_v2 = vld [vmem:[#allocation43_spill] sm:$0xff]  ;;  %v15861_v10 = vld [vmem:[#allocation44_spill] sm:$0xff] }
 0x2ba   : > { %v4509_v35 = vpop.f32.mrf.mxu1 }
 0x2bb   : > { %v14024_v21 = vadd.f32 %v10060_v8, %v4557_v3  ;;  %v4556_v1 = vadd.f32 %v4509_v35, %v13780_v53  ;;  %v10063_v12 = vpop.f32.mrf.mxu0  ;;  %10362 = vmatmul.mubr.msk.f32.gmra.mxu0 %vm361_vm1, %v14014_v43  ;;  %v15860_v8 = vld [vmem:[#allocation19_spill] sm:$0xff] }
 0x2bc   : > { %v10013_v34 = vpop.f32.mrf.mxu1  ;;  %10312 = vmatmul.mubr.msk.f32.gmra.mxu1 %vm361_vm1, %v14022_v19  ;;  %10416 = vmatprep.mubr.msk.f32.mxu0 %vm361_vm1, %v15859_v2 }
 0x2bd   : > { %v14033_v11 = vadd.f32 %v4777_v38, %v4556_v1  ;;  %v4559_v45 = vadd.f32 %v10013_v34, %v13785_v5  ;;  %v4787_v4 = vpop.f32.mrf.mxu0  ;;  %10366 = vmatprep.mubr.msk.f32.mxu1 %vm361_vm1, %v15860_v8  ;;  %v15863_v1 = vld [vmem:[#allocation24_spill] sm:$0xff]  ;;  %v15864_v34 = vld [vmem:[#allocation45_spill] sm:$0xff] }
 0x2be   : > { %v4519_v53 = vpop.f32.mrf.mxu1 }
 0x2bf   : > { %v14038_v46 = vadd.f32 %v10063_v12, %v4559_v45  ;;  %v4558_v3 = vadd.f32 %v4519_v53, %v13803_v6  ;;  %v10118_v35 = vpop.f32.mrf.mxu0  ;;  %10417 = vmatmul.mubr.msk.f32.vlgmr.msra.gmra.mxu0 %vm361_vm1, %v15861_v10  ;;  %v15868_v53 = vld [vmem:[#allocation29_spill] sm:$0xff] }
 0x2c0   : > { %v10068_v19 = vpop.f32.mrf.mxu1  ;;  %10367 = vmatmul.mubr.msk.f32.vlgmr.msra.gmra.mxu1 %vm361_vm1, %v15862_v39  ;;  %10515 = vmatpush3.msra.mxu0 %v13801_v49  ;;  %v15865_v49 = vld [vmem:[#allocation46_spill] sm:$0xff] }
 0x2c1   : > { %v14046_v5 = vadd.f32 %v4787_v4, %v4558_v3  ;;  %v5062_v38 = vadd.f32 %v10068_v19, %v13812_v27  ;;  %10465 = vmatpush3.msra.mxu1 %v13793_v28  ;;  %v5171_v12 = vpop.f32.mrf.mxu0  ;;  %10369 = vmatprep.mubr.msk.f32.mxu1 %vm361_vm1, %v15863_v1  ;;  %v15866_v27 = vld [vmem:[#allocation27_spill] sm:$0xff]  ;;  %v15869_v1 = vld [vmem:[#allocation48_spill] sm:$0xff] }
 0x2c2   : > { %v4902_v6 = vpop.f32.mrf.mxu1  ;;  %10419 = vmatprep.mubr.msk.f32.mxu0 %vm361_vm1, %v15864_v34  ;;  %v15867_v28 = vld [vmem:[#allocation47_spill] sm:$0xff] }
 0x2c3   : > { %v14054_v10 = vadd.f32 %v10118_v35, %v5062_v38  ;;  %v5061_v39 = vadd.f32 %v4902_v6, %v13822_v7  ;;  %v10121_v2 = vpop.f32.mrf.mxu0  ;;  %10420 = vmatmul.mubr.msk.f32.gmra.mxu0 %vm361_vm1, %v15865_v49  ;;  %v15870_v34 = vld [vmem:[#allocation31_spill] sm:$0xff] }
 0x2c4   : > { %v10071_v45 = vpop.f32.mrf.mxu1  ;;  %10370 = vmatmul.mubr.msk.f32.gmra.mxu1 %vm361_vm1, %v15866_v27  ;;  %10422 = vmatprep.mubr.msk.f32.mxu0 %vm361_vm1, %v15867_v28 }
 0x2c5   : > { %v14063_v19 = vadd.f32 %v5171_v12, %v5061_v39  ;;  %v5064_v4 = vadd.f32 %v10071_v45, %v13827_v14  ;;  %v5181_v8 = vpop.f32.mrf.mxu0  ;;  %10372 = vmatprep.mubr.msk.f32.mxu1 %vm361_vm1, %v15868_v53  ;;  %v15871_v12 = vld [vmem:[#allocation49_spill] sm:$0xff] }
 0x2c6   : > { %v4912_v7 = vpop.f32.mrf.mxu1 }
 0x2c7   : > { %v14068_v3 = vadd.f32 %v10121_v2, %v5064_v4  ;;  %v5063_v35 = vadd.f32 %v4912_v7, %v13836_v50  ;;  %v10124_v38 = vpop.f32.mrf.mxu0  ;;  %10423 = vmatmul.mubr.msk.f32.gmra.mxu0 %vm361_vm1, %v15869_v1  ;;  %v15872_v2 = vld [vmem:[#allocation33_spill] sm:$0xff]  ;;  %v15873_v4 = vld [vmem:[#allocation50_spill] sm:$0xff]  ;;  %v15874_v7 = vld [vmem:[#allocation35_spill] sm:$0xff] }
 0x2c8   : > { %v10074_v6 = vpop.f32.mrf.mxu1  ;;  %10373 = vmatmul.mubr.msk.f32.gmra.mxu1 %vm361_vm1, %v15870_v34  ;;  %10425 = vmatprep.mubr.msk.f32.mxu0 %vm361_vm1, %v15871_v12 }
 0x2c9   : > { %v14077_v14 = vadd.f32 %v5181_v8, %v5063_v35  ;;  %v5066_v39 = vadd.f32 %v10074_v6, %v13841_v40  ;;  %v5191_v49 = vpop.f32.mrf.mxu0  ;;  %10375 = vmatprep.mubr.msk.f32.mxu1 %vm361_vm1, %v15872_v2  ;;  %v15875_v8 = vld [vmem:[#allocation51_spill] sm:$0xff] }
 0x2ca   : > { %v4922_v50 = vpop.f32.mrf.mxu1 }
 0x2cb   : > { %v14082_v45 = vadd.f32 %v10124_v38, %v5066_v39  ;;  %v5065_v27 = vadd.f32 %v4922_v50, %v13850_v51  ;;  %v10127_v28 = vpop.f32.mrf.mxu0  ;;  %10426 = vmatmul.mubr.msk.f32.gmra.mxu0 %vm361_vm1, %v15873_v4  ;;  %v15876_v38 = vld [vmem:[#allocation5_spill] sm:$0xff]  ;;  %v15877_v39 = vld [vmem:[#allocation52_spill] sm:$0xff]  ;;  %v15878_v50 = vld [vmem:[#allocation6_spill] sm:$0xff] }
 0x2cc   : > { %v10077_v53 = vpop.f32.mrf.mxu1  ;;  %10376 = vmatmul.mubr.msk.f32.gmra.mxu1 %vm361_vm1, %v15874_v7  ;;  %10428 = vmatprep.mubr.msk.f32.mxu0 %vm361_vm1, %v15875_v8 }
 0x2cd   : > { %v14091_v40 = vadd.f32 %v5191_v49, %v5065_v27  ;;  %v5068_v35 = vadd.f32 %v10077_v53, %v13855_v52  ;;  %v5201_v1 = vpop.f32.mrf.mxu0  ;;  %10378 = vmatprep.mubr.msk.f32.mxu1 %vm361_vm1, %v15876_v38  ;;  %v15879_v49 = vld [vmem:[#allocation53_spill] sm:$0xff] }
 0x2ce   : > { %v4932_v51 = vpop.f32.mrf.mxu1 }
 0x2cf   : > { %v14096_v6 = vadd.f32 %v10127_v28, %v5068_v35  ;;  %v5067_v34 = vadd.f32 %v4932_v51, %v13864_v58  ;;  %v10130_v12 = vpop.f32.mrf.mxu0  ;;  %10429 = vmatmul.mubr.msk.f32.gmra.mxu0 %vm361_vm1, %v15877_v39  ;;  %v15880_v28 = vld [vmem:[#allocation8_spill] sm:$0xff]  ;;  %v15881_v35 = vld [vmem:[#allocation54_spill] sm:$0xff] }
 0x2d0   : > { %v10080_v2 = vpop.f32.mrf.mxu1  ;;  %10379 = vmatmul.mubr.msk.f32.gmra.mxu1 %vm361_vm1, %v15878_v50  ;;  %10431 = vmatprep.mubr.msk.f32.mxu0 %vm361_vm1, %v15879_v49  ;;  %v15882_v51 = vld [vmem:[#allocation10_spill] sm:$0xff] }
 0x2d1   : > { %v14105_v52 = vadd.f32 %v5201_v1, %v5067_v34  ;;  %v5070_v27 = vadd.f32 %v10080_v2, %v13869_v22  ;;  %v5211_v4 = vpop.f32.mrf.mxu0  ;;  %10381 = vmatprep.mubr.msk.f32.mxu1 %vm361_vm1, %v15880_v28  ;;  %v15883_v1 = vld [vmem:[#allocation55_spill] sm:$0xff] }
 0x2d2   : > { %v4942_v58 = vpop.f32.mrf.mxu1 }
 0x2d3   : > { %v14110_v53 = vadd.f32 %v10130_v12, %v5070_v27  ;;  %v5069_v7 = vadd.f32 %v4942_v58, %v13878_v18  ;;  %v10133_v8 = vpop.f32.mrf.mxu0  ;;  %10432 = vmatmul.mubr.msk.f32.gmra.mxu0 %vm361_vm1, %v15881_v35  ;;  %v15884_v12 = vld [vmem:[#allocation12_spill] sm:$0xff]  ;;  %v15886_v58 = vld [vmem:[#allocation14_spill] sm:$0xff] }
 0x2d4   : > { %v10083_v38 = vpop.f32.mrf.mxu1  ;;  %10382 = vmatmul.mubr.msk.f32.gmra.mxu1 %vm361_vm1, %v15882_v51  ;;  %10434 = vmatprep.mubr.msk.f32.mxu0 %vm361_vm1, %v15883_v1  ;;  %v15885_v27 = vld [vmem:[#allocation56_spill] sm:$0xff]  ;;  %v15888_v1 = vld [vmem:[#allocation58_spill] sm:$0xff] }
 0x2d5   : > { %v14119_v22 = vadd.f32 %v5211_v4, %v5069_v7  ;;  %v5072_v34 = vadd.f32 %v10083_v38, %v13883_v32  ;;  %v5221_v39 = vpop.f32.mrf.mxu0  ;;  %10384 = vmatprep.mubr.msk.f32.mxu1 %vm361_vm1, %v15884_v12  ;;  %v15889_v12 = vld [vmem:[#allocation18_spill] sm:$0xff] }
 0x2d6   : > { %v4952_v18 = vpop.f32.mrf.mxu1 }
 0x2d7   : > { %v14124_v2 = vadd.f32 %v10133_v8, %v5072_v34  ;;  %v5071_v50 = vadd.f32 %v4952_v18, %v13892_v20  ;;  %v10136_v49 = vpop.f32.mrf.mxu0  ;;  %10435 = vmatmul.mubr.msk.f32.gmra.mxu0 %vm361_vm1, %v15885_v27  ;;  %v15887_v8 = vld [vmem:[#allocation16_spill] sm:$0xff] }
 0x2d8   : > { %v10086_v28 = vpop.f32.mrf.mxu1  ;;  %10385 = vmatmul.mubr.msk.f32.gmra.mxu1 %vm361_vm1, %v15886_v58  ;;  %10437 = vmatprep.mubr.msk.f32.mxu0 %vm361_vm1, %v15782_v9  ;;  %v15890_v9 = vld [vmem:[#allocation59_spill] sm:$0xff]  ;;  %v15892_v58 = vld [vmem:[#allocation60_spill] sm:$0xff] }
 0x2d9   : > { %v14133_v32 = vadd.f32 %v5221_v39, %v5071_v50  ;;  %v5074_v4 = vadd.f32 %v10086_v28, %v13897_v24  ;;  %v5231_v7 = vpop.f32.mrf.mxu0  ;;  %10387 = vmatprep.mubr.msk.f32.mxu1 %vm361_vm1, %v15887_v8  ;;  %v15891_v50 = vld [vmem:[#allocation20_spill] sm:$0xff]  ;;  %v15893_v8 = vld [vmem:[#allocation23_spill] sm:$0xff] }
 0x2da   : > { %v4962_v20 = vpop.f32.mrf.mxu1 }
 0x2db   : > { %v14138_v35 = vadd.f32 %v10136_v49, %v5074_v4  ;;  %v5073_v38 = vadd.f32 %v4962_v20, %v13906_v41  ;;  %v10139_v51 = vpop.f32.mrf.mxu0  ;;  %10438 = vmatmul.mubr.msk.f32.gmra.mxu0 %vm361_vm1, %v15888_v1 }
 0x2dc   : > { %v10089_v34 = vpop.f32.mrf.mxu1  ;;  %10388 = vmatmul.mubr.msk.f32.gmra.mxu1 %vm361_vm1, %v15889_v12  ;;  %10440 = vmatprep.mubr.msk.f32.mxu0 %vm361_vm1, %v15890_v9  ;;  %v15895_v9 = vld [vmem:[#allocation28_spill] sm:$0xff] }
 0x2dd   : > { %v14147_v24 = vadd.f32 %v5231_v7, %v5073_v38  ;;  %v5076_v39 = vadd.f32 %v10089_v34, %v13911_v37  ;;  %v5241_v18 = vpop.f32.mrf.mxu0  ;;  %10390 = vmatprep.mubr.msk.f32.mxu1 %vm361_vm1, %v15891_v50  ;;  %v15894_v38 = vld [vmem:[#allocation26_spill] sm:$0xff] }
 0x2de   : > { %v4972_v41 = vpop.f32.mrf.mxu1  ;;  %v15897_v50 = vld [vmem:[#allocation30_spill] sm:$0xff] }
 0x2df   : > { %v14152_v49 = vadd.f32 %v10139_v51, %v5076_v39  ;;  %v5075_v27 = vadd.f32 %v4972_v41, %v13920_v55  ;;  %v10142_v28 = vpop.f32.mrf.mxu0  ;;  %10441 = vmatmul.mubr.msk.f32.gmra.mxu0 %vm361_vm1, %v15892_v58 }
 0x2e0   : > { %v10092_v4 = vpop.f32.mrf.mxu1  ;;  %10391 = vmatmul.mubr.msk.f32.gmra.mxu1 %vm361_vm1, %v15893_v8  ;;  %10443 = vmatprep.mubr.msk.f32.mxu0 %vm361_vm1, %v15789_v15  ;;  %v15896_v15 = vld [vmem:[#allocation25_spill] sm:$0xff] }
 0x2e1   : > { %v14161_v37 = vadd.f32 %v5241_v18, %v5075_v27  ;;  %v5078_v7 = vadd.f32 %v10092_v4, %v13925_v26  ;;  %v5251_v20 = vpop.f32.mrf.mxu0  ;;  %10393 = vmatprep.mubr.msk.f32.mxu1 %vm361_vm1, %v15894_v38  ;;  %v15899_v4 = vld [vmem:[#allocation32_spill] sm:$0xff] }
 0x2e2   : > { %v4982_v55 = vpop.f32.mrf.mxu1 }
 0x2e3   : > { %v14166_v51 = vadd.f32 %v10142_v28, %v5078_v7  ;;  %v5077_v1 = vadd.f32 %v4982_v55, %v13934_v33  ;;  %v10145_v34 = vpop.f32.mrf.mxu0  ;;  %10444 = vmatmul.mubr.msk.f32.gmra.mxu0 %vm361_vm1, %v15791_v0  ;;  %v15898_v28 = vld [vmem:[#allocation62_spill] sm:$0xff] }
 0x2e4   : > { %v10095_v12 = vpop.f32.mrf.mxu1  ;;  %10394 = vmatmul.mubr.msk.f32.gmra.mxu1 %vm361_vm1, %v15895_v9  ;;  %10446 = vmatprep.mubr.msk.f32.mxu0 %vm361_vm1, %v15896_v15  ;;  %v15902_v9 = vld [vmem:[#allocation36_spill] sm:$0xff] }
 0x2e5   : > { %v14175_v26 = vadd.f32 %v5251_v20, %v5077_v1  ;;  %v5080_v39 = vadd.f32 %v10095_v12, %v13939_v56  ;;  %v5261_v18 = vpop.f32.mrf.mxu0  ;;  %10396 = vmatprep.mubr.msk.f32.mxu1 %vm361_vm1, %v15897_v50  ;;  %v15900_v20 = vld [vmem:[#allocation34_spill] sm:$0xff] }
 0x2e6   : > { %v4992_v33 = vpop.f32.mrf.mxu1 }
 0x2e7   : > { %v14180_v41 = vadd.f32 %v10145_v34, %v5080_v39  ;;  %v5079_v0 = vadd.f32 %v4992_v33, %v13948_v47  ;;  %v10148_v27 = vpop.f32.mrf.mxu0  ;;  %10447 = vmatmul.mubr.msk.f32.gmra.mxu0 %vm361_vm1, %v15898_v28  ;;  %v15901_v34 = vld [vmem:[#allocation64_spill] sm:$0xff] }
 0x2e8   : > { %v10098_v58 = vpop.f32.mrf.mxu1  ;;  %10397 = vmatmul.mubr.msk.f32.gmra.mxu1 %vm361_vm1, %v15899_v4  ;;  %10449 = vmatprep.mubr.msk.f32.mxu0 %vm361_vm1, %v15795_v44  ;;  %v15903_v44 = vld [vmem:[#allocation39_spill] sm:$0xff] }
 0x2e9   : > { %v14189_v56 = vadd.f32 %v5261_v18, %v5079_v0  ;;  %v5082_v8 = vadd.f32 %v10098_v58, %v13953_v30  ;;  %v5271_v7 = vpop.f32.mrf.mxu0  ;;  %10399 = vmatprep.mubr.msk.f32.mxu1 %vm361_vm1, %v15900_v20  ;;  %v15904_v18 = vld [vmem:[#allocation144_spill] sm:$0xff]  ;;  %v6701_v20 = vrot.slane %v14014_v43, 2 }
 0x2ea   : > { %v5002_v47 = vpop.f32.mrf.mxu1  ;;  %v15906_v58 = vld [vmem:[#allocation148_spill] sm:$0xff] }
 0x2eb   : > { %v14194_v38 = vadd.f32 %v10148_v27, %v5082_v8  ;;  %v5081_v55 = vadd.f32 %v5002_v47, %v13962_v25  ;;  %v10151_v1 = vpop.f32.mrf.mxu0  ;;  %10450 = vmatmul.mubr.msk.f32.gmra.mxu0 %vm361_vm1, %v15901_v34  ;;  %v15905_v27 = vld [vmem:[#allocation136_spill] sm:$0xff]  ;;  %v6433_v34 = vrot.slane %v14014_v43, 1 }
 0x2ec   : > { %v10101_v12 = vpop.f32.mrf.mxu1  ;;  %10400 = vmatmul.mubr.msk.f32.gmra.mxu1 %vm361_vm1, %v15902_v9  ;;  %10452 = vmatprep.mubr.msk.f32.mxu0 %vm361_vm1, %v15903_v44  ;;  %v14225_v47 = vld [vmem:[%s10815_s7 + $0x1d8] sm:$0xf]  ;;  %v15908_v9 = vld [vmem:[#allocation146_spill] sm:$0xff]  ;;  %s161_s7 = sand.u32 1, %s10720_s13  }
 0x2ed   : > { %v14203_v30 = vadd.f32 %v5271_v7, %v5081_v55  ;;  %v5084_v15 = vadd.f32 %v10101_v12, %v13967_v31  ;;  %v5281_v39 = vpop.f32.mrf.mxu0  ;;  %10402 = vmatprep.mubr.msk.f32.mxu1 %vm361_vm1, %v15904_v18  ;;  %v15907_v7 = vld [vmem:[#allocation145_spill] sm:$0xff]  ;;  %s7656_s27 = sshll.u32 %s161_s7, 8  ;;  %s14935_s16 = scalar_lea.sflag [#allocation3], %s161_s7 }
 0x2ee   : > { %v5012_v25 = vpop.f32.mrf.mxu1  ;;  %s14750_s30 = scalar_lea.vmem [#allocation2], %s7656_s27 }
 0x2ef   : > { %v14208_v50 = vadd.f32 %v10151_v1, %v5084_v15  ;;  %v5083_v33 = vadd.f32 %v5012_v25, %v13976_v61  ;;  %v10154_v0 = vpop.f32.mrf.mxu0  ;;  %10453 = vmatmul.mubr.msk.f32.gmra.mxu0 %vm361_vm1, %v15905_v27  ;;  %v6700_v61 = vrot.slane %v13998_v62, 2  ;;  %v6432_v1 = vrot.slane %v13998_v62, 1  ;;  %v15909_v15 = vld [vmem:[#allocation149_spill] sm:$0xff]  ;;  %s7590_s5 = sshll.u32 %s14750_s30, 4  ;;  %s14926_s5 = int_to_ptr.vmem [resolvable:$true] %s7590_s5 }
 0x2f0   : > { %v10104_v28 = vpop.f32.mrf.mxu1  ;;  %10403 = vmatmul.mubr.msk.f32.gmra.mxu1 %vm361_vm1, %v15906_v58  ;;  %10455 = vmatprep.mubr.msk.f32.mxu0 %vm361_vm1, %v15800_v63  ;;  %v6435_v27 = vrot.slane %v14225_v47, 1  ;;  %s10668_s10 = scalar_lea.vmem %s14926_s5, 4096  ;;  %p10675_p0 = scmp.lt.s32.totalorder %s14926_s5, %s10673_s17 }
 0x2f1   : > { %v14217_v31 = vadd.f32 %v5281_v39, %v5083_v33  ;;  %v5086_v4 = vadd.f32 %v10104_v28, %v13983_v29  ;;  %v5291_v8 = vpop.f32.mrf.mxu0  ;;  %10405 = vmatprep.mubr.msk.f32.mxu1 %vm361_vm1, %v15907_v7  ;;  %v6703_v39 = vrot.slane %v14225_v47, 2  ;;  %v6434_v58 = vsel %vm278_vm0, %v6432_v1, %v6433_v34  ;;  %p10669_p11 = scmp.ne.s32.totalorder %s14926_s5, %s10668_s10  ;;  %p10676_p1 = scmp.lt.s32.totalorder %s10674_s19, %s10668_s10 }
 0x2f2   : > { %v5022_v55 = vpop.f32.mrf.mxu1 }
 0x2f3   : > { %v14229_v63 = vadd.f32 %v10154_v0, %v5086_v4  ;;  %v5085_v12 = vadd.f32 %v5022_v55, %v13992_v42  ;;  %v10157_v29 = vpop.f32.mrf.mxu0  ;;  %10456 = vmatmul.mubr.msk.f32.gmra.mxu0 %vm361_vm1, %v15908_v9  ;;  %v15910_v0 = vld [vmem:[#allocation15_spill] sm:$0xff]  ;;  %v6702_v42 = vsel %vm940_vm2, %v6700_v61, %v6701_v20  ;;  %v6704_v61 = vsel %vm940_vm2, %v6701_v20, %v6703_v39  ;;  %p10670_p12 = pnand %p10669_p11, %p10791_p5  ;;  %p10677_p2 = por %p10676_p1, %p10675_p0 }
 0x2f4   : > { %v10107_v44 = vpop.f32.mrf.mxu1  ;;  %10406 = vmatmul.mubr.msk.f32.gmra.mxu1 %vm361_vm1, %v15909_v15  ;;  %10458 = vmatprep.mubr.msk.f32.mxu0 %vm361_vm1, %v13749_v54 }
 0x2f5   : > { %v14239_v18 = vadd.f32 %v5291_v8, %v5085_v12  ;;  %v5088_v25 = vadd.f32 %v10107_v44, %v14004_v17  ;;  %v5301_v33 = vpop.f32.mrf.mxu0  ;;  %10408 = vmatprep.mubr.msk.f32.mxu1 %vm361_vm1, %v15910_v0  ;;  %v15911_v8 = vld [vmem:[#allocation67_spill] sm:$0xff]  ;;  %p10671_p13 = pneg %p10670_p12 }
 0x2f6   : > { %v5032_v28 = vpop.f32.mrf.mxu1 }
 0x2f7   : > { %v14247_v4 = vadd.f32 %v10157_v29, %v5088_v25  ;;  %v5087_v54 = vadd.f32 %v5032_v28, %v14016_v60  ;;  %v10160_v7 = vpop.f32.mrf.mxu0  ;;  %10459 = vmatmul.mubr.msk.f32.gmra.mxu0 %vm361_vm1, %v13769_v48  ;;  %v6436_v60 = vsel %vm278_vm0, %v6433_v34, %v6435_v27  ;;  %v15912_v34 = vld [vmem:[#allocation76_spill] sm:$0xff]  ;;  %v15913_v27 = vld [vmem:[#allocation78_spill] sm:$0xff]  ;;  %p10678_p3 = pnand %p10677_p2, %p10671_p13 }
 0x2f8   : > { %v10110_v17 = vpop.f32.mrf.mxu1  ;;  %10409 = vmatmul.mubr.msk.f32.gmra.mxu1 %vm361_vm1, %v15911_v8  ;;  %10461 = vmatprep.mubr.msk.f32.mxu0 %vm361_vm1, %v6702_v42  ;;  %v15915_v8 = vld [vmem:[#allocation81_spill] sm:$0xff] }
 0x2f9   : > { %v14256_v55 = vadd.f32 %v5301_v33, %v5087_v54  ;;  %v5090_v1 = vadd.f32 %v10110_v17, %v14024_v21  ;;  %v5311_v12 = vpop.f32.mrf.mxu0  ;;  %10411 = vmatprep.mubr.msk.f32.mxu1 %vm361_vm1, %v6434_v58  ;;  %v15914_v58 = vld [vmem:[#allocation80_spill] sm:$0xff] }
 0x2fa   : > { %v5042_v29 = vpop.f32.mrf.mxu1 }
 0x2fb   : > { %v14261_v9 = vadd.f32 %v10160_v7, %v5090_v1  ;;  %v5089_v48 = vadd.f32 %v5042_v29, %v14033_v11  ;;  %v10163_v44 = vpop.f32.mrf.mxu0  ;;  %10462 = vmatmul.mubr.msk.f32.gmra.mxu0 %vm361_vm1, %v6704_v61 }
 0x2fc   : > { %v10113_v15 = vpop.f32.mrf.mxu1  ;;  %10412 = vmatmul.mubr.msk.f32.gmra.mxu1 %vm361_vm1, %v6436_v60  ;;  %10516 = vmatprep.mubr.msk.f32.mxu0 %vm361_vm1, %v15806_v57 }
 0x2fd   : > { %v14268_v21 = vadd.f32 %v5311_v12, %v5089_v48  ;;  %v5092_v20 = vadd.f32 %v10113_v15, %v14038_v46  ;;  %v5321_v39 = vpop.f32.mrf.mxu0  ;;  %10466 = vmatprep.mubr.msk.f32.mxu1 %vm361_vm1, %v15912_v34  ;;  %v15917_v12 = vld [vmem:[#allocation84_spill] sm:$0xff]  ;;  %v15918_v48 = vld [vmem:[#allocation85_spill] sm:$0xff]  ;;  %v15919_v15 = vld [vmem:[#allocation86_spill] sm:$0xff] }
 0x2fe   : > { %v5052_v25 = vpop.f32.mrf.mxu1 }
 0x2ff   : > { %v14273_v33 = vadd.f32 %v10163_v44, %v5092_v20  ;;  %v5091_v11 = vadd.f32 %v5052_v25, %v14046_v5  ;;  %v10218_v0 = vpop.f32.mrf.mxu0  ;;  %10517 = vmatmul.mubr.msk.f32.vlgmr.msra.gmra.mxu0 %vm361_vm1, %v15807_v36  ;;  %v15920_v20 = vld [vmem:[#allocation87_spill] sm:$0xff]  ;;  %v15921_v25 = vld [vmem:[#allocation88_spill] sm:$0xff] }
 0x300   : > { %v10168_v42 = vpop.f32.mrf.mxu1  ;;  %10467 = vmatmul.mubr.msk.f32.vlgmr.msra.gmra.mxu1 %vm361_vm1, %v15913_v27  ;;  %10519 = vmatprep.mubr.msk.f32.mxu0 %vm361_vm1, %v15809_v13  ;;  %v15916_v13 = vld [vmem:[#allocation83_spill] sm:$0xff]  ;;  %v15922_v27 = vld [vmem:[#allocation90_spill] sm:$0xff] }
 0x301   : > { %v14282_v57 = vadd.f32 %v5321_v39, %v5091_v11  ;;  %v5599_v46 = vadd.f32 %v10168_v42, %v14054_v10  ;;  %v5707_v28 = vpop.f32.mrf.mxu0  ;;  %10469 = vmatprep.mubr.msk.f32.mxu1 %vm361_vm1, %v15914_v58  ;;  %v15924_v58 = vld [vmem:[#allocation91_spill] sm:$0xff] }
 0x302   : > { %v5439_v5 = vpop.f32.mrf.mxu1 }
 0x303   : > { %v14287_v54 = vadd.f32 %v10218_v0, %v5599_v46  ;;  %v5598_v36 = vadd.f32 %v5439_v5, %v14063_v19  ;;  %v10221_v7 = vpop.f32.mrf.mxu0  ;;  %10520 = vmatmul.mubr.msk.f32.gmra.mxu0 %vm361_vm1, %v15811_v16 }
 0x304   : > { %v10171_v17 = vpop.f32.mrf.mxu1  ;;  %10470 = vmatmul.mubr.msk.f32.gmra.mxu1 %vm361_vm1, %v15915_v8  ;;  %10522 = vmatprep.mubr.msk.f32.mxu0 %vm361_vm1, %v15916_v13 }
 0x305   : > { %v14296_v10 = vadd.f32 %v5707_v28, %v5598_v36  ;;  %v5601_v61 = vadd.f32 %v10171_v17, %v14068_v3  ;;  %v5717_v1 = vpop.f32.mrf.mxu0  ;;  %10472 = vmatprep.mubr.msk.f32.mxu1 %vm361_vm1, %v15917_v12  ;;  %v15923_v28 = vld [vmem:[#allocation89_spill] sm:$0xff]  ;;  %v15927_v12 = vld [vmem:[#allocation94_spill] sm:$0xff] }
 0x306   : > { %v5449_v19 = vpop.f32.mrf.mxu1 }
 0x307   : > { %v14301_v60 = vadd.f32 %v10221_v7, %v5601_v61  ;;  %v5600_v16 = vadd.f32 %v5449_v19, %v14077_v14  ;;  %v10224_v29 = vpop.f32.mrf.mxu0  ;;  %10523 = vmatmul.mubr.msk.f32.gmra.mxu0 %vm361_vm1, %v15918_v48  ;;  %v15925_v7 = vld [vmem:[#allocation92_spill] sm:$0xff]  ;;  %v15926_v61 = vld [vmem:[#allocation93_spill] sm:$0xff]  ;;  %v15928_v19 = vld [vmem:[#allocation95_spill] sm:$0xff] }
 0x308   : > { %v10174_v44 = vpop.f32.mrf.mxu1  ;;  %10473 = vmatmul.mubr.msk.f32.gmra.mxu1 %vm361_vm1, %v15919_v15  ;;  %10525 = vmatprep.mubr.msk.f32.mxu0 %vm361_vm1, %v15920_v20  ;;  %v15929_v48 = vld [vmem:[#allocation96_spill] sm:$0xff] }
 0x309   : > { %v14310_v3 = vadd.f32 %v5717_v1, %v5600_v16  ;;  %v5603_v39 = vadd.f32 %v10174_v44, %v14082_v45  ;;  %v5727_v34 = vpop.f32.mrf.mxu0  ;;  %10475 = vmatprep.mubr.msk.f32.mxu1 %vm361_vm1, %v15921_v25  ;;  %v15931_v25 = vld [vmem:[#allocation97_spill] sm:$0xff] }
 0x30a   : > { %v5459_v14 = vpop.f32.mrf.mxu1 }
 0x30b   : > { %v14315_v11 = vadd.f32 %v10224_v29, %v5603_v39  ;;  %v5602_v0 = vadd.f32 %v5459_v14, %v14091_v40  ;;  %v10227_v42 = vpop.f32.mrf.mxu0  ;;  %10526 = vmatmul.mubr.msk.f32.gmra.mxu0 %vm361_vm1, %v15922_v27  ;;  %v15930_v39 = vld [vmem:[#allocation98_spill] sm:$0xff]  ;;  %v15932_v14 = vld [vmem:[#allocation99_spill] sm:$0xff]  ;;  %v15933_v27 = vld [vmem:[#allocation100_spill] sm:$0xff] }
 0x30c   : > { %v10177_v46 = vpop.f32.mrf.mxu1  ;;  %10476 = vmatmul.mubr.msk.f32.gmra.mxu1 %vm361_vm1, %v15923_v28  ;;  %10528 = vmatprep.mubr.msk.f32.mxu0 %vm361_vm1, %v15924_v58 }
 0x30d   : > { %v14324_v45 = vadd.f32 %v5727_v34, %v5602_v0  ;;  %v5605_v5 = vadd.f32 %v10177_v46, %v14096_v6  ;;  %v5737_v36 = vpop.f32.mrf.mxu0  ;;  %10478 = vmatprep.mubr.msk.f32.mxu1 %vm361_vm1, %v15925_v7  ;;  %v15935_v7 = vld [vmem:[#allocation102_spill] sm:$0xff] }
 0x30e   : > { %v5469_v40 = vpop.f32.mrf.mxu1 }
 0x30f   : > { %v14329_v17 = vadd.f32 %v10227_v42, %v5605_v5  ;;  %v5604_v8 = vadd.f32 %v5469_v40, %v14105_v52  ;;  %v10230_v13 = vpop.f32.mrf.mxu0  ;;  %10529 = vmatmul.mubr.msk.f32.gmra.mxu0 %vm361_vm1, %v15926_v61  ;;  %v15934_v5 = vld [vmem:[#allocation101_spill] sm:$0xff]  ;;  %v15936_v40 = vld [vmem:[#allocation103_spill] sm:$0xff]  ;;  %v15937_v61 = vld [vmem:[#allocation104_spill] sm:$0xff] }
 0x310   : > { %v10180_v1 = vpop.f32.mrf.mxu1  ;;  %10479 = vmatmul.mubr.msk.f32.gmra.mxu1 %vm361_vm1, %v15927_v12  ;;  %10531 = vmatprep.mubr.msk.f32.mxu0 %vm361_vm1, %v15928_v19 }
 0x311   : > { %v14338_v6 = vadd.f32 %v5737_v36, %v5604_v8  ;;  %v5607_v16 = vadd.f32 %v10180_v1, %v14110_v53  ;;  %v5747_v29 = vpop.f32.mrf.mxu0  ;;  %10481 = vmatprep.mubr.msk.f32.mxu1 %vm361_vm1, %v15929_v48  ;;  %v15939_v48 = vld [vmem:[#allocation105_spill] sm:$0xff] }
 0x312   : > { %v5479_v52 = vpop.f32.mrf.mxu1 }
 0x313   : > { %v14343_v44 = vadd.f32 %v10230_v13, %v5607_v16  ;;  %v5606_v15 = vadd.f32 %v5479_v52, %v14119_v22  ;;  %v10233_v20 = vpop.f32.mrf.mxu0  ;;  %10532 = vmatmul.mubr.msk.f32.gmra.mxu0 %vm361_vm1, %v15930_v39  ;;  %v15938_v16 = vld [vmem:[#allocation106_spill] sm:$0xff]  ;;  %v15940_v52 = vld [vmem:[#allocation107_spill] sm:$0xff]  ;;  %v15941_v39 = vld [vmem:[#allocation108_spill] sm:$0xff] }
 0x314   : > { %v10183_v34 = vpop.f32.mrf.mxu1  ;;  %10482 = vmatmul.mubr.msk.f32.gmra.mxu1 %vm361_vm1, %v15931_v25  ;;  %10534 = vmatprep.mubr.msk.f32.mxu0 %vm361_vm1, %v15932_v14 }
 0x315   : > { %v14352_v53 = vadd.f32 %v5747_v29, %v5606_v15  ;;  %v5609_v0 = vadd.f32 %v10183_v34, %v14124_v2  ;;  %v5757_v42 = vpop.f32.mrf.mxu0  ;;  %10484 = vmatprep.mubr.msk.f32.mxu1 %vm361_vm1, %v15933_v27  ;;  %v15943_v27 = vld [vmem:[#allocation110_spill] sm:$0xff] }
 0x316   : > { %v5489_v22 = vpop.f32.mrf.mxu1 }
 0x317   : > { %v14357_v46 = vadd.f32 %v10233_v20, %v5609_v0  ;;  %v5608_v28 = vadd.f32 %v5489_v22, %v14133_v32  ;;  %v10236_v58 = vpop.f32.mrf.mxu0  ;;  %10535 = vmatmul.mubr.msk.f32.gmra.mxu0 %vm361_vm1, %v15934_v5  ;;  %v15942_v0 = vld [vmem:[#allocation109_spill] sm:$0xff]  ;;  %v15944_v22 = vld [vmem:[#allocation111_spill] sm:$0xff]  ;;  %v15945_v5 = vld [vmem:[#allocation112_spill] sm:$0xff] }
 0x318   : > { %v10186_v36 = vpop.f32.mrf.mxu1  ;;  %10485 = vmatmul.mubr.msk.f32.gmra.mxu1 %vm361_vm1, %v15935_v7  ;;  %10537 = vmatprep.mubr.msk.f32.mxu0 %vm361_vm1, %v15936_v40 }
 0x319   : > { %v14366_v2 = vadd.f32 %v5757_v42, %v5608_v28  ;;  %v5611_v8 = vadd.f32 %v10186_v36, %v14138_v35  ;;  %v5767_v13 = vpop.f32.mrf.mxu0  ;;  %10487 = vmatprep.mubr.msk.f32.mxu1 %vm361_vm1, %v15937_v61  ;;  %v15947_v61 = vld [vmem:[#allocation113_spill] sm:$0xff] }
 0x31a   : > { %v5499_v32 = vpop.f32.mrf.mxu1 }
 0x31b   : > { %v14371_v1 = vadd.f32 %v10236_v58, %v5611_v8  ;;  %v5610_v12 = vadd.f32 %v5499_v32, %v14147_v24  ;;  %v10239_v19 = vpop.f32.mrf.mxu0  ;;  %10538 = vmatmul.mubr.msk.f32.gmra.mxu0 %vm361_vm1, %v15938_v16  ;;  %v15946_v8 = vld [vmem:[#allocation114_spill] sm:$0xff]  ;;  %v15948_v32 = vld [vmem:[#allocation115_spill] sm:$0xff]  ;;  %v15949_v16 = vld [vmem:[#allocation116_spill] sm:$0xff] }
 0x31c   : > { %v10189_v29 = vpop.f32.mrf.mxu1  ;;  %10488 = vmatmul.mubr.msk.f32.gmra.mxu1 %vm361_vm1, %v15939_v48  ;;  %10540 = vmatprep.mubr.msk.f32.mxu0 %vm361_vm1, %v15940_v52 }
 0x31d   : > { %v14380_v35 = vadd.f32 %v5767_v13, %v5610_v12  ;;  %v5613_v15 = vadd.f32 %v10189_v29, %v14152_v49  ;;  %v5777_v20 = vpop.f32.mrf.mxu0  ;;  %10490 = vmatprep.mubr.msk.f32.mxu1 %vm361_vm1, %v15941_v39  ;;  %v15951_v39 = vld [vmem:[#allocation118_spill] sm:$0xff] }
 0x31e   : > { %v5509_v24 = vpop.f32.mrf.mxu1 }
 0x31f   : > { %v14385_v34 = vadd.f32 %v10239_v19, %v5613_v15  ;;  %v5612_v25 = vadd.f32 %v5509_v24, %v14161_v37  ;;  %v10242_v14 = vpop.f32.mrf.mxu0  ;;  %10541 = vmatmul.mubr.msk.f32.gmra.mxu0 %vm361_vm1, %v15942_v0  ;;  %v15950_v15 = vld [vmem:[#allocation117_spill] sm:$0xff] }
 0x320   : > { %v10192_v42 = vpop.f32.mrf.mxu1  ;;  %10491 = vmatmul.mubr.msk.f32.gmra.mxu1 %vm361_vm1, %v15943_v27  ;;  %10543 = vmatprep.mubr.msk.f32.mxu0 %vm361_vm1, %v15944_v22 }
 0x321   : > { %v14394_v49 = vadd.f32 %v5777_v20, %v5612_v25  ;;  %v5615_v28 = vadd.f32 %v10192_v42, %v14166_v51  ;;  %v5787_v58 = vpop.f32.mrf.mxu0  ;;  %10493 = vmatprep.mubr.msk.f32.mxu1 %vm361_vm1, %v15945_v5 }
 0x322   : > { %v5519_v37 = vpop.f32.mrf.mxu1 }
 0x323   : > { %v14399_v36 = vadd.f32 %v10242_v14, %v5615_v28  ;;  %v5614_v7 = vadd.f32 %v5519_v37, %v14175_v26  ;;  %v10245_v40 = vpop.f32.mrf.mxu0  ;;  %10544 = vmatmul.mubr.msk.f32.gmra.mxu0 %vm361_vm1, %v15946_v8  ;;  %v15952_v14 = vld [vmem:[#allocation120_spill] sm:$0xff]  ;;  %v15953_v28 = vld [vmem:[#allocation122_spill] sm:$0xff] }
 0x324   : > { %v10195_v13 = vpop.f32.mrf.mxu1  ;;  %10494 = vmatmul.mubr.msk.f32.gmra.mxu1 %vm361_vm1, %v15947_v61  ;;  %10546 = vmatprep.mubr.msk.f32.mxu0 %vm361_vm1, %v15948_v32  ;;  %v15955_v37 = vld [vmem:[#allocation38_spill] sm:$0xff]  ;;  %v15956_v8 = vld [vmem:[#allocation140_spill] sm:$0xff]  ;;  %v15957_v61 = vld [vmem:[#allocation137_spill] sm:$0xff] }
 0x325   : > { %v14408_v51 = vadd.f32 %v5787_v58, %v5614_v7  ;;  %v5617_v12 = vadd.f32 %v10195_v13, %v14180_v41  ;;  %v5797_v19 = vpop.f32.mrf.mxu0  ;;  %10496 = vmatprep.mubr.msk.f32.mxu1 %vm361_vm1, %v15949_v16  ;;  %v15958_v32 = vld [vmem:[#allocation7_spill] sm:$0xff]  ;;  %v15959_v16 = vld [vmem:[#allocation150_spill] sm:$0xff] }
 0x326   : > { %v5529_v26 = vpop.f32.mrf.mxu1 }
 0x327   : > { %v14413_v29 = vadd.f32 %v10245_v40, %v5617_v12  ;;  %v5616_v48 = vadd.f32 %v5529_v26, %v14189_v56  ;;  %v10248_v52 = vpop.f32.mrf.mxu0  ;;  %10547 = vmatmul.mubr.msk.f32.gmra.mxu0 %vm361_vm1, %v15950_v15  ;;  %v7237_v26 = vrot.slane %v14014_v43, 4  ;;  %v6969_v15 = vrot.slane %v14014_v43, 3 }
 0x328   : > { %v10198_v20 = vpop.f32.mrf.mxu1  ;;  %10497 = vmatmul.mubr.msk.f32.gmra.mxu1 %vm361_vm1, %v15951_v39  ;;  %10549 = vmatprep.mubr.msk.f32.mxu0 %vm361_vm1, %v15849_v23  ;;  %v15954_v23 = vld [vmem:[#allocation141_spill] sm:$0xff] }
 0x329   : > { %v14422_v41 = vadd.f32 %v5797_v19, %v5616_v48  ;;  %v5619_v24 = vadd.f32 %v10198_v20, %v14194_v38  ;;  %v5807_v25 = vpop.f32.mrf.mxu0  ;;  %10499 = vmatprep.mubr.msk.f32.mxu1 %vm361_vm1, %v15952_v14  ;;  %v15961_v14 = vld [vmem:[#allocation37_spill] sm:$0xff] }
 0x32a   : > { %v5539_v56 = vpop.f32.mrf.mxu1 }
 0x32b   : > { %v14427_v0 = vadd.f32 %v10248_v52, %v5619_v24  ;;  %v5618_v42 = vadd.f32 %v5539_v56, %v14203_v30  ;;  %v10251_v27 = vpop.f32.mrf.mxu0  ;;  %10550 = vmatmul.mubr.msk.f32.gmra.mxu0 %vm361_vm1, %v15851_v59  ;;  %v6968_v52 = vrot.slane %v13998_v62, 3  ;;  %v15962_v56 = vld [vmem:[#allocation70_spill] sm:$0xff] }
 0x32c   : > { %v10201_v22 = vpop.f32.mrf.mxu1  ;;  %10500 = vmatmul.mubr.msk.f32.gmra.mxu1 %vm361_vm1, %v15953_v28  ;;  %10552 = vmatprep.mubr.msk.f32.mxu0 %vm361_vm1, %v15954_v23  ;;  %v6971_v28 = vrot.slane %v14225_v47, 3 }
 0x32d   : > { %v14436_v38 = vadd.f32 %v5807_v25, %v5618_v42  ;;  %v5621_v58 = vadd.f32 %v10201_v22, %v14208_v50  ;;  %v5817_v5 = vpop.f32.mrf.mxu0  ;;  %10502 = vmatprep.mubr.msk.f32.mxu1 %vm361_vm1, %v15955_v37  ;;  %v15960_v25 = vld [vmem:[#allocation65_spill] sm:$0xff]  ;;  %v7239_v42 = vrot.slane %v14225_v47, 4  ;;  %v15963_v22 = vld [vmem:[#allocation68_spill] sm:$0xff] }
 0x32e   : > { %v5549_v30 = vpop.f32.mrf.mxu1 }
 0x32f   : > { %v14441_v7 = vadd.f32 %v10251_v27, %v5621_v58  ;;  %v5620_v59 = vadd.f32 %v5549_v30, %v14217_v31  ;;  %v10254_v40 = vpop.f32.mrf.mxu0  ;;  %10553 = vmatmul.mubr.msk.f32.gmra.mxu0 %vm361_vm1, %v15956_v8  ;;  %v7236_v31 = vrot.slane %v13998_v62, 4  ;;  %v6970_v58 = vsel %vm1344_vm3, %v6968_v52, %v6969_v15 }
 0x330   : > { %v10204_v13 = vpop.f32.mrf.mxu1  ;;  %10503 = vmatmul.mubr.msk.f32.gmra.mxu1 %vm361_vm1, %v15957_v61  ;;  %10555 = vmatprep.mubr.msk.f32.mxu0 %vm361_vm1, %v15958_v32  ;;  %v7240_v8 = vsel %vm1748_vm4, %v7237_v26, %v7239_v42 }
 0x331   : > { %v14450_v50 = vadd.f32 %v5817_v5, %v5620_v59  ;;  %v5623_v12 = vadd.f32 %v10204_v13, %v14229_v63  ;;  %v5827_v19 = vpop.f32.mrf.mxu0  ;;  %10505 = vmatprep.mubr.msk.f32.mxu1 %vm361_vm1, %v15959_v16  ;;  %v15964_v59 = vld [vmem:[#allocation72_spill] sm:$0xff] }
 0x332   : > { %v5559_v48 = vpop.f32.mrf.mxu1 }
 0x333   : > { %v14459_v20 = vadd.f32 %v10254_v40, %v5623_v12  ;;  %v5622_v39 = vadd.f32 %v5559_v48, %v14239_v18  ;;  %v10257_v24 = vpop.f32.mrf.mxu0  ;;  %10556 = vmatmul.mubr.msk.f32.gmra.mxu0 %vm361_vm1, %v15960_v25  ;;  %v7238_v18 = vsel %vm1748_vm4, %v7236_v31, %v7237_v26  ;;  %v15965_v40 = vld [vmem:[#allocation69_spill] sm:$0xff] }
 0x334   : > { %v10207_v63 = vpop.f32.mrf.mxu1  ;;  %10506 = vmatmul.mubr.msk.f32.gmra.mxu1 %vm361_vm1, %v15961_v14  ;;  %10558 = vmatprep.mubr.msk.f32.mxu0 %vm361_vm1, %v15962_v56 }
 0x335   : > { %v14469_v62 = vadd.f32 %v5827_v19, %v5622_v39  ;;  %v5625_v43 = vadd.f32 %v10207_v63, %v14247_v4  ;;  %v5837_v27 = vpop.f32.mrf.mxu0  ;;  %10508 = vmatprep.mubr.msk.f32.mxu1 %vm361_vm1, %v15963_v22 }
 0x336   : > { %v5569_v23 = vpop.f32.mrf.mxu1 }
 0x337   : > { %v14477_v5 = vadd.f32 %v10257_v24, %v5625_v43  ;;  %v5624_v37 = vadd.f32 %v5569_v23, %v14256_v55  ;;  %v10260_v30 = vpop.f32.mrf.mxu0  ;;  %10559 = vmatmul.mubr.msk.f32.gmra.mxu0 %vm361_vm1, %v15964_v59  ;;  %v6972_v55 = vsel %vm1344_vm3, %v6969_v15, %v6971_v28 }
 0x338   : > { %v10210_v4 = vpop.f32.mrf.mxu1  ;;  %10509 = vmatmul.mubr.msk.f32.gmra.mxu1 %vm361_vm1, %v15965_v40  ;;  %10561 = vmatprep.mubr.msk.f32.mxu0 %vm361_vm1, %v7238_v18 }
 0x339   : > { %v14486_v47 = vadd.f32 %v5837_v27, %v5624_v37  ;;  %v5627_v13 = vadd.f32 %v10210_v4, %v14261_v9  ;;  %v5847_v61 = vpop.f32.mrf.mxu0  ;;  %10511 = vmatprep.mubr.msk.f32.mxu1 %vm361_vm1, %v6970_v58 }
 0x33a   : > { %v5579_v32 = vpop.f32.mrf.mxu1 }
 0x33b   : > { %v14491_v12 = vadd.f32 %v10260_v30, %v5627_v13  ;;  %v5626_v19 = vadd.f32 %v5579_v32, %v14268_v21  ;;  %v10263_v16 = vpop.f32.mrf.mxu0  ;;  %10562 = vmatmul.mubr.msk.f32.gmra.mxu0 %vm361_vm1, %v7240_v8 }
 0x33c   : > { %v10213_v31 = vpop.f32.mrf.mxu1  ;;  %10512 = vmatmul.mubr.msk.f32.gmra.mxu1 %vm361_vm1, %v6972_v55 }
 0x33d   : > { %v14496_v26 = vadd.f32 %v5847_v61, %v5626_v19  ;;  %v5629_v9 = vadd.f32 %v10213_v31, %v14273_v33  ;;  %v5857_v48 = vpop.f32.mrf.mxu0 }
 0x33e   : > { %v5589_v52 = vpop.f32.mrf.mxu1 }
 0x33f   : > { %v14499_v39 = vadd.f32 %v10263_v16, %v5629_v9  ;;  %v5628_v15 = vadd.f32 %v5589_v52, %v14282_v57  ;;  %v10318_v24 = vpop.f32.mrf.mxu0 }
 0x340   : > { %v10268_v25 = vpop.f32.mrf.mxu1 }
 0x341   : > { %v14502_v63 = vadd.f32 %v5857_v48, %v5628_v15  ;;  %v6135_v21 = vadd.f32 %v10268_v25, %v14287_v54  ;;  %v6240_v14 = vpop.f32.mrf.mxu0 }
 0x342   : > { %v5975_v56 = vpop.f32.mrf.mxu1 }
 0x343   : > { %v14505_v42 = vadd.f32 %v10318_v24, %v6135_v21  ;;  %v6134_v43 = vadd.f32 %v5975_v56, %v14296_v10  ;;  %v10321_v27 = vpop.f32.mrf.mxu0 }
 0x344   : > { %v10271_v33 = vpop.f32.mrf.mxu1 }
 0x345   : > { %v14508_v22 = vadd.f32 %v6240_v14, %v6134_v43  ;;  %v6137_v18 = vadd.f32 %v10271_v33, %v14301_v60  ;;  %v6250_v28 = vpop.f32.mrf.mxu0 }
 0x346   : > { %v5985_v57 = vpop.f32.mrf.mxu1 }
 0x347   : > { %v14511_v23 = vadd.f32 %v10321_v27, %v6137_v18  ;;  %v6136_v58 = vadd.f32 %v5985_v57, %v14310_v3  ;;  %v10324_v37 = vpop.f32.mrf.mxu0 }
 0x348   : > { %v10274_v54 = vpop.f32.mrf.mxu1 }
 0x349   : > { %v14514_v30 = vadd.f32 %v6250_v28, %v6136_v58  ;;  %v6139_v59 = vadd.f32 %v10274_v54, %v14315_v11  ;;  %v6260_v4 = vpop.f32.mrf.mxu0 }
 0x34a   : > { %v5995_v10 = vpop.f32.mrf.mxu1 }
 0x34b   : > { %v14517_v40 = vadd.f32 %v10324_v37, %v6139_v59  ;;  %v6138_v8 = vadd.f32 %v5995_v10, %v14324_v45  ;;  %v10327_v13 = vpop.f32.mrf.mxu0 }
 0x34c   : > { %v10277_v60 = vpop.f32.mrf.mxu1 }
 0x34d   : > { %v14520_v61 = vadd.f32 %v6260_v4, %v6138_v8  ;;  %v6141_v55 = vadd.f32 %v10277_v60, %v14329_v17  ;;  %v6270_v32 = vpop.f32.mrf.mxu0 }
 0x34e   : > { %v6005_v3 = vpop.f32.mrf.mxu1 }
 0x34f   : > { %v14523_v19 = vadd.f32 %v10327_v13, %v6141_v55  ;;  %v6140_v16 = vadd.f32 %v6005_v3, %v14338_v6  ;;  %v10330_v31 = vpop.f32.mrf.mxu0 }
 0x350   : > { %v10280_v11 = vpop.f32.mrf.mxu1 }
 0x351   : > { %v14526_v9 = vadd.f32 %v6270_v32, %v6140_v16  ;;  %v6143_v48 = vadd.f32 %v10280_v11, %v14343_v44  ;;  %v6280_v52 = vpop.f32.mrf.mxu0 }
 0x352   : > { %v6015_v45 = vpop.f32.mrf.mxu1 }
 0x353   : > { %v14529_v15 = vadd.f32 %v10330_v31, %v6143_v48  ;;  %v6142_v24 = vadd.f32 %v6015_v45, %v14352_v53  ;;  %v10333_v25 = vpop.f32.mrf.mxu0 }
 0x354   : > { %v10283_v17 = vpop.f32.mrf.mxu1 }
 0x355   : > { %v14532_v21 = vadd.f32 %v6280_v52, %v6142_v24  ;;  %v6145_v14 = vadd.f32 %v10283_v17, %v14357_v46  ;;  %v6290_v56 = vpop.f32.mrf.mxu0 }
 0x356   : > { %v6025_v6 = vpop.f32.mrf.mxu1 }
 0x357   : > { %v14535_v43 = vadd.f32 %v10333_v25, %v6145_v14  ;;  %v6144_v27 = vadd.f32 %v6025_v6, %v14366_v2  ;;  %v10336_v33 = vpop.f32.mrf.mxu0 }
 0x358   : > { %v10286_v44 = vpop.f32.mrf.mxu1 }
 0x359   : > { %v14538_v18 = vadd.f32 %v6290_v56, %v6144_v27  ;;  %v6147_v28 = vadd.f32 %v10286_v44, %v14371_v1  ;;  %v6300_v57 = vpop.f32.mrf.mxu0 }
 0x35a   : > { %v6035_v53 = vpop.f32.mrf.mxu1 }
 0x35b   : > { %v14541_v58 = vadd.f32 %v10336_v33, %v6147_v28  ;;  %v6146_v37 = vadd.f32 %v6035_v53, %v14380_v35  ;;  %v10339_v54 = vpop.f32.mrf.mxu0 }
 0x35c   : > { %v10289_v46 = vpop.f32.mrf.mxu1 }
 0x35d   : > { %v14544_v59 = vadd.f32 %v6300_v57, %v6146_v37  ;;  %v6149_v4 = vadd.f32 %v10289_v46, %v14385_v34  ;;  %v6310_v10 = vpop.f32.mrf.mxu0 }
 0x35e   : > { %v6045_v2 = vpop.f32.mrf.mxu1 }
 0x35f   : > { %v14547_v8 = vadd.f32 %v10339_v54, %v6149_v4  ;;  %v6148_v13 = vadd.f32 %v6045_v2, %v14394_v49  ;;  %v10342_v60 = vpop.f32.mrf.mxu0 }
 0x360   : > { %v10292_v1 = vpop.f32.mrf.mxu1 }
 0x361   : > { %v14550_v55 = vadd.f32 %v6310_v10, %v6148_v13  ;;  %v6151_v32 = vadd.f32 %v10292_v1, %v14399_v36  ;;  %v6320_v3 = vpop.f32.mrf.mxu0 }
 0x362   : > { %v6055_v35 = vpop.f32.mrf.mxu1 }
 0x363   : > { %v14553_v16 = vadd.f32 %v10342_v60, %v6151_v32  ;;  %v6150_v31 = vadd.f32 %v6055_v35, %v14408_v51  ;;  %v10345_v11 = vpop.f32.mrf.mxu0 }
 0x364   : > { %v10295_v34 = vpop.f32.mrf.mxu1 }
 0x365   : > { %v14556_v48 = vadd.f32 %v6320_v3, %v6150_v31  ;;  %v6153_v52 = vadd.f32 %v10295_v34, %v14413_v29  ;;  %v6330_v45 = vpop.f32.mrf.mxu0 }
 0x366   : > { %v6065_v49 = vpop.f32.mrf.mxu1 }
 0x367   : > { %v14559_v24 = vadd.f32 %v10345_v11, %v6153_v52  ;;  %v6152_v25 = vadd.f32 %v6065_v49, %v14422_v41  ;;  %v10348_v17 = vpop.f32.mrf.mxu0 }
 0x368   : > { %v10298_v36 = vpop.f32.mrf.mxu1 }
 0x369   : > { %15966 = vst [vmem:[#allocation41_spill] sm:$0xff] %v14559_v24  ;;  %v14562_v14 = vadd.f32 %v6330_v45, %v6152_v25  ;;  %v6155_v56 = vadd.f32 %v10298_v36, %v14427_v0  ;;  %v6340_v6 = vpop.f32.mrf.mxu0 }
 0x36a   : > { %v6075_v51 = vpop.f32.mrf.mxu1 }
 0x36b   : > { %15967 = vst [vmem:[#allocation73_spill] sm:$0xff] %v14562_v14  ;;  %v14565_v27 = vadd.f32 %v10348_v17, %v6155_v56  ;;  %v6154_v33 = vadd.f32 %v6075_v51, %v14436_v38  ;;  %v10351_v44 = vpop.f32.mrf.mxu0 }
 0x36c   : > { %v10301_v29 = vpop.f32.mrf.mxu1 }
 0x36d   : > { %15968 = vst [vmem:[#allocation42_spill] sm:$0xff] %v14565_v27  ;;  %v14568_v28 = vadd.f32 %v6340_v6, %v6154_v33  ;;  %v6157_v57 = vadd.f32 %v10301_v29, %v14441_v7  ;;  %v6350_v53 = vpop.f32.mrf.mxu0 }
 0x36e   : > { %v6085_v41 = vpop.f32.mrf.mxu1 }
 0x36f   : > { %15969 = vst [vmem:[#allocation57_spill] sm:$0xff] %v14568_v28  ;;  %v14571_v37 = vadd.f32 %v10351_v44, %v6157_v57  ;;  %v6156_v54 = vadd.f32 %v6085_v41, %v14450_v50  ;;  %v10354_v46 = vpop.f32.mrf.mxu0 }
 0x370   : > { %v10304_v0 = vpop.f32.mrf.mxu1 }
 0x371   : > { %15970 = vst [vmem:[#allocation61_spill] sm:$0xff] %v14571_v37  ;;  %v14574_v4 = vadd.f32 %v6350_v53, %v6156_v54  ;;  %v6159_v10 = vadd.f32 %v10304_v0, %v14459_v20  ;;  %v6360_v2 = vpop.f32.mrf.mxu0 }
 0x372   : > { %v6095_v38 = vpop.f32.mrf.mxu1 }
 0x373   : > { %15971 = vst [vmem:[#allocation21_spill] sm:$0xff] %v14574_v4  ;;  %v14577_v13 = vadd.f32 %v10354_v46, %v6159_v10  ;;  %v6158_v60 = vadd.f32 %v6095_v38, %v14469_v62  ;;  %v10357_v1 = vpop.f32.mrf.mxu0 }
 0x374   : > { %v10307_v7 = vpop.f32.mrf.mxu1 }
 0x375   : > { %15972 = vst [vmem:[#allocation63_spill] sm:$0xff] %v14577_v13  ;;  %v14580_v32 = vadd.f32 %v6360_v2, %v6158_v60  ;;  %v6161_v3 = vadd.f32 %v10307_v7, %v14477_v5  ;;  %v6370_v35 = vpop.f32.mrf.mxu0 }
 0x376   : > { %v6105_v50 = vpop.f32.mrf.mxu1 }
 0x377   : > { %15973 = vst [vmem:[#allocation142_spill] sm:$0xff] %v14580_v32  ;;  %v14583_v31 = vadd.f32 %v10357_v1, %v6161_v3  ;;  %v6160_v11 = vadd.f32 %v6105_v50, %v14486_v47  ;;  %v10360_v34 = vpop.f32.mrf.mxu0 }
 0x378   : > { %v10310_v20 = vpop.f32.mrf.mxu1 }
 0x379   : > { %15974 = vst [vmem:[#allocation71_spill] sm:$0xff] %v14583_v31  ;;  %v14586_v52 = vadd.f32 %v6370_v35, %v6160_v11  ;;  %v6163_v45 = vadd.f32 %v10310_v20, %v14491_v12  ;;  %v6380_v49 = vpop.f32.mrf.mxu0 }
 0x37a   : > { %v6115_v62 = vpop.f32.mrf.mxu1 }
 0x37b   : > { %15975 = vst [vmem:[#allocation74_spill] sm:$0xff] %v14586_v52  ;;  %v14589_v25 = vadd.f32 %v10360_v34, %v6163_v45  ;;  %v6162_v17 = vadd.f32 %v6115_v62, %v14496_v26  ;;  %v10363_v36 = vpop.f32.mrf.mxu0 }
 0x37c   : > { %v10313_v5 = vpop.f32.mrf.mxu1 }
 0x37d   : > { %15976 = vst [vmem:[#allocation75_spill] sm:$0xff] %v14589_v25  ;;  %v14592_v56 = vadd.f32 %v6380_v49, %v6162_v17  ;;  %v6165_v6 = vadd.f32 %v10313_v5, %v14499_v39  ;;  %v6390_v51 = vpop.f32.mrf.mxu0 }
 0x37e   : > { %v6125_v47 = vpop.f32.mrf.mxu1 }
 0x37f   : > { %15977 = vst [vmem:[#allocation77_spill] sm:$0xff] %v14592_v56  ;;  %v14595_v33 = vadd.f32 %v10363_v36, %v6165_v6  ;;  %v6164_v44 = vadd.f32 %v6125_v47, %v14502_v63  ;;  %v14598_v29 = vpop.f32.mrf.mxu0 }
 0x380   : > { %v10368_v12 = vpop.f32.mrf.mxu1 }
 0x381   : > { %15978 = vst [vmem:[#allocation9_spill] sm:$0xff] %v14595_v33  ;;  %v14600_v57 = vadd.f32 %v6390_v51, %v6164_v44  ;;  %v14602_v53 = vpop.f32.mrf.mxu0 }
 0x382   : > { %v6509_v26 = vpop.f32.mrf.mxu1 }
 0x383   : > { %15979 = vst [vmem:[#allocation79_spill] sm:$0xff] %v14600_v57  ;;  %v14604_v41 = vpop.f32.mrf.mxu0 }
 0x384   : > { %v14606_v54 = vpop.f32.mrf.mxu1 }
 0x385   : > { %v14608_v46 = vpop.f32.mrf.mxu0 }
 0x386   : > { %v14610_v39 = vpop.f32.mrf.mxu1 }
 0x387   : > { %v14612_v0 = vpop.f32.mrf.mxu0 }
 0x388   : > { %v14614_v10 = vpop.f32.mrf.mxu1 }
 0x389   : > { %v14616_v63 = vpop.f32.mrf.mxu0 }
 0x38a   : > { %v14618_v2 = vpop.f32.mrf.mxu1 }
 0x38b   : > { %v14620_v38 = vpop.f32.mrf.mxu0 }
 0x38c   : > { %v14622_v60 = vpop.f32.mrf.mxu1 }
 0x38d   : > { %v14624_v1 = vpop.f32.mrf.mxu0 }
 0x38e   : > { %v14626_v7 = vpop.f32.mrf.mxu1 }
 0x38f   : > { %v14628_v3 = vpop.f32.mrf.mxu0 }
 0x390   : > { %v14630_v35 = vpop.f32.mrf.mxu1 }
 0x391   : > { %v14632_v50 = vpop.f32.mrf.mxu0 }
 0x392   : > { %v14634_v11 = vpop.f32.mrf.mxu1 }
 0x393   : > { %v14636_v34 = vpop.f32.mrf.mxu0 }
 0x394   : > { %v14638_v20 = vpop.f32.mrf.mxu1 }
 0x395   : > { %v14640_v45 = vpop.f32.mrf.mxu0 }
 0x396   : > { %v14642_v49 = vpop.f32.mrf.mxu1 }
 0x397   : > { %v14644_v62 = vpop.f32.mrf.mxu0 }
 0x398   : > { %v14646_v17 = vpop.f32.mrf.mxu1 }
 0x399   : > { %v14648_v36 = vpop.f32.mrf.mxu0 }
 0x39a   : > { %v14650_v5 = vpop.f32.mrf.mxu1 }
 0x39b   : > { %v14652_v6 = vpop.f32.mrf.mxu0 }
 0x39c   : > { %v14654_v51 = vpop.f32.mrf.mxu1 }
 0x39d   : > { %v14656_v47 = vpop.f32.mrf.mxu0 }
 0x39e   : > { %v14658_v44 = vpop.f32.mrf.mxu1 }
 0x39f   : > { %v14660_v57 = vpop.f32.mrf.mxu0 }
 0x3a0   : > { %v14662_v33 = vpop.f32.mrf.mxu1 }
 0x3a1   : > { %v14664_v56 = vpop.f32.mrf.mxu0 }
 0x3a2   : > { %15980 = vst [vmem:[#allocation66_spill] sm:$0xff] %v14664_v56  ;;  %v14666_v25 = vpop.f32.mrf.mxu1 }
 0x3a3   : > { %v14668_v52 = vpop.f32.mrf.mxu0 }
 0x3a4   : > { %15981 = vst [vmem:[#allocation82_spill] sm:$0xff] %v14668_v52  ;;  %v14670_v31 = vpop.f32.mrf.mxu1 }
 0x3a5   : > { %15982 = vst [vmem:[#allocation123_spill] sm:$0xff] %v14670_v31  ;;  %v14672_v32 = vpop.f32.mrf.mxu0 }
 0x3a6   : > { %15983 = vst [vmem:[#allocation124_spill] sm:$0xff] %v14672_v32  ;;  %v14674_v13 = vpop.f32.mrf.mxu1 }
 0x3a7   : > { %15984 = vst [vmem:[#allocation125_spill] sm:$0xff] %v14674_v13  ;;  %v14676_v4 = vpop.f32.mrf.mxu0 }
 0x3a8   : > { %15985 = vst [vmem:[#allocation126_spill] sm:$0xff] %v14676_v4  ;;  %v14678_v37 = vpop.f32.mrf.mxu1 }
 0x3a9   : > { %v14680_v28 = vpop.f32.mrf.mxu0 }
 0x3aa   : > { %15986 = vst [vmem:[#allocation127_spill] sm:$0xff] %v14680_v28  ;;  %v14682_v27 = vpop.f32.mrf.mxu1 }
 0x3ab   : > { %15987 = vst [vmem:[#allocation128_spill] sm:$0xff] %v14682_v27  ;;  %v14684_v14 = vpop.f32.mrf.mxu0 }
 0x3ac   : > { %15988 = vst [vmem:[#allocation129_spill] sm:$0xff] %v14684_v14  ;;  %v14686_v56 = vpop.f32.mrf.mxu1 }
 0x3ad   : > { %15989 = vst [vmem:[#allocation130_spill] sm:$0xff] %v14686_v56  ;;  %v14688_v24 = vpop.f32.mrf.mxu0 }
 0x3ae   : > { %15990 = vst [vmem:[#allocation131_spill] sm:$0xff] %v14688_v24  ;;  %v14690_v52 = vpop.f32.mrf.mxu1 }
 0x3af   : > { %15991 = vst [vmem:[#allocation132_spill] sm:$0xff] %v14690_v52  ;;  %v14692_v31 = vpop.f32.mrf.mxu0 }
 0x3b0   : > { %15992 = vst [vmem:[#allocation133_spill] sm:$0xff] %v14692_v31  ;;  %v14694_v32 = vpop.f32.mrf.mxu1 }
 0x3b1   : > { %15993 = vst [vmem:[#allocation134_spill] sm:$0xff] %v14694_v32  ;;  %v14696_v13 = vpop.f32.mrf.mxu0 }
 0x3b2   : > { %15994 = vst [vmem:[#allocation135_spill] sm:$0xff] %v14696_v13  ;;  %v14698_v4 = vpop.f32.mrf.mxu1  ;;  %v6669_v13 = vadd.f32 %v10368_v12, %v14505_v42  ;;  %v6670_v12 = vadd.f32 %v14610_v39, %v14514_v30  ;;  %v6672_v30 = vadd.f32 %v14618_v2, %v14520_v61 }
 0x3b3   : > { %15995 = vst [vmem:[#allocation138_spill] sm:$0xff] %v14698_v4  ;;  %v14700_v28 = vpop.f32.mrf.mxu0 }
 0x3b4   : > { %15996 = vst [vmem:[#allocation139_spill] sm:$0xff] %v14700_v28  ;;  %v14702_v27 = vpop.f32.mrf.mxu1 }
 0x3b5   : > { %15997 = vst [vmem:[#allocation143_spill] sm:$0xff] %v14702_v27  ;;  %v14704_v14 = vpop.f32.mrf.mxu0  ;;  %v6668_v27 = vadd.f32 %v6509_v26, %v14508_v22  ;;  %v6673_v26 = vadd.f32 %v14614_v10, %v14517_v40 }
 0x3b6   : > { %15998 = vst [vmem:[#allocation147_spill] sm:$0xff] %v14704_v14  ;;  %v14706_v56 = vpop.f32.mrf.mxu1 }
 0x3b7   : > { %15999 = vst [vmem:[#allocation11_spill] sm:$0xff] %v14706_v56  ;;  %v14708_v24 = vpop.f32.mrf.mxu0  ;;  %v6936_v42 = vadd.f32 %v14602_v53, %v6668_v27 }
 0x3b8   : > { %16000 = vst [vmem:[#allocation40_spill] sm:$0xff] %v14708_v24  ;;  %v14710_v52 = vpop.f32.mrf.mxu1  ;;  %v6937_v24 = vadd.f32 %v14598_v29, %v6669_v13  ;;  %v14740_v13 = vld [vmem:[%s14977_s2] ss:$0 sm:$0xff] }
 0x3b9   : > { %16001 = vst [vmem:[#allocation119_spill] sm:$0xff] %v14710_v52  ;;  %v14712_v31 = vpop.f32.mrf.mxu0 }
 0x3ba   : > { %16002 = vst [vmem:[#allocation13_spill] sm:$0xff] %v14712_v31  ;;  %v14714_v32 = vpop.f32.mrf.mxu1  ;;  %v6671_v31 = vadd.f32 %v14606_v54, %v14511_v23 }
 0x3bb   : > { %16003 = vst [vmem:[#allocation121_spill] sm:$0xff] %v14714_v32  ;;  %v14717_v4 = vpop.f32.mrf.mxu0 }
 0x3bc   : > { %16004 = vst [vmem:[#allocation17_spill] sm:$0xff] %v14717_v4  ;;  %v14719_v28 = vpop.f32.mrf.mxu1  ;;  %v6939_v29 = vadd.f32 %v14604_v41, %v6671_v31 }
 0x3bd   : > { %16005 = vst [vmem:[#allocation43_spill] sm:$0xff] %v14719_v28  ;;  %v14722_v14 = vpop.f32.mrf.mxu0 }
 0x3be   : > { %16006 = vst [vmem:[#allocation19_spill] sm:$0xff] %v14722_v14  ;;  %v14724_v56 = vpop.f32.mrf.mxu1 }
 0x3bf   : > { %16007 = vst [vmem:[#allocation44_spill] sm:$0xff] %v14724_v56  ;;  %v10518_v52 = vpop.f32.mrf.mxu0  ;;  %v6941_v56 = vadd.f32 %v14612_v0, %v6673_v26  ;;  %v6674_v0 = vadd.f32 %v14626_v7, %v14526_v9 }
 0x3c0   : > { %v10468_v32 = vpop.f32.mrf.mxu1 }
 0x3c1   : > { %v7205_v4 = vadd.f32 %v10468_v32, %v6937_v24  ;;  %v7313_v22 = vpop.f32.mrf.mxu0  ;;  %v6938_v32 = vadd.f32 %v14608_v46, %v6670_v12  ;;  %v6940_v46 = vadd.f32 %v14616_v63, %v6672_v30  ;;  %v6679_v30 = vadd.f32 %v14638_v20, %v14535_v43 }
 0x3c2   : > { %v7045_v23 = vpop.f32.mrf.mxu1 }
 0x3c3   : > { %v7473_v54 = vadd.f32 %v10518_v52, %v7205_v4  ;;  %v7204_v27 = vadd.f32 %v7045_v23, %v6936_v42  ;;  %v10521_v53 = vpop.f32.mrf.mxu0  ;;  %v6675_v4 = vadd.f32 %v14622_v60, %v14523_v19 }
 0x3c4   : > { %v10471_v24 = vpop.f32.mrf.mxu1 }
 0x3c5   : > { %v7512_v40 = vadd.f32 %v14740_v13, %v7473_v54  ;;  %v7472_v39 = vadd.f32 %v7313_v22, %v7204_v27  ;;  %v7207_v10 = vadd.f32 %v10471_v24, %v6939_v29  ;;  %v7323_v14 = vpop.f32.mrf.mxu0  ;;  %v6677_v22 = vadd.f32 %v14630_v35, %v14529_v15 }
 0x3c6   : > { %v7055_v28 = vpop.f32.mrf.mxu1  ;;  %v6676_v29 = vadd.f32 %v14634_v11, %v14532_v21 }
 0x3c7   : > { %7545 = vst.msk [vmem:[%s14750_s30 + $0x8] sm:$0xff] %vm7543_vm5, %v7512_v40  ;;  %v7511_v61 = vadd.f32 %v14740_v13, %v7472_v39  ;;  %v7475_v31 = vadd.f32 %v10521_v53, %v7207_v10  ;;  %v7206_v52 = vadd.f32 %v7055_v28, %v6938_v32  ;;  %v10524_v41 = vpop.f32.mrf.mxu0  ;;  %v6943_v28 = vadd.f32 %v14620_v38, %v6675_v4 }
 0x3c8   : > { %v10474_v2 = vpop.f32.mrf.mxu1  ;;  %v6945_v27 = vadd.f32 %v14628_v3, %v6677_v22  ;;  %v6944_v32 = vadd.f32 %v14632_v50, %v6676_v29  ;;  %v6678_v39 = vadd.f32 %v14642_v49, %v14538_v18  ;;  %v6681_v4 = vadd.f32 %v14646_v17, %v14541_v58 }
 0x3c9   : > { %7544 = vst.msk [vmem:[%s14750_s30] sm:$0xff] %vm7543_vm5, %v7511_v61  ;;  %v7514_v19 = vadd.f32 %v14740_v13, %v7475_v31  ;;  %v7474_v60 = vadd.f32 %v7323_v14, %v7206_v52  ;;  %v7209_v42 = vadd.f32 %v10474_v2, %v6941_v56  ;;  %v7333_v12 = vpop.f32.mrf.mxu0  ;;  %v6942_v56 = vadd.f32 %v14624_v1, %v6674_v0 }
 0x3ca   : > { %v7065_v26 = vpop.f32.mrf.mxu1  ;;  %v6947_v31 = vadd.f32 %v14636_v34, %v6679_v30  ;;  %v6946_v2 = vadd.f32 %v14640_v45, %v6678_v39 }
 0x3cb   : > { %7547 = vst.msk [vmem:[%s14750_s30 + $0x18] sm:$0xff] %vm7543_vm5, %v7514_v19  ;;  %v7513_v63 = vadd.f32 %v14740_v13, %v7474_v60  ;;  %v7477_v9 = vadd.f32 %v10524_v41, %v7209_v42  ;;  %v7208_v7 = vadd.f32 %v7065_v26, %v6940_v46  ;;  %v10527_v23 = vpop.f32.mrf.mxu0  ;;  %v6680_v41 = vadd.f32 %v14650_v5, %v14544_v59 }
 0x3cc   : > { %v10477_v14 = vpop.f32.mrf.mxu1  ;;  %v6949_v19 = vadd.f32 %v14644_v62, %v6681_v4  ;;  %v6683_v42 = vadd.f32 %v14654_v51, %v14547_v8 }
 0x3cd   : > { %7546 = vst.msk [vmem:[%s14750_s30 + $0x10] sm:$0xff] %vm7543_vm5, %v7513_v63  ;;  %v7516_v15 = vadd.f32 %v14740_v13, %v7477_v9  ;;  %v7476_v38 = vadd.f32 %v7333_v12, %v7208_v7  ;;  %v7211_v35 = vadd.f32 %v10477_v14, %v6943_v28  ;;  %v7343_v54 = vpop.f32.mrf.mxu0  ;;  %v6948_v22 = vadd.f32 %v14648_v36, %v6680_v41 }
 0x3ce   : > { %v7075_v53 = vpop.f32.mrf.mxu1  ;;  %v6682_v28 = vadd.f32 %v14658_v44, %v14550_v55  ;;  %v6685_v9 = vadd.f32 %v14662_v33, %v14553_v16  ;;  %v6684_v14 = vadd.f32 %v14666_v25, %v14556_v48 }
 0x3cf   : > { %7549 = vst.msk [vmem:[%s14750_s30 + $0x28] sm:$0xff] %vm7543_vm5, %v7516_v15  ;;  %v7515_v21 = vadd.f32 %v14740_v13, %v7476_v38  ;;  %v7479_v1 = vadd.f32 %v10527_v23, %v7211_v35  ;;  %v7210_v11 = vadd.f32 %v7075_v53, %v6942_v56  ;;  %v10530_v24 = vpop.f32.mrf.mxu0  ;;  %v6951_v23 = vadd.f32 %v14652_v6, %v6683_v42  ;;  %v16009_v53 = vld [vmem:[#allocation123_spill] sm:$0xff] }
 0x3d0   : > { %v10480_v40 = vpop.f32.mrf.mxu1  ;;  %v6950_v15 = vadd.f32 %v14656_v47, %v6682_v28  ;;  %v6953_v35 = vadd.f32 %v14660_v57, %v6685_v9 }
 0x3d1   : > { %7548 = vst.msk [vmem:[%s14750_s30 + $0x20] sm:$0xff] %vm7543_vm5, %v7515_v21  ;;  %v7518_v3 = vadd.f32 %v14740_v13, %v7479_v1  ;;  %v7478_v43 = vadd.f32 %v7343_v54, %v7210_v11  ;;  %v7213_v20 = vadd.f32 %v10480_v40, %v6945_v27  ;;  %v7353_v10 = vpop.f32.mrf.mxu0  ;;  %v16008_v27 = vld [vmem:[#allocation41_spill] sm:$0xff]  ;;  %v16010_v1 = vld [vmem:[#allocation66_spill] sm:$0xff] }
 0x3d2   : > { %v7085_v61 = vpop.f32.mrf.mxu1  ;;  %v6687_v30 = vadd.f32 %v16009_v53, %v16008_v27  ;;  %v6952_v11 = vadd.f32 %v16010_v1, %v6684_v14  ;;  %v16012_v40 = vld [vmem:[#allocation125_spill] sm:$0xff]  ;;  %v16029_v1 = vld [vmem:[#allocation131_spill] sm:$0xff] }
 0x3d3   : > { %7551 = vst.msk [vmem:[%s14750_s30 + $0x38] sm:$0xff] %vm7543_vm5, %v7518_v3  ;;  %v7517_v50 = vadd.f32 %v14740_v13, %v7478_v43  ;;  %v7481_v18 = vadd.f32 %v10530_v24, %v7213_v20  ;;  %v7212_v49 = vadd.f32 %v7085_v61, %v6944_v32  ;;  %v10533_v52 = vpop.f32.mrf.mxu0  ;;  %v16011_v32 = vld [vmem:[#allocation73_spill] sm:$0xff] }
 0x3d4   : > { %v10483_v46 = vpop.f32.mrf.mxu1  ;;  %v6686_v39 = vadd.f32 %v16012_v40, %v16011_v32 }
 0x3d5   : > { %7550 = vst.msk [vmem:[%s14750_s30 + $0x30] sm:$0xff] %vm7543_vm5, %v7517_v50  ;;  %v7520_v58 = vadd.f32 %v14740_v13, %v7481_v18  ;;  %v7480_v34 = vadd.f32 %v7353_v10, %v7212_v49  ;;  %v7215_v17 = vadd.f32 %v10483_v46, %v6947_v31  ;;  %v7363_v0 = vpop.f32.mrf.mxu0  ;;  %v16013_v10 = vld [vmem:[#allocation42_spill] sm:$0xff]  ;;  %v16015_v46 = vld [vmem:[#allocation57_spill] sm:$0xff] }
 0x3d6   : > { %v7095_v60 = vpop.f32.mrf.mxu1  ;;  %v6689_v4 = vadd.f32 %v14678_v37, %v16013_v10  ;;  %v16014_v31 = vld [vmem:[#allocation82_spill] sm:$0xff]  ;;  %v16032_v10 = vld [vmem:[#allocation143_spill] sm:$0xff] }
 0x3d7   : > { %7553 = vst.msk [vmem:[%s14750_s30 + $0x48] sm:$0xff] %vm7543_vm5, %v7520_v58  ;;  %v7519_v59 = vadd.f32 %v14740_v13, %v7480_v34  ;;  %v7483_v45 = vadd.f32 %v10533_v52, %v7215_v17  ;;  %v7214_v5 = vadd.f32 %v7095_v60, %v6946_v2  ;;  %v10536_v12 = vpop.f32.mrf.mxu0  ;;  %v6955_v50 = vadd.f32 %v16014_v31, %v6687_v30  ;;  %v16016_v2 = vld [vmem:[#allocation128_spill] sm:$0xff] }
 0x3d8   : > { %v10486_v26 = vpop.f32.mrf.mxu1  ;;  %v6688_v58 = vadd.f32 %v16016_v2, %v16015_v46  ;;  %v16017_v17 = vld [vmem:[#allocation124_spill] sm:$0xff]  ;;  %v16034_v46 = vld [vmem:[#allocation74_spill] sm:$0xff]  ;;  %v16035_v2 = vld [vmem:[#allocation11_spill] sm:$0xff] }
 0x3d9   : > { %7552 = vst.msk [vmem:[%s14750_s30 + $0x40] sm:$0xff] %vm7543_vm5, %v7519_v59  ;;  %v7522_v62 = vadd.f32 %v14740_v13, %v7483_v45  ;;  %v7482_v8 = vadd.f32 %v7363_v0, %v7214_v5  ;;  %v7217_v51 = vadd.f32 %v10486_v26, %v6949_v19  ;;  %v7373_v63 = vpop.f32.mrf.mxu0  ;;  %v6954_v0 = vadd.f32 %v16017_v17, %v6686_v39  ;;  %v16018_v59 = vld [vmem:[#allocation126_spill] sm:$0xff] }
 0x3da   : > { %v7105_v7 = vpop.f32.mrf.mxu1  ;;  %v6957_v45 = vadd.f32 %v16018_v59, %v6689_v4 }
 0x3db   : > { %7555 = vst.msk [vmem:[%s14750_s30 + $0x58] sm:$0xff] %vm7543_vm5, %v7522_v62  ;;  %v7521_v36 = vadd.f32 %v14740_v13, %v7482_v8  ;;  %v7485_v55 = vadd.f32 %v10536_v12, %v7217_v51  ;;  %v7216_v44 = vadd.f32 %v7105_v7, %v6948_v22  ;;  %v10539_v29 = vpop.f32.mrf.mxu0  ;;  %v16019_v12 = vld [vmem:[#allocation61_spill] sm:$0xff]  ;;  %v16020_v22 = vld [vmem:[#allocation130_spill] sm:$0xff] }
 0x3dc   : > { %v10489_v56 = vpop.f32.mrf.mxu1  ;;  %v6691_v26 = vadd.f32 %v16020_v22, %v16019_v12 }
 0x3dd   : > { %7554 = vst.msk [vmem:[%s14750_s30 + $0x50] sm:$0xff] %vm7543_vm5, %v7521_v36  ;;  %v7524_v16 = vadd.f32 %v14740_v13, %v7485_v55  ;;  %v7484_v33 = vadd.f32 %v7373_v63, %v7216_v44  ;;  %v7219_v6 = vadd.f32 %v10489_v56, %v6951_v23  ;;  %v7383_v38 = vpop.f32.mrf.mxu0  ;;  %v16021_v63 = vld [vmem:[#allocation127_spill] sm:$0xff]  ;;  %v16022_v23 = vld [vmem:[#allocation21_spill] sm:$0xff]  ;;  %v16023_v36 = vld [vmem:[#allocation132_spill] sm:$0xff] }
 0x3de   : > { %v7115_v54 = vpop.f32.mrf.mxu1  ;;  %v6956_v9 = vadd.f32 %v16021_v63, %v6688_v58  ;;  %v6690_v55 = vadd.f32 %v16023_v36, %v16022_v23  ;;  %v6694_v58 = vadd.f32 %v16035_v2, %v16034_v46 }
 0x3df   : > { %7557 = vst.msk [vmem:[%s14750_s30 + $0x68] sm:$0xff] %vm7543_vm5, %v7524_v16  ;;  %v7523_v48 = vadd.f32 %v14740_v13, %v7484_v33  ;;  %v7487_v25 = vadd.f32 %v10539_v29, %v7219_v6  ;;  %v7218_v47 = vadd.f32 %v7115_v54, %v6950_v15  ;;  %v10542_v21 = vpop.f32.mrf.mxu0  ;;  %v16024_v15 = vld [vmem:[#allocation63_spill] sm:$0xff]  ;;  %v16025_v16 = vld [vmem:[#allocation134_spill] sm:$0xff] }
 0x3e0   : > { %v10492_v24 = vpop.f32.mrf.mxu1  ;;  %v6693_v33 = vadd.f32 %v16025_v16, %v16024_v15  ;;  %v16043_v15 = vld [vmem:[#allocation9_spill] sm:$0xff]  ;;  %v16044_v16 = vld [vmem:[#allocation43_spill] sm:$0xff] }
 0x3e1   : > { %7556 = vst.msk [vmem:[%s14750_s30 + $0x60] sm:$0xff] %vm7543_vm5, %v7523_v48  ;;  %v7526_v57 = vadd.f32 %v14740_v13, %v7487_v25  ;;  %v7486_v3 = vadd.f32 %v7383_v38, %v7218_v47  ;;  %v7221_v43 = vadd.f32 %v10492_v24, %v6953_v35  ;;  %v7393_v20 = vpop.f32.mrf.mxu0  ;;  %v16026_v38 = vld [vmem:[#allocation129_spill] sm:$0xff]  ;;  %v16027_v48 = vld [vmem:[#allocation142_spill] sm:$0xff] }
 0x3e2   : > { %v7125_v61 = vpop.f32.mrf.mxu1  ;;  %v6959_v35 = vadd.f32 %v16026_v38, %v6691_v26  ;;  %v16028_v25 = vld [vmem:[#allocation138_spill] sm:$0xff] }
 0x3e3   : > { %7559 = vst.msk [vmem:[%s14750_s30 + $0x78] sm:$0xff] %vm7543_vm5, %v7526_v57  ;;  %v7525_v18 = vadd.f32 %v14740_v13, %v7486_v3  ;;  %v7489_v49 = vadd.f32 %v10542_v21, %v7221_v43  ;;  %v7220_v52 = vadd.f32 %v7125_v61, %v6952_v11  ;;  %v10545_v41 = vpop.f32.mrf.mxu0  ;;  %v6692_v47 = vadd.f32 %v16028_v25, %v16027_v48  ;;  %v16030_v57 = vld [vmem:[#allocation133_spill] sm:$0xff]  ;;  %v16046_v48 = vld [vmem:[#allocation79_spill] sm:$0xff]  ;;  %v16047_v25 = vld [vmem:[#allocation44_spill] sm:$0xff] }
 0x3e4   : > { %v10495_v34 = vpop.f32.mrf.mxu1  ;;  %v6958_v11 = vadd.f32 %v16029_v1, %v6690_v55  ;;  %v6961_v3 = vadd.f32 %v16030_v57, %v6693_v33  ;;  %v6699_v33 = vadd.f32 %v16044_v16, %v16043_v15 }
 0x3e5   : > { %7558 = vst.msk [vmem:[%s14750_s30 + $0x70] sm:$0xff] %vm7543_vm5, %v7525_v18  ;;  %v7528_v37 = vadd.f32 %v14740_v13, %v7489_v49  ;;  %v7488_v19 = vadd.f32 %v7393_v20, %v7220_v52  ;;  %v7223_v60 = vadd.f32 %v10495_v34, %v6955_v50  ;;  %v7403_v42 = vpop.f32.mrf.mxu0  ;;  %v16031_v20 = vld [vmem:[#allocation71_spill] sm:$0xff] }
 0x3e6   : > { %v7135_v5 = vpop.f32.mrf.mxu1  ;;  %v6695_v4 = vadd.f32 %v16032_v10, %v16031_v20  ;;  %v16033_v49 = vld [vmem:[#allocation135_spill] sm:$0xff] }
 0x3e7   : > { %7561 = vst.msk [vmem:[%s14750_s30 + $0x88] sm:$0xff] %vm7543_vm5, %v7528_v37  ;;  %v7527_v28 = vadd.f32 %v14740_v13, %v7488_v19  ;;  %v7491_v62 = vadd.f32 %v10545_v41, %v7223_v60  ;;  %v7222_v8 = vadd.f32 %v7135_v5, %v6954_v0  ;;  %v10548_v51 = vpop.f32.mrf.mxu0  ;;  %v6960_v52 = vadd.f32 %v16033_v49, %v6692_v47  ;;  %v16036_v19 = vld [vmem:[#allocation75_spill] sm:$0xff] }
 0x3e8   : > { %v10498_v7 = vpop.f32.mrf.mxu1  ;;  %v16037_v60 = vld [vmem:[#allocation119_spill] sm:$0xff]  ;;  %v6698_v47 = vadd.f32 %v16047_v25, %v16046_v48 }
 0x3e9   : > { %7560 = vst.msk [vmem:[%s14750_s30 + $0x80] sm:$0xff] %vm7543_vm5, %v7527_v28  ;;  %v7530_v44 = vadd.f32 %v14740_v13, %v7491_v62  ;;  %v7490_v29 = vadd.f32 %v7403_v42, %v7222_v8  ;;  %v7225_v14 = vadd.f32 %v10498_v7, %v6957_v45  ;;  %v7413_v56 = vpop.f32.mrf.mxu0  ;;  %v6697_v42 = vadd.f32 %v16037_v60, %v16036_v19  ;;  %v16038_v45 = vld [vmem:[#allocation139_spill] sm:$0xff]  ;;  %v16039_v62 = vld [vmem:[#allocation77_spill] sm:$0xff] }
 0x3ea   : > { %v7145_v6 = vpop.f32.mrf.mxu1  ;;  %v6963_v5 = vadd.f32 %v16038_v45, %v6695_v4  ;;  %v16040_v8 = vld [vmem:[#allocation121_spill] sm:$0xff]  ;;  %v16049_v4 = vld [vmem:[#allocation19_spill] sm:$0xff] }
 0x3eb   : > { %7563 = vst.msk [vmem:[%s14750_s30 + $0x98] sm:$0xff] %vm7543_vm5, %v7530_v44  ;;  %v7529_v54 = vadd.f32 %v14740_v13, %v7490_v29  ;;  %v7493_v27 = vadd.f32 %v10548_v51, %v7225_v14  ;;  %v7224_v53 = vadd.f32 %v7145_v6, %v6956_v9  ;;  %v10551_v30 = vpop.f32.mrf.mxu0  ;;  %v6696_v51 = vadd.f32 %v16040_v8, %v16039_v62  ;;  %v16041_v9 = vld [vmem:[#allocation147_spill] sm:$0xff]  ;;  %v16042_v29 = vld [vmem:[#allocation40_spill] sm:$0xff] }
 0x3ec   : > { %v10501_v21 = vpop.f32.mrf.mxu1  ;;  %v6962_v7 = vadd.f32 %v16041_v9, %v6694_v58  ;;  %v6965_v14 = vadd.f32 %v16042_v29, %v6697_v42 }
 0x3ed   : > { %7562 = vst.msk [vmem:[%s14750_s30 + $0x90] sm:$0xff] %vm7543_vm5, %v7529_v54  ;;  %v7532_v24 = vadd.f32 %v14740_v13, %v7493_v27  ;;  %v7492_v32 = vadd.f32 %v7413_v56, %v7224_v53  ;;  %v7227_v40 = vadd.f32 %v10501_v21, %v6959_v35  ;;  %v7423_v39 = vpop.f32.mrf.mxu0  ;;  %v16045_v27 = vld [vmem:[#allocation13_spill] sm:$0xff] }
 0x3ee   : > { %v7155_v43 = vpop.f32.mrf.mxu1  ;;  %v6964_v53 = vadd.f32 %v16045_v27, %v6696_v51 }
 0x3ef   : > { %7565 = vst.msk [vmem:[%s14750_s30 + $0xa8] sm:$0xff] %vm7543_vm5, %v7532_v24  ;;  %v7531_v61 = vadd.f32 %v14740_v13, %v7492_v32  ;;  %v7495_v31 = vadd.f32 %v10551_v30, %v7227_v40  ;;  %v7226_v50 = vadd.f32 %v7155_v43, %v6958_v11  ;;  %v10554_v18 = vpop.f32.mrf.mxu0  ;;  %v16048_v40 = vld [vmem:[#allocation17_spill] sm:$0xff] }
 0x3f0   : > { %v10504_v41 = vpop.f32.mrf.mxu1 }
 0x3f1   : > { %7564 = vst.msk [vmem:[%s14750_s30 + $0xa0] sm:$0xff] %vm7543_vm5, %v7531_v61  ;;  %v7534_v34 = vadd.f32 %v14740_v13, %v7495_v31  ;;  %v7494_v17 = vadd.f32 %v7423_v39, %v7226_v50  ;;  %v7229_v0 = vadd.f32 %v10504_v41, %v6961_v3  ;;  %v7433_v37 = vpop.f32.mrf.mxu0  ;;  %v6967_v39 = vadd.f32 %v16048_v40, %v6699_v33 }
 0x3f2   : > { %v7165_v59 = vpop.f32.mrf.mxu1  ;;  %v6966_v61 = vadd.f32 %v16049_v4, %v6698_v47 }
 0x3f3   : > { %7567 = vst.msk [vmem:[%s14750_s30 + $0xb8] sm:$0xff] %vm7543_vm5, %v7534_v34  ;;  %v7533_v12 = vadd.f32 %v14740_v13, %v7494_v17  ;;  %v7497_v22 = vadd.f32 %v10554_v18, %v7229_v0  ;;  %v7228_v26 = vadd.f32 %v7165_v59, %v6960_v52  ;;  %v10557_v28 = vpop.f32.mrf.mxu0 }
 0x3f4   : > { %v10507_v63 = vpop.f32.mrf.mxu1 }
 0x3f5   : > { %7566 = vst.msk [vmem:[%s14750_s30 + $0xb0] sm:$0xff] %vm7543_vm5, %v7533_v12  ;;  %v7536_v23 = vadd.f32 %v14740_v13, %v7497_v22  ;;  %v7496_v36 = vadd.f32 %v7433_v37, %v7228_v26  ;;  %v7231_v55 = vadd.f32 %v10507_v63, %v6963_v5  ;;  %v7443_v44 = vpop.f32.mrf.mxu0 }
 0x3f6   : > { %v7175_v56 = vpop.f32.mrf.mxu1 }
 0x3f7   : > { %7569 = vst.msk [vmem:[%s14750_s30 + $0xc8] sm:$0xff] %vm7543_vm5, %v7536_v23  ;;  %v7535_v6 = vadd.f32 %v14740_v13, %v7496_v36  ;;  %v7499_v38 = vadd.f32 %v10557_v28, %v7231_v55  ;;  %v7230_v35 = vadd.f32 %v7175_v56, %v6962_v7  ;;  %v10560_v54 = vpop.f32.mrf.mxu0 }
 0x3f8   : > { %v10510_v30 = vpop.f32.mrf.mxu1 }
 0x3f9   : > { %7568 = vst.msk [vmem:[%s14750_s30 + $0xc0] sm:$0xff] %vm7543_vm5, %v7535_v6  ;;  %v7538_v21 = vadd.f32 %v14740_v13, %v7499_v38  ;;  %v7498_v1 = vadd.f32 %v7443_v44, %v7230_v35  ;;  %v7233_v11 = vadd.f32 %v10510_v30, %v6965_v14  ;;  %v7453_v24 = vpop.f32.mrf.mxu0 }
 0x3fa   : > { %v7185_v32 = vpop.f32.mrf.mxu1 }
 0x3fb   : > { %7571 = vst.msk [vmem:[%s14750_s30 + $0xd8] sm:$0xff] %vm7543_vm5, %v7538_v21  ;;  %v7537_v57 = vadd.f32 %v14740_v13, %v7498_v1  ;;  %v7501_v3 = vadd.f32 %v10560_v54, %v7233_v11  ;;  %v7232_v43 = vadd.f32 %v7185_v32, %v6964_v53  ;;  %v10563_v10 = vpop.f32.mrf.mxu0 }
 0x3fc   : > { %v10513_v20 = vpop.f32.mrf.mxu1 }
 0x3fd   : > { %7570 = vst.msk [vmem:[%s14750_s30 + $0xd0] sm:$0xff] %vm7543_vm5, %v7537_v57  ;;  %v7540_v31 = vadd.f32 %v14740_v13, %v7501_v3  ;;  %v7500_v50 = vadd.f32 %v7453_v24, %v7232_v43  ;;  %v7235_v18 = vadd.f32 %v10513_v20, %v6967_v39  ;;  %v7463_v2 = vpop.f32.mrf.mxu0 }
 0x3fe   : > { %v7195_v49 = vpop.f32.mrf.mxu1 }
 0x3ff   : > { %7573 = vst.msk [vmem:[%s14750_s30 + $0xe8] sm:$0xff] %vm7543_vm5, %v7540_v31  ;;  %v7539_v52 = vadd.f32 %v14740_v13, %v7500_v50  ;;  %v7503_v41 = vadd.f32 %v10563_v10, %v7235_v18  ;;  %v7234_v46 = vadd.f32 %v7195_v49, %v6966_v61 }
 0x401   : > { %7572 = vst.msk [vmem:[%s14750_s30 + $0xe0] sm:$0xff] %vm7543_vm5, %v7539_v52  ;;  %v7542_v58 = vadd.f32 %v14740_v13, %v7503_v41  ;;  %v7502_v34 = vadd.f32 %v7463_v2, %v7234_v46 }
 0x403   : > { %7575 = vst.msk [vmem:[%s14750_s30 + $0xf8] sm:$0xff] %vm7543_vm5, %v7542_v58  ;;  %v7541_v17 = vadd.f32 %v14740_v13, %v7502_v34 }
 0x405   : > { %7574 = vst.msk [vmem:[%s14750_s30 + $0xf0] sm:$0xff] %vm7543_vm5, %v7541_v17 }
 0x406   : > { %10681 = shalt.err (!%p10678_p3)
}
 0x407   : > { %s10682_s20 = scalar_lea.hbm %s14924_s9, 4096  ;;  %s10686_s26 = scalar_lea.hbm %s14978_s3, 8192 }
 0x408   : > { %p10683_p4 = scmp.ne.s32.totalorder %s14924_s9, %s10682_s20  ;;  %p10687_p9 = scmp.lt.s32.totalorder %s14924_s9, %s14978_s3 }
 0x409   : > { %p10688_p10 = scmp.lt.s32.totalorder %s10686_s26, %s10682_s20 }
 0x40a   : > { %p10684_p7 = pnand %p10683_p4, %p10791_p5 }
 0x40b   : > { %p10689_p11 = por %p10688_p10, %p10687_p9 }
 0x40c   : > { %p10685_p8 = pneg %p10684_p7 }
 0x40e   : > { %p10690_p12 = pnand %p10689_p11, %p10685_p8 }
 0x410   : > { %10693 = shalt.err (!%p10690_p12)
}
 0x411   : > { %s10731_s28 = smov 128   ;;  %s10732_s29 = smov 8  }
 0x412   : > { %10567 = dma.vmem_to_hbm [thread:$0]  (%p10791_p5), %s14926_s5, 4096, %s14924_s9, %s14935_s16, %s10731_s28, %s10731_s28, %s10732_s29  }
 0x413 PF: > { %p10573_p13 = scmp.ge.s32.totalorder %s10728_s15, 2  ;;  %s7605_s30 = sand.u32 1, %s10716_s12  }
 0x414   : > { %s7606_s4 = scalar_lea.sflag [#allocation3], %s7605_s30 }
 0x415   : > { %p10570_p0 = pnand %p10573_p13, %p10795_p6 }
 0x417   : > { %p10571_p1 = pneg %p10570_p0 }
 0x419   : > { %10711 = dma.done.wait (%p10571_p1), %s7606_s4, 4096  }
 0x41a   : > { %10713 = vsyncadd (%p10571_p1), %s7606_s4, 4294963200  ;;  %p13_p2 = scmp.ge.s32.totalorder %s10778_s18, 4   ;;  %s16050_s12 = smov %s10720_s13 }
 0x41b   : > { %s16051_s13 = smov %s10724_s14  ;;  %s16052_s14 = smov %s10789_s21 }
 0x41c   : > { %s16053_s15 = smov %s10778_s18  ;;  %15 = sbr.rel (!%p13_p2) target bundleno = 3 (0x3), region = 91 }
 0x421   :  { %7611 = vsyncpa [#allocation3], 1 }
 0x422   :  { %7613 = vsyncpa [#allocation3 + $0x1], 1 }

</bundles_post_ra>
